<compile_context>
chip_gen: v7x
topology: tpu7x:2x2x1
jax: 0.10.0
libtpu: 0.0.40
codegen_flags: <defaults>
</compile_context>

<pallas_src>
import math
import functools

import jax
import jax.numpy as jnp
from jax.experimental import pallas as pl
from jax.experimental.pallas import tpu as pltpu

STANDARD_1020 = ['FP1', 'FPZ', 'FP2', 'AF9', 'AF7', 'AF5', 'AF3', 'AF1', 'AFZ', 'AF2', 'AF4', 'AF6', 'AF8', 'AF10', 'F9', 'F7', 'F5', 'F3', 'F1', 'FZ', 'F2', 'F4', 'F6', 'F8', 'F10', 'FT9', 'FT7', 'FC5', 'FC3', 'FC1', 'FCZ', 'FC2', 'FC4', 'FC6', 'FT8', 'FT10', 'T9', 'T7', 'C5', 'C3', 'C1', 'CZ', 'C2', 'C4', 'C6', 'T8', 'T10', 'TP9', 'TP7', 'CP5', 'CP3', 'CP1', 'CPZ', 'CP2', 'CP4', 'CP6', 'TP8', 'TP10', 'P9', 'P7', 'P5', 'P3', 'P1', 'PZ', 'P2', 'P4', 'P6', 'P8', 'P10', 'PO9', 'PO7', 'PO5', 'PO3', 'PO1', 'POZ', 'PO2', 'PO4', 'PO6', 'PO8', 'PO10', 'O1', 'OZ', 'O2', 'O9', 'CB1', 'CB2', 'IZ', 'O10', 'T3', 'T5', 'T4', 'T6', 'M1', 'M2', 'A1', 'A2', 'CFC1', 'CFC2', 'CFC3', 'CFC4', 'CFC5', 'CFC6', 'CFC7', 'CFC8', 'CCP1', 'CCP2', 'CCP3', 'CCP4', 'CCP5', 'CCP6', 'CCP7', 'CCP8', 'T1', 'T2', 'FTT9h', 'TTP7h', 'TPP9h', 'FTT10h', 'TPP8h', 'TPP10h', 'FP1-F7', 'F7-T7', 'T7-P7', 'P7-O1', 'FP2-F8', 'F8-T8', 'T8-P8', 'P8-O2', 'FP1-F3', 'F3-C3', 'C3-P3', 'P3-O1', 'FP2-F4', 'F4-C4', 'C4-P4', 'P4-O2']

# ---------------- small-shape synthetic config (consistent with forward) ----------------
B = 2                  # batch
N_ELEC = 4             # electrodes
A_WIN = 2              # chunk_size // patch_size time windows
PATCH = 64             # patch_size (temporal samples per patch)
OUT_CHANS = 8          # TemporalConv out_chans
KERN1, STRIDE1, PAD1 = 15, 8, 7
W_OUT = (PATCH + 2 * PAD1 - KERN1) // STRIDE1 + 1   # = 8
EMBED = W_OUT * OUT_CHANS                           # = 64 (== embed_dim)
DEPTH = 2
NUM_HEADS = 8
HEAD_DIM = EMBED // NUM_HEADS                       # = 8
MLP_HIDDEN = int(EMBED * 4.0)                       # = 256
NUM_CLASSES = 4
NC_PAD = 128                                        # lane-dense classifier output
INIT_VALUES = 0.1
INIT_SCALE = 0.001
GN_GROUPS = 4
LN_EPS = 1e-6
GN_EPS = 1e-5
ELECTRODES = ['FP1', 'FPZ', 'FP2', 'AF7']


# ------------------------------ in-kernel math helpers ---------------------------------
def _erf(x):
    # Abramowitz & Stegun 7.1.26 (|err| ~ 1.5e-7), matches torch's exact-erf GELU
    # to ~f32 precision.  TODO(synk): switch to lax.erf once Mosaic lowering is guaranteed.
    p = 0.3275911
    a1, a2, a3, a4, a5 = 0.254829592, -0.284496736, 1.421413741, -1.453152027, 1.061405429
    sgn = jnp.where(x >= 0.0, 1.0, -1.0)
    ax = jnp.abs(x)
    t = 1.0 / (1.0 + p * ax)
    poly = ((((a5 * t + a4) * t + a3) * t + a2) * t + a1) * t
    return sgn * (1.0 - poly * jnp.exp(-ax * ax))


def _gelu(x):
    return 0.5 * x * (1.0 + _erf(x * (1.0 / math.sqrt(2.0))))


def _layernorm(x, w, b, eps):
    mu = jnp.mean(x, axis=-1, keepdims=True)
    var = jnp.mean((x - mu) ** 2, axis=-1, keepdims=True)
    return (x - mu) * jax.lax.rsqrt(var + eps) * w + b


# ------------------------- fused TemporalConv kernel (per batch) ------------------------
def _temporal_conv_kernel(p_ref, sp_ref, sn_ref, gmat_ref,
                          w1_ref, b1_ref, g1w_ref, g1b_ref,
                          w2_ref, b2_ref, g2w_ref, g2b_ref,
                          w3_ref, b3_ref, g3w_ref, g3b_ref,
                          o_ref, *, eps):
    gmat = gmat_ref[...]                                   # (C, C) group-average matrix

    def gn_gelu(y, gw, gb):
        # GroupNorm over (channels-in-group x all spatial), fully vectorized:
        # per-channel column means -> mixed across group channels via gmat matmul.
        m = jnp.dot(jnp.mean(y, axis=0, keepdims=True), gmat,
                    preferred_element_type=jnp.float32)     # (1, C) group means
        m2 = jnp.dot(jnp.mean(y * y, axis=0, keepdims=True), gmat,
                     preferred_element_type=jnp.float32)    # (1, C) group E[x^2]
        var = m2 - m * m
        return _gelu((y - m) * jax.lax.rsqrt(var + eps) * gw + gb)

    # conv1 (im2col patches @ weight) : (NA*Wo, K1) @ (K1, C)
    y = jnp.dot(p_ref[0], w1_ref[...], preferred_element_type=jnp.float32) + b1_ref[...]
    y = gn_gelu(y, g1w_ref[...], g1b_ref[...])

    # conv2 / conv3 : kernel-3 conv along W realized with shift matrices (zero-padded
    # within each NA row-block) + three (C_in, C_out) matmuls.
    for wr, br, gwr, gbr in ((w2_ref, b2_ref, g2w_ref, g2b_ref),
                             (w3_ref, b3_ref, g3w_ref, g3b_ref)):
        prev = jnp.dot(sp_ref[...], y, preferred_element_type=jnp.float32)
        nxt = jnp.dot(sn_ref[...], y, preferred_element_type=jnp.float32)
        y = (jnp.dot(prev, wr[0], preferred_element_type=jnp.float32)
             + jnp.dot(y, wr[1], preferred_element_type=jnp.float32)
             + jnp.dot(nxt, wr[2], preferred_element_type=jnp.float32)
             + br[...])
        y = gn_gelu(y, gwr[...], gbr[...])

    o_ref[0] = y                                            # (NA*Wo, C)


def temporal_conv(x, p):
    # x: (B, N, A, T)  ->  (B, N*A, Wo*C)
    Bsz, N, A, T = x.shape
    NA = N * A
    C = OUT_CHANS
    Wo = (T + 2 * PAD1 - KERN1) // STRIDE1 + 1
    R = NA * Wo

    # conv1 im2col (tiny XLA glue)
    x2 = x.reshape(Bsz, NA, T)
    xp = jnp.pad(x2, ((0, 0), (0, 0), (PAD1, PAD1)))
    idx = jnp.arange(Wo)[:, None] * STRIDE1 + jnp.arange(KERN1)[None, :]
    patches = xp[:, :, idx].reshape(Bsz, R, KERN1)          # (B, NA*Wo, 15)

    # shift matrices for the k=3 convs (zero at each NA-block boundary)
    rows = jnp.arange(R)
    s_prev = ((rows[:, None] - 1 == rows[None, :]) &
              (rows[:, None] % Wo != 0)).astype(jnp.float32)
    s_next = ((rows[:, None] + 1 == rows[None, :]) &
              (rows[:, None] % Wo != Wo - 1)).astype(jnp.float32)
    # group-averaging matrix for GroupNorm
    gs = C // GN_GROUPS
    ch = jnp.arange(C)
    gmat = ((ch[:, None] // gs) == (ch[None, :] // gs)).astype(jnp.float32) / float(gs)

    def fixed(a):
        n = a.ndim
        return pl.BlockSpec(a.shape, lambda b, n=n: (0,) * n)

    args = (patches, s_prev, s_next, gmat,
            p['w1'], p['b1'], p['gn1_w'], p['gn1_b'],
            p['w2'], p['b2'], p['gn2_w'], p['gn2_b'],
            p['w3'], p['b3'], p['gn3_w'], p['gn3_b'])
    in_specs = [pl.BlockSpec((1, R, KERN1), lambda b: (b, 0, 0))] + [fixed(a) for a in args[1:]]

    out = pl.pallas_call(
        functools.partial(_temporal_conv_kernel, eps=GN_EPS),
        out_shape=jax.ShapeDtypeStruct((Bsz, R, C), jnp.float32),
        grid=(Bsz,),
        in_specs=in_specs,
        out_specs=pl.BlockSpec((1, R, C), lambda b: (b, 0, 0)),
        compiler_params=pltpu.CompilerParams(dimension_semantics=("parallel",)),
    )(*args)
    # rearrange 'B C NA T -> B NA (T C)' : (NA*Wo, C) row-major == (NA, Wo*C)
    # (flat element order is identical, so this reshape is free).
    return out.reshape(Bsz, NA, Wo * C)


# ---------------- fused transformer stack + mean-pool + fc_norm + head -----------------
def _transformer_kernel(x_ref, emb_ref,
                        ln1w_ref, ln1b_ref, wq_ref, wk_ref, wv_ref,
                        qnw_ref, qnb_ref, knw_ref, knb_ref,
                        wpr_ref, bpr_ref, g1_ref,
                        ln2w_ref, ln2b_ref, w1_ref, b1_ref, w2_ref, b2_ref, g2_ref,
                        fnw_ref, fnb_ref, hw_ref, hb_ref,
                        o_ref, *, depth, num_heads, eps, scale):
    x = x_ref[0] + emb_ref[...]                             # (S, D) f32, pos/time folded in
    S, D = x.shape

    for l in range(depth):
        # ---- attention branch (head-batched, no per-head loop) ----
        h = _layernorm(x, ln1w_ref[l], ln1b_ref[l], eps)    # (S, D)
        hb = jnp.broadcast_to(h.astype(jnp.bfloat16)[None], (num_heads, S, D))
        q = jnp.einsum('hsd,hde->hse', hb, wq_ref[l],
                       preferred_element_type=jnp.float32)   # (H, S, hd)
        k = jnp.einsum('hsd,hde->hse', hb, wk_ref[l],
                       preferred_element_type=jnp.float32)
        v = jnp.einsum('hsd,hde->hse', hb, wv_ref[l],
                       preferred_element_type=jnp.float32)
        q = _layernorm(q, qnw_ref[l], qnb_ref[l], eps) * scale   # qk-norm then scale
        k = _layernorm(k, knw_ref[l], knb_ref[l], eps)
        att = jnp.einsum('hqe,hke->hqk', q, k,
                         preferred_element_type=jnp.float32)     # (H, S, S)
        att = jnp.exp(att - jnp.max(att, axis=-1, keepdims=True))
        att = att * pl.reciprocal(jnp.sum(att, axis=-1, keepdims=True), approx=True)
        oh = jnp.einsum('hqk,hke->hqe', att, v,
                        preferred_element_type=jnp.float32)      # (H, S, hd)
        pr = jnp.einsum('hse,hed->hsd', oh.astype(jnp.bfloat16), wpr_ref[l],
                        preferred_element_type=jnp.float32)      # (H, S, D)
        attn_out = jnp.sum(pr, axis=0) + bpr_ref[l]              # (S, D)
        x = x + g1_ref[l] * attn_out

        # ---- MLP branch ----
        h2 = _layernorm(x, ln2w_ref[l], ln2b_ref[l], eps)
        h2 = _gelu(jnp.dot(h2.astype(jnp.bfloat16), w1_ref[l],
                           preferred_element_type=jnp.float32) + b1_ref[l])
        mlp = jnp.dot(h2.astype(jnp.bfloat16), w2_ref[l],
                      preferred_element_type=jnp.float32) + b2_ref[l]
        x = x + g2_ref[l] * mlp

    # mean over patch tokens (sum-all minus cls row: no mid-tile slice), fc_norm, head
    pooled = (jnp.sum(x, axis=0, keepdims=True) - x[0:1, :]) * (1.0 / (S - 1))
    pooled = _layernorm(pooled, fnw_ref[...], fnb_ref[...], eps)
    # lane-padded head (NC_PAD lanes) -> unmasked, lane-dense store
    o_ref[0] = jnp.dot(pooled, hw_ref[...],
                       preferred_element_type=jnp.float32) + hb_ref[...]


def transformer_head(x_tok, emb, stk, fc_w, fc_b, head_w, head_b):
    Bsz, S, D = x_tok.shape
    NC = head_w.shape[-1]          # padded class count (lane-dense)

    def fixed(a):
        n = a.ndim
        return pl.BlockSpec(a.shape, lambda b, n=n: (0,) * n)

    weights = (stk['ln1_w'], stk['ln1_b'], stk['wq'], stk['wk'], stk['wv'],
               stk['qn_w'], stk['qn_b'], stk['kn_w'], stk['kn_b'],
               stk['wproj'], stk['bproj'], stk['gamma1'],
               stk['ln2_w'], stk['ln2_b'], stk['w1'], stk['b1'], stk['w2'], stk['b2'],
               stk['gamma2'], fc_w, fc_b, head_w, head_b)
    in_specs = ([pl.BlockSpec((1, S, D), lambda b: (b, 0, 0)), fixed(emb)]
                + [fixed(a) for a in weights])

    out = pl.pallas_call(
        functools.partial(_transformer_kernel, depth=DEPTH, num_heads=NUM_HEADS,
                          eps=LN_EPS, scale=float(HEAD_DIM) ** -0.5),
        out_shape=jax.ShapeDtypeStruct((Bsz, 1, NC), jnp.float32),
        grid=(Bsz,),
        in_specs=in_specs,
        out_specs=pl.BlockSpec((1, 1, NC), lambda b: (b, 0, 0)),
        compiler_params=pltpu.CompilerParams(dimension_semantics=("parallel",)),
    )(x_tok, emb, *weights)
    return out[:, 0, :]


# ------------------------------- full model forward -------------------------------------
def labram_forward(x, params, input_chans):
    Bsz, N, A, T = x.shape
    D = EMBED

    feats = temporal_conv(x, params['patch_embed'])          # (B, N*A, D)
    cls = jnp.broadcast_to(params['cls_token'], (Bsz, 1, D))
    x_tok = jnp.concatenate([cls, feats], axis=1)            # (B, S, D), S = N*A + 1

    # combined pos + time embedding (added inside the fused transformer kernel)
    pos_used = params['pos_embed'][0, input_chans]           # (N+1, D)
    pos_tok = jnp.repeat(pos_used[1:], A, axis=0)            # (N*A, D), electrode-major
    time_tok = jnp.tile(params['time_embed'][0, :A, :], (N, 1))
    emb = jnp.concatenate([pos_used[0:1], pos_tok + time_tok], axis=0)   # (S, D)

    logits = transformer_head(x_tok, emb, params['stack'],
                              params['fc_norm_w'], params['fc_norm_b'],
                              params['head_w'], params['head_b'])
    return logits[:, :NUM_CLASSES]                           # drop lane padding


# ------------------------------- deterministic params -----------------------------------
def init_params(key):
    keys = jax.random.split(key, 128)
    it = iter(keys)

    def nrm(shape, std=0.02):
        return (std * jax.random.normal(next(it), shape)).astype(jnp.float32)

    C, D, H, HD, DH = OUT_CHANS, EMBED, NUM_HEADS, HEAD_DIM, MLP_HIDDEN
    head_w = nrm((D, NUM_CLASSES)) * INIT_SCALE
    params = {
        'patch_embed': dict(
            w1=nrm((KERN1, C)), b1=jnp.zeros((1, C), jnp.float32),
            gn1_w=jnp.ones((1, C), jnp.float32), gn1_b=jnp.zeros((1, C), jnp.float32),
            w2=nrm((3, C, C)), b2=jnp.zeros((1, C), jnp.float32),
            gn2_w=jnp.ones((1, C), jnp.float32), gn2_b=jnp.zeros((1, C), jnp.float32),
            w3=nrm((3, C, C)), b3=jnp.zeros((1, C), jnp.float32),
            gn3_w=jnp.ones((1, C), jnp.float32), gn3_b=jnp.zeros((1, C), jnp.float32),
        ),
        'cls_token': nrm((1, 1, D)),
        'pos_embed': nrm((1, 128 + 1, D)),
        'time_embed': nrm((1, 16, D)),
        'fc_norm_w': jnp.ones((1, D), jnp.float32),
        'fc_norm_b': jnp.zeros((1, D), jnp.float32),
        # classifier head lane-padded to NC_PAD (=128) -> unmasked lane-dense store;
        # the padded zero logits are sliced off in labram_forward.
        'head_w': jnp.pad(head_w, ((0, 0), (0, NC_PAD - NUM_CLASSES))),
        'head_b': jnp.zeros((1, NC_PAD), jnp.float32),
    }

    blocks = []
    for layer_id in range(1, DEPTH + 1):
        rescale = 1.0 / math.sqrt(2.0 * layer_id)            # LaBraM fix_init_weight
        wqkv = nrm((D, 3 * D))
        wproj = nrm((D, D)) * rescale
        blocks.append(dict(
            ln1_w=jnp.ones((1, D), jnp.float32), ln1_b=jnp.zeros((1, D), jnp.float32),
            # head-major QKV weights: (H, D, hd)
            wq=jnp.transpose(wqkv[:, 0:D].reshape(D, H, HD), (1, 0, 2)),
            wk=jnp.transpose(wqkv[:, D:2 * D].reshape(D, H, HD), (1, 0, 2)),
            wv=jnp.transpose(wqkv[:, 2 * D:3 * D].reshape(D, H, HD), (1, 0, 2)),
            qn_w=jnp.ones((1, HD), jnp.float32), qn_b=jnp.zeros((1, HD), jnp.float32),
            kn_w=jnp.ones((1, HD), jnp.float32), kn_b=jnp.zeros((1, HD), jnp.float32),
            wproj=wproj.reshape(H, HD, D), bproj=jnp.zeros((1, D), jnp.float32),
            gamma1=jnp.full((1, D), INIT_VALUES, jnp.float32),
            ln2_w=jnp.ones((1, D), jnp.float32), ln2_b=jnp.zeros((1, D), jnp.float32),
            w1=nrm((D, DH)), b1=jnp.zeros((1, DH), jnp.float32),
            w2=nrm((DH, D)) * rescale, b2=jnp.zeros((1, D), jnp.float32),
            gamma2=jnp.full((1, D), INIT_VALUES, jnp.float32),
        ))
    stack = {k: jnp.stack([blk[k] for blk in blocks], axis=0) for k in blocks[0]}
    # bf16 weights -> halved DMA bytes + MXU fast path (accumulation stays f32 in-kernel)
    for k in ('wq', 'wk', 'wv', 'wproj', 'w1', 'w2'):
        stack[k] = stack[k].astype(jnp.bfloat16)
    params['stack'] = stack
    return params


if __name__ == "__main__":
    key = jax.random.PRNGKey(0)
    pkey, xkey = jax.random.split(key)
    params = init_params(pkey)
    # (batch, num_electrodes, chunk_size // patch_size, patch_size)
    x = jax.random.normal(xkey, (B, N_ELEC, A_WIN, PATCH), dtype=jnp.float32)
    input_chans = jnp.array([0] + [STANDARD_1020.index(e) + 1 for e in ELECTRODES],
                            dtype=jnp.int32)

    fwd = jax.jit(labram_forward)
    out = fwd(x, params, input_chans)
    out = jax.block_until_ready(out)
    assert out.shape == (B, NUM_CLASSES)
    assert bool(jnp.all(jnp.isfinite(out)))
    print("KERNEL_OK")
</pallas_src>

<mosaic_0001>
module attributes {stable_mosaic.version = 11 : i64} {
  func.func @_temporal_conv_kernel(%arg0: i32, %arg1: memref<1x64x15xf32, #tpu.memory_space<vmem>>, %arg2: memref<64x64xf32, #tpu.memory_space<vmem>>, %arg3: memref<64x64xf32, #tpu.memory_space<vmem>>, %arg4: memref<8x8xf32, #tpu.memory_space<vmem>>, %arg5: memref<15x8xf32, #tpu.memory_space<vmem>>, %arg6: memref<1x8xf32, #tpu.memory_space<vmem>>, %arg7: memref<1x8xf32, #tpu.memory_space<vmem>>, %arg8: memref<1x8xf32, #tpu.memory_space<vmem>>, %arg9: memref<3x8x8xf32, #tpu.memory_space<vmem>>, %arg10: memref<1x8xf32, #tpu.memory_space<vmem>>, %arg11: memref<1x8xf32, #tpu.memory_space<vmem>>, %arg12: memref<1x8xf32, #tpu.memory_space<vmem>>, %arg13: memref<3x8x8xf32, #tpu.memory_space<vmem>>, %arg14: memref<1x8xf32, #tpu.memory_space<vmem>>, %arg15: memref<1x8xf32, #tpu.memory_space<vmem>>, %arg16: memref<1x8xf32, #tpu.memory_space<vmem>>, %arg17: memref<1x64x8xf32, #tpu.memory_space<vmem>>) attributes {dimension_semantics = [#tpu.dimension_semantics<parallel>], iteration_bounds = array<i64: 2>, scalar_prefetch = 0 : i64, scratch_operands = 0 : i64, tpu.core_type = #tpu.core_type<tc>, window_params = [{transform_indices = @transform_0, window_bounds = array<i64: 1, 64, 15>}, {pipeline_mode = #tpu.pipeline_mode<synchronous>, transform_indices = @transform_1, window_bounds = array<i64: 64, 64>}, {pipeline_mode = #tpu.pipeline_mode<synchronous>, transform_indices = @transform_2, window_bounds = array<i64: 64, 64>}, {pipeline_mode = #tpu.pipeline_mode<synchronous>, transform_indices = @transform_3, window_bounds = array<i64: 8, 8>}, {pipeline_mode = #tpu.pipeline_mode<synchronous>, transform_indices = @transform_4, window_bounds = array<i64: 15, 8>}, {pipeline_mode = #tpu.pipeline_mode<synchronous>, transform_indices = @transform_5, window_bounds = array<i64: 1, 8>}, {pipeline_mode = #tpu.pipeline_mode<synchronous>, transform_indices = @transform_6, window_bounds = array<i64: 1, 8>}, {pipeline_mode = #tpu.pipeline_mode<synchronous>, transform_indices = @transform_7, window_bounds = array<i64: 1, 8>}, {pipeline_mode = #tpu.pipeline_mode<synchronous>, transform_indices = @transform_8, window_bounds = array<i64: 3, 8, 8>}, {pipeline_mode = #tpu.pipeline_mode<synchronous>, transform_indices = @transform_9, window_bounds = array<i64: 1, 8>}, {pipeline_mode = #tpu.pipeline_mode<synchronous>, transform_indices = @transform_10, window_bounds = array<i64: 1, 8>}, {pipeline_mode = #tpu.pipeline_mode<synchronous>, transform_indices = @transform_11, window_bounds = array<i64: 1, 8>}, {pipeline_mode = #tpu.pipeline_mode<synchronous>, transform_indices = @transform_12, window_bounds = array<i64: 3, 8, 8>}, {pipeline_mode = #tpu.pipeline_mode<synchronous>, transform_indices = @transform_13, window_bounds = array<i64: 1, 8>}, {pipeline_mode = #tpu.pipeline_mode<synchronous>, transform_indices = @transform_14, window_bounds = array<i64: 1, 8>}, {pipeline_mode = #tpu.pipeline_mode<synchronous>, transform_indices = @transform_15, window_bounds = array<i64: 1, 8>}, {transform_indices = @transform_16, window_bounds = array<i64: 1, 64, 8>}]} {
    %c0 = arith.constant 0 : index
    %c0_0 = arith.constant 0 : index
    %0 = vector.load %arg4[%c0, %c0_0] : memref<8x8xf32, #tpu.memory_space<vmem>>, vector<8x8xf32>
    %c0_1 = arith.constant 0 : index
    %c0_2 = arith.constant 0 : index
    %c0_3 = arith.constant 0 : index
    %1 = vector.load %arg1[%c0_1, %c0_2, %c0_3] : memref<1x64x15xf32, #tpu.memory_space<vmem>>, vector<1x64x15xf32>
    %2 = vector.shape_cast %1 : vector<1x64x15xf32> to vector<64x15xf32>
    %c0_4 = arith.constant 0 : index
    %c0_5 = arith.constant 0 : index
    %3 = vector.load %arg5[%c0_4, %c0_5] : memref<15x8xf32, #tpu.memory_space<vmem>>, vector<15x8xf32>
    %cst = arith.constant dense<0.000000e+00> : vector<64x8xf32>
    %4 = tpu.matmul %2, %3, %cst {dimension_numbers = #tpu.dot_dimension_numbers<[1], [0], [0], [1], [0, 0, 1, 1], [], []>} : vector<64x15xf32>, vector<15x8xf32>, vector<64x8xf32> -> vector<64x8xf32>
    %c0_6 = arith.constant 0 : index
    %c0_7 = arith.constant 0 : index
    %5 = vector.load %arg6[%c0_6, %c0_7] : memref<1x8xf32, #tpu.memory_space<vmem>>, vector<1x8xf32>
    %6 = vector.broadcast %5 : vector<1x8xf32> to vector<64x8xf32>
    %7 = arith.addf %4, %6 : vector<64x8xf32>
    %c0_8 = arith.constant 0 : index
    %c0_9 = arith.constant 0 : index
    %8 = vector.load %arg7[%c0_8, %c0_9] : memref<1x8xf32, #tpu.memory_space<vmem>>, vector<1x8xf32>
    %c0_10 = arith.constant 0 : index
    %c0_11 = arith.constant 0 : index
    %9 = vector.load %arg8[%c0_10, %c0_11] : memref<1x8xf32, #tpu.memory_space<vmem>>, vector<1x8xf32>
    %cst_12 = arith.constant dense<0.000000e+00> : vector<8xf32>
    %10 = vector.multi_reduction <add>, %7, %cst_12 [0] : vector<64x8xf32> to vector<8xf32>
    %11 = vector.shape_cast %10 : vector<8xf32> to vector<1x8xf32>
    %cst_13 = arith.constant 6.400000e+01 : f32
    %12 = vector.broadcast %cst_13 : f32 to vector<1x8xf32>
    %13 = arith.divf %11, %12 : vector<1x8xf32>
    %cst_14 = arith.constant dense<0.000000e+00> : vector<1x8xf32>
    %14 = tpu.matmul %13, %0, %cst_14 {dimension_numbers = #tpu.dot_dimension_numbers<[1], [0], [0], [1], [0, 0, 1, 1], [], []>} : vector<1x8xf32>, vector<8x8xf32>, vector<1x8xf32> -> vector<1x8xf32>
    %15 = arith.mulf %7, %7 : vector<64x8xf32>
    %cst_15 = arith.constant dense<0.000000e+00> : vector<8xf32>
    %16 = vector.multi_reduction <add>, %15, %cst_15 [0] : vector<64x8xf32> to vector<8xf32>
    %17 = vector.shape_cast %16 : vector<8xf32> to vector<1x8xf32>
    %cst_16 = arith.constant 6.400000e+01 : f32
    %18 = vector.broadcast %cst_16 : f32 to vector<1x8xf32>
    %19 = arith.divf %17, %18 : vector<1x8xf32>
    %cst_17 = arith.constant dense<0.000000e+00> : vector<1x8xf32>
    %20 = tpu.matmul %19, %0, %cst_17 {dimension_numbers = #tpu.dot_dimension_numbers<[1], [0], [0], [1], [0, 0, 1, 1], [], []>} : vector<1x8xf32>, vector<8x8xf32>, vector<1x8xf32> -> vector<1x8xf32>
    %21 = arith.mulf %14, %14 : vector<1x8xf32>
    %22 = arith.subf %20, %21 : vector<1x8xf32>
    %23 = vector.broadcast %14 : vector<1x8xf32> to vector<64x8xf32>
    %24 = arith.subf %7, %23 : vector<64x8xf32>
    %cst_18 = arith.constant 9.99999974E-6 : f32
    %25 = vector.broadcast %cst_18 : f32 to vector<1x8xf32>
    %26 = arith.addf %22, %25 : vector<1x8xf32>
    %27 = math.rsqrt %26 : vector<1x8xf32>
    %28 = vector.broadcast %27 : vector<1x8xf32> to vector<64x8xf32>
    %29 = arith.mulf %24, %28 : vector<64x8xf32>
    %30 = vector.broadcast %8 : vector<1x8xf32> to vector<64x8xf32>
    %31 = arith.mulf %29, %30 : vector<64x8xf32>
    %32 = vector.broadcast %9 : vector<1x8xf32> to vector<64x8xf32>
    %33 = arith.addf %31, %32 : vector<64x8xf32>
    %cst_19 = arith.constant 5.000000e-01 : f32
    %34 = vector.broadcast %cst_19 : f32 to vector<64x8xf32>
    %35 = arith.mulf %34, %33 : vector<64x8xf32>
    %cst_20 = arith.constant 0.707106769 : f32
    %36 = vector.broadcast %cst_20 : f32 to vector<64x8xf32>
    %37 = arith.mulf %33, %36 : vector<64x8xf32>
    %cst_21 = arith.constant 0.000000e+00 : f32
    %38 = vector.broadcast %cst_21 : f32 to vector<64x8xf32>
    %39 = arith.cmpf oge, %37, %38 : vector<64x8xf32>
    %cst_22 = arith.constant 1.000000e+00 : f32
    %cst_23 = arith.constant -1.000000e+00 : f32
    %40 = vector.broadcast %cst_22 : f32 to vector<64x8xf32>
    %41 = vector.broadcast %cst_23 : f32 to vector<64x8xf32>
    %42 = arith.select %39, %40, %41 : vector<64x8xi1>, vector<64x8xf32>
    %43 = math.absf %37 : vector<64x8xf32>
    %cst_24 = arith.constant 0.327591091 : f32
    %44 = vector.broadcast %cst_24 : f32 to vector<64x8xf32>
    %45 = arith.mulf %44, %43 : vector<64x8xf32>
    %cst_25 = arith.constant 1.000000e+00 : f32
    %46 = vector.broadcast %cst_25 : f32 to vector<64x8xf32>
    %47 = arith.addf %46, %45 : vector<64x8xf32>
    %cst_26 = arith.constant 1.000000e+00 : f32
    %48 = vector.broadcast %cst_26 : f32 to vector<64x8xf32>
    %49 = arith.divf %48, %47 : vector<64x8xf32>
    %cst_27 = arith.constant 1.06140542 : f32
    %50 = vector.broadcast %cst_27 : f32 to vector<64x8xf32>
    %51 = arith.mulf %50, %49 : vector<64x8xf32>
    %cst_28 = arith.constant -1.45315206 : f32
    %52 = vector.broadcast %cst_28 : f32 to vector<64x8xf32>
    %53 = arith.addf %51, %52 : vector<64x8xf32>
    %54 = arith.mulf %53, %49 : vector<64x8xf32>
    %cst_29 = arith.constant 1.42141378 : f32
    %55 = vector.broadcast %cst_29 : f32 to vector<64x8xf32>
    %56 = arith.addf %54, %55 : vector<64x8xf32>
    %57 = arith.mulf %56, %49 : vector<64x8xf32>
    %cst_30 = arith.constant -0.284496725 : f32
    %58 = vector.broadcast %cst_30 : f32 to vector<64x8xf32>
    %59 = arith.addf %57, %58 : vector<64x8xf32>
    %60 = arith.mulf %59, %49 : vector<64x8xf32>
    %cst_31 = arith.constant 0.254829586 : f32
    %61 = vector.broadcast %cst_31 : f32 to vector<64x8xf32>
    %62 = arith.addf %60, %61 : vector<64x8xf32>
    %63 = arith.mulf %62, %49 : vector<64x8xf32>
    %cst_32 = arith.constant 0.000000e+00 : f32
    %64 = vector.broadcast %cst_32 : f32 to vector<64x8xf32>
    %65 = arith.subf %64, %43 : vector<64x8xf32>
    %66 = arith.mulf %65, %43 : vector<64x8xf32>
    %67 = math.exp %66 : vector<64x8xf32>
    %68 = arith.mulf %63, %67 : vector<64x8xf32>
    %cst_33 = arith.constant 1.000000e+00 : f32
    %69 = vector.broadcast %cst_33 : f32 to vector<64x8xf32>
    %70 = arith.subf %69, %68 : vector<64x8xf32>
    %71 = arith.mulf %42, %70 : vector<64x8xf32>
    %cst_34 = arith.constant 1.000000e+00 : f32
    %72 = vector.broadcast %cst_34 : f32 to vector<64x8xf32>
    %73 = arith.addf %72, %71 : vector<64x8xf32>
    %74 = arith.mulf %35, %73 : vector<64x8xf32>
    %c0_35 = arith.constant 0 : index
    %c0_36 = arith.constant 0 : index
    %75 = vector.load %arg2[%c0_35, %c0_36] : memref<64x64xf32, #tpu.memory_space<vmem>>, vector<64x64xf32>
    %cst_37 = arith.constant dense<0.000000e+00> : vector<64x8xf32>
    %76 = tpu.matmul %75, %74, %cst_37 {dimension_numbers = #tpu.dot_dimension_numbers<[1], [0], [0], [1], [0, 0, 1, 1], [], []>} : vector<64x64xf32>, vector<64x8xf32>, vector<64x8xf32> -> vector<64x8xf32>
    %c0_38 = arith.constant 0 : index
    %c0_39 = arith.constant 0 : index
    %77 = vector.load %arg3[%c0_38, %c0_39] : memref<64x64xf32, #tpu.memory_space<vmem>>, vector<64x64xf32>
    %cst_40 = arith.constant dense<0.000000e+00> : vector<64x8xf32>
    %78 = tpu.matmul %77, %74, %cst_40 {dimension_numbers = #tpu.dot_dimension_numbers<[1], [0], [0], [1], [0, 0, 1, 1], [], []>} : vector<64x64xf32>, vector<64x8xf32>, vector<64x8xf32> -> vector<64x8xf32>
    %c0_41 = arith.constant 0 : index
    %c0_42 = arith.constant 0 : index
    %c0_43 = arith.constant 0 : index
    %79 = vector.load %arg9[%c0_41, %c0_42, %c0_43] : memref<3x8x8xf32, #tpu.memory_space<vmem>>, vector<1x8x8xf32>
    %80 = vector.shape_cast %79 : vector<1x8x8xf32> to vector<8x8xf32>
    %cst_44 = arith.constant dense<0.000000e+00> : vector<64x8xf32>
    %81 = tpu.matmul %76, %80, %cst_44 {dimension_numbers = #tpu.dot_dimension_numbers<[1], [0], [0], [1], [0, 0, 1, 1], [], []>} : vector<64x8xf32>, vector<8x8xf32>, vector<64x8xf32> -> vector<64x8xf32>
    %c1 = arith.constant 1 : index
    %c0_45 = arith.constant 0 : index
    %c0_46 = arith.constant 0 : index
    %82 = vector.load %arg9[%c1, %c0_45, %c0_46] : memref<3x8x8xf32, #tpu.memory_space<vmem>>, vector<1x8x8xf32>
    %83 = vector.shape_cast %82 : vector<1x8x8xf32> to vector<8x8xf32>
    %cst_47 = arith.constant dense<0.000000e+00> : vector<64x8xf32>
    %84 = tpu.matmul %74, %83, %cst_47 {dimension_numbers = #tpu.dot_dimension_numbers<[1], [0], [0], [1], [0, 0, 1, 1], [], []>} : vector<64x8xf32>, vector<8x8xf32>, vector<64x8xf32> -> vector<64x8xf32>
    %85 = arith.addf %81, %84 : vector<64x8xf32>
    %c2 = arith.constant 2 : index
    %c0_48 = arith.constant 0 : index
    %c0_49 = arith.constant 0 : index
    %86 = vector.load %arg9[%c2, %c0_48, %c0_49] : memref<3x8x8xf32, #tpu.memory_space<vmem>>, vector<1x8x8xf32>
    %87 = vector.shape_cast %86 : vector<1x8x8xf32> to vector<8x8xf32>
    %cst_50 = arith.constant dense<0.000000e+00> : vector<64x8xf32>
    %88 = tpu.matmul %78, %87, %cst_50 {dimension_numbers = #tpu.dot_dimension_numbers<[1], [0], [0], [1], [0, 0, 1, 1], [], []>} : vector<64x8xf32>, vector<8x8xf32>, vector<64x8xf32> -> vector<64x8xf32>
    %89 = arith.addf %85, %88 : vector<64x8xf32>
    %c0_51 = arith.constant 0 : index
    %c0_52 = arith.constant 0 : index
    %90 = vector.load %arg10[%c0_51, %c0_52] : memref<1x8xf32, #tpu.memory_space<vmem>>, vector<1x8xf32>
    %91 = vector.broadcast %90 : vector<1x8xf32> to vector<64x8xf32>
    %92 = arith.addf %89, %91 : vector<64x8xf32>
    %c0_53 = arith.constant 0 : index
    %c0_54 = arith.constant 0 : index
    %93 = vector.load %arg11[%c0_53, %c0_54] : memref<1x8xf32, #tpu.memory_space<vmem>>, vector<1x8xf32>
    %c0_55 = arith.constant 0 : index
    %c0_56 = arith.constant 0 : index
    %94 = vector.load %arg12[%c0_55, %c0_56] : memref<1x8xf32, #tpu.memory_space<vmem>>, vector<1x8xf32>
    %cst_57 = arith.constant dense<0.000000e+00> : vector<8xf32>
    %95 = vector.multi_reduction <add>, %92, %cst_57 [0] : vector<64x8xf32> to vector<8xf32>
    %96 = vector.shape_cast %95 : vector<8xf32> to vector<1x8xf32>
    %cst_58 = arith.constant 6.400000e+01 : f32
    %97 = vector.broadcast %cst_58 : f32 to vector<1x8xf32>
    %98 = arith.divf %96, %97 : vector<1x8xf32>
    %cst_59 = arith.constant dense<0.000000e+00> : vector<1x8xf32>
    %99 = tpu.matmul %98, %0, %cst_59 {dimension_numbers = #tpu.dot_dimension_numbers<[1], [0], [0], [1], [0, 0, 1, 1], [], []>} : vector<1x8xf32>, vector<8x8xf32>, vector<1x8xf32> -> vector<1x8xf32>
    %100 = arith.mulf %92, %92 : vector<64x8xf32>
    %cst_60 = arith.constant dense<0.000000e+00> : vector<8xf32>
    %101 = vector.multi_reduction <add>, %100, %cst_60 [0] : vector<64x8xf32> to vector<8xf32>
    %102 = vector.shape_cast %101 : vector<8xf32> to vector<1x8xf32>
    %cst_61 = arith.constant 6.400000e+01 : f32
    %103 = vector.broadcast %cst_61 : f32 to vector<1x8xf32>
    %104 = arith.divf %102, %103 : vector<1x8xf32>
    %cst_62 = arith.constant dense<0.000000e+00> : vector<1x8xf32>
    %105 = tpu.matmul %104, %0, %cst_62 {dimension_numbers = #tpu.dot_dimension_numbers<[1], [0], [0], [1], [0, 0, 1, 1], [], []>} : vector<1x8xf32>, vector<8x8xf32>, vector<1x8xf32> -> vector<1x8xf32>
    %106 = arith.mulf %99, %99 : vector<1x8xf32>
    %107 = arith.subf %105, %106 : vector<1x8xf32>
    %108 = vector.broadcast %99 : vector<1x8xf32> to vector<64x8xf32>
    %109 = arith.subf %92, %108 : vector<64x8xf32>
    %cst_63 = arith.constant 9.99999974E-6 : f32
    %110 = vector.broadcast %cst_63 : f32 to vector<1x8xf32>
    %111 = arith.addf %107, %110 : vector<1x8xf32>
    %112 = math.rsqrt %111 : vector<1x8xf32>
    %113 = vector.broadcast %112 : vector<1x8xf32> to vector<64x8xf32>
    %114 = arith.mulf %109, %113 : vector<64x8xf32>
    %115 = vector.broadcast %93 : vector<1x8xf32> to vector<64x8xf32>
    %116 = arith.mulf %114, %115 : vector<64x8xf32>
    %117 = vector.broadcast %94 : vector<1x8xf32> to vector<64x8xf32>
    %118 = arith.addf %116, %117 : vector<64x8xf32>
    %cst_64 = arith.constant 5.000000e-01 : f32
    %119 = vector.broadcast %cst_64 : f32 to vector<64x8xf32>
    %120 = arith.mulf %119, %118 : vector<64x8xf32>
    %cst_65 = arith.constant 0.707106769 : f32
    %121 = vector.broadcast %cst_65 : f32 to vector<64x8xf32>
    %122 = arith.mulf %118, %121 : vector<64x8xf32>
    %cst_66 = arith.constant 0.000000e+00 : f32
    %123 = vector.broadcast %cst_66 : f32 to vector<64x8xf32>
    %124 = arith.cmpf oge, %122, %123 : vector<64x8xf32>
    %cst_67 = arith.constant 1.000000e+00 : f32
    %cst_68 = arith.constant -1.000000e+00 : f32
    %125 = vector.broadcast %cst_67 : f32 to vector<64x8xf32>
    %126 = vector.broadcast %cst_68 : f32 to vector<64x8xf32>
    %127 = arith.select %124, %125, %126 : vector<64x8xi1>, vector<64x8xf32>
    %128 = math.absf %122 : vector<64x8xf32>
    %cst_69 = arith.constant 0.327591091 : f32
    %129 = vector.broadcast %cst_69 : f32 to vector<64x8xf32>
    %130 = arith.mulf %129, %128 : vector<64x8xf32>
    %cst_70 = arith.constant 1.000000e+00 : f32
    %131 = vector.broadcast %cst_70 : f32 to vector<64x8xf32>
    %132 = arith.addf %131, %130 : vector<64x8xf32>
    %cst_71 = arith.constant 1.000000e+00 : f32
    %133 = vector.broadcast %cst_71 : f32 to vector<64x8xf32>
    %134 = arith.divf %133, %132 : vector<64x8xf32>
    %cst_72 = arith.constant 1.06140542 : f32
    %135 = vector.broadcast %cst_72 : f32 to vector<64x8xf32>
    %136 = arith.mulf %135, %134 : vector<64x8xf32>
    %cst_73 = arith.constant -1.45315206 : f32
    %137 = vector.broadcast %cst_73 : f32 to vector<64x8xf32>
    %138 = arith.addf %136, %137 : vector<64x8xf32>
    %139 = arith.mulf %138, %134 : vector<64x8xf32>
    %cst_74 = arith.constant 1.42141378 : f32
    %140 = vector.broadcast %cst_74 : f32 to vector<64x8xf32>
    %141 = arith.addf %139, %140 : vector<64x8xf32>
    %142 = arith.mulf %141, %134 : vector<64x8xf32>
    %cst_75 = arith.constant -0.284496725 : f32
    %143 = vector.broadcast %cst_75 : f32 to vector<64x8xf32>
    %144 = arith.addf %142, %143 : vector<64x8xf32>
    %145 = arith.mulf %144, %134 : vector<64x8xf32>
    %cst_76 = arith.constant 0.254829586 : f32
    %146 = vector.broadcast %cst_76 : f32 to vector<64x8xf32>
    %147 = arith.addf %145, %146 : vector<64x8xf32>
    %148 = arith.mulf %147, %134 : vector<64x8xf32>
    %cst_77 = arith.constant 0.000000e+00 : f32
    %149 = vector.broadcast %cst_77 : f32 to vector<64x8xf32>
    %150 = arith.subf %149, %128 : vector<64x8xf32>
    %151 = arith.mulf %150, %128 : vector<64x8xf32>
    %152 = math.exp %151 : vector<64x8xf32>
    %153 = arith.mulf %148, %152 : vector<64x8xf32>
    %cst_78 = arith.constant 1.000000e+00 : f32
    %154 = vector.broadcast %cst_78 : f32 to vector<64x8xf32>
    %155 = arith.subf %154, %153 : vector<64x8xf32>
    %156 = arith.mulf %127, %155 : vector<64x8xf32>
    %cst_79 = arith.constant 1.000000e+00 : f32
    %157 = vector.broadcast %cst_79 : f32 to vector<64x8xf32>
    %158 = arith.addf %157, %156 : vector<64x8xf32>
    %159 = arith.mulf %120, %158 : vector<64x8xf32>
    %c0_80 = arith.constant 0 : index
    %c0_81 = arith.constant 0 : index
    %160 = vector.load %arg2[%c0_80, %c0_81] : memref<64x64xf32, #tpu.memory_space<vmem>>, vector<64x64xf32>
    %cst_82 = arith.constant dense<0.000000e+00> : vector<64x8xf32>
    %161 = tpu.matmul %160, %159, %cst_82 {dimension_numbers = #tpu.dot_dimension_numbers<[1], [0], [0], [1], [0, 0, 1, 1], [], []>} : vector<64x64xf32>, vector<64x8xf32>, vector<64x8xf32> -> vector<64x8xf32>
    %c0_83 = arith.constant 0 : index
    %c0_84 = arith.constant 0 : index
    %162 = vector.load %arg3[%c0_83, %c0_84] : memref<64x64xf32, #tpu.memory_space<vmem>>, vector<64x64xf32>
    %cst_85 = arith.constant dense<0.000000e+00> : vector<64x8xf32>
    %163 = tpu.matmul %162, %159, %cst_85 {dimension_numbers = #tpu.dot_dimension_numbers<[1], [0], [0], [1], [0, 0, 1, 1], [], []>} : vector<64x64xf32>, vector<64x8xf32>, vector<64x8xf32> -> vector<64x8xf32>
    %c0_86 = arith.constant 0 : index
    %c0_87 = arith.constant 0 : index
    %c0_88 = arith.constant 0 : index
    %164 = vector.load %arg13[%c0_86, %c0_87, %c0_88] : memref<3x8x8xf32, #tpu.memory_space<vmem>>, vector<1x8x8xf32>
    %165 = vector.shape_cast %164 : vector<1x8x8xf32> to vector<8x8xf32>
    %cst_89 = arith.constant dense<0.000000e+00> : vector<64x8xf32>
    %166 = tpu.matmul %161, %165, %cst_89 {dimension_numbers = #tpu.dot_dimension_numbers<[1], [0], [0], [1], [0, 0, 1, 1], [], []>} : vector<64x8xf32>, vector<8x8xf32>, vector<64x8xf32> -> vector<64x8xf32>
    %c1_90 = arith.constant 1 : index
    %c0_91 = arith.constant 0 : index
    %c0_92 = arith.constant 0 : index
    %167 = vector.load %arg13[%c1_90, %c0_91, %c0_92] : memref<3x8x8xf32, #tpu.memory_space<vmem>>, vector<1x8x8xf32>
    %168 = vector.shape_cast %167 : vector<1x8x8xf32> to vector<8x8xf32>
    %cst_93 = arith.constant dense<0.000000e+00> : vector<64x8xf32>
    %169 = tpu.matmul %159, %168, %cst_93 {dimension_numbers = #tpu.dot_dimension_numbers<[1], [0], [0], [1], [0, 0, 1, 1], [], []>} : vector<64x8xf32>, vector<8x8xf32>, vector<64x8xf32> -> vector<64x8xf32>
    %170 = arith.addf %166, %169 : vector<64x8xf32>
    %c2_94 = arith.constant 2 : index
    %c0_95 = arith.constant 0 : index
    %c0_96 = arith.constant 0 : index
    %171 = vector.load %arg13[%c2_94, %c0_95, %c0_96] : memref<3x8x8xf32, #tpu.memory_space<vmem>>, vector<1x8x8xf32>
    %172 = vector.shape_cast %171 : vector<1x8x8xf32> to vector<8x8xf32>
    %cst_97 = arith.constant dense<0.000000e+00> : vector<64x8xf32>
    %173 = tpu.matmul %163, %172, %cst_97 {dimension_numbers = #tpu.dot_dimension_numbers<[1], [0], [0], [1], [0, 0, 1, 1], [], []>} : vector<64x8xf32>, vector<8x8xf32>, vector<64x8xf32> -> vector<64x8xf32>
    %174 = arith.addf %170, %173 : vector<64x8xf32>
    %c0_98 = arith.constant 0 : index
    %c0_99 = arith.constant 0 : index
    %175 = vector.load %arg14[%c0_98, %c0_99] : memref<1x8xf32, #tpu.memory_space<vmem>>, vector<1x8xf32>
    %176 = vector.broadcast %175 : vector<1x8xf32> to vector<64x8xf32>
    %177 = arith.addf %174, %176 : vector<64x8xf32>
    %c0_100 = arith.constant 0 : index
    %c0_101 = arith.constant 0 : index
    %178 = vector.load %arg15[%c0_100, %c0_101] : memref<1x8xf32, #tpu.memory_space<vmem>>, vector<1x8xf32>
    %c0_102 = arith.constant 0 : index
    %c0_103 = arith.constant 0 : index
    %179 = vector.load %arg16[%c0_102, %c0_103] : memref<1x8xf32, #tpu.memory_space<vmem>>, vector<1x8xf32>
    %cst_104 = arith.constant dense<0.000000e+00> : vector<8xf32>
    %180 = vector.multi_reduction <add>, %177, %cst_104 [0] : vector<64x8xf32> to vector<8xf32>
    %181 = vector.shape_cast %180 : vector<8xf32> to vector<1x8xf32>
    %cst_105 = arith.constant 6.400000e+01 : f32
    %182 = vector.broadcast %cst_105 : f32 to vector<1x8xf32>
    %183 = arith.divf %181, %182 : vector<1x8xf32>
    %cst_106 = arith.constant dense<0.000000e+00> : vector<1x8xf32>
    %184 = tpu.matmul %183, %0, %cst_106 {dimension_numbers = #tpu.dot_dimension_numbers<[1], [0], [0], [1], [0, 0, 1, 1], [], []>} : vector<1x8xf32>, vector<8x8xf32>, vector<1x8xf32> -> vector<1x8xf32>
    %185 = arith.mulf %177, %177 : vector<64x8xf32>
    %cst_107 = arith.constant dense<0.000000e+00> : vector<8xf32>
    %186 = vector.multi_reduction <add>, %185, %cst_107 [0] : vector<64x8xf32> to vector<8xf32>
    %187 = vector.shape_cast %186 : vector<8xf32> to vector<1x8xf32>
    %cst_108 = arith.constant 6.400000e+01 : f32
    %188 = vector.broadcast %cst_108 : f32 to vector<1x8xf32>
    %189 = arith.divf %187, %188 : vector<1x8xf32>
    %cst_109 = arith.constant dense<0.000000e+00> : vector<1x8xf32>
    %190 = tpu.matmul %189, %0, %cst_109 {dimension_numbers = #tpu.dot_dimension_numbers<[1], [0], [0], [1], [0, 0, 1, 1], [], []>} : vector<1x8xf32>, vector<8x8xf32>, vector<1x8xf32> -> vector<1x8xf32>
    %191 = arith.mulf %184, %184 : vector<1x8xf32>
    %192 = arith.subf %190, %191 : vector<1x8xf32>
    %193 = vector.broadcast %184 : vector<1x8xf32> to vector<64x8xf32>
    %194 = arith.subf %177, %193 : vector<64x8xf32>
    %cst_110 = arith.constant 9.99999974E-6 : f32
    %195 = vector.broadcast %cst_110 : f32 to vector<1x8xf32>
    %196 = arith.addf %192, %195 : vector<1x8xf32>
    %197 = math.rsqrt %196 : vector<1x8xf32>
    %198 = vector.broadcast %197 : vector<1x8xf32> to vector<64x8xf32>
    %199 = arith.mulf %194, %198 : vector<64x8xf32>
    %200 = vector.broadcast %178 : vector<1x8xf32> to vector<64x8xf32>
    %201 = arith.mulf %199, %200 : vector<64x8xf32>
    %202 = vector.broadcast %179 : vector<1x8xf32> to vector<64x8xf32>
    %203 = arith.addf %201, %202 : vector<64x8xf32>
    %cst_111 = arith.constant 5.000000e-01 : f32
    %204 = vector.broadcast %cst_111 : f32 to vector<64x8xf32>
    %205 = arith.mulf %204, %203 : vector<64x8xf32>
    %cst_112 = arith.constant 0.707106769 : f32
    %206 = vector.broadcast %cst_112 : f32 to vector<64x8xf32>
    %207 = arith.mulf %203, %206 : vector<64x8xf32>
    %cst_113 = arith.constant 0.000000e+00 : f32
    %208 = vector.broadcast %cst_113 : f32 to vector<64x8xf32>
    %209 = arith.cmpf oge, %207, %208 : vector<64x8xf32>
    %cst_114 = arith.constant 1.000000e+00 : f32
    %cst_115 = arith.constant -1.000000e+00 : f32
    %210 = vector.broadcast %cst_114 : f32 to vector<64x8xf32>
    %211 = vector.broadcast %cst_115 : f32 to vector<64x8xf32>
    %212 = arith.select %209, %210, %211 : vector<64x8xi1>, vector<64x8xf32>
    %213 = math.absf %207 : vector<64x8xf32>
    %cst_116 = arith.constant 0.327591091 : f32
    %214 = vector.broadcast %cst_116 : f32 to vector<64x8xf32>
    %215 = arith.mulf %214, %213 : vector<64x8xf32>
    %cst_117 = arith.constant 1.000000e+00 : f32
    %216 = vector.broadcast %cst_117 : f32 to vector<64x8xf32>
    %217 = arith.addf %216, %215 : vector<64x8xf32>
    %cst_118 = arith.constant 1.000000e+00 : f32
    %218 = vector.broadcast %cst_118 : f32 to vector<64x8xf32>
    %219 = arith.divf %218, %217 : vector<64x8xf32>
    %cst_119 = arith.constant 1.06140542 : f32
    %220 = vector.broadcast %cst_119 : f32 to vector<64x8xf32>
    %221 = arith.mulf %220, %219 : vector<64x8xf32>
    %cst_120 = arith.constant -1.45315206 : f32
    %222 = vector.broadcast %cst_120 : f32 to vector<64x8xf32>
    %223 = arith.addf %221, %222 : vector<64x8xf32>
    %224 = arith.mulf %223, %219 : vector<64x8xf32>
    %cst_121 = arith.constant 1.42141378 : f32
    %225 = vector.broadcast %cst_121 : f32 to vector<64x8xf32>
    %226 = arith.addf %224, %225 : vector<64x8xf32>
    %227 = arith.mulf %226, %219 : vector<64x8xf32>
    %cst_122 = arith.constant -0.284496725 : f32
    %228 = vector.broadcast %cst_122 : f32 to vector<64x8xf32>
    %229 = arith.addf %227, %228 : vector<64x8xf32>
    %230 = arith.mulf %229, %219 : vector<64x8xf32>
    %cst_123 = arith.constant 0.254829586 : f32
    %231 = vector.broadcast %cst_123 : f32 to vector<64x8xf32>
    %232 = arith.addf %230, %231 : vector<64x8xf32>
    %233 = arith.mulf %232, %219 : vector<64x8xf32>
    %cst_124 = arith.constant 0.000000e+00 : f32
    %234 = vector.broadcast %cst_124 : f32 to vector<64x8xf32>
    %235 = arith.subf %234, %213 : vector<64x8xf32>
    %236 = arith.mulf %235, %213 : vector<64x8xf32>
    %237 = math.exp %236 : vector<64x8xf32>
    %238 = arith.mulf %233, %237 : vector<64x8xf32>
    %cst_125 = arith.constant 1.000000e+00 : f32
    %239 = vector.broadcast %cst_125 : f32 to vector<64x8xf32>
    %240 = arith.subf %239, %238 : vector<64x8xf32>
    %241 = arith.mulf %212, %240 : vector<64x8xf32>
    %cst_126 = arith.constant 1.000000e+00 : f32
    %242 = vector.broadcast %cst_126 : f32 to vector<64x8xf32>
    %243 = arith.addf %242, %241 : vector<64x8xf32>
    %244 = arith.mulf %205, %243 : vector<64x8xf32>
    %c0_127 = arith.constant 0 : index
    %c0_128 = arith.constant 0 : index
    %c0_129 = arith.constant 0 : index
    %245 = vector.load %arg17[%c0_127, %c0_128, %c0_129] : memref<1x64x8xf32, #tpu.memory_space<vmem>>, vector<1x64x8xf32>
    %246 = vector.shape_cast %245 : vector<1x64x8xf32> to vector<64x8xf32>
    %247 = vector.shape_cast %244 : vector<64x8xf32> to vector<1x64x8xf32>
    tpu.vector_store %arg17[%c0_127, %c0_128, %c0_129], %247 {strides = array<i32>} : memref<1x64x8xf32, #tpu.memory_space<vmem>>, vector<1x64x8xf32>,
    return
  }
  func.func @transform_0(%arg0: i32) -> (i32, i32, i32) {
    %c0_i32 = arith.constant 0 : i32
    %c0_i32_0 = arith.constant 0 : i32
    %c0_i32_1 = arith.constant 0 : i32
    return %arg0, %c0_i32, %c0_i32_0 : i32, i32, i32
  }
  func.func @transform_1(%arg0: i32) -> (i32, i32) {
    %c0_i32 = arith.constant 0 : i32
    %c0_i32_0 = arith.constant 0 : i32
    %c0_i32_1 = arith.constant 0 : i32
    return %c0_i32, %c0_i32_0 : i32, i32
  }
  func.func @transform_2(%arg0: i32) -> (i32, i32) {
    %c0_i32 = arith.constant 0 : i32
    %c0_i32_0 = arith.constant 0 : i32
    %c0_i32_1 = arith.constant 0 : i32
    return %c0_i32, %c0_i32_0 : i32, i32
  }
  func.func @transform_3(%arg0: i32) -> (i32, i32) {
    %c0_i32 = arith.constant 0 : i32
    %c0_i32_0 = arith.constant 0 : i32
    %c0_i32_1 = arith.constant 0 : i32
    return %c0_i32, %c0_i32_0 : i32, i32
  }
  func.func @transform_4(%arg0: i32) -> (i32, i32) {
    %c0_i32 = arith.constant 0 : i32
    %c0_i32_0 = arith.constant 0 : i32
    %c0_i32_1 = arith.constant 0 : i32
    return %c0_i32, %c0_i32_0 : i32, i32
  }
  func.func @transform_5(%arg0: i32) -> (i32, i32) {
    %c0_i32 = arith.constant 0 : i32
    %c0_i32_0 = arith.constant 0 : i32
    %c0_i32_1 = arith.constant 0 : i32
    return %c0_i32, %c0_i32_0 : i32, i32
  }
  func.func @transform_6(%arg0: i32) -> (i32, i32) {
    %c0_i32 = arith.constant 0 : i32
    %c0_i32_0 = arith.constant 0 : i32
    %c0_i32_1 = arith.constant 0 : i32
    return %c0_i32, %c0_i32_0 : i32, i32
  }
  func.func @transform_7(%arg0: i32) -> (i32, i32) {
    %c0_i32 = arith.constant 0 : i32
    %c0_i32_0 = arith.constant 0 : i32
    %c0_i32_1 = arith.constant 0 : i32
    return %c0_i32, %c0_i32_0 : i32, i32
  }
  func.func @transform_8(%arg0: i32) -> (i32, i32, i32) {
    %c0_i32 = arith.constant 0 : i32
    %c0_i32_0 = arith.constant 0 : i32
    %c0_i32_1 = arith.constant 0 : i32
    %c0_i32_2 = arith.constant 0 : i32
    return %c0_i32, %c0_i32_0, %c0_i32_1 : i32, i32, i32
  }
  func.func @transform_9(%arg0: i32) -> (i32, i32) {
    %c0_i32 = arith.constant 0 : i32
    %c0_i32_0 = arith.constant 0 : i32
    %c0_i32_1 = arith.constant 0 : i32
    return %c0_i32, %c0_i32_0 : i32, i32
  }
  func.func @transform_10(%arg0: i32) -> (i32, i32) {
    %c0_i32 = arith.constant 0 : i32
    %c0_i32_0 = arith.constant 0 : i32
    %c0_i32_1 = arith.constant 0 : i32
    return %c0_i32, %c0_i32_0 : i32, i32
  }
  func.func @transform_11(%arg0: i32) -> (i32, i32) {
    %c0_i32 = arith.constant 0 : i32
    %c0_i32_0 = arith.constant 0 : i32
    %c0_i32_1 = arith.constant 0 : i32
    return %c0_i32, %c0_i32_0 : i32, i32
  }
  func.func @transform_12(%arg0: i32) -> (i32, i32, i32) {
    %c0_i32 = arith.constant 0 : i32
    %c0_i32_0 = arith.constant 0 : i32
    %c0_i32_1 = arith.constant 0 : i32
    %c0_i32_2 = arith.constant 0 : i32
    return %c0_i32, %c0_i32_0, %c0_i32_1 : i32, i32, i32
  }
  func.func @transform_13(%arg0: i32) -> (i32, i32) {
    %c0_i32 = arith.constant 0 : i32
    %c0_i32_0 = arith.constant 0 : i32
    %c0_i32_1 = arith.constant 0 : i32
    return %c0_i32, %c0_i32_0 : i32, i32
  }
  func.func @transform_14(%arg0: i32) -> (i32, i32) {
    %c0_i32 = arith.constant 0 : i32
    %c0_i32_0 = arith.constant 0 : i32
    %c0_i32_1 = arith.constant 0 : i32
    return %c0_i32, %c0_i32_0 : i32, i32
  }
  func.func @transform_15(%arg0: i32) -> (i32, i32) {
    %c0_i32 = arith.constant 0 : i32
    %c0_i32_0 = arith.constant 0 : i32
    %c0_i32_1 = arith.constant 0 : i32
    return %c0_i32, %c0_i32_0 : i32, i32
  }
  func.func @transform_16(%arg0: i32) -> (i32, i32, i32) {
    %c0_i32 = arith.constant 0 : i32
    %c0_i32_0 = arith.constant 0 : i32
    %c0_i32_1 = arith.constant 0 : i32
    return %arg0, %c0_i32, %c0_i32_0 : i32, i32, i32
  }
}

module attributes {stable_mosaic.version = 11 : i64} {
  func.func @_transformer_kernel(%arg0: i32, %arg1: memref<1x9x64xf32, #tpu.memory_space<vmem>>, %arg2: memref<9x64xf32, #tpu.memory_space<vmem>>, %arg3: memref<2x1x64xf32, #tpu.memory_space<vmem>>, %arg4: memref<2x1x64xf32, #tpu.memory_space<vmem>>, %arg5: memref<2x8x64x8xbf16, #tpu.memory_space<vmem>>, %arg6: memref<2x8x64x8xbf16, #tpu.memory_space<vmem>>, %arg7: memref<2x8x64x8xbf16, #tpu.memory_space<vmem>>, %arg8: memref<2x1x8xf32, #tpu.memory_space<vmem>>, %arg9: memref<2x1x8xf32, #tpu.memory_space<vmem>>, %arg10: memref<2x1x8xf32, #tpu.memory_space<vmem>>, %arg11: memref<2x1x8xf32, #tpu.memory_space<vmem>>, %arg12: memref<2x8x8x64xbf16, #tpu.memory_space<vmem>>, %arg13: memref<2x1x64xf32, #tpu.memory_space<vmem>>, %arg14: memref<2x1x64xf32, #tpu.memory_space<vmem>>, %arg15: memref<2x1x64xf32, #tpu.memory_space<vmem>>, %arg16: memref<2x1x64xf32, #tpu.memory_space<vmem>>, %arg17: memref<2x64x256xbf16, #tpu.memory_space<vmem>>, %arg18: memref<2x1x256xf32, #tpu.memory_space<vmem>>, %arg19: memref<2x256x64xbf16, #tpu.memory_space<vmem>>, %arg20: memref<2x1x64xf32, #tpu.memory_space<vmem>>, %arg21: memref<2x1x64xf32, #tpu.memory_space<vmem>>, %arg22: memref<1x64xf32, #tpu.memory_space<vmem>>, %arg23: memref<1x64xf32, #tpu.memory_space<vmem>>, %arg24: memref<64x128xf32, #tpu.memory_space<vmem>>, %arg25: memref<1x128xf32, #tpu.memory_space<vmem>>, %arg26: memref<1x1x128xf32, #tpu.memory_space<vmem>>) attributes {dimension_semantics = [#tpu.dimension_semantics<parallel>], iteration_bounds = array<i64: 2>, scalar_prefetch = 0 : i64, scratch_operands = 0 : i64, tpu.core_type = #tpu.core_type<tc>, window_params = [{transform_indices = @transform_0, window_bounds = array<i64: 1, 9, 64>}, {pipeline_mode = #tpu.pipeline_mode<synchronous>, transform_indices = @transform_1, window_bounds = array<i64: 9, 64>}, {pipeline_mode = #tpu.pipeline_mode<synchronous>, transform_indices = @transform_2, window_bounds = array<i64: 2, 1, 64>}, {pipeline_mode = #tpu.pipeline_mode<synchronous>, transform_indices = @transform_3, window_bounds = array<i64: 2, 1, 64>}, {pipeline_mode = #tpu.pipeline_mode<synchronous>, transform_indices = @transform_4, window_bounds = array<i64: 2, 8, 64, 8>}, {pipeline_mode = #tpu.pipeline_mode<synchronous>, transform_indices = @transform_5, window_bounds = array<i64: 2, 8, 64, 8>}, {pipeline_mode = #tpu.pipeline_mode<synchronous>, transform_indices = @transform_6, window_bounds = array<i64: 2, 8, 64, 8>}, {pipeline_mode = #tpu.pipeline_mode<synchronous>, transform_indices = @transform_7, window_bounds = array<i64: 2, 1, 8>}, {pipeline_mode = #tpu.pipeline_mode<synchronous>, transform_indices = @transform_8, window_bounds = array<i64: 2, 1, 8>}, {pipeline_mode = #tpu.pipeline_mode<synchronous>, transform_indices = @transform_9, window_bounds = array<i64: 2, 1, 8>}, {pipeline_mode = #tpu.pipeline_mode<synchronous>, transform_indices = @transform_10, window_bounds = array<i64: 2, 1, 8>}, {pipeline_mode = #tpu.pipeline_mode<synchronous>, transform_indices = @transform_11, window_bounds = array<i64: 2, 8, 8, 64>}, {pipeline_mode = #tpu.pipeline_mode<synchronous>, transform_indices = @transform_12, window_bounds = array<i64: 2, 1, 64>}, {pipeline_mode = #tpu.pipeline_mode<synchronous>, transform_indices = @transform_13, window_bounds = array<i64: 2, 1, 64>}, {pipeline_mode = #tpu.pipeline_mode<synchronous>, transform_indices = @transform_14, window_bounds = array<i64: 2, 1, 64>}, {pipeline_mode = #tpu.pipeline_mode<synchronous>, transform_indices = @transform_15, window_bounds = array<i64: 2, 1, 64>}, {pipeline_mode = #tpu.pipeline_mode<synchronous>, transform_indices = @transform_16, window_bounds = array<i64: 2, 64, 256>}, {pipeline_mode = #tpu.pipeline_mode<synchronous>, transform_indices = @transform_17, window_bounds = array<i64: 2, 1, 256>}, {pipeline_mode = #tpu.pipeline_mode<synchronous>, transform_indices = @transform_18, window_bounds = array<i64: 2, 256, 64>}, {pipeline_mode = #tpu.pipeline_mode<synchronous>, transform_indices = @transform_19, window_bounds = array<i64: 2, 1, 64>}, {pipeline_mode = #tpu.pipeline_mode<synchronous>, transform_indices = @transform_20, window_bounds = array<i64: 2, 1, 64>}, {pipeline_mode = #tpu.pipeline_mode<synchronous>, transform_indices = @transform_21, window_bounds = array<i64: 1, 64>}, {pipeline_mode = #tpu.pipeline_mode<synchronous>, transform_indices = @transform_22, window_bounds = array<i64: 1, 64>}, {pipeline_mode = #tpu.pipeline_mode<synchronous>, transform_indices = @transform_23, window_bounds = array<i64: 64, 128>}, {pipeline_mode = #tpu.pipeline_mode<synchronous>, transform_indices = @transform_24, window_bounds = array<i64: 1, 128>}, {transform_indices = @transform_25, window_bounds = array<i64: 1, 1, 128>}]} {
    %c0 = arith.constant 0 : index
    %c0_0 = arith.constant 0 : index
    %c0_1 = arith.constant 0 : index
    %0 = vector.load %arg1[%c0, %c0_0, %c0_1] : memref<1x9x64xf32, #tpu.memory_space<vmem>>, vector<1x9x64xf32>
    %1 = vector.shape_cast %0 : vector<1x9x64xf32> to vector<9x64xf32>
    %c0_2 = arith.constant 0 : index
    %c0_3 = arith.constant 0 : index
    %2 = vector.load %arg2[%c0_2, %c0_3] : memref<9x64xf32, #tpu.memory_space<vmem>>, vector<9x64xf32>
    %3 = arith.addf %1, %2 : vector<9x64xf32>
    %c0_4 = arith.constant 0 : index
    %c0_5 = arith.constant 0 : index
    %c0_6 = arith.constant 0 : index
    %4 = vector.load %arg3[%c0_4, %c0_5, %c0_6] : memref<2x1x64xf32, #tpu.memory_space<vmem>>, vector<1x1x64xf32>
    %5 = vector.shape_cast %4 : vector<1x1x64xf32> to vector<1x64xf32>
    %c0_7 = arith.constant 0 : index
    %c0_8 = arith.constant 0 : index
    %c0_9 = arith.constant 0 : index
    %6 = vector.load %arg4[%c0_7, %c0_8, %c0_9] : memref<2x1x64xf32, #tpu.memory_space<vmem>>, vector<1x1x64xf32>
    %7 = vector.shape_cast %6 : vector<1x1x64xf32> to vector<1x64xf32>
    %cst = arith.constant dense<0.000000e+00> : vector<9xf32>
    %8 = vector.multi_reduction <add>, %3, %cst [1] : vector<9x64xf32> to vector<9xf32>
    %9 = vector.shape_cast %8 : vector<9xf32> to vector<9x1xf32>
    %cst_10 = arith.constant 6.400000e+01 : f32
    %10 = vector.broadcast %cst_10 : f32 to vector<9x1xf32>
    %11 = arith.divf %9, %10 : vector<9x1xf32>
    %12 = vector.broadcast %11 : vector<9x1xf32> to vector<9x64xf32>
    %13 = arith.subf %3, %12 : vector<9x64xf32>
    %14 = arith.mulf %13, %13 : vector<9x64xf32>
    %cst_11 = arith.constant dense<0.000000e+00> : vector<9xf32>
    %15 = vector.multi_reduction <add>, %14, %cst_11 [1] : vector<9x64xf32> to vector<9xf32>
    %16 = vector.shape_cast %15 : vector<9xf32> to vector<9x1xf32>
    %cst_12 = arith.constant 6.400000e+01 : f32
    %17 = vector.broadcast %cst_12 : f32 to vector<9x1xf32>
    %18 = arith.divf %16, %17 : vector<9x1xf32>
    %19 = vector.broadcast %11 : vector<9x1xf32> to vector<9x64xf32>
    %20 = arith.subf %3, %19 : vector<9x64xf32>
    %cst_13 = arith.constant 9.99999997E-7 : f32
    %21 = vector.broadcast %cst_13 : f32 to vector<9x1xf32>
    %22 = arith.addf %18, %21 : vector<9x1xf32>
    %23 = math.rsqrt %22 : vector<9x1xf32>
    %24 = vector.broadcast %23 : vector<9x1xf32> to vector<9x64xf32>
    %25 = arith.mulf %20, %24 : vector<9x64xf32>
    %26 = vector.broadcast %5 : vector<1x64xf32> to vector<9x64xf32>
    %27 = arith.mulf %25, %26 : vector<9x64xf32>
    %28 = vector.broadcast %7 : vector<1x64xf32> to vector<9x64xf32>
    %29 = arith.addf %27, %28 : vector<9x64xf32>
    %30 = arith.truncf %29 : vector<9x64xf32> to vector<9x64xbf16>
    %31 = vector.shape_cast %30 : vector<9x64xbf16> to vector<1x9x64xbf16>
    %32 = vector.shape_cast %31 : vector<1x9x64xbf16> to vector<1x9x64xbf16>
    %33 = vector.broadcast %32 : vector<1x9x64xbf16> to vector<8x9x64xbf16>
    %c0_14 = arith.constant 0 : index
    %c0_15 = arith.constant 0 : index
    %c0_16 = arith.constant 0 : index
    %c0_17 = arith.constant 0 : index
    %34 = vector.load %arg5[%c0_14, %c0_15, %c0_16, %c0_17] : memref<2x8x64x8xbf16, #tpu.memory_space<vmem>>, vector<1x8x64x8xbf16>
    %35 = vector.shape_cast %34 : vector<1x8x64x8xbf16> to vector<8x64x8xbf16>
    "tpu.trace_start"() <{level = 10 : i32, message = "hsd,hde->hse"}> : () -> ()
    %cst_18 = arith.constant dense<0.000000e+00> : vector<8x9x8xf32>
    %36 = tpu.matmul %33, %35, %cst_18 {dimension_numbers = #tpu.dot_dimension_numbers<[2], [1], [1], [2], [0, 0, 0, 1, 1, 2], [0], [0]>} : vector<8x9x64xbf16>, vector<8x64x8xbf16>, vector<8x9x8xf32> -> vector<8x9x8xf32>
    "tpu.trace_stop"() : () -> ()
    %c0_19 = arith.constant 0 : index
    %c0_20 = arith.constant 0 : index
    %c0_21 = arith.constant 0 : index
    %c0_22 = arith.constant 0 : index
    %37 = vector.load %arg6[%c0_19, %c0_20, %c0_21, %c0_22] : memref<2x8x64x8xbf16, #tpu.memory_space<vmem>>, vector<1x8x64x8xbf16>
    %38 = vector.shape_cast %37 : vector<1x8x64x8xbf16> to vector<8x64x8xbf16>
    "tpu.trace_start"() <{level = 10 : i32, message = "hsd,hde->hse"}> : () -> ()
    %cst_23 = arith.constant dense<0.000000e+00> : vector<8x9x8xf32>
    %39 = tpu.matmul %33, %38, %cst_23 {dimension_numbers = #tpu.dot_dimension_numbers<[2], [1], [1], [2], [0, 0, 0, 1, 1, 2], [0], [0]>} : vector<8x9x64xbf16>, vector<8x64x8xbf16>, vector<8x9x8xf32> -> vector<8x9x8xf32>
    "tpu.trace_stop"() : () -> ()
    %c0_24 = arith.constant 0 : index
    %c0_25 = arith.constant 0 : index
    %c0_26 = arith.constant 0 : index
    %c0_27 = arith.constant 0 : index
    %40 = vector.load %arg7[%c0_24, %c0_25, %c0_26, %c0_27] : memref<2x8x64x8xbf16, #tpu.memory_space<vmem>>, vector<1x8x64x8xbf16>
    %41 = vector.shape_cast %40 : vector<1x8x64x8xbf16> to vector<8x64x8xbf16>
    "tpu.trace_start"() <{level = 10 : i32, message = "hsd,hde->hse"}> : () -> ()
    %cst_28 = arith.constant dense<0.000000e+00> : vector<8x9x8xf32>
    %42 = tpu.matmul %33, %41, %cst_28 {dimension_numbers = #tpu.dot_dimension_numbers<[2], [1], [1], [2], [0, 0, 0, 1, 1, 2], [0], [0]>} : vector<8x9x64xbf16>, vector<8x64x8xbf16>, vector<8x9x8xf32> -> vector<8x9x8xf32>
    "tpu.trace_stop"() : () -> ()
    %c0_29 = arith.constant 0 : index
    %c0_30 = arith.constant 0 : index
    %c0_31 = arith.constant 0 : index
    %43 = vector.load %arg8[%c0_29, %c0_30, %c0_31] : memref<2x1x8xf32, #tpu.memory_space<vmem>>, vector<1x1x8xf32>
    %44 = vector.shape_cast %43 : vector<1x1x8xf32> to vector<1x8xf32>
    %c0_32 = arith.constant 0 : index
    %c0_33 = arith.constant 0 : index
    %c0_34 = arith.constant 0 : index
    %45 = vector.load %arg9[%c0_32, %c0_33, %c0_34] : memref<2x1x8xf32, #tpu.memory_space<vmem>>, vector<1x1x8xf32>
    %46 = vector.shape_cast %45 : vector<1x1x8xf32> to vector<1x8xf32>
    %cst_35 = arith.constant dense<0.000000e+00> : vector<8x9xf32>
    %47 = vector.multi_reduction <add>, %36, %cst_35 [2] : vector<8x9x8xf32> to vector<8x9xf32>
    %48 = vector.shape_cast %47 : vector<8x9xf32> to vector<8x9x1xf32>
    %cst_36 = arith.constant 8.000000e+00 : f32
    %49 = vector.broadcast %cst_36 : f32 to vector<8x9x1xf32>
    %50 = arith.divf %48, %49 : vector<8x9x1xf32>
    %51 = vector.broadcast %50 : vector<8x9x1xf32> to vector<8x9x8xf32>
    %52 = arith.subf %36, %51 : vector<8x9x8xf32>
    %53 = arith.mulf %52, %52 : vector<8x9x8xf32>
    %cst_37 = arith.constant dense<0.000000e+00> : vector<8x9xf32>
    %54 = vector.multi_reduction <add>, %53, %cst_37 [2] : vector<8x9x8xf32> to vector<8x9xf32>
    %55 = vector.shape_cast %54 : vector<8x9xf32> to vector<8x9x1xf32>
    %cst_38 = arith.constant 8.000000e+00 : f32
    %56 = vector.broadcast %cst_38 : f32 to vector<8x9x1xf32>
    %57 = arith.divf %55, %56 : vector<8x9x1xf32>
    %58 = vector.broadcast %50 : vector<8x9x1xf32> to vector<8x9x8xf32>
    %59 = arith.subf %36, %58 : vector<8x9x8xf32>
    %cst_39 = arith.constant 9.99999997E-7 : f32
    %60 = vector.broadcast %cst_39 : f32 to vector<8x9x1xf32>
    %61 = arith.addf %57, %60 : vector<8x9x1xf32>
    %62 = math.rsqrt %61 : vector<8x9x1xf32>
    %63 = vector.broadcast %62 : vector<8x9x1xf32> to vector<8x9x8xf32>
    %64 = arith.mulf %59, %63 : vector<8x9x8xf32>
    %65 = vector.shape_cast %44 : vector<1x8xf32> to vector<1x1x8xf32>
    %66 = vector.broadcast %65 : vector<1x1x8xf32> to vector<8x9x8xf32>
    %67 = arith.mulf %64, %66 : vector<8x9x8xf32>
    %68 = vector.shape_cast %46 : vector<1x8xf32> to vector<1x1x8xf32>
    %69 = vector.broadcast %68 : vector<1x1x8xf32> to vector<8x9x8xf32>
    %70 = arith.addf %67, %69 : vector<8x9x8xf32>
    %cst_40 = arith.constant 0.353553385 : f32
    %71 = vector.broadcast %cst_40 : f32 to vector<8x9x8xf32>
    %72 = arith.mulf %70, %71 : vector<8x9x8xf32>
    %c0_41 = arith.constant 0 : index
    %c0_42 = arith.constant 0 : index
    %c0_43 = arith.constant 0 : index
    %73 = vector.load %arg10[%c0_41, %c0_42, %c0_43] : memref<2x1x8xf32, #tpu.memory_space<vmem>>, vector<1x1x8xf32>
    %74 = vector.shape_cast %73 : vector<1x1x8xf32> to vector<1x8xf32>
    %c0_44 = arith.constant 0 : index
    %c0_45 = arith.constant 0 : index
    %c0_46 = arith.constant 0 : index
    %75 = vector.load %arg11[%c0_44, %c0_45, %c0_46] : memref<2x1x8xf32, #tpu.memory_space<vmem>>, vector<1x1x8xf32>
    %76 = vector.shape_cast %75 : vector<1x1x8xf32> to vector<1x8xf32>
    %cst_47 = arith.constant dense<0.000000e+00> : vector<8x9xf32>
    %77 = vector.multi_reduction <add>, %39, %cst_47 [2] : vector<8x9x8xf32> to vector<8x9xf32>
    %78 = vector.shape_cast %77 : vector<8x9xf32> to vector<8x9x1xf32>
    %cst_48 = arith.constant 8.000000e+00 : f32
    %79 = vector.broadcast %cst_48 : f32 to vector<8x9x1xf32>
    %80 = arith.divf %78, %79 : vector<8x9x1xf32>
    %81 = vector.broadcast %80 : vector<8x9x1xf32> to vector<8x9x8xf32>
    %82 = arith.subf %39, %81 : vector<8x9x8xf32>
    %83 = arith.mulf %82, %82 : vector<8x9x8xf32>
    %cst_49 = arith.constant dense<0.000000e+00> : vector<8x9xf32>
    %84 = vector.multi_reduction <add>, %83, %cst_49 [2] : vector<8x9x8xf32> to vector<8x9xf32>
    %85 = vector.shape_cast %84 : vector<8x9xf32> to vector<8x9x1xf32>
    %cst_50 = arith.constant 8.000000e+00 : f32
    %86 = vector.broadcast %cst_50 : f32 to vector<8x9x1xf32>
    %87 = arith.divf %85, %86 : vector<8x9x1xf32>
    %88 = vector.broadcast %80 : vector<8x9x1xf32> to vector<8x9x8xf32>
    %89 = arith.subf %39, %88 : vector<8x9x8xf32>
    %cst_51 = arith.constant 9.99999997E-7 : f32
    %90 = vector.broadcast %cst_51 : f32 to vector<8x9x1xf32>
    %91 = arith.addf %87, %90 : vector<8x9x1xf32>
    %92 = math.rsqrt %91 : vector<8x9x1xf32>
    %93 = vector.broadcast %92 : vector<8x9x1xf32> to vector<8x9x8xf32>
    %94 = arith.mulf %89, %93 : vector<8x9x8xf32>
    %95 = vector.shape_cast %74 : vector<1x8xf32> to vector<1x1x8xf32>
    %96 = vector.broadcast %95 : vector<1x1x8xf32> to vector<8x9x8xf32>
    %97 = arith.mulf %94, %96 : vector<8x9x8xf32>
    %98 = vector.shape_cast %76 : vector<1x8xf32> to vector<1x1x8xf32>
    %99 = vector.broadcast %98 : vector<1x1x8xf32> to vector<8x9x8xf32>
    %100 = arith.addf %97, %99 : vector<8x9x8xf32>
    "tpu.trace_start"() <{level = 10 : i32, message = "hqe,hke->hqk"}> : () -> ()
    %cst_52 = arith.constant dense<0.000000e+00> : vector<8x9x9xf32>
    %101 = tpu.matmul %72, %100, %cst_52 {dimension_numbers = #tpu.dot_dimension_numbers<[2], [2], [1], [1], [0, 0, 0, 1, 1, 1], [0], [0]>} : vector<8x9x8xf32>, vector<8x9x8xf32>, vector<8x9x9xf32> -> vector<8x9x9xf32>
    "tpu.trace_stop"() : () -> ()
    %cst_53 = arith.constant dense<0xFF800000> : vector<8x9xf32>
    %102 = vector.multi_reduction <maximumf>, %101, %cst_53 [2] : vector<8x9x9xf32> to vector<8x9xf32>
    %103 = vector.shape_cast %102 : vector<8x9xf32> to vector<8x9x1xf32>
    %104 = vector.broadcast %103 : vector<8x9x1xf32> to vector<8x9x9xf32>
    %105 = arith.subf %101, %104 : vector<8x9x9xf32>
    %106 = math.exp %105 : vector<8x9x9xf32>
    %cst_54 = arith.constant dense<0.000000e+00> : vector<8x9xf32>
    %107 = vector.multi_reduction <add>, %106, %cst_54 [2] : vector<8x9x9xf32> to vector<8x9xf32>
    %108 = vector.shape_cast %107 : vector<8x9xf32> to vector<8x9x1xf32>
    %109 = tpu.reciprocal %108 {approx = true} : vector<8x9x1xf32> -> vector<8x9x1xf32>
    %110 = vector.broadcast %109 : vector<8x9x1xf32> to vector<8x9x9xf32>
    %111 = arith.mulf %106, %110 : vector<8x9x9xf32>
    "tpu.trace_start"() <{level = 10 : i32, message = "hqk,hke->hqe"}> : () -> ()
    %cst_55 = arith.constant dense<0.000000e+00> : vector<8x9x8xf32>
    %112 = tpu.matmul %111, %42, %cst_55 {dimension_numbers = #tpu.dot_dimension_numbers<[2], [1], [1], [2], [0, 0, 0, 1, 1, 2], [0], [0]>} : vector<8x9x9xf32>, vector<8x9x8xf32>, vector<8x9x8xf32> -> vector<8x9x8xf32>
    "tpu.trace_stop"() : () -> ()
    %113 = arith.truncf %112 : vector<8x9x8xf32> to vector<8x9x8xbf16>
    %c0_56 = arith.constant 0 : index
    %c0_57 = arith.constant 0 : index
    %c0_58 = arith.constant 0 : index
    %c0_59 = arith.constant 0 : index
    %114 = vector.load %arg12[%c0_56, %c0_57, %c0_58, %c0_59] : memref<2x8x8x64xbf16, #tpu.memory_space<vmem>>, vector<1x8x8x64xbf16>
    %115 = vector.shape_cast %114 : vector<1x8x8x64xbf16> to vector<8x8x64xbf16>
    "tpu.trace_start"() <{level = 10 : i32, message = "hse,hed->hsd"}> : () -> ()
    %cst_60 = arith.constant dense<0.000000e+00> : vector<8x9x64xf32>
    %116 = tpu.matmul %113, %115, %cst_60 {dimension_numbers = #tpu.dot_dimension_numbers<[2], [1], [1], [2], [0, 0, 0, 1, 1, 2], [0], [0]>} : vector<8x9x8xbf16>, vector<8x8x64xbf16>, vector<8x9x64xf32> -> vector<8x9x64xf32>
    "tpu.trace_stop"() : () -> ()
    %cst_61 = arith.constant dense<0.000000e+00> : vector<9x64xf32>
    %117 = vector.multi_reduction <add>, %116, %cst_61 [0] : vector<8x9x64xf32> to vector<9x64xf32>
    %c0_62 = arith.constant 0 : index
    %c0_63 = arith.constant 0 : index
    %c0_64 = arith.constant 0 : index
    %118 = vector.load %arg13[%c0_62, %c0_63, %c0_64] : memref<2x1x64xf32, #tpu.memory_space<vmem>>, vector<1x1x64xf32>
    %119 = vector.shape_cast %118 : vector<1x1x64xf32> to vector<1x64xf32>
    %120 = vector.broadcast %119 : vector<1x64xf32> to vector<9x64xf32>
    %121 = arith.addf %117, %120 : vector<9x64xf32>
    %c0_65 = arith.constant 0 : index
    %c0_66 = arith.constant 0 : index
    %c0_67 = arith.constant 0 : index
    %122 = vector.load %arg14[%c0_65, %c0_66, %c0_67] : memref<2x1x64xf32, #tpu.memory_space<vmem>>, vector<1x1x64xf32>
    %123 = vector.shape_cast %122 : vector<1x1x64xf32> to vector<1x64xf32>
    %124 = vector.broadcast %123 : vector<1x64xf32> to vector<9x64xf32>
    %125 = arith.mulf %124, %121 : vector<9x64xf32>
    %126 = arith.addf %3, %125 : vector<9x64xf32>
    %c0_68 = arith.constant 0 : index
    %c0_69 = arith.constant 0 : index
    %c0_70 = arith.constant 0 : index
    %127 = vector.load %arg15[%c0_68, %c0_69, %c0_70] : memref<2x1x64xf32, #tpu.memory_space<vmem>>, vector<1x1x64xf32>
    %128 = vector.shape_cast %127 : vector<1x1x64xf32> to vector<1x64xf32>
    %c0_71 = arith.constant 0 : index
    %c0_72 = arith.constant 0 : index
    %c0_73 = arith.constant 0 : index
    %129 = vector.load %arg16[%c0_71, %c0_72, %c0_73] : memref<2x1x64xf32, #tpu.memory_space<vmem>>, vector<1x1x64xf32>
    %130 = vector.shape_cast %129 : vector<1x1x64xf32> to vector<1x64xf32>
    %cst_74 = arith.constant dense<0.000000e+00> : vector<9xf32>
    %131 = vector.multi_reduction <add>, %126, %cst_74 [1] : vector<9x64xf32> to vector<9xf32>
    %132 = vector.shape_cast %131 : vector<9xf32> to vector<9x1xf32>
    %cst_75 = arith.constant 6.400000e+01 : f32
    %133 = vector.broadcast %cst_75 : f32 to vector<9x1xf32>
    %134 = arith.divf %132, %133 : vector<9x1xf32>
    %135 = vector.broadcast %134 : vector<9x1xf32> to vector<9x64xf32>
    %136 = arith.subf %126, %135 : vector<9x64xf32>
    %137 = arith.mulf %136, %136 : vector<9x64xf32>
    %cst_76 = arith.constant dense<0.000000e+00> : vector<9xf32>
    %138 = vector.multi_reduction <add>, %137, %cst_76 [1] : vector<9x64xf32> to vector<9xf32>
    %139 = vector.shape_cast %138 : vector<9xf32> to vector<9x1xf32>
    %cst_77 = arith.constant 6.400000e+01 : f32
    %140 = vector.broadcast %cst_77 : f32 to vector<9x1xf32>
    %141 = arith.divf %139, %140 : vector<9x1xf32>
    %142 = vector.broadcast %134 : vector<9x1xf32> to vector<9x64xf32>
    %143 = arith.subf %126, %142 : vector<9x64xf32>
    %cst_78 = arith.constant 9.99999997E-7 : f32
    %144 = vector.broadcast %cst_78 : f32 to vector<9x1xf32>
    %145 = arith.addf %141, %144 : vector<9x1xf32>
    %146 = math.rsqrt %145 : vector<9x1xf32>
    %147 = vector.broadcast %146 : vector<9x1xf32> to vector<9x64xf32>
    %148 = arith.mulf %143, %147 : vector<9x64xf32>
    %149 = vector.broadcast %128 : vector<1x64xf32> to vector<9x64xf32>
    %150 = arith.mulf %148, %149 : vector<9x64xf32>
    %151 = vector.broadcast %130 : vector<1x64xf32> to vector<9x64xf32>
    %152 = arith.addf %150, %151 : vector<9x64xf32>
    %153 = arith.truncf %152 : vector<9x64xf32> to vector<9x64xbf16>
    %c0_79 = arith.constant 0 : index
    %c0_80 = arith.constant 0 : index
    %c0_81 = arith.constant 0 : index
    %154 = vector.load %arg17[%c0_79, %c0_80, %c0_81] : memref<2x64x256xbf16, #tpu.memory_space<vmem>>, vector<1x64x256xbf16>
    %155 = vector.shape_cast %154 : vector<1x64x256xbf16> to vector<64x256xbf16>
    %cst_82 = arith.constant dense<0.000000e+00> : vector<9x256xf32>
    %156 = tpu.matmul %153, %155, %cst_82 {dimension_numbers = #tpu.dot_dimension_numbers<[1], [0], [0], [1], [0, 0, 1, 1], [], []>} : vector<9x64xbf16>, vector<64x256xbf16>, vector<9x256xf32> -> vector<9x256xf32>
    %c0_83 = arith.constant 0 : index
    %c0_84 = arith.constant 0 : index
    %c0_85 = arith.constant 0 : index
    %157 = vector.load %arg18[%c0_83, %c0_84, %c0_85] : memref<2x1x256xf32, #tpu.memory_space<vmem>>, vector<1x1x256xf32>
    %158 = vector.shape_cast %157 : vector<1x1x256xf32> to vector<1x256xf32>
    %159 = vector.broadcast %158 : vector<1x256xf32> to vector<9x256xf32>
    %160 = arith.addf %156, %159 : vector<9x256xf32>
    %cst_86 = arith.constant 5.000000e-01 : f32
    %161 = vector.broadcast %cst_86 : f32 to vector<9x256xf32>
    %162 = arith.mulf %161, %160 : vector<9x256xf32>
    %cst_87 = arith.constant 0.707106769 : f32
    %163 = vector.broadcast %cst_87 : f32 to vector<9x256xf32>
    %164 = arith.mulf %160, %163 : vector<9x256xf32>
    %cst_88 = arith.constant 0.000000e+00 : f32
    %165 = vector.broadcast %cst_88 : f32 to vector<9x256xf32>
    %166 = arith.cmpf oge, %164, %165 : vector<9x256xf32>
    %cst_89 = arith.constant 1.000000e+00 : f32
    %cst_90 = arith.constant -1.000000e+00 : f32
    %167 = vector.broadcast %cst_89 : f32 to vector<9x256xf32>
    %168 = vector.broadcast %cst_90 : f32 to vector<9x256xf32>
    %169 = arith.select %166, %167, %168 : vector<9x256xi1>, vector<9x256xf32>
    %170 = math.absf %164 : vector<9x256xf32>
    %cst_91 = arith.constant 0.327591091 : f32
    %171 = vector.broadcast %cst_91 : f32 to vector<9x256xf32>
    %172 = arith.mulf %171, %170 : vector<9x256xf32>
    %cst_92 = arith.constant 1.000000e+00 : f32
    %173 = vector.broadcast %cst_92 : f32 to vector<9x256xf32>
    %174 = arith.addf %173, %172 : vector<9x256xf32>
    %cst_93 = arith.constant 1.000000e+00 : f32
    %175 = vector.broadcast %cst_93 : f32 to vector<9x256xf32>
    %176 = arith.divf %175, %174 : vector<9x256xf32>
    %cst_94 = arith.constant 1.06140542 : f32
    %177 = vector.broadcast %cst_94 : f32 to vector<9x256xf32>
    %178 = arith.mulf %177, %176 : vector<9x256xf32>
    %cst_95 = arith.constant -1.45315206 : f32
    %179 = vector.broadcast %cst_95 : f32 to vector<9x256xf32>
    %180 = arith.addf %178, %179 : vector<9x256xf32>
    %181 = arith.mulf %180, %176 : vector<9x256xf32>
    %cst_96 = arith.constant 1.42141378 : f32
    %182 = vector.broadcast %cst_96 : f32 to vector<9x256xf32>
    %183 = arith.addf %181, %182 : vector<9x256xf32>
    %184 = arith.mulf %183, %176 : vector<9x256xf32>
    %cst_97 = arith.constant -0.284496725 : f32
    %185 = vector.broadcast %cst_97 : f32 to vector<9x256xf32>
    %186 = arith.addf %184, %185 : vector<9x256xf32>
    %187 = arith.mulf %186, %176 : vector<9x256xf32>
    %cst_98 = arith.constant 0.254829586 : f32
    %188 = vector.broadcast %cst_98 : f32 to vector<9x256xf32>
    %189 = arith.addf %187, %188 : vector<9x256xf32>
    %190 = arith.mulf %189, %176 : vector<9x256xf32>
    %cst_99 = arith.constant 0.000000e+00 : f32
    %191 = vector.broadcast %cst_99 : f32 to vector<9x256xf32>
    %192 = arith.subf %191, %170 : vector<9x256xf32>
    %193 = arith.mulf %192, %170 : vector<9x256xf32>
    %194 = math.exp %193 : vector<9x256xf32>
    %195 = arith.mulf %190, %194 : vector<9x256xf32>
    %cst_100 = arith.constant 1.000000e+00 : f32
    %196 = vector.broadcast %cst_100 : f32 to vector<9x256xf32>
    %197 = arith.subf %196, %195 : vector<9x256xf32>
    %198 = arith.mulf %169, %197 : vector<9x256xf32>
    %cst_101 = arith.constant 1.000000e+00 : f32
    %199 = vector.broadcast %cst_101 : f32 to vector<9x256xf32>
    %200 = arith.addf %199, %198 : vector<9x256xf32>
    %201 = arith.mulf %162, %200 : vector<9x256xf32>
    %202 = arith.truncf %201 : vector<9x256xf32> to vector<9x256xbf16>
    %c0_102 = arith.constant 0 : index
    %c0_103 = arith.constant 0 : index
    %c0_104 = arith.constant 0 : index
    %203 = vector.load %arg19[%c0_102, %c0_103, %c0_104] : memref<2x256x64xbf16, #tpu.memory_space<vmem>>, vector<1x256x64xbf16>
    %204 = vector.shape_cast %203 : vector<1x256x64xbf16> to vector<256x64xbf16>
    %cst_105 = arith.constant dense<0.000000e+00> : vector<9x64xf32>
    %205 = tpu.matmul %202, %204, %cst_105 {dimension_numbers = #tpu.dot_dimension_numbers<[1], [0], [0], [1], [0, 0, 1, 1], [], []>} : vector<9x256xbf16>, vector<256x64xbf16>, vector<9x64xf32> -> vector<9x64xf32>
    %c0_106 = arith.constant 0 : index
    %c0_107 = arith.constant 0 : index
    %c0_108 = arith.constant 0 : index
    %206 = vector.load %arg20[%c0_106, %c0_107, %c0_108] : memref<2x1x64xf32, #tpu.memory_space<vmem>>, vector<1x1x64xf32>
    %207 = vector.shape_cast %206 : vector<1x1x64xf32> to vector<1x64xf32>
    %208 = vector.broadcast %207 : vector<1x64xf32> to vector<9x64xf32>
    %209 = arith.addf %205, %208 : vector<9x64xf32>
    %c0_109 = arith.constant 0 : index
    %c0_110 = arith.constant 0 : index
    %c0_111 = arith.constant 0 : index
    %210 = vector.load %arg21[%c0_109, %c0_110, %c0_111] : memref<2x1x64xf32, #tpu.memory_space<vmem>>, vector<1x1x64xf32>
    %211 = vector.shape_cast %210 : vector<1x1x64xf32> to vector<1x64xf32>
    %212 = vector.broadcast %211 : vector<1x64xf32> to vector<9x64xf32>
    %213 = arith.mulf %212, %209 : vector<9x64xf32>
    %214 = arith.addf %126, %213 : vector<9x64xf32>
    %c1 = arith.constant 1 : index
    %c0_112 = arith.constant 0 : index
    %c0_113 = arith.constant 0 : index
    %215 = vector.load %arg3[%c1, %c0_112, %c0_113] : memref<2x1x64xf32, #tpu.memory_space<vmem>>, vector<1x1x64xf32>
    %216 = vector.shape_cast %215 : vector<1x1x64xf32> to vector<1x64xf32>
    %c1_114 = arith.constant 1 : index
    %c0_115 = arith.constant 0 : index
    %c0_116 = arith.constant 0 : index
    %217 = vector.load %arg4[%c1_114, %c0_115, %c0_116] : memref<2x1x64xf32, #tpu.memory_space<vmem>>, vector<1x1x64xf32>
    %218 = vector.shape_cast %217 : vector<1x1x64xf32> to vector<1x64xf32>
    %cst_117 = arith.constant dense<0.000000e+00> : vector<9xf32>
    %219 = vector.multi_reduction <add>, %214, %cst_117 [1] : vector<9x64xf32> to vector<9xf32>
    %220 = vector.shape_cast %219 : vector<9xf32> to vector<9x1xf32>
    %cst_118 = arith.constant 6.400000e+01 : f32
    %221 = vector.broadcast %cst_118 : f32 to vector<9x1xf32>
    %222 = arith.divf %220, %221 : vector<9x1xf32>
    %223 = vector.broadcast %222 : vector<9x1xf32> to vector<9x64xf32>
    %224 = arith.subf %214, %223 : vector<9x64xf32>
    %225 = arith.mulf %224, %224 : vector<9x64xf32>
    %cst_119 = arith.constant dense<0.000000e+00> : vector<9xf32>
    %226 = vector.multi_reduction <add>, %225, %cst_119 [1] : vector<9x64xf32> to vector<9xf32>
    %227 = vector.shape_cast %226 : vector<9xf32> to vector<9x1xf32>
    %cst_120 = arith.constant 6.400000e+01 : f32
    %228 = vector.broadcast %cst_120 : f32 to vector<9x1xf32>
    %229 = arith.divf %227, %228 : vector<9x1xf32>
    %230 = vector.broadcast %222 : vector<9x1xf32> to vector<9x64xf32>
    %231 = arith.subf %214, %230 : vector<9x64xf32>
    %cst_121 = arith.constant 9.99999997E-7 : f32
    %232 = vector.broadcast %cst_121 : f32 to vector<9x1xf32>
    %233 = arith.addf %229, %232 : vector<9x1xf32>
    %234 = math.rsqrt %233 : vector<9x1xf32>
    %235 = vector.broadcast %234 : vector<9x1xf32> to vector<9x64xf32>
    %236 = arith.mulf %231, %235 : vector<9x64xf32>
    %237 = vector.broadcast %216 : vector<1x64xf32> to vector<9x64xf32>
    %238 = arith.mulf %236, %237 : vector<9x64xf32>
    %239 = vector.broadcast %218 : vector<1x64xf32> to vector<9x64xf32>
    %240 = arith.addf %238, %239 : vector<9x64xf32>
    %241 = arith.truncf %240 : vector<9x64xf32> to vector<9x64xbf16>
    %242 = vector.shape_cast %241 : vector<9x64xbf16> to vector<1x9x64xbf16>
    %243 = vector.shape_cast %242 : vector<1x9x64xbf16> to vector<1x9x64xbf16>
    %244 = vector.broadcast %243 : vector<1x9x64xbf16> to vector<8x9x64xbf16>
    %c1_122 = arith.constant 1 : index
    %c0_123 = arith.constant 0 : index
    %c0_124 = arith.constant 0 : index
    %c0_125 = arith.constant 0 : index
    %245 = vector.load %arg5[%c1_122, %c0_123, %c0_124, %c0_125] : memref<2x8x64x8xbf16, #tpu.memory_space<vmem>>, vector<1x8x64x8xbf16>
    %246 = vector.shape_cast %245 : vector<1x8x64x8xbf16> to vector<8x64x8xbf16>
    "tpu.trace_start"() <{level = 10 : i32, message = "hsd,hde->hse"}> : () -> ()
    %cst_126 = arith.constant dense<0.000000e+00> : vector<8x9x8xf32>
    %247 = tpu.matmul %244, %246, %cst_126 {dimension_numbers = #tpu.dot_dimension_numbers<[2], [1], [1], [2], [0, 0, 0, 1, 1, 2], [0], [0]>} : vector<8x9x64xbf16>, vector<8x64x8xbf16>, vector<8x9x8xf32> -> vector<8x9x8xf32>
    "tpu.trace_stop"() : () -> ()
    %c1_127 = arith.constant 1 : index
    %c0_128 = arith.constant 0 : index
    %c0_129 = arith.constant 0 : index
    %c0_130 = arith.constant 0 : index
    %248 = vector.load %arg6[%c1_127, %c0_128, %c0_129, %c0_130] : memref<2x8x64x8xbf16, #tpu.memory_space<vmem>>, vector<1x8x64x8xbf16>
    %249 = vector.shape_cast %248 : vector<1x8x64x8xbf16> to vector<8x64x8xbf16>
    "tpu.trace_start"() <{level = 10 : i32, message = "hsd,hde->hse"}> : () -> ()
    %cst_131 = arith.constant dense<0.000000e+00> : vector<8x9x8xf32>
    %250 = tpu.matmul %244, %249, %cst_131 {dimension_numbers = #tpu.dot_dimension_numbers<[2], [1], [1], [2], [0, 0, 0, 1, 1, 2], [0], [0]>} : vector<8x9x64xbf16>, vector<8x64x8xbf16>, vector<8x9x8xf32> -> vector<8x9x8xf32>
    "tpu.trace_stop"() : () -> ()
    %c1_132 = arith.constant 1 : index
    %c0_133 = arith.constant 0 : index
    %c0_134 = arith.constant 0 : index
    %c0_135 = arith.constant 0 : index
    %251 = vector.load %arg7[%c1_132, %c0_133, %c0_134, %c0_135] : memref<2x8x64x8xbf16, #tpu.memory_space<vmem>>, vector<1x8x64x8xbf16>
    %252 = vector.shape_cast %251 : vector<1x8x64x8xbf16> to vector<8x64x8xbf16>
    "tpu.trace_start"() <{level = 10 : i32, message = "hsd,hde->hse"}> : () -> ()
    %cst_136 = arith.constant dense<0.000000e+00> : vector<8x9x8xf32>
    %253 = tpu.matmul %244, %252, %cst_136 {dimension_numbers = #tpu.dot_dimension_numbers<[2], [1], [1], [2], [0, 0, 0, 1, 1, 2], [0], [0]>} : vector<8x9x64xbf16>, vector<8x64x8xbf16>, vector<8x9x8xf32> -> vector<8x9x8xf32>
    "tpu.trace_stop"() : () -> ()
    %c1_137 = arith.constant 1 : index
    %c0_138 = arith.constant 0 : index
    %c0_139 = arith.constant 0 : index
    %254 = vector.load %arg8[%c1_137, %c0_138, %c0_139] : memref<2x1x8xf32, #tpu.memory_space<vmem>>, vector<1x1x8xf32>
    %255 = vector.shape_cast %254 : vector<1x1x8xf32> to vector<1x8xf32>
    %c1_140 = arith.constant 1 : index
    %c0_141 = arith.constant 0 : index
    %c0_142 = arith.constant 0 : index
    %256 = vector.load %arg9[%c1_140, %c0_141, %c0_142] : memref<2x1x8xf32, #tpu.memory_space<vmem>>, vector<1x1x8xf32>
    %257 = vector.shape_cast %256 : vector<1x1x8xf32> to vector<1x8xf32>
    %cst_143 = arith.constant dense<0.000000e+00> : vector<8x9xf32>
    %258 = vector.multi_reduction <add>, %247, %cst_143 [2] : vector<8x9x8xf32> to vector<8x9xf32>
    %259 = vector.shape_cast %258 : vector<8x9xf32> to vector<8x9x1xf32>
    %cst_144 = arith.constant 8.000000e+00 : f32
    %260 = vector.broadcast %cst_144 : f32 to vector<8x9x1xf32>
    %261 = arith.divf %259, %260 : vector<8x9x1xf32>
    %262 = vector.broadcast %261 : vector<8x9x1xf32> to vector<8x9x8xf32>
    %263 = arith.subf %247, %262 : vector<8x9x8xf32>
    %264 = arith.mulf %263, %263 : vector<8x9x8xf32>
    %cst_145 = arith.constant dense<0.000000e+00> : vector<8x9xf32>
    %265 = vector.multi_reduction <add>, %264, %cst_145 [2] : vector<8x9x8xf32> to vector<8x9xf32>
    %266 = vector.shape_cast %265 : vector<8x9xf32> to vector<8x9x1xf32>
    %cst_146 = arith.constant 8.000000e+00 : f32
    %267 = vector.broadcast %cst_146 : f32 to vector<8x9x1xf32>
    %268 = arith.divf %266, %267 : vector<8x9x1xf32>
    %269 = vector.broadcast %261 : vector<8x9x1xf32> to vector<8x9x8xf32>
    %270 = arith.subf %247, %269 : vector<8x9x8xf32>
    %cst_147 = arith.constant 9.99999997E-7 : f32
    %271 = vector.broadcast %cst_147 : f32 to vector<8x9x1xf32>
    %272 = arith.addf %268, %271 : vector<8x9x1xf32>
    %273 = math.rsqrt %272 : vector<8x9x1xf32>
    %274 = vector.broadcast %273 : vector<8x9x1xf32> to vector<8x9x8xf32>
    %275 = arith.mulf %270, %274 : vector<8x9x8xf32>
    %276 = vector.shape_cast %255 : vector<1x8xf32> to vector<1x1x8xf32>
    %277 = vector.broadcast %276 : vector<1x1x8xf32> to vector<8x9x8xf32>
    %278 = arith.mulf %275, %277 : vector<8x9x8xf32>
    %279 = vector.shape_cast %257 : vector<1x8xf32> to vector<1x1x8xf32>
    %280 = vector.broadcast %279 : vector<1x1x8xf32> to vector<8x9x8xf32>
    %281 = arith.addf %278, %280 : vector<8x9x8xf32>
    %cst_148 = arith.constant 0.353553385 : f32
    %282 = vector.broadcast %cst_148 : f32 to vector<8x9x8xf32>
    %283 = arith.mulf %281, %282 : vector<8x9x8xf32>
    %c1_149 = arith.constant 1 : index
    %c0_150 = arith.constant 0 : index
    %c0_151 = arith.constant 0 : index
    %284 = vector.load %arg10[%c1_149, %c0_150, %c0_151] : memref<2x1x8xf32, #tpu.memory_space<vmem>>, vector<1x1x8xf32>
    %285 = vector.shape_cast %284 : vector<1x1x8xf32> to vector<1x8xf32>
    %c1_152 = arith.constant 1 : index
    %c0_153 = arith.constant 0 : index
    %c0_154 = arith.constant 0 : index
    %286 = vector.load %arg11[%c1_152, %c0_153, %c0_154] : memref<2x1x8xf32, #tpu.memory_space<vmem>>, vector<1x1x8xf32>
    %287 = vector.shape_cast %286 : vector<1x1x8xf32> to vector<1x8xf32>
    %cst_155 = arith.constant dense<0.000000e+00> : vector<8x9xf32>
    %288 = vector.multi_reduction <add>, %250, %cst_155 [2] : vector<8x9x8xf32> to vector<8x9xf32>
    %289 = vector.shape_cast %288 : vector<8x9xf32> to vector<8x9x1xf32>
    %cst_156 = arith.constant 8.000000e+00 : f32
    %290 = vector.broadcast %cst_156 : f32 to vector<8x9x1xf32>
    %291 = arith.divf %289, %290 : vector<8x9x1xf32>
    %292 = vector.broadcast %291 : vector<8x9x1xf32> to vector<8x9x8xf32>
    %293 = arith.subf %250, %292 : vector<8x9x8xf32>
    %294 = arith.mulf %293, %293 : vector<8x9x8xf32>
    %cst_157 = arith.constant dense<0.000000e+00> : vector<8x9xf32>
    %295 = vector.multi_reduction <add>, %294, %cst_157 [2] : vector<8x9x8xf32> to vector<8x9xf32>
    %296 = vector.shape_cast %295 : vector<8x9xf32> to vector<8x9x1xf32>
    %cst_158 = arith.constant 8.000000e+00 : f32
    %297 = vector.broadcast %cst_158 : f32 to vector<8x9x1xf32>
    %298 = arith.divf %296, %297 : vector<8x9x1xf32>
    %299 = vector.broadcast %291 : vector<8x9x1xf32> to vector<8x9x8xf32>
    %300 = arith.subf %250, %299 : vector<8x9x8xf32>
    %cst_159 = arith.constant 9.99999997E-7 : f32
    %301 = vector.broadcast %cst_159 : f32 to vector<8x9x1xf32>
    %302 = arith.addf %298, %301 : vector<8x9x1xf32>
    %303 = math.rsqrt %302 : vector<8x9x1xf32>
    %304 = vector.broadcast %303 : vector<8x9x1xf32> to vector<8x9x8xf32>
    %305 = arith.mulf %300, %304 : vector<8x9x8xf32>
    %306 = vector.shape_cast %285 : vector<1x8xf32> to vector<1x1x8xf32>
    %307 = vector.broadcast %306 : vector<1x1x8xf32> to vector<8x9x8xf32>
    %308 = arith.mulf %305, %307 : vector<8x9x8xf32>
    %309 = vector.shape_cast %287 : vector<1x8xf32> to vector<1x1x8xf32>
    %310 = vector.broadcast %309 : vector<1x1x8xf32> to vector<8x9x8xf32>
    %311 = arith.addf %308, %310 : vector<8x9x8xf32>
    "tpu.trace_start"() <{level = 10 : i32, message = "hqe,hke->hqk"}> : () -> ()
    %cst_160 = arith.constant dense<0.000000e+00> : vector<8x9x9xf32>
    %312 = tpu.matmul %283, %311, %cst_160 {dimension_numbers = #tpu.dot_dimension_numbers<[2], [2], [1], [1], [0, 0, 0, 1, 1, 1], [0], [0]>} : vector<8x9x8xf32>, vector<8x9x8xf32>, vector<8x9x9xf32> -> vector<8x9x9xf32>
    "tpu.trace_stop"() : () -> ()
    %cst_161 = arith.constant dense<0xFF800000> : vector<8x9xf32>
    %313 = vector.multi_reduction <maximumf>, %312, %cst_161 [2] : vector<8x9x9xf32> to vector<8x9xf32>
    %314 = vector.shape_cast %313 : vector<8x9xf32> to vector<8x9x1xf32>
    %315 = vector.broadcast %314 : vector<8x9x1xf32> to vector<8x9x9xf32>
    %316 = arith.subf %312, %315 : vector<8x9x9xf32>
    %317 = math.exp %316 : vector<8x9x9xf32>
    %cst_162 = arith.constant dense<0.000000e+00> : vector<8x9xf32>
    %318 = vector.multi_reduction <add>, %317, %cst_162 [2] : vector<8x9x9xf32> to vector<8x9xf32>
    %319 = vector.shape_cast %318 : vector<8x9xf32> to vector<8x9x1xf32>
    %320 = tpu.reciprocal %319 {approx = true} : vector<8x9x1xf32> -> vector<8x9x1xf32>
    %321 = vector.broadcast %320 : vector<8x9x1xf32> to vector<8x9x9xf32>
    %322 = arith.mulf %317, %321 : vector<8x9x9xf32>
    "tpu.trace_start"() <{level = 10 : i32, message = "hqk,hke->hqe"}> : () -> ()
    %cst_163 = arith.constant dense<0.000000e+00> : vector<8x9x8xf32>
    %323 = tpu.matmul %322, %253, %cst_163 {dimension_numbers = #tpu.dot_dimension_numbers<[2], [1], [1], [2], [0, 0, 0, 1, 1, 2], [0], [0]>} : vector<8x9x9xf32>, vector<8x9x8xf32>, vector<8x9x8xf32> -> vector<8x9x8xf32>
    "tpu.trace_stop"() : () -> ()
    %324 = arith.truncf %323 : vector<8x9x8xf32> to vector<8x9x8xbf16>
    %c1_164 = arith.constant 1 : index
    %c0_165 = arith.constant 0 : index
    %c0_166 = arith.constant 0 : index
    %c0_167 = arith.constant 0 : index
    %325 = vector.load %arg12[%c1_164, %c0_165, %c0_166, %c0_167] : memref<2x8x8x64xbf16, #tpu.memory_space<vmem>>, vector<1x8x8x64xbf16>
    %326 = vector.shape_cast %325 : vector<1x8x8x64xbf16> to vector<8x8x64xbf16>
    "tpu.trace_start"() <{level = 10 : i32, message = "hse,hed->hsd"}> : () -> ()
    %cst_168 = arith.constant dense<0.000000e+00> : vector<8x9x64xf32>
    %327 = tpu.matmul %324, %326, %cst_168 {dimension_numbers = #tpu.dot_dimension_numbers<[2], [1], [1], [2], [0, 0, 0, 1, 1, 2], [0], [0]>} : vector<8x9x8xbf16>, vector<8x8x64xbf16>, vector<8x9x64xf32> -> vector<8x9x64xf32>
    "tpu.trace_stop"() : () -> ()
    %cst_169 = arith.constant dense<0.000000e+00> : vector<9x64xf32>
    %328 = vector.multi_reduction <add>, %327, %cst_169 [0] : vector<8x9x64xf32> to vector<9x64xf32>
    %c1_170 = arith.constant 1 : index
    %c0_171 = arith.constant 0 : index
    %c0_172 = arith.constant 0 : index
    %329 = vector.load %arg13[%c1_170, %c0_171, %c0_172] : memref<2x1x64xf32, #tpu.memory_space<vmem>>, vector<1x1x64xf32>
    %330 = vector.shape_cast %329 : vector<1x1x64xf32> to vector<1x64xf32>
    %331 = vector.broadcast %330 : vector<1x64xf32> to vector<9x64xf32>
    %332 = arith.addf %328, %331 : vector<9x64xf32>
    %c1_173 = arith.constant 1 : index
    %c0_174 = arith.constant 0 : index
    %c0_175 = arith.constant 0 : index
    %333 = vector.load %arg14[%c1_173, %c0_174, %c0_175] : memref<2x1x64xf32, #tpu.memory_space<vmem>>, vector<1x1x64xf32>
    %334 = vector.shape_cast %333 : vector<1x1x64xf32> to vector<1x64xf32>
    %335 = vector.broadcast %334 : vector<1x64xf32> to vector<9x64xf32>
    %336 = arith.mulf %335, %332 : vector<9x64xf32>
    %337 = arith.addf %214, %336 : vector<9x64xf32>
    %c1_176 = arith.constant 1 : index
    %c0_177 = arith.constant 0 : index
    %c0_178 = arith.constant 0 : index
    %338 = vector.load %arg15[%c1_176, %c0_177, %c0_178] : memref<2x1x64xf32, #tpu.memory_space<vmem>>, vector<1x1x64xf32>
    %339 = vector.shape_cast %338 : vector<1x1x64xf32> to vector<1x64xf32>
    %c1_179 = arith.constant 1 : index
    %c0_180 = arith.constant 0 : index
    %c0_181 = arith.constant 0 : index
    %340 = vector.load %arg16[%c1_179, %c0_180, %c0_181] : memref<2x1x64xf32, #tpu.memory_space<vmem>>, vector<1x1x64xf32>
    %341 = vector.shape_cast %340 : vector<1x1x64xf32> to vector<1x64xf32>
    %cst_182 = arith.constant dense<0.000000e+00> : vector<9xf32>
    %342 = vector.multi_reduction <add>, %337, %cst_182 [1] : vector<9x64xf32> to vector<9xf32>
    %343 = vector.shape_cast %342 : vector<9xf32> to vector<9x1xf32>
    %cst_183 = arith.constant 6.400000e+01 : f32
    %344 = vector.broadcast %cst_183 : f32 to vector<9x1xf32>
    %345 = arith.divf %343, %344 : vector<9x1xf32>
    %346 = vector.broadcast %345 : vector<9x1xf32> to vector<9x64xf32>
    %347 = arith.subf %337, %346 : vector<9x64xf32>
    %348 = arith.mulf %347, %347 : vector<9x64xf32>
    %cst_184 = arith.constant dense<0.000000e+00> : vector<9xf32>
    %349 = vector.multi_reduction <add>, %348, %cst_184 [1] : vector<9x64xf32> to vector<9xf32>
    %350 = vector.shape_cast %349 : vector<9xf32> to vector<9x1xf32>
    %cst_185 = arith.constant 6.400000e+01 : f32
    %351 = vector.broadcast %cst_185 : f32 to vector<9x1xf32>
    %352 = arith.divf %350, %351 : vector<9x1xf32>
    %353 = vector.broadcast %345 : vector<9x1xf32> to vector<9x64xf32>
    %354 = arith.subf %337, %353 : vector<9x64xf32>
    %cst_186 = arith.constant 9.99999997E-7 : f32
    %355 = vector.broadcast %cst_186 : f32 to vector<9x1xf32>
    %356 = arith.addf %352, %355 : vector<9x1xf32>
    %357 = math.rsqrt %356 : vector<9x1xf32>
    %358 = vector.broadcast %357 : vector<9x1xf32> to vector<9x64xf32>
    %359 = arith.mulf %354, %358 : vector<9x64xf32>
    %360 = vector.broadcast %339 : vector<1x64xf32> to vector<9x64xf32>
    %361 = arith.mulf %359, %360 : vector<9x64xf32>
    %362 = vector.broadcast %341 : vector<1x64xf32> to vector<9x64xf32>
    %363 = arith.addf %361, %362 : vector<9x64xf32>
    %364 = arith.truncf %363 : vector<9x64xf32> to vector<9x64xbf16>
    %c1_187 = arith.constant 1 : index
    %c0_188 = arith.constant 0 : index
    %c0_189 = arith.constant 0 : index
    %365 = vector.load %arg17[%c1_187, %c0_188, %c0_189] : memref<2x64x256xbf16, #tpu.memory_space<vmem>>, vector<1x64x256xbf16>
    %366 = vector.shape_cast %365 : vector<1x64x256xbf16> to vector<64x256xbf16>
    %cst_190 = arith.constant dense<0.000000e+00> : vector<9x256xf32>
    %367 = tpu.matmul %364, %366, %cst_190 {dimension_numbers = #tpu.dot_dimension_numbers<[1], [0], [0], [1], [0, 0, 1, 1], [], []>} : vector<9x64xbf16>, vector<64x256xbf16>, vector<9x256xf32> -> vector<9x256xf32>
    %c1_191 = arith.constant 1 : index
    %c0_192 = arith.constant 0 : index
    %c0_193 = arith.constant 0 : index
    %368 = vector.load %arg18[%c1_191, %c0_192, %c0_193] : memref<2x1x256xf32, #tpu.memory_space<vmem>>, vector<1x1x256xf32>
    %369 = vector.shape_cast %368 : vector<1x1x256xf32> to vector<1x256xf32>
    %370 = vector.broadcast %369 : vector<1x256xf32> to vector<9x256xf32>
    %371 = arith.addf %367, %370 : vector<9x256xf32>
    %cst_194 = arith.constant 5.000000e-01 : f32
    %372 = vector.broadcast %cst_194 : f32 to vector<9x256xf32>
    %373 = arith.mulf %372, %371 : vector<9x256xf32>
    %cst_195 = arith.constant 0.707106769 : f32
    %374 = vector.broadcast %cst_195 : f32 to vector<9x256xf32>
    %375 = arith.mulf %371, %374 : vector<9x256xf32>
    %cst_196 = arith.constant 0.000000e+00 : f32
    %376 = vector.broadcast %cst_196 : f32 to vector<9x256xf32>
    %377 = arith.cmpf oge, %375, %376 : vector<9x256xf32>
    %cst_197 = arith.constant 1.000000e+00 : f32
    %cst_198 = arith.constant -1.000000e+00 : f32
    %378 = vector.broadcast %cst_197 : f32 to vector<9x256xf32>
    %379 = vector.broadcast %cst_198 : f32 to vector<9x256xf32>
    %380 = arith.select %377, %378, %379 : vector<9x256xi1>, vector<9x256xf32>
    %381 = math.absf %375 : vector<9x256xf32>
    %cst_199 = arith.constant 0.327591091 : f32
    %382 = vector.broadcast %cst_199 : f32 to vector<9x256xf32>
    %383 = arith.mulf %382, %381 : vector<9x256xf32>
    %cst_200 = arith.constant 1.000000e+00 : f32
    %384 = vector.broadcast %cst_200 : f32 to vector<9x256xf32>
    %385 = arith.addf %384, %383 : vector<9x256xf32>
    %cst_201 = arith.constant 1.000000e+00 : f32
    %386 = vector.broadcast %cst_201 : f32 to vector<9x256xf32>
    %387 = arith.divf %386, %385 : vector<9x256xf32>
    %cst_202 = arith.constant 1.06140542 : f32
    %388 = vector.broadcast %cst_202 : f32 to vector<9x256xf32>
    %389 = arith.mulf %388, %387 : vector<9x256xf32>
    %cst_203 = arith.constant -1.45315206 : f32
    %390 = vector.broadcast %cst_203 : f32 to vector<9x256xf32>
    %391 = arith.addf %389, %390 : vector<9x256xf32>
    %392 = arith.mulf %391, %387 : vector<9x256xf32>
    %cst_204 = arith.constant 1.42141378 : f32
    %393 = vector.broadcast %cst_204 : f32 to vector<9x256xf32>
    %394 = arith.addf %392, %393 : vector<9x256xf32>
    %395 = arith.mulf %394, %387 : vector<9x256xf32>
    %cst_205 = arith.constant -0.284496725 : f32
    %396 = vector.broadcast %cst_205 : f32 to vector<9x256xf32>
    %397 = arith.addf %395, %396 : vector<9x256xf32>
    %398 = arith.mulf %397, %387 : vector<9x256xf32>
    %cst_206 = arith.constant 0.254829586 : f32
    %399 = vector.broadcast %cst_206 : f32 to vector<9x256xf32>
    %400 = arith.addf %398, %399 : vector<9x256xf32>
    %401 = arith.mulf %400, %387 : vector<9x256xf32>
    %cst_207 = arith.constant 0.000000e+00 : f32
    %402 = vector.broadcast %cst_207 : f32 to vector<9x256xf32>
    %403 = arith.subf %402, %381 : vector<9x256xf32>
    %404 = arith.mulf %403, %381 : vector<9x256xf32>
    %405 = math.exp %404 : vector<9x256xf32>
    %406 = arith.mulf %401, %405 : vector<9x256xf32>
    %cst_208 = arith.constant 1.000000e+00 : f32
    %407 = vector.broadcast %cst_208 : f32 to vector<9x256xf32>
    %408 = arith.subf %407, %406 : vector<9x256xf32>
    %409 = arith.mulf %380, %408 : vector<9x256xf32>
    %cst_209 = arith.constant 1.000000e+00 : f32
    %410 = vector.broadcast %cst_209 : f32 to vector<9x256xf32>
    %411 = arith.addf %410, %409 : vector<9x256xf32>
    %412 = arith.mulf %373, %411 : vector<9x256xf32>
    %413 = arith.truncf %412 : vector<9x256xf32> to vector<9x256xbf16>
    %c1_210 = arith.constant 1 : index
    %c0_211 = arith.constant 0 : index
    %c0_212 = arith.constant 0 : index
    %414 = vector.load %arg19[%c1_210, %c0_211, %c0_212] : memref<2x256x64xbf16, #tpu.memory_space<vmem>>, vector<1x256x64xbf16>
    %415 = vector.shape_cast %414 : vector<1x256x64xbf16> to vector<256x64xbf16>
    %cst_213 = arith.constant dense<0.000000e+00> : vector<9x64xf32>
    %416 = tpu.matmul %413, %415, %cst_213 {dimension_numbers = #tpu.dot_dimension_numbers<[1], [0], [0], [1], [0, 0, 1, 1], [], []>} : vector<9x256xbf16>, vector<256x64xbf16>, vector<9x64xf32> -> vector<9x64xf32>
    %c1_214 = arith.constant 1 : index
    %c0_215 = arith.constant 0 : index
    %c0_216 = arith.constant 0 : index
    %417 = vector.load %arg20[%c1_214, %c0_215, %c0_216] : memref<2x1x64xf32, #tpu.memory_space<vmem>>, vector<1x1x64xf32>
    %418 = vector.shape_cast %417 : vector<1x1x64xf32> to vector<1x64xf32>
    %419 = vector.broadcast %418 : vector<1x64xf32> to vector<9x64xf32>
    %420 = arith.addf %416, %419 : vector<9x64xf32>
    %c1_217 = arith.constant 1 : index
    %c0_218 = arith.constant 0 : index
    %c0_219 = arith.constant 0 : index
    %421 = vector.load %arg21[%c1_217, %c0_218, %c0_219] : memref<2x1x64xf32, #tpu.memory_space<vmem>>, vector<1x1x64xf32>
    %422 = vector.shape_cast %421 : vector<1x1x64xf32> to vector<1x64xf32>
    %423 = vector.broadcast %422 : vector<1x64xf32> to vector<9x64xf32>
    %424 = arith.mulf %423, %420 : vector<9x64xf32>
    %425 = arith.addf %337, %424 : vector<9x64xf32>
    %cst_220 = arith.constant dense<0.000000e+00> : vector<64xf32>
    %426 = vector.multi_reduction <add>, %425, %cst_220 [0] : vector<9x64xf32> to vector<64xf32>
    %427 = vector.shape_cast %426 : vector<64xf32> to vector<1x64xf32>
    %428 = vector.extract_strided_slice %425 {offsets = [0, 0], sizes = [1, 64], strides = [1, 1]} : vector<9x64xf32> to vector<1x64xf32>
    %429 = arith.subf %427, %428 : vector<1x64xf32>
    %cst_221 = arith.constant 1.250000e-01 : f32
    %430 = vector.broadcast %cst_221 : f32 to vector<1x64xf32>
    %431 = arith.mulf %429, %430 : vector<1x64xf32>
    %c0_222 = arith.constant 0 : index
    %c0_223 = arith.constant 0 : index
    %432 = vector.load %arg22[%c0_222, %c0_223] : memref<1x64xf32, #tpu.memory_space<vmem>>, vector<1x64xf32>
    %c0_224 = arith.constant 0 : index
    %c0_225 = arith.constant 0 : index
    %433 = vector.load %arg23[%c0_224, %c0_225] : memref<1x64xf32, #tpu.memory_space<vmem>>, vector<1x64xf32>
    %cst_226 = arith.constant dense<0.000000e+00> : vector<1xf32>
    %434 = vector.multi_reduction <add>, %431, %cst_226 [1] : vector<1x64xf32> to vector<1xf32>
    %435 = vector.shape_cast %434 : vector<1xf32> to vector<1x1xf32>
    %cst_227 = arith.constant 6.400000e+01 : f32
    %436 = vector.broadcast %cst_227 : f32 to vector<1x1xf32>
    %437 = arith.divf %435, %436 : vector<1x1xf32>
    %438 = vector.broadcast %437 : vector<1x1xf32> to vector<1x64xf32>
    %439 = arith.subf %431, %438 : vector<1x64xf32>
    %440 = arith.mulf %439, %439 : vector<1x64xf32>
    %cst_228 = arith.constant dense<0.000000e+00> : vector<1xf32>
    %441 = vector.multi_reduction <add>, %440, %cst_228 [1] : vector<1x64xf32> to vector<1xf32>
    %442 = vector.shape_cast %441 : vector<1xf32> to vector<1x1xf32>
    %cst_229 = arith.constant 6.400000e+01 : f32
    %443 = vector.broadcast %cst_229 : f32 to vector<1x1xf32>
    %444 = arith.divf %442, %443 : vector<1x1xf32>
    %445 = vector.broadcast %437 : vector<1x1xf32> to vector<1x64xf32>
    %446 = arith.subf %431, %445 : vector<1x64xf32>
    %cst_230 = arith.constant 9.99999997E-7 : f32
    %447 = vector.broadcast %cst_230 : f32 to vector<1x1xf32>
    %448 = arith.addf %444, %447 : vector<1x1xf32>
    %449 = math.rsqrt %448 : vector<1x1xf32>
    %450 = vector.broadcast %449 : vector<1x1xf32> to vector<1x64xf32>
    %451 = arith.mulf %446, %450 : vector<1x64xf32>
    %452 = arith.mulf %451, %432 : vector<1x64xf32>
    %453 = arith.addf %452, %433 : vector<1x64xf32>
    %c0_231 = arith.constant 0 : index
    %c0_232 = arith.constant 0 : index
    %454 = vector.load %arg24[%c0_231, %c0_232] : memref<64x128xf32, #tpu.memory_space<vmem>>, vector<64x128xf32>
    %cst_233 = arith.constant dense<0.000000e+00> : vector<1x128xf32>
    %455 = tpu.matmul %453, %454, %cst_233 {dimension_numbers = #tpu.dot_dimension_numbers<[1], [0], [0], [1], [0, 0, 1, 1], [], []>} : vector<1x64xf32>, vector<64x128xf32>, vector<1x128xf32> -> vector<1x128xf32>
    %c0_234 = arith.constant 0 : index
    %c0_235 = arith.constant 0 : index
    %456 = vector.load %arg25[%c0_234, %c0_235] : memref<1x128xf32, #tpu.memory_space<vmem>>, vector<1x128xf32>
    %457 = arith.addf %455, %456 : vector<1x128xf32>
    %c0_236 = arith.constant 0 : index
    %c0_237 = arith.constant 0 : index
    %c0_238 = arith.constant 0 : index
    %458 = vector.load %arg26[%c0_236, %c0_237, %c0_238] : memref<1x1x128xf32, #tpu.memory_space<vmem>>, vector<1x1x128xf32>
    %459 = vector.shape_cast %458 : vector<1x1x128xf32> to vector<1x128xf32>
    %460 = vector.shape_cast %457 : vector<1x128xf32> to vector<1x1x128xf32>
    tpu.vector_store %arg26[%c0_236, %c0_237, %c0_238], %460 {strides = array<i32>} : memref<1x1x128xf32, #tpu.memory_space<vmem>>, vector<1x1x128xf32>,
    return
  }
  func.func @transform_0(%arg0: i32) -> (i32, i32, i32) {
    %c0_i32 = arith.constant 0 : i32
    %c0_i32_0 = arith.constant 0 : i32
    %c0_i32_1 = arith.constant 0 : i32
    return %arg0, %c0_i32, %c0_i32_0 : i32, i32, i32
  }
  func.func @transform_1(%arg0: i32) -> (i32, i32) {
    %c0_i32 = arith.constant 0 : i32
    %c0_i32_0 = arith.constant 0 : i32
    %c0_i32_1 = arith.constant 0 : i32
    return %c0_i32, %c0_i32_0 : i32, i32
  }
  func.func @transform_2(%arg0: i32) -> (i32, i32, i32) {
    %c0_i32 = arith.constant 0 : i32
    %c0_i32_0 = arith.constant 0 : i32
    %c0_i32_1 = arith.constant 0 : i32
    %c0_i32_2 = arith.constant 0 : i32
    return %c0_i32, %c0_i32_0, %c0_i32_1 : i32, i32, i32
  }
  func.func @transform_3(%arg0: i32) -> (i32, i32, i32) {
    %c0_i32 = arith.constant 0 : i32
    %c0_i32_0 = arith.constant 0 : i32
    %c0_i32_1 = arith.constant 0 : i32
    %c0_i32_2 = arith.constant 0 : i32
    return %c0_i32, %c0_i32_0, %c0_i32_1 : i32, i32, i32
  }
  func.func @transform_4(%arg0: i32) -> (i32, i32, i32, i32) {
    %c0_i32 = arith.constant 0 : i32
    %c0_i32_0 = arith.constant 0 : i32
    %c0_i32_1 = arith.constant 0 : i32
    %c0_i32_2 = arith.constant 0 : i32
    %c0_i32_3 = arith.constant 0 : i32
    return %c0_i32, %c0_i32_0, %c0_i32_1, %c0_i32_2 : i32, i32, i32, i32
  }
  func.func @transform_5(%arg0: i32) -> (i32, i32, i32, i32) {
    %c0_i32 = arith.constant 0 : i32
    %c0_i32_0 = arith.constant 0 : i32
    %c0_i32_1 = arith.constant 0 : i32
    %c0_i32_2 = arith.constant 0 : i32
    %c0_i32_3 = arith.constant 0 : i32
    return %c0_i32, %c0_i32_0, %c0_i32_1, %c0_i32_2 : i32, i32, i32, i32
  }
  func.func @transform_6(%arg0: i32) -> (i32, i32, i32, i32) {
    %c0_i32 = arith.constant 0 : i32
    %c0_i32_0 = arith.constant 0 : i32
    %c0_i32_1 = arith.constant 0 : i32
    %c0_i32_2 = arith.constant 0 : i32
    %c0_i32_3 = arith.constant 0 : i32
    return %c0_i32, %c0_i32_0, %c0_i32_1, %c0_i32_2 : i32, i32, i32, i32
  }
  func.func @transform_7(%arg0: i32) -> (i32, i32, i32) {
    %c0_i32 = arith.constant 0 : i32
    %c0_i32_0 = arith.constant 0 : i32
    %c0_i32_1 = arith.constant 0 : i32
    %c0_i32_2 = arith.constant 0 : i32
    return %c0_i32, %c0_i32_0, %c0_i32_1 : i32, i32, i32
  }
  func.func @transform_8(%arg0: i32) -> (i32, i32, i32) {
    %c0_i32 = arith.constant 0 : i32
    %c0_i32_0 = arith.constant 0 : i32
    %c0_i32_1 = arith.constant 0 : i32
    %c0_i32_2 = arith.constant 0 : i32
    return %c0_i32, %c0_i32_0, %c0_i32_1 : i32, i32, i32
  }
  func.func @transform_9(%arg0: i32) -> (i32, i32, i32) {
    %c0_i32 = arith.constant 0 : i32
    %c0_i32_0 = arith.constant 0 : i32
    %c0_i32_1 = arith.constant 0 : i32
    %c0_i32_2 = arith.constant 0 : i32
    return %c0_i32, %c0_i32_0, %c0_i32_1 : i32, i32, i32
  }
  func.func @transform_10(%arg0: i32) -> (i32, i32, i32) {
    %c0_i32 = arith.constant 0 : i32
    %c0_i32_0 = arith.constant 0 : i32
    %c0_i32_1 = arith.constant 0 : i32
    %c0_i32_2 = arith.constant 0 : i32
    return %c0_i32, %c0_i32_0, %c0_i32_1 : i32, i32, i32
  }
  func.func @transform_11(%arg0: i32) -> (i32, i32, i32, i32) {
    %c0_i32 = arith.constant 0 : i32
    %c0_i32_0 = arith.constant 0 : i32
    %c0_i32_1 = arith.constant 0 : i32
    %c0_i32_2 = arith.constant 0 : i32
    %c0_i32_3 = arith.constant 0 : i32
    return %c0_i32, %c0_i32_0, %c0_i32_1, %c0_i32_2 : i32, i32, i32, i32
  }
  func.func @transform_12(%arg0: i32) -> (i32, i32, i32) {
    %c0_i32 = arith.constant 0 : i32
    %c0_i32_0 = arith.constant 0 : i32
    %c0_i32_1 = arith.constant 0 : i32
    %c0_i32_2 = arith.constant 0 : i32
    return %c0_i32, %c0_i32_0, %c0_i32_1 : i32, i32, i32
  }
  func.func @transform_13(%arg0: i32) -> (i32, i32, i32) {
    %c0_i32 = arith.constant 0 : i32
    %c0_i32_0 = arith.constant 0 : i32
    %c0_i32_1 = arith.constant 0 : i32
    %c0_i32_2 = arith.constant 0 : i32
    return %c0_i32, %c0_i32_0, %c0_i32_1 : i32, i32, i32
  }
  func.func @transform_14(%arg0: i32) -> (i32, i32, i32) {
    %c0_i32 = arith.constant 0 : i32
    %c0_i32_0 = arith.constant 0 : i32
    %c0_i32_1 = arith.constant 0 : i32
    %c0_i32_2 = arith.constant 0 : i32
    return %c0_i32, %c0_i32_0, %c0_i32_1 : i32, i32, i32
  }
  func.func @transform_15(%arg0: i32) -> (i32, i32, i32) {
    %c0_i32 = arith.constant 0 : i32
    %c0_i32_0 = arith.constant 0 : i32
    %c0_i32_1 = arith.constant 0 : i32
    %c0_i32_2 = arith.constant 0 : i32
    return %c0_i32, %c0_i32_0, %c0_i32_1 : i32, i32, i32
  }
  func.func @transform_16(%arg0: i32) -> (i32, i32, i32) {
    %c0_i32 = arith.constant 0 : i32
    %c0_i32_0 = arith.constant 0 : i32
    %c0_i32_1 = arith.constant 0 : i32
    %c0_i32_2 = arith.constant 0 : i32
    return %c0_i32, %c0_i32_0, %c0_i32_1 : i32, i32, i32
  }
  func.func @transform_17(%arg0: i32) -> (i32, i32, i32) {
    %c0_i32 = arith.constant 0 : i32
    %c0_i32_0 = arith.constant 0 : i32
    %c0_i32_1 = arith.constant 0 : i32
    %c0_i32_2 = arith.constant 0 : i32
    return %c0_i32, %c0_i32_0, %c0_i32_1 : i32, i32, i32
  }
  func.func @transform_18(%arg0: i32) -> (i32, i32, i32) {
    %c0_i32 = arith.constant 0 : i32
    %c0_i32_0 = arith.constant 0 : i32
    %c0_i32_1 = arith.constant 0 : i32
    %c0_i32_2 = arith.constant 0 : i32
    return %c0_i32, %c0_i32_0, %c0_i32_1 : i32, i32, i32
  }
  func.func @transform_19(%arg0: i32) -> (i32, i32, i32) {
    %c0_i32 = arith.constant 0 : i32
    %c0_i32_0 = arith.constant 0 : i32
    %c0_i32_1 = arith.constant 0 : i32
    %c0_i32_2 = arith.constant 0 : i32
    return %c0_i32, %c0_i32_0, %c0_i32_1 : i32, i32, i32
  }
  func.func @transform_20(%arg0: i32) -> (i32, i32, i32) {
    %c0_i32 = arith.constant 0 : i32
    %c0_i32_0 = arith.constant 0 : i32
    %c0_i32_1 = arith.constant 0 : i32
    %c0_i32_2 = arith.constant 0 : i32
    return %c0_i32, %c0_i32_0, %c0_i32_1 : i32, i32, i32
  }
  func.func @transform_21(%arg0: i32) -> (i32, i32) {
    %c0_i32 = arith.constant 0 : i32
    %c0_i32_0 = arith.constant 0 : i32
    %c0_i32_1 = arith.constant 0 : i32
    return %c0_i32, %c0_i32_0 : i32, i32
  }
  func.func @transform_22(%arg0: i32) -> (i32, i32) {
    %c0_i32 = arith.constant 0 : i32
    %c0_i32_0 = arith.constant 0 : i32
    %c0_i32_1 = arith.constant 0 : i32
    return %c0_i32, %c0_i32_0 : i32, i32
  }
  func.func @transform_23(%arg0: i32) -> (i32, i32) {
    %c0_i32 = arith.constant 0 : i32
    %c0_i32_0 = arith.constant 0 : i32
    %c0_i32_1 = arith.constant 0 : i32
    return %c0_i32, %c0_i32_0 : i32, i32
  }
  func.func @transform_24(%arg0: i32) -> (i32, i32) {
    %c0_i32 = arith.constant 0 : i32
    %c0_i32_0 = arith.constant 0 : i32
    %c0_i32_1 = arith.constant 0 : i32
    return %c0_i32, %c0_i32_0 : i32, i32
  }
  func.func @transform_25(%arg0: i32) -> (i32, i32, i32) {
    %c0_i32 = arith.constant 0 : i32
    %c0_i32_0 = arith.constant 0 : i32
    %c0_i32_1 = arith.constant 0 : i32
    return %arg0, %c0_i32, %c0_i32_0 : i32, i32, i32
  }
}

</mosaic_0001>

<bundles_post_ra>
// kernel: labram_forward.2
= control target key start
LH: loop header
LB: loop body
LE: loop exit
PB: predicated region body
PF: predicated region fallthrough
CT: control target
= control target key end

     0   :  { %s4287_s21 = smov 0   ;;  %s5247_s0 = inlined_call_operand.vmem [shape: f32[2,64,15], index: 0, kind: input, shape index: {}]   ;;  %s5248_s1 = inlined_call_operand.vmem [shape: f32[64,64], index: 1, kind: input, shape index: {}]   ;;  %s5249_s2 = inlined_call_operand.vmem [shape: f32[64,64], index: 2, kind: input, shape index: {}]   ;;  %s5250_s3 = inlined_call_operand.vmem [shape: f32[8,8], index: 3, kind: input, shape index: {}]   ;;  %s5251_s4 = inlined_call_operand.vmem [shape: f32[15,8], index: 4, kind: input, shape index: {}]   ;;  %s5252_s5 = inlined_call_operand.vmem [shape: f32[1,8], index: 5, kind: input, shape index: {}]   ;;  %s5253_s6 = inlined_call_operand.vmem [shape: f32[1,8], index: 6, kind: input, shape index: {}]   ;;  %s5254_s7 = inlined_call_operand.vmem [shape: f32[1,8], index: 7, kind: input, shape index: {}]   ;;  %s5255_s8 = inlined_call_operand.vmem [shape: f32[3,8,8], index: 8, kind: input, shape index: {}]   ;;  %s5256_s9 = inlined_call_operand.vmem [shape: f32[1,8], index: 9, kind: input, shape index: {}]   ;;  %s5257_s10 = inlined_call_operand.vmem [shape: f32[1,8], index: 10, kind: input, shape index: {}]   ;;  %s5258_s11 = inlined_call_operand.vmem [shape: f32[1,8], index: 11, kind: input, shape index: {}]   ;;  %s5259_s12 = inlined_call_operand.vmem [shape: f32[3,8,8], index: 12, kind: input, shape index: {}]   ;;  %s5260_s13 = inlined_call_operand.vmem [shape: f32[1,8], index: 13, kind: input, shape index: {}]   ;;  %s5261_s14 = inlined_call_operand.vmem [shape: f32[1,8], index: 14, kind: input, shape index: {}]   ;;  %s5262_s15 = inlined_call_operand.vmem [shape: f32[1,8], index: 15, kind: input, shape index: {}]   ;;  %s5263_s16 = inlined_call_operand.vmem [shape: f32[2,64,8], index: 16, kind: output, shape index: {}]  }
   0x1   :  { %5271 = sst [smem:[#allocation4_spill]] %s5247_s0 }
   0x2 LB: > { %s3470_s22 = sadd.s32 4294967295, %s4196_s21   ;;  %p3474_p0 = scmp.ge.s32.totalorder %s4196_s21, 1  ;;  %s4196_s21 = sphi %s4287_s21, %s26_s21  }
   0x3   : > { %p462_p1 = scmp.lt.s32.totalorder %s4196_s21, 3 }
   0x5   : > { %p463_p2 = pnand %p3474_p0, %p462_p1 }
   0x7   : > { %466 = sbr.rel (%p463_p2) target bundleno = 2135 (0x857), region = 84 }
   0xe   : > { %v531_v0 = vld [vmem:[%s5251_s4] sm:$0xff]  ;;  %v532_v1 = vld [vmem:[%s5251_s4 + $0x8] sm:$0x7f]  ;;  %vm565_vm0 = vcmask 1046528   ;;  %p512_p3 = scmp.lt.s32.totalorder %s3470_s22, 1  ;;  %vm4198_vm1 = vmmov 1  }
   0xf   : > { %v3973_v2 = vpack.c.bf16 %v532_v1, %v531_v0  ;;  %vm3974_vm2 = vmpackc.low %vm565_vm0, %vm4198_vm1  ;;  %vm540_vm3 = vcmask 121856   ;;  %s5272_s30 = sld [smem:[#allocation4_spill]]  ;;  %v4320_v11 = vld [vmem:[%s5250_s3] sm:$0xff]  ;;  %v5264_v12 = vmov 0.0   ;;  %vm4200_vm4 = vmmov 0  }
  0x10   : > { %s5280_s22 = smov (!%p512_p3, %s3470_s22), 1  ;;  %3747 = vmatprep.subr.mxu1 %v5264_v12  ;;  %3749 = vmatprep.mubr.msk.f32.mxu1 %vm4200_vm4, %v5264_v12  ;;  %v3479_v13 = vld [vmem:[%s5252_s5] ss:$0 sm:$0xff]  ;;  %vm676_vm5 = vcmask 64512   ;;  %vm1156_vm6 = vcmask 523264  }
  0x11   : > { %3975 = vmatprep.subr.msk.bf16.mxu0 %vm3974_vm2, %v3973_v2  ;;  %s3589_s27 = sshll.u32 %s5280_s22, 6  ;;  %3748 = vmatpush3.msra.mxu1 %v4320_v11 }
  0x12   : > { %3978 = vmatpush3.bf16.msk.msra.mxu0 %vm3974_vm2, %v3973_v2  ;;  %3752 = vmatprep.subr.mxu1 %v5264_v12  ;;  %s5211_s28 = scalar_lea.vmem %s5263_s16, %s3589_s27 }
  0x15   : > { %s516_s0 = scalar_lea.vmem %s5272_s30, %s3589_s27 }
  0x16   : > { %v523_v3 = vld [vmem:[%s516_s0] sm:$0xff]  ;;  %v524_v4 = vld [vmem:[%s516_s0 + $0x8] sm:$0xff]  ;;  %v525_v5 = vld [vmem:[%s516_s0 + $0x10] sm:$0xff] }
  0x17   : > { %3735 = vmatprep.mubr.msk.f32.mxu0 %vm540_vm3, %v523_v3  ;;  %v526_v6 = vld [vmem:[%s516_s0 + $0x18] sm:$0xff]  ;;  %v527_v7 = vld [vmem:[%s516_s0 + $0x20] sm:$0xff]  ;;  %v528_v8 = vld [vmem:[%s516_s0 + $0x28] sm:$0xff] }
  0x18   : > { %3736 = vmatmul.mubr.msk.f32.vlgmr.msra.gmra.mrb[0].mxu0 %vm540_vm3, %v524_v4  ;;  %v529_v9 = vld [vmem:[%s516_s0 + $0x30] sm:$0xff]  ;;  %v530_v10 = vld [vmem:[%s516_s0 + $0x38] sm:$0xff] }
  0x19   : > { %3738 = vmatprep.mubr.msk.f32.mxu0 %vm540_vm3, %v525_v5 }
  0x1c   : > { %3739 = vmatmul.mubr.msk.f32.gmra.mrb[2].mxu0 %vm540_vm3, %v526_v6 }
  0x1d   : > { %3741 = vmatprep.mubr.msk.f32.mxu0 %vm540_vm3, %v527_v7 }
  0x20   : > { %3742 = vmatmul.mubr.msk.f32.gmra.mrb[4].mxu0 %vm540_vm3, %v528_v8 }
  0x21   : > { %3744 = vmatprep.mubr.msk.f32.mxu0 %vm540_vm3, %v529_v9 }
  0x24   : > { %3745 = vmatmul.mubr.msk.f32.gmra.mrb[6].mxu0 %vm540_vm3, %v530_v10 }
  0xeb   : > { %v3737_v14 = vpop.f32.mrb[0].mxu0 }
  0xec   : > { %v4330_v15 = vadd.f32 %v3737_v14, %v3479_v13  ;;  %v635_v16 = vpop.f32.mrb[1].mxu0 }
  0xed   : > { %v4332_v17 = vadd.f32 %v3479_v13, %v635_v16 }
  0xee   : > { %v774_v18 = vmul.f32 %v4330_v15, %v4330_v15  ;;  %v678_v19 = vsel %vm676_vm5, %v4330_v15, 0.0 }
  0xef   : > { %v677_v20 = vsel %vm676_vm5, %v4332_v17, 0.0  ;;  %v773_v21 = vmul.f32 %v4332_v17, %v4332_v17  ;;  %v3740_v22 = vpop.f32.mrb[2].mxu0 }
  0xf0   : > { %v4342_v23 = vadd.f32 %v3740_v22, %v3479_v13  ;;  %v645_v24 = vpop.f32.mrb[3].mxu0  ;;  %v782_v25 = vsel %vm676_vm5, %v774_v18, 0.0  ;;  %v679_v28 = vadd.f32 %v678_v19, %v677_v20  ;;  %v3509_v22 = vld [vmem:[%s5255_s8 + $0x8] sm:$0xff] }
  0xf1   : > { %v781_v26 = vsel %vm676_vm5, %v773_v21, 0.0  ;;  %v4346_v27 = vadd.f32 %v3479_v13, %v645_v24  ;;  %3813 = vmatprep.subr.mxu0 %v3509_v22  ;;  %v4397_v24 = vld [vmem:[%s5248_s1] sm:$0xff] }
  0xf2   : > { %v776_v29 = vmul.f32 %v4342_v23, %v4342_v23  ;;  %v783_v33 = vadd.f32 %v782_v25, %v781_v26  ;;  %v682_v37 = vsel %vm676_vm5, %v4342_v23, 0.0  ;;  %3814 = vmatpush3.msra.mxu0 %v3509_v22  ;;  %v4404_v26 = vld [vmem:[%s5255_s8] sm:$0xff] }
  0xf3   : > { %v680_v30 = vsel %vm676_vm5, %v4346_v27, 0.0  ;;  %v775_v31 = vmul.f32 %v4346_v27, %v4346_v27  ;;  %v3743_v32 = vpop.f32.mrb[4].mxu0  ;;  %3827 = vmatprep.subr.mxu0 %v4404_v26 }
  0xf4   : > { %v681_v34 = vadd.f32 %v680_v30, %v679_v28  ;;  %v4354_v35 = vadd.f32 %v3743_v32, %v3479_v13  ;;  %v655_v36 = vpop.f32.mrb[5].mxu0  ;;  %v786_v42 = vsel %vm676_vm5, %v776_v29, 0.0  ;;  %v878_v30 = vlaneseq }
  0xf5   : > { %v784_v38 = vsel %vm676_vm5, %v775_v31, 0.0  ;;  %v4359_v39 = vadd.f32 %v3479_v13, %v655_v36 }
  0xf6   : > { %v785_v40 = vadd.f32 %v784_v38, %v783_v33  ;;  %v683_v41 = vadd.f32 %v682_v37, %v681_v34  ;;  %v778_v43 = vmul.f32 %v4354_v35, %v4354_v35  ;;  %v686_v51 = vsel %vm676_vm5, %v4354_v35, 0.0 }
  0xf7   : > { %v684_v44 = vsel %vm676_vm5, %v4359_v39, 0.0  ;;  %v777_v45 = vmul.f32 %v4359_v39, %v4359_v39  ;;  %v3746_v46 = vpop.f32.mrb[6].mxu0  ;;  %v879_v34 = vshrl.u32 %v878_v30, 7 }
  0xf8   : > { %v685_v47 = vadd.f32 %v684_v44, %v683_v41  ;;  %v787_v48 = vadd.f32 %v786_v42, %v785_v40  ;;  %v4368_v49 = vadd.f32 %v3746_v46, %v3479_v13  ;;  %v665_v50 = vpop.f32.mrb[7].mxu0  ;;  %v790_v56 = vsel %vm676_vm5, %v778_v43, 0.0  ;;  %v3491_v46 = vld [vmem:[%s5253_s6] ss:$0 sm:$0xff] }
  0xf9   : > { %v788_v52 = vsel %vm676_vm5, %v777_v45, 0.0  ;;  %v4373_v53 = vadd.f32 %v3479_v13, %v665_v50  ;;  %v4407_v37 = vsub.s32 0, %v879_v34 }
  0xfa   : > { %v789_v54 = vadd.f32 %v788_v52, %v787_v48  ;;  %v687_v55 = vadd.f32 %v686_v51, %v685_v47  ;;  %v780_v57 = vmul.f32 %v4368_v49, %v4368_v49  ;;  %v690_v62 = vsel %vm676_vm5, %v4368_v49, 0.0 }
  0xfb   : > { %v688_v58 = vsel %vm676_vm5, %v4373_v53, 0.0  ;;  %v779_v59 = vmul.f32 %v4373_v53, %v4373_v53  ;;  %5273 = vst [vmem:[#allocation2_spill] sm:$0xff] %v4407_v37 }
  0xfc   : > { %v689_v60 = vadd.f32 %v688_v58, %v687_v55  ;;  %v791_v61 = vadd.f32 %v790_v56, %v789_v54  ;;  %v794_v2 = vsel %vm676_vm5, %v780_v57, 0.0 }
  0xfd   : > { %v792_v63 = vsel %vm676_vm5, %v779_v59, 0.0 }
  0xfe   : > { %v691_v0 = vadd.f32 %v690_v62, %v689_v60  ;;  %v793_v1 = vadd.f32 %v792_v63, %v791_v61 }
 0x100   : > { %v692_v3 = vrot.slane %v691_v0, 4  ;;  %v795_v4 = vadd.f32 %v794_v2, %v793_v1 }
 0x102   : > { %v693_v5 = vadd.f32 %v692_v3, %v691_v0  ;;  %v796_v6 = vrot.slane %v795_v4, 4 }
 0x104   : > { %v797_v7 = vadd.f32 %v796_v6, %v795_v4  ;;  %v694_v8 = vrot.slane %v693_v5, 2 }
 0x106   : > { %v798_v9 = vrot.slane %v797_v7, 2  ;;  %v695_v10 = vadd.f32 %v694_v8, %v693_v5 }
 0x108   : > { %v799_v13 = vadd.f32 %v798_v9, %v797_v7  ;;  %v696_v14 = vrot.slane %v695_v10, 1 }
 0x10a   : > { %v697_v16 = vadd.f32 %v696_v14, %v695_v10  ;;  %v800_v18 = vrot.slane %v799_v13, 1 }
 0x10c   : > { %v699_v19 = vmul.f32 0.015625, %v697_v16  ;;  %v801_v20 = vadd.f32 %v800_v18, %v799_v13 }
 0x10e   : > { %3750 = vmatmul.mubr.msk.f32.vlgmr.msra.gmra.mrb[0].mxu1 %vm676_vm5, %v699_v19  ;;  %v802_v21 = vmul.f32 0.015625, %v801_v20 }
 0x10f   : > { %3753 = vmatpush3.msra.mxu1 %v4320_v11  ;;  %3754 = vmatprep.mubr.msk.f32.mxu1 %vm4200_vm4, %v5264_v12 }
 0x112   : > { %3755 = vmatmul.mubr.msk.f32.vlgmr.msra.gmra.mrb[2].mxu1 %vm676_vm5, %v802_v21 }
 0x113   : > { %3773 = vmatprep.mubr.msk.f32.mxu1 %vm1156_vm6, %v4397_v24 }
 0x1e1   : > { %v769_v25 = vpop.f32.mrb[0].mxu1 }
 0x1e2   : > { %v3751_v28 = vpop.f32.mrb[1].mxu1  ;;  %v876_v29 = vmul.f32 %v769_v25, %v769_v25  ;;  %v881_v38 = vrot.slane %v769_v25, %v4407_v37 }
 0x1e4   : > { %v882_v41 = vsub.f32 %v4332_v17, %v881_v38  ;;  %v883_v43 = vsub.f32 %v4330_v15, %v881_v38  ;;  %v884_v44 = vsub.f32 %v4346_v27, %v881_v38  ;;  %v885_v45 = vsub.f32 %v4342_v23, %v881_v38  ;;  %v3492_v23 = vld [vmem:[%s5254_s7] ss:$0 sm:$0xff] }
 0x1e5   : > { %v872_v31 = vpop.f32.mrb[2].mxu1  ;;  %v886_v47 = vsub.f32 %v4359_v39, %v881_v38  ;;  %v887_v48 = vsub.f32 %v4354_v35, %v881_v38  ;;  %v888_v50 = vsub.f32 %v4373_v53, %v881_v38  ;;  %v889_v17 = vsub.f32 %v4368_v49, %v881_v38 }
 0x1e6   : > { %v877_v32 = vsub.f32 %v872_v31, %v876_v29  ;;  %v3756_v33 = vpop.f32.mrb[3].mxu1 }
 0x1e8   : > { %v890_v36 = vadd.f32 1e-05, %v877_v32 }
 0x1ea   : > { %4087 = vrsqrt.f32 %v890_v36 }
 0x1f4   : > { %v4088_v40 = vpop.eup %4087 }
 0x1f5   : > { %v895_v42 = vrot.slane %v4088_v40, %v4407_v37 }
 0x1f7   : > { %v896_v51 = vmul.f32 %v895_v42, %v882_v41  ;;  %v897_v52 = vmul.f32 %v895_v42, %v883_v43  ;;  %v898_v54 = vmul.f32 %v895_v42, %v884_v44  ;;  %v899_v15 = vmul.f32 %v895_v42, %v885_v45 }
 0x1f8   : > { %v900_v27 = vmul.f32 %v895_v42, %v886_v47  ;;  %v901_v55 = vmul.f32 %v895_v42, %v887_v48  ;;  %v902_v56 = vmul.f32 %v895_v42, %v888_v50  ;;  %v903_v57 = vmul.f32 %v895_v42, %v889_v17 }
 0x1f9   : > { %v910_v58 = vmul.f32 %v3491_v46, %v896_v51  ;;  %v911_v39 = vmul.f32 %v3491_v46, %v897_v52  ;;  %v912_v59 = vmul.f32 %v3491_v46, %v898_v54  ;;  %v913_v35 = vmul.f32 %v3491_v46, %v899_v15 }
 0x1fa   : > { %v914_v3 = vmul.f32 %v3491_v46, %v900_v27  ;;  %v915_v4 = vmul.f32 %v3491_v46, %v901_v55  ;;  %v916_v10 = vmul.f32 %v3491_v46, %v902_v56  ;;  %v917_v13 = vmul.f32 %v3491_v46, %v903_v57 }
 0x1fb   : > { %v924_v60 = vadd.f32 %v3492_v23, %v910_v58  ;;  %v925_v53 = vadd.f32 %v3492_v23, %v911_v39  ;;  %v926_v61 = vadd.f32 %v3492_v23, %v912_v59  ;;  %v927_v49 = vadd.f32 %v3492_v23, %v913_v35 }
 0x1fc   : > { %v4427_v18 = vadd.f32 %v3492_v23, %v914_v3  ;;  %v4429_v19 = vadd.f32 %v3492_v23, %v915_v4  ;;  %v4438_v30 = vadd.f32 %v3492_v23, %v916_v10  ;;  %v4440_v31 = vadd.f32 %v3492_v23, %v917_v13 }
 0x1fd   : > { %v940_v62 = vmul.f32 0.70710677, %v924_v60  ;;  %v941_v63 = vmul.f32 0.70710677, %v925_v53  ;;  %v942_v0 = vmul.f32 0.70710677, %v926_v61 }
 0x1fe   : > { %v4425_v6 = vmul.f32 0.70710677, %v927_v49  ;;  %v4433_v28 = vmul.f32 0.70710677, %v4427_v18  ;;  %v4436_v29 = vmul.f32 0.70710677, %v4429_v19 }
 0x1ff   : > { %v964_v1 = vand.u32 2147483647, %v940_v62  ;;  %v965_v2 = vand.u32 2147483647, %v941_v63  ;;  %v966_v5 = vand.u32 2147483647, %v942_v0 }
 0x200   : > { %v967_v20 = vand.u32 2147483647, %v4425_v6  ;;  %v4442_v32 = vmul.f32 0.5, %v924_v60  ;;  %vm948_vm7 = vcmp.ge.f32.partialorder %v940_v62, 0.0  ;;  %v4444_v33 = vmul.f32 0.5, %v925_v53 }
 0x201   : > { %v972_v7 = vmul.f32 0.3275911, %v964_v1  ;;  %v973_v8 = vmul.f32 0.3275911, %v965_v2  ;;  %v974_v9 = vmul.f32 0.3275911, %v966_v5 }
 0x202   : > { %v1076_v21 = vsub.f32 0.0, %v964_v1  ;;  %v975_v25 = vmul.f32 0.3275911, %v967_v20  ;;  %v1077_v38 = vsub.f32 0.0, %v965_v2  ;;  %v968_v40 = vand.u32 2147483647, %v4433_v28 }
 0x203   : > { %v980_v14 = vadd.f32 1.0, %v972_v7  ;;  %v981_v16 = vadd.f32 1.0, %v973_v8  ;;  %v982_v22 = vadd.f32 1.0, %v974_v9  ;;  %vm949_vm8 = vcmp.ge.f32.partialorder %v941_v63, 0.0 }
 0x204   : > { %v983_v34 = vadd.f32 1.0, %v975_v25  ;;  %v1084_v36 = vmul.f32 %v1076_v21, %v964_v1  ;;  %v4447_v41 = vmul.f32 0.5, %v926_v61  ;;  %v1078_v42 = vsub.f32 0.0, %v966_v5 }
 0x205   : > { %4089 = vrcp.f32 %v980_v14  ;;  %v4449_v43 = vmul.f32 0.5, %v927_v49  ;;  %vm950_vm9 = vcmp.ge.f32.partialorder %v942_v0, 0.0  ;;  %v976_v44 = vmul.f32 0.3275911, %v968_v40 }
 0x206   : > { %4091 = vrcp.f32 %v981_v16  ;;  %v969_v45 = vand.u32 2147483647, %v4436_v29  ;;  %v5266_v46 = vmov -1.0   ;;  %v1079_v48 = vsub.f32 0.0, %v967_v20 }
 0x207   : > { %4093 = vrcp.f32 %v982_v22  ;;  %v4454_v47 = vsel %vm948_vm7, 1.0, %v5266_v46  ;;  %v4457_v50 = vmul.f32 0.70710677, %v4438_v30  ;;  %v4460_v17 = vmul.f32 0.70710677, %v4440_v31 }
 0x208   : > { %4095 = vrcp.f32 %v983_v34  ;;  %v1092_v51 = vmul.f32 1.442695, %v1084_v36  ;;  %v1085_v52 = vmul.f32 %v1077_v38, %v965_v2  ;;  %v984_v54 = vadd.f32 1.0, %v976_v44 }
 0x209   : > { %v977_v15 = vmul.f32 0.3275911, %v969_v45  ;;  %v4464_v23 = vsel %vm949_vm8, 1.0, %v5266_v46  ;;  %v4467_v27 = vsel %vm950_vm9, 1.0, %v5266_v46  ;;  %v1086_v55 = vmul.f32 %v1078_v42, %v966_v5 }
 0x20a   : > { %v970_v56 = vand.u32 2147483647, %v4457_v50  ;;  %4097 = vrcp.f32 %v984_v54  ;;  %v1080_v58 = vsub.f32 0.0, %v968_v40  ;;  %v971_v59 = vand.u32 2147483647, %v4460_v17 }
 0x20b   : > { %v985_v39 = vadd.f32 1.0, %v977_v15  ;;  %vm951_vm10 = vcmp.ge.f32.partialorder %v4425_v6, 0.0  ;;  %v1087_v53 = vmul.f32 %v1079_v48, %v967_v20  ;;  %4099 = vpow2.f32 %v1092_v51 }
 0x20c   : > { %v978_v61 = vmul.f32 0.3275911, %v970_v56  ;;  %v1094_v62 = vmul.f32 1.442695, %v1085_v52  ;;  %v1081_v63 = vsub.f32 0.0, %v969_v45  ;;  %v1088_v5 = vmul.f32 %v1080_v58, %v968_v40 }
 0x20d   : > { %v1096_v1 = vmul.f32 1.442695, %v1086_v55  ;;  %4101 = vrcp.f32 %v985_v39  ;;  %v1082_v7 = vsub.f32 0.0, %v970_v56  ;;  %v979_v8 = vmul.f32 0.3275911, %v971_v59 }
 0x20e   : > { %v986_v2 = vadd.f32 1.0, %v978_v61  ;;  %v1098_v13 = vmul.f32 1.442695, %v1087_v53  ;;  %v1089_v20 = vmul.f32 %v1081_v63, %v969_v45  ;;  %v1083_v22 = vsub.f32 0.0, %v971_v59 }
 0x20f   : > { %v4470_v57 = vpop.eup %4089  ;;  %v987_v21 = vadd.f32 1.0, %v979_v8  ;;  %v1100_v40 = vmul.f32 1.442695, %v1088_v5  ;;  %v1090_v42 = vmul.f32 %v1082_v7, %v970_v56  ;;  %v4496_v61 = vsel %vm951_vm10, 1.0, %v5266_v46 }
 0x210   : > { %v4473_v35 = vpop.eup %4091  ;;  %v1004_v60 = vmul.f32 1.0614054, %v4470_v57  ;;  %4103 = vrcp.f32 %v986_v2  ;;  %v1102_v54 = vmul.f32 1.442695, %v1089_v20  ;;  %v1091_v15 = vmul.f32 %v1083_v22, %v971_v59 }
 0x211   : > { %v1005_v49 = vmul.f32 1.0614054, %v4473_v35  ;;  %v4478_v3 = vpop.eup %4093  ;;  %4105 = vpow2.f32 %v1094_v62  ;;  %vm952_vm11 = vcmp.ge.f32.partialorder %v4433_v28, 0.0  ;;  %vm953_vm12 = vcmp.ge.f32.partialorder %v4436_v29, 0.0 }
 0x212   : > { %v1012_v0 = vadd.f32 -1.4531521, %v1004_v60  ;;  %v1006_v10 = vmul.f32 1.0614054, %v4478_v3  ;;  %v4482_v14 = vpop.eup %4095  ;;  %4107 = vrcp.f32 %v987_v21  ;;  %v1106_v5 = vmul.f32 1.442695, %v1091_v15 }
 0x213   : > { %v1013_v4 = vadd.f32 -1.4531521, %v1005_v49  ;;  %v1007_v36 = vmul.f32 1.0614054, %v4482_v14  ;;  %4109 = vpow2.f32 %v1096_v1  ;;  %v1104_v49 = vmul.f32 1.442695, %v1090_v42 }
 0x214   : > { %v1020_v9 = vmul.f32 %v4470_v57, %v1012_v0  ;;  %v1014_v34 = vadd.f32 -1.4531521, %v1006_v10  ;;  %v4488_v52 = vpop.eup %4097  ;;  %4111 = vpow2.f32 %v1098_v13  ;;  %v960_v28 = vsel %vm952_vm11, 1.0, %v5266_v46 }
 0x215   : > { %v1021_v16 = vmul.f32 %v4473_v35, %v1013_v4  ;;  %v1015_v51 = vadd.f32 -1.4531521, %v1007_v36  ;;  %v1008_v56 = vmul.f32 1.0614054, %v4488_v52  ;;  %v4100_v60 = vpop.eup %4099  ;;  %4113 = vpow2.f32 %v1100_v40 }
 0x216   : > { %v1028_v25 = vadd.f32 1.4214138, %v1020_v9  ;;  %v1022_v48 = vmul.f32 %v4478_v3, %v1014_v34  ;;  %4115 = vpow2.f32 %v1102_v54  ;;  %vm954_vm13 = vcmp.ge.f32.partialorder %v4457_v50, 0.0 }
 0x217   : > { %v1029_v38 = vadd.f32 1.4214138, %v1021_v16  ;;  %v1023_v39 = vmul.f32 %v4482_v14, %v1015_v51  ;;  %v4498_v62 = vpop.eup %4101  ;;  %v1016_v1 = vadd.f32 -1.4531521, %v1008_v56  ;;  %4117 = vpow2.f32 %v1104_v49 }
 0x218   : > { %v1036_v44 = vmul.f32 %v4470_v57, %v1028_v25  ;;  %v1030_v58 = vadd.f32 1.4214138, %v1022_v48  ;;  %v1009_v4 = vmul.f32 1.0614054, %v4498_v62  ;;  %4119 = vpow2.f32 %v1106_v5 }
 0x219   : > { %v1037_v45 = vmul.f32 %v4473_v35, %v1029_v38  ;;  %v1031_v0 = vadd.f32 1.4214138, %v1023_v39  ;;  %v1024_v10 = vmul.f32 %v4488_v52, %v1016_v1  ;;  %v937_v50 = vmul.f32 0.5, %v4429_v19 }
 0x21a   : > { %v1044_v55 = vadd.f32 -0.28449672, %v1036_v44  ;;  %v1038_v59 = vmul.f32 %v4478_v3, %v1030_v58  ;;  %v4504_v7 = vpop.eup %4103  ;;  %v1017_v16 = vadd.f32 -1.4531521, %v1009_v4  ;;  %vm955_vm14 = vcmp.ge.f32.partialorder %v4460_v17, 0.0 }
 0x21b   : > { %v1045_v53 = vadd.f32 -0.28449672, %v1037_v45  ;;  %v1039_v9 = vmul.f32 %v4482_v14, %v1031_v0  ;;  %v1010_v20 = vmul.f32 1.0614054, %v4504_v7  ;;  %v4106_v21 = vpop.eup %4105  ;;  %v1032_v36 = vadd.f32 1.4214138, %v1024_v10 }
 0x21c   : > { %v1052_v63 = vmul.f32 %v4470_v57, %v1044_v55  ;;  %v1046_v8 = vadd.f32 -0.28449672, %v1038_v59  ;;  %v4511_v38 = vpop.eup %4107  ;;  %v1025_v42 = vmul.f32 %v4498_v62, %v1017_v16  ;;  %v939_v17 = vmul.f32 0.5, %v4440_v31  ;;  %v4587_v31 = vld [vmem:[%s5248_s1 + $0x18] sm:$0xff] }
 0x21d   : > { %v1053_v2 = vmul.f32 %v4473_v35, %v1045_v53  ;;  %v1047_v34 = vadd.f32 -0.28449672, %v1039_v9  ;;  %v1018_v44 = vadd.f32 -1.4531521, %v1010_v20  ;;  %v4110_v48 = vpop.eup %4109  ;;  %v1040_v15 = vmul.f32 %v4488_v52, %v1032_v36 }
 0x21e   : > { %v1060_v6 = vadd.f32 0.2548296, %v1052_v63  ;;  %v1054_v25 = vmul.f32 %v4478_v3, %v1046_v8  ;;  %v1033_v58 = vadd.f32 1.4214138, %v1025_v42  ;;  %v1011_v56 = vmul.f32 1.0614054, %v4511_v38 }
 0x21f   : > { %v1061_v13 = vadd.f32 0.2548296, %v1053_v2  ;;  %v1055_v54 = vmul.f32 %v4482_v14, %v1047_v34  ;;  %v1026_v39 = vmul.f32 %v4504_v7, %v1018_v44  ;;  %v1048_v63 = vadd.f32 -0.28449672, %v1040_v15 }
 0x220   : > { %v1068_v22 = vmul.f32 %v4470_v57, %v1060_v6  ;;  %v1062_v45 = vadd.f32 0.2548296, %v1054_v25  ;;  %v4112_v57 = vpop.eup %4111  ;;  %v1019_v2 = vadd.f32 -1.4531521, %v1011_v56 }
 0x221   : > { %v1069_v40 = vmul.f32 %v4473_v35, %v1061_v13  ;;  %v1063_v49 = vadd.f32 0.2548296, %v1055_v54  ;;  %v4114_v59 = vpop.eup %4113  ;;  %v1034_v1 = vadd.f32 1.4214138, %v1026_v39  ;;  %v1056_v8 = vmul.f32 %v4488_v52, %v1048_v63 }
 0x222   : > { %v1108_v51 = vmul.f32 %v4100_v60, %v1068_v22  ;;  %v1070_v35 = vmul.f32 %v4478_v3, %v1062_v45  ;;  %v1041_v60 = vmul.f32 %v4498_v62, %v1033_v58  ;;  %v4116_v9 = vpop.eup %4115  ;;  %v1027_v16 = vmul.f32 %v4511_v38, %v1019_v2 }
 0x223   : > { %v1109_v55 = vmul.f32 %v4106_v21, %v1069_v40  ;;  %v1071_v6 = vmul.f32 %v4482_v14, %v1063_v49  ;;  %v1042_v3 = vmul.f32 %v4504_v7, %v1034_v1  ;;  %v1064_v25 = vadd.f32 0.2548296, %v1056_v8  ;;  %v4118_v34 = vpop.eup %4117 }
 0x224   : > { %v1116_v53 = vsub.f32 1.0, %v1108_v51  ;;  %v1110_v5 = vmul.f32 %v4110_v48, %v1070_v35  ;;  %v1049_v13 = vadd.f32 -0.28449672, %v1041_v60  ;;  %v1035_v14 = vadd.f32 1.4214138, %v1027_v16  ;;  %v4120_v51 = vpop.eup %4119 }
 0x225   : > { %v1117_v0 = vsub.f32 1.0, %v1109_v55  ;;  %v1111_v22 = vmul.f32 %v4112_v57, %v1071_v6  ;;  %v1050_v40 = vadd.f32 -0.28449672, %v1042_v3  ;;  %v1072_v48 = vmul.f32 %v4488_v52, %v1064_v25 }
 0x226   : > { %v1124_v4 = vmul.f32 %v1116_v53, %v4454_v47  ;;  %v1118_v21 = vsub.f32 1.0, %v1110_v5  ;;  %v1057_v47 = vmul.f32 %v4498_v62, %v1049_v13  ;;  %v1043_v57 = vmul.f32 %v4511_v38, %v1035_v14  ;;  %v4606_v14 = vld [vmem:[%s5248_s1 + $0x30] sm:$0xff] }
 0x227   : > { %v1125_v10 = vmul.f32 %v1117_v0, %v4464_v23  ;;  %v1119_v23 = vsub.f32 1.0, %v1111_v22  ;;  %v1058_v15 = vmul.f32 %v4504_v7, %v1050_v40  ;;  %v936_v1 = vmul.f32 0.5, %v4427_v18  ;;  %v4601_v40 = vld [vmem:[%s5248_s1 + $0x28] sm:$0xff] }
 0x228   : > { %v1132_v20 = vadd.f32 1.0, %v1124_v4  ;;  %v1126_v44 = vmul.f32 %v1118_v21, %v4467_v27  ;;  %v1065_v54 = vadd.f32 0.2548296, %v1057_v47  ;;  %v1051_v39 = vadd.f32 -0.28449672, %v1043_v57  ;;  %v4592_v47 = vld [vmem:[%s5248_s1 + $0x20] sm:$0xff] }
 0x229   : > { %v1133_v36 = vadd.f32 1.0, %v1125_v10  ;;  %v1127_v58 = vmul.f32 %v1119_v23, %v4496_v61  ;;  %v961_v2 = vsel %vm953_vm12, 1.0, %v5266_v46  ;;  %v962_v8 = vsel %vm954_vm13, 1.0, %v5266_v46  ;;  %v4629_v23 = vld [vmem:[%s5249_s2 + $0x8] sm:$0xff]  ;;  %v3526_v57 = vld [vmem:[%s5255_s8 + $0x10] sm:$0xff] }
 0x22a   : > { %v1140_v42 = vmul.f32 %v1132_v20, %v4442_v32  ;;  %v1134_v55 = vadd.f32 1.0, %v1126_v44  ;;  %v1112_v32 = vmul.f32 %v4114_v59, %v1072_v48  ;;  %v1073_v52 = vmul.f32 %v4498_v62, %v1065_v54  ;;  %v4620_v44 = vld [vmem:[%s5249_s2] sm:$0xff]  ;;  %v4634_v48 = vld [vmem:[%s5249_s2 + $0x10] sm:$0xff]  ;;  %v4660_v54 = vld [vmem:[%s5249_s2 + $0x28] sm:$0xff] }
 0x22b   : > { %v1141_v45 = vmul.f32 %v1133_v36, %v4444_v33  ;;  %v1066_v33 = vadd.f32 0.2548296, %v1058_v15  ;;  %v1135_v53 = vadd.f32 1.0, %v1127_v58  ;;  %v1059_v63 = vmul.f32 %v4511_v38, %v1051_v39  ;;  %v4577_v36 = vld [vmem:[%s5248_s1 + $0x10] sm:$0xff]  ;;  %v4674_v15 = vld [vmem:[%s5249_s2 + $0x38] sm:$0xff] }
 0x22c   : > { %3815 = vmatprep.mubr.msk.f32.mxu0 %vm676_vm5, %v1140_v42  ;;  %v1142_v56 = vmul.f32 %v1134_v55, %v4447_v41  ;;  %v1120_v35 = vsub.f32 1.0, %v1112_v32  ;;  %v1113_v61 = vmul.f32 %v4116_v9, %v1073_v52  ;;  %v938_v13 = vmul.f32 0.5, %v4438_v30  ;;  %v4571_v30 = vld [vmem:[%s5248_s1 + $0x8] sm:$0xff]  ;;  %5274 = vst [vmem:[#allocation3_spill] sm:$0xff] %v4674_v15 }
 0x22d   : > { %3816 = vmatmul.mubr.msk.f32.vlgmr.msra.gmra.mrb[8].mxu0 %vm676_vm5, %v1141_v45  ;;  %v4538_v27 = vpack.c.bf16 %v1141_v45, %v1140_v42  ;;  %v1074_v49 = vmul.f32 %v4504_v7, %v1066_v33  ;;  %v1143_v41 = vmul.f32 %v1135_v53, %v4449_v43  ;;  %v1067_v0 = vadd.f32 0.2548296, %v1059_v63  ;;  %v4615_v42 = vld [vmem:[%s5248_s1 + $0x38] sm:$0xff]  ;;  %v4650_v45 = vld [vmem:[%s5249_s2 + $0x20] sm:$0xff] }
 0x22e   : > { %3828 = vmatpush3.msra.mxu0 %v4404_v26  ;;  %3818 = vmatprep.mubr.msk.f32.mxu0 %vm676_vm5, %v1142_v56  ;;  %v1128_v62 = vmul.f32 %v1120_v35, %v960_v28  ;;  %v1121_v59 = vsub.f32 1.0, %v1113_v61 }
 0x22f   : > { %3980 = vmatprep.subr.bf16.mxu1 %v4538_v27  ;;  %v1114_v26 = vmul.f32 %v4118_v34, %v1074_v49  ;;  %v3983_v60 = vpack.c.bf16 %v1143_v41, %v1142_v56  ;;  %v1075_v43 = vmul.f32 %v4511_v38, %v1067_v0  ;;  %v963_v38 = vsel %vm955_vm14, 1.0, %v5266_v46  ;;  %3841 = vmatprep.subr.mxu0 %v3526_v57 }
 0x230   : > { %3982 = vmatpush3.bf16.msra.mxu1 %v4538_v27  ;;  %v1136_v7 = vadd.f32 1.0, %v1128_v62  ;;  %v1129_v4 = vmul.f32 %v1121_v59, %v961_v2  ;;  %v3535_v59 = vld [vmem:[%s5256_s9] ss:$0 sm:$0xff] }
 0x231   : > { %3819 = vmatmul.mubr.msk.f32.gmra.mrb[10].mxu0 %vm676_vm5, %v1143_v41  ;;  %v1122_v5 = vsub.f32 1.0, %v1114_v26  ;;  %3984 = vmatprep.subr.bf16.mxu1 %v3983_v60  ;;  %v1115_v18 = vmul.f32 %v4120_v51, %v1075_v43  ;;  %v4644_v51 = vld [vmem:[%s5249_s2 + $0x18] sm:$0xff] }
 0x232   : > { %v1144_v6 = vmul.f32 %v1136_v7, %v936_v1  ;;  %v1137_v9 = vadd.f32 1.0, %v1129_v4 }
 0x233   : > { %v1130_v10 = vmul.f32 %v1122_v5, %v962_v8  ;;  %v1123_v16 = vsub.f32 1.0, %v1115_v18 }
 0x234   : > { %3986 = vmatpush3.bf16.msra.mxu1 %v3983_v60  ;;  %3821 = vmatprep.mubr.msk.f32.mxu0 %vm676_vm5, %v1144_v6  ;;  %v1145_v29 = vmul.f32 %v1137_v9, %v937_v50 }
 0x235   : > { %v1138_v3 = vadd.f32 1.0, %v1130_v10  ;;  %v1131_v21 = vmul.f32 %v1123_v16, %v963_v38 }
 0x236   : > { %v3987_v20 = vpack.c.bf16 %v1145_v29, %v1144_v6  ;;  %3822 = vmatmul.mubr.msk.f32.gmra.mrb[12].mxu0 %vm676_vm5, %v1145_v29 }
 0x237   : > { %v1146_v19 = vmul.f32 %v1138_v3, %v938_v13  ;;  %v1139_v22 = vadd.f32 1.0, %v1131_v21 }
 0x238   : > { %3988 = vmatprep.subr.bf16.mxu1 %v3987_v20 }
 0x239   : > { %3824 = vmatprep.mubr.msk.f32.mxu0 %vm676_vm5, %v1146_v19  ;;  %3990 = vmatpush3.bf16.msra.mxu1 %v3987_v20  ;;  %v1147_v25 = vmul.f32 %v1139_v22, %v939_v17 }
 0x23b   : > { %v3991_v34 = vpack.c.bf16 %v1147_v25, %v1146_v19  ;;  %3825 = vmatmul.mubr.msk.f32.gmra.mrb[14].mxu0 %vm676_vm5, %v1147_v25 }
 0x23d   : > { %3992 = vmatprep.subr.bf16.mxu1 %v3991_v34 }
 0x23e   : > { %3994 = vmatpush3.bf16.msra.mxu1 %v3991_v34 }
 0x23f   : > { %3996 = vmatprep.subr.bf16.mxu1 %v4538_v27 }
 0x241   : > { %3774 = vmatmul.mubr.msk.f32.vlgmr.msra.gmra.mrb[4].mxu1 %vm1156_vm6, %v4571_v30 }
 0x242   : > { %3998 = vmatpush3.bf16.msra.mxu1 %v4538_v27  ;;  %3776 = vmatprep.mubr.msk.f32.mxu1 %vm1156_vm6, %v4577_v36 }
 0x243   : > { %4000 = vmatprep.subr.bf16.mxu1 %v3983_v60 }
 0x245   : > { %3777 = vmatmul.mubr.msk.f32.gmra.mrb[6].mxu1 %vm1156_vm6, %v4587_v31 }
 0x246   : > { %4002 = vmatpush3.bf16.msra.mxu1 %v3983_v60  ;;  %3779 = vmatprep.mubr.msk.f32.mxu1 %vm1156_vm6, %v4592_v47 }
 0x247   : > { %4004 = vmatprep.subr.bf16.mxu1 %v3987_v20 }
 0x249   : > { %3780 = vmatmul.mubr.msk.f32.gmra.mrb[8].mxu1 %vm1156_vm6, %v4601_v40 }
 0x24a   : > { %4006 = vmatpush3.bf16.msra.mxu1 %v3987_v20  ;;  %3782 = vmatprep.mubr.msk.f32.mxu1 %vm1156_vm6, %v4606_v14 }
 0x24b   : > { %4008 = vmatprep.subr.bf16.mxu1 %v3991_v34 }
 0x24d   : > { %3783 = vmatmul.mubr.msk.f32.gmra.mrb[10].mxu1 %vm1156_vm6, %v4615_v42 }
 0x24e   : > { %4010 = vmatpush3.bf16.msra.mxu1 %v3991_v34  ;;  %3801 = vmatprep.mubr.msk.f32.mxu1 %vm1156_vm6, %v4620_v44 }
 0x24f   : > { %3855 = vmatprep.subr.mxu1 %v5264_v12 }
 0x251   : > { %3802 = vmatmul.mubr.msk.f32.vlgmr.msra.gmra.mrb[12].mxu1 %vm1156_vm6, %v4629_v23 }
 0x252   : > { %3804 = vmatprep.mubr.msk.f32.mxu1 %vm1156_vm6, %v4634_v48  ;;  %3856 = vmatpush3.msra.mxu1 %v4320_v11  ;;  %v4665_v11 = vld [vmem:[%s5249_s2 + $0x30] sm:$0xff] }
 0x253   : > { %3860 = vmatprep.subr.mxu1 %v5264_v12 }
 0x255   : > { %3805 = vmatmul.mubr.msk.f32.gmra.mrb[14].mxu1 %vm1156_vm6, %v4644_v51 }
 0x256   : > { %3807 = vmatprep.mubr.msk.f32.mxu1 %vm1156_vm6, %v4650_v45 }
 0x259   : > { %3808 = vmatmul.mubr.msk.f32.gmra.mrb[16].mxu1 %vm1156_vm6, %v4660_v54 }
 0x25a   : > { %3810 = vmatprep.mubr.msk.f32.mxu1 %vm1156_vm6, %v4665_v11 }
 0x25d   : > { %3811 = vmatmul.mubr.msk.f32.gmra.mrb[18].mxu1 %vm1156_vm6, %v4674_v15 }
 0x25e   : > { %3857 = vmatprep.mubr.msk.f32.mxu1 %vm4200_vm4, %v5264_v12 }
 0x314   : > { %v3775_v55 = vpop.f32.mrb[4].mxu1 }
 0x315   : > { %v1247_v58 = vpop.f32.mrb[5].mxu1 }
 0x316   : > { %3829 = vmatprep.mubr.msk.f32.mxu0 %vm676_vm5, %v1247_v58 }
 0x317   : > { %3830 = vmatmul.mubr.msk.f32.vlgmr.msra.gmra.mrb[8].mxu0 %vm676_vm5, %v3775_v55 }
 0x318   : > { %v3778_v32 = vpop.f32.mrb[6].mxu1  ;;  %3842 = vmatpush3.msra.mxu0 %v3526_v57 }
 0x319   : > { %v1257_v27 = vpop.f32.mrb[7].mxu1 }
 0x31a   : > { %3832 = vmatprep.mubr.msk.f32.mxu0 %vm676_vm5, %v1257_v27 }
 0x31b   : > { %3833 = vmatmul.mubr.msk.f32.gmra.mrb[10].mxu0 %vm676_vm5, %v3778_v32 }
 0x31c   : > { %v3781_v52 = vpop.f32.mrb[8].mxu1 }
 0x31d   : > { %v1267_v33 = vpop.f32.mrb[9].mxu1 }
 0x31e   : > { %3835 = vmatprep.mubr.msk.f32.mxu0 %vm676_vm5, %v1267_v33 }
 0x31f   : > { %3836 = vmatmul.mubr.msk.f32.gmra.mrb[12].mxu0 %vm676_vm5, %v3781_v52 }
 0x320   : > { %v3784_v39 = vpop.f32.mrb[10].mxu1 }
 0x321   : > { %v1277_v56 = vpop.f32.mrb[11].mxu1 }
 0x322   : > { %3838 = vmatprep.mubr.msk.f32.mxu0 %vm676_vm5, %v1277_v56 }
 0x323   : > { %3839 = vmatmul.mubr.msk.f32.gmra.mrb[14].mxu0 %vm676_vm5, %v3784_v39 }
 0x324   : > { %v3803_v53 = vpop.f32.mrb[12].mxu1 }
 0x325   : > { %v1384_v35 = vpop.f32.mrb[13].mxu1 }
 0x326   : > { %3843 = vmatprep.mubr.msk.f32.mxu0 %vm676_vm5, %v1384_v35 }
 0x327   : > { %3844 = vmatmul.mubr.msk.f32.vlgmr.msra.gmra.mrb[8].mxu0 %vm676_vm5, %v3803_v53 }
 0x328   : > { %v3806_v28 = vpop.f32.mrb[14].mxu1 }
 0x329   : > { %v1394_v61 = vpop.f32.mrb[15].mxu1 }
 0x32a   : > { %3846 = vmatprep.mubr.msk.f32.mxu0 %vm676_vm5, %v1394_v61 }
 0x32b   : > { %3847 = vmatmul.mubr.msk.f32.gmra.mrb[10].mxu0 %vm676_vm5, %v3806_v28 }
 0x32c   : > { %v3809_v49 = vpop.f32.mrb[16].mxu1 }
 0x32d   : > { %v1404_v63 = vpop.f32.mrb[17].mxu1 }
 0x32e   : > { %3849 = vmatprep.mubr.msk.f32.mxu0 %vm676_vm5, %v1404_v63 }
 0x32f   : > { %3850 = vmatmul.mubr.msk.f32.gmra.mrb[12].mxu0 %vm676_vm5, %v3809_v49 }
 0x330   : > { %v3812_v41 = vpop.f32.mrb[18].mxu1 }
 0x331   : > { %v1414_v62 = vpop.f32.mrb[19].mxu1 }
 0x332   : > { %3852 = vmatprep.mubr.msk.f32.mxu0 %vm676_vm5, %v1414_v62 }
 0x333   : > { %3853 = vmatmul.mubr.msk.f32.gmra.mrb[14].mxu0 %vm676_vm5, %v3812_v41 }
 0x3fa   : > { %v3845_v26 = vpop.f32.mrb[8].mxu0 }
 0x3fb   : > { %v4702_v0 = vadd.f32 %v3845_v26, %v3535_v59  ;;  %v1776_v60 = vpop.f32.mrb[9].mxu0 }
 0x3fc   : > { %v4704_v1 = vadd.f32 %v3535_v59, %v1776_v60 }
 0x3fd   : > { %v1936_v7 = vmul.f32 %v4702_v0, %v4702_v0  ;;  %v1841_v2 = vsel %vm676_vm5, %v4702_v0, 0.0 }
 0x3fe   : > { %v1840_v4 = vsel %vm676_vm5, %v4704_v1, 0.0  ;;  %v1935_v5 = vmul.f32 %v4704_v1, %v4704_v1  ;;  %v3848_v43 = vpop.f32.mrb[10].mxu0 }
 0x3ff   : > { %v4714_v6 = vadd.f32 %v3848_v43, %v3535_v59  ;;  %v1786_v50 = vpop.f32.mrb[11].mxu0  ;;  %v1944_v8 = vsel %vm676_vm5, %v1936_v7, 0.0  ;;  %v1842_v18 = vadd.f32 %v1841_v2, %v1840_v4 }
 0x400   : > { %v1943_v9 = vsel %vm676_vm5, %v1935_v5, 0.0  ;;  %v4718_v10 = vadd.f32 %v3535_v59, %v1786_v50 }
 0x401   : > { %v1938_v29 = vmul.f32 %v4714_v6, %v4714_v6  ;;  %v1945_v38 = vadd.f32 %v1944_v8, %v1943_v9  ;;  %v1845_v17 = vsel %vm676_vm5, %v4714_v6, 0.0 }
 0x402   : > { %v1843_v13 = vsel %vm676_vm5, %v4718_v10, 0.0  ;;  %v1937_v3 = vmul.f32 %v4718_v10, %v4718_v10  ;;  %v3851_v16 = vpop.f32.mrb[12].mxu0 }
 0x403   : > { %v1844_v20 = vadd.f32 %v1843_v13, %v1842_v18  ;;  %v4726_v19 = vadd.f32 %v3851_v16, %v3535_v59  ;;  %v1796_v21 = vpop.f32.mrb[13].mxu0  ;;  %v1948_v55 = vsel %vm676_vm5, %v1938_v29, 0.0 }
 0x404   : > { %v1946_v22 = vsel %vm676_vm5, %v1937_v3, 0.0  ;;  %v4731_v25 = vadd.f32 %v3535_v59, %v1796_v21 }
 0x405   : > { %v1947_v34 = vadd.f32 %v1946_v22, %v1945_v38  ;;  %v1846_v57 = vadd.f32 %v1845_v17, %v1844_v20  ;;  %v1940_v58 = vmul.f32 %v4726_v19, %v4726_v19  ;;  %v1849_v35 = vsel %vm676_vm5, %v4726_v19, 0.0 }
 0x406   : > { %v1847_v32 = vsel %vm676_vm5, %v4731_v25, 0.0  ;;  %v1939_v27 = vmul.f32 %v4731_v25, %v4731_v25  ;;  %v3854_v52 = vpop.f32.mrb[14].mxu0 }
 0x407   : > { %v1848_v33 = vadd.f32 %v1847_v32, %v1846_v57  ;;  %v1949_v39 = vadd.f32 %v1948_v55, %v1947_v34  ;;  %v4740_v56 = vadd.f32 %v3854_v52, %v3535_v59  ;;  %v1806_v53 = vpop.f32.mrb[15].mxu0  ;;  %v1952_v41 = vsel %vm676_vm5, %v1940_v58, 0.0  ;;  %v4762_v55 = vld [vmem:[%s5250_s3] sm:$0xff]  ;;  %v3556_v32 = vld [vmem:[%s5259_s12 + $0x8] sm:$0xff] }
 0x408   : > { %v1950_v28 = vsel %vm676_vm5, %v1939_v27, 0.0  ;;  %v4745_v61 = vadd.f32 %v3535_v59, %v1806_v53  ;;  %3921 = vmatprep.subr.mxu0 %v3556_v32  ;;  %v4776_v52 = vld [vmem:[%s5259_s12] sm:$0xff] }
 0x409   : > { %v1951_v49 = vadd.f32 %v1950_v28, %v1949_v39  ;;  %v1850_v63 = vadd.f32 %v1849_v35, %v1848_v33  ;;  %v1942_v62 = vmul.f32 %v4740_v56, %v4740_v56  ;;  %v1853_v4 = vsel %vm676_vm5, %v4740_v56, 0.0  ;;  %3922 = vmatpush3.msra.mxu0 %v3556_v32 }
 0x40a   : > { %v1851_v26 = vsel %vm676_vm5, %v4745_v61, 0.0  ;;  %v1941_v60 = vmul.f32 %v4745_v61, %v4745_v61  ;;  %3935 = vmatprep.subr.mxu0 %v4776_v52 }
 0x40b   : > { %v1852_v7 = vadd.f32 %v1851_v26, %v1850_v63  ;;  %v1953_v2 = vadd.f32 %v1952_v41, %v1951_v49  ;;  %v1956_v50 = vsel %vm676_vm5, %v1942_v62, 0.0 }
 0x40c   : > { %v1954_v59 = vsel %vm676_vm5, %v1941_v60, 0.0 }
 0x40d   : > { %v1854_v5 = vadd.f32 %v1853_v4, %v1852_v7  ;;  %v1955_v43 = vadd.f32 %v1954_v59, %v1953_v2  ;;  %v3538_v2 = vld [vmem:[%s5257_s10] ss:$0 sm:$0xff] }
 0x40f   : > { %v1855_v8 = vrot.slane %v1854_v5, 4  ;;  %v1957_v9 = vadd.f32 %v1956_v50, %v1955_v43 }
 0x411   : > { %v1856_v18 = vadd.f32 %v1855_v8, %v1854_v5  ;;  %v1958_v29 = vrot.slane %v1957_v9, 4 }
 0x413   : > { %v1857_v13 = vrot.slane %v1856_v18, 2  ;;  %v1959_v3 = vadd.f32 %v1958_v29, %v1957_v9 }
 0x415   : > { %v1858_v16 = vadd.f32 %v1857_v13, %v1856_v18  ;;  %v1960_v38 = vrot.slane %v1959_v3, 2 }
 0x417   : > { %v1859_v20 = vrot.slane %v1858_v16, 1  ;;  %v1961_v21 = vadd.f32 %v1960_v38, %v1959_v3 }
 0x419   : > { %v1860_v17 = vadd.f32 %v1859_v20, %v1858_v16  ;;  %v1962_v22 = vrot.slane %v1961_v21, 1 }
 0x41b   : > { %v1861_v34 = vmul.f32 0.015625, %v1860_v17  ;;  %v1963_v57 = vadd.f32 %v1962_v22, %v1961_v21 }
 0x41d   : > { %3858 = vmatmul.mubr.msk.f32.vlgmr.msra.gmra.mrb[20].mxu1 %vm676_vm5, %v1861_v34  ;;  %v1964_v58 = vmul.f32 0.015625, %v1963_v57 }
 0x41e   : > { %3861 = vmatpush3.msra.mxu1 %v4762_v55  ;;  %3862 = vmatprep.mubr.msk.f32.mxu1 %vm4200_vm4, %v5264_v12 }
 0x421   : > { %3863 = vmatmul.mubr.msk.f32.vlgmr.msra.gmra.mrb[22].mxu1 %vm676_vm5, %v1964_v58 }
 0x422   : > { %3881 = vmatprep.mubr.msk.f32.mxu1 %vm1156_vm6, %v4397_v24 }
 0x4f0   : > { %v1931_v27 = vpop.f32.mrb[20].mxu1 }
 0x4f1   : > { %v3859_v33 = vpop.f32.mrb[21].mxu1  ;;  %v2038_v39 = vmul.f32 %v1931_v27, %v1931_v27  ;;  %v2043_v49 = vrot.slane %v1931_v27, %v4407_v37 }
 0x4f3   : > { %v2044_v41 = vsub.f32 %v4704_v1, %v2043_v49  ;;  %v2045_v26 = vsub.f32 %v4702_v0, %v2043_v49  ;;  %v2046_v60 = vsub.f32 %v4718_v10, %v2043_v49  ;;  %v2047_v7 = vsub.f32 %v4714_v6, %v2043_v49  ;;  %v3539_v6 = vld [vmem:[%s5258_s11] ss:$0 sm:$0xff] }
 0x4f4   : > { %v2034_v53 = vpop.f32.mrb[22].mxu1  ;;  %v2048_v4 = vsub.f32 %v4731_v25, %v2043_v49  ;;  %v2049_v59 = vsub.f32 %v4726_v19, %v2043_v49  ;;  %v2050_v5 = vsub.f32 %v4745_v61, %v2043_v49  ;;  %v2051_v1 = vsub.f32 %v4740_v56, %v2043_v49 }
 0x4f5   : > { %v2039_v35 = vsub.f32 %v2034_v53, %v2038_v39  ;;  %v3864_v28 = vpop.f32.mrb[23].mxu1 }
 0x4f7   : > { %v2052_v24 = vadd.f32 1e-05, %v2039_v35 }
 0x4f9   : > { %4121 = vrsqrt.f32 %v2052_v24 }
 0x503   : > { %v4122_v63 = vpop.eup %4121 }
 0x504   : > { %v2057_v62 = vrot.slane %v4122_v63, %v4407_v37 }
 0x506   : > { %v2058_v43 = vmul.f32 %v2057_v62, %v2044_v41  ;;  %v2059_v50 = vmul.f32 %v2057_v62, %v2045_v26  ;;  %v2060_v8 = vmul.f32 %v2057_v62, %v2046_v60  ;;  %v2061_v0 = vmul.f32 %v2057_v62, %v2047_v7 }
 0x507   : > { %v2062_v10 = vmul.f32 %v2057_v62, %v2048_v4  ;;  %v2063_v9 = vmul.f32 %v2057_v62, %v2049_v59  ;;  %v2064_v18 = vmul.f32 %v2057_v62, %v2050_v5  ;;  %v2065_v29 = vmul.f32 %v2057_v62, %v2051_v1 }
 0x508   : > { %v2072_v13 = vmul.f32 %v3538_v2, %v2058_v43  ;;  %v2073_v25 = vmul.f32 %v3538_v2, %v2059_v50  ;;  %v2074_v3 = vmul.f32 %v3538_v2, %v2060_v8  ;;  %v2075_v19 = vmul.f32 %v3538_v2, %v2061_v0 }
 0x509   : > { %v2076_v57 = vmul.f32 %v3538_v2, %v2062_v10  ;;  %v2077_v58 = vmul.f32 %v3538_v2, %v2063_v9  ;;  %v2078_v35 = vmul.f32 %v3538_v2, %v2064_v18  ;;  %v2079_v28 = vmul.f32 %v3538_v2, %v2065_v29 }
 0x50a   : > { %v2086_v16 = vadd.f32 %v3539_v6, %v2072_v13  ;;  %v2087_v61 = vadd.f32 %v3539_v6, %v2073_v25  ;;  %v2088_v38 = vadd.f32 %v3539_v6, %v2074_v3  ;;  %v2089_v56 = vadd.f32 %v3539_v6, %v2075_v19 }
 0x50b   : > { %v4797_v63 = vadd.f32 %v3539_v6, %v2076_v57  ;;  %v4799_v41 = vadd.f32 %v3539_v6, %v2077_v58  ;;  %v4808_v2 = vadd.f32 %v3539_v6, %v2078_v35  ;;  %v4810_v5 = vadd.f32 %v3539_v6, %v2079_v28 }
 0x50c   : > { %v2102_v20 = vmul.f32 0.70710677, %v2086_v16  ;;  %v2103_v21 = vmul.f32 0.70710677, %v2087_v61  ;;  %v2104_v17 = vmul.f32 0.70710677, %v2088_v38 }
 0x50d   : > { %v4795_v27 = vmul.f32 0.70710677, %v2089_v56  ;;  %v4803_v4 = vmul.f32 0.70710677, %v4797_v63  ;;  %v4806_v59 = vmul.f32 0.70710677, %v4799_v41 }
 0x50e   : > { %v2126_v22 = vand.u32 2147483647, %v2102_v20  ;;  %v2127_v34 = vand.u32 2147483647, %v2103_v21  ;;  %v2128_v32 = vand.u32 2147483647, %v2104_v17 }
 0x50f   : > { %v2129_v62 = vand.u32 2147483647, %v4795_v27  ;;  %v4812_v1 = vmul.f32 0.5, %v2086_v16  ;;  %vm2110_vm15 = vcmp.ge.f32.partialorder %v2102_v20, 0.0  ;;  %v4814_v43 = vmul.f32 0.5, %v2087_v61 }
 0x510   : > { %v2134_v33 = vmul.f32 0.3275911, %v2126_v22  ;;  %v2135_v39 = vmul.f32 0.3275911, %v2127_v34  ;;  %v2136_v53 = vmul.f32 0.3275911, %v2128_v32 }
 0x511   : > { %v2238_v26 = vsub.f32 0.0, %v2126_v22  ;;  %v2137_v7 = vmul.f32 0.3275911, %v2129_v62  ;;  %v2239_v0 = vsub.f32 0.0, %v2127_v34  ;;  %v2130_v10 = vand.u32 2147483647, %v4803_v4 }
 0x512   : > { %v2142_v24 = vadd.f32 1.0, %v2134_v33  ;;  %v2143_v49 = vadd.f32 1.0, %v2135_v39  ;;  %v2144_v60 = vadd.f32 1.0, %v2136_v53  ;;  %vm2111_vm0 = vcmp.ge.f32.partialorder %v2103_v21, 0.0 }
 0x513   : > { %v2145_v50 = vadd.f32 1.0, %v2137_v7  ;;  %v2246_v8 = vmul.f32 %v2238_v26, %v2126_v22  ;;  %v4817_v9 = vmul.f32 0.5, %v2088_v38  ;;  %v2240_v18 = vsub.f32 0.0, %v2128_v32 }
 0x514   : > { %4123 = vrcp.f32 %v2142_v24  ;;  %v4819_v29 = vmul.f32 0.5, %v2089_v56  ;;  %vm2112_vm1 = vcmp.ge.f32.partialorder %v2104_v17, 0.0  ;;  %v2138_v6 = vmul.f32 0.3275911, %v2130_v10 }
 0x515   : > { %4125 = vrcp.f32 %v2143_v49  ;;  %v2131_v13 = vand.u32 2147483647, %v4806_v59  ;;  %v4823_v25 = vsel %vm2110_vm15, 1.0, %v5266_v46  ;;  %v2241_v3 = vsub.f32 0.0, %v2129_v62 }
 0x516   : > { %4127 = vrcp.f32 %v2144_v60  ;;  %v4826_v19 = vmul.f32 0.70710677, %v4808_v2  ;;  %v4829_v16 = vmul.f32 0.70710677, %v4810_v5  ;;  %v2254_v61 = vmul.f32 1.442695, %v2246_v8 }
 0x517   : > { %4129 = vrcp.f32 %v2145_v50  ;;  %v2247_v38 = vmul.f32 %v2239_v0, %v2127_v34  ;;  %v2146_v20 = vadd.f32 1.0, %v2138_v6  ;;  %v2139_v56 = vmul.f32 0.3275911, %v2131_v13 }
 0x518   : > { %v4833_v17 = vsel %vm2111_vm0, 1.0, %v5266_v46  ;;  %v4836_v22 = vsel %vm2112_vm1, 1.0, %v5266_v46  ;;  %v2248_v57 = vmul.f32 %v2240_v18, %v2128_v32  ;;  %v2132_v58 = vand.u32 2147483647, %v4826_v19 }
 0x519   : > { %4131 = vrcp.f32 %v2146_v20  ;;  %v2242_v39 = vsub.f32 0.0, %v2130_v10  ;;  %v2147_v53 = vadd.f32 1.0, %v2139_v56  ;;  %v2133_v35 = vand.u32 2147483647, %v4829_v16 }
 0x51a   : > { %vm2113_vm2 = vcmp.ge.f32.partialorder %v4795_v27, 0.0  ;;  %v2249_v21 = vmul.f32 %v2241_v3, %v2129_v62  ;;  %v2140_v24 = vmul.f32 0.3275911, %v2132_v58  ;;  %4133 = vpow2.f32 %v2254_v61 }
 0x51b   : > { %v2256_v49 = vmul.f32 1.442695, %v2247_v38  ;;  %v2243_v26 = vsub.f32 0.0, %v2131_v13  ;;  %v2258_v7 = vmul.f32 1.442695, %v2248_v57  ;;  %4135 = vrcp.f32 %v2147_v53 }
 0x51c   : > { %v2148_v50 = vadd.f32 1.0, %v2140_v24  ;;  %v2250_v18 = vmul.f32 %v2242_v39, %v2130_v10  ;;  %v2244_v6 = vsub.f32 0.0, %v2132_v58  ;;  %v2141_v20 = vmul.f32 0.3275911, %v2133_v35 }
 0x51d   : > { %v2260_v3 = vmul.f32 1.442695, %v2249_v21  ;;  %v2245_v53 = vsub.f32 0.0, %v2133_v35  ;;  %vm2114_vm3 = vcmp.ge.f32.partialorder %v4803_v4, 0.0  ;;  %vm2115_vm7 = vcmp.ge.f32.partialorder %v4806_v59, 0.0 }
 0x51e   : > { %v4839_v33 = vpop.eup %4123  ;;  %4137 = vrcp.f32 %v2148_v50  ;;  %v2149_v57 = vadd.f32 1.0, %v2141_v20  ;;  %v2252_v46 = vmul.f32 %v2244_v6, %v2132_v58  ;;  %vm2116_vm8 = vcmp.ge.f32.partialorder %v4826_v19, 0.0 }
 0x51f   : > { %v4842_v34 = vpop.eup %4125  ;;  %v2166_v28 = vmul.f32 1.0614054, %v4839_v33  ;;  %4139 = vpow2.f32 %v2256_v49  ;;  %v2253_v49 = vmul.f32 %v2245_v53, %v2133_v35  ;;  %v2099_v19 = vmul.f32 0.5, %v4799_v41 }
 0x520   : > { %v2167_v32 = vmul.f32 1.0614054, %v4842_v34  ;;  %v4847_v8 = vpop.eup %4127  ;;  %4141 = vrcp.f32 %v2149_v57  ;;  %vm2117_vm9 = vcmp.ge.f32.partialorder %v4829_v16, 0.0  ;;  %v2101_v16 = vmul.f32 0.5, %v4810_v5 }
 0x521   : > { %v2174_v60 = vadd.f32 -1.4531521, %v2166_v28  ;;  %v2168_v62 = vmul.f32 1.0614054, %v4847_v8  ;;  %v4851_v61 = vpop.eup %4129  ;;  %v2251_v28 = vmul.f32 %v2243_v26, %v2131_v13  ;;  %4143 = vpow2.f32 %v2258_v7 }
 0x522   : > { %v2175_v0 = vadd.f32 -1.4531521, %v2167_v32  ;;  %v2169_v10 = vmul.f32 1.0614054, %v4851_v61  ;;  %v2262_v32 = vmul.f32 1.442695, %v2250_v18  ;;  %4145 = vpow2.f32 %v2260_v3 }
 0x523   : > { %v2182_v56 = vmul.f32 %v4839_v33, %v2174_v60  ;;  %v2176_v12 = vadd.f32 -1.4531521, %v2168_v62  ;;  %v4857_v37 = vpop.eup %4131  ;;  %v2264_v26 = vmul.f32 1.442695, %v2251_v28  ;;  %v5275_v62 = vmov -1.0  }
 0x524   : > { %v2183_v38 = vmul.f32 %v4842_v34, %v2175_v0  ;;  %v2177_v50 = vadd.f32 -1.4531521, %v2169_v10  ;;  %v2170_v58 = vmul.f32 1.0614054, %v4857_v37  ;;  %v4134_v18 = vpop.eup %4133  ;;  %4147 = vpow2.f32 %v2262_v32 }
 0x525   : > { %v2190_v24 = vadd.f32 1.4214138, %v2182_v56  ;;  %v2184_v21 = vmul.f32 %v4847_v8, %v2176_v12  ;;  %v4865_v12 = vsel %vm2113_vm2, 1.0, %v5275_v62  ;;  %v2266_v7 = vmul.f32 1.442695, %v2252_v46 }
 0x526   : > { %v2191_v39 = vadd.f32 1.4214138, %v2183_v38  ;;  %v2185_v56 = vmul.f32 %v4851_v61, %v2177_v50  ;;  %v4867_v38 = vpop.eup %4135  ;;  %v2178_v57 = vadd.f32 -1.4531521, %v2170_v58  ;;  %4149 = vpow2.f32 %v2264_v26 }
 0x527   : > { %v2198_v60 = vmul.f32 %v4839_v33, %v2190_v24  ;;  %v2192_v20 = vadd.f32 1.4214138, %v2184_v21  ;;  %v2171_v24 = vmul.f32 1.0614054, %v4867_v38  ;;  %v2268_v10 = vmul.f32 1.442695, %v2253_v49 }
 0x528   : > { %v2199_v13 = vmul.f32 %v4842_v34, %v2191_v39  ;;  %v2193_v28 = vadd.f32 1.4214138, %v2185_v56  ;;  %v4873_v39 = vpop.eup %4137  ;;  %v2186_v32 = vmul.f32 %v4857_v37, %v2178_v57  ;;  %4151 = vpow2.f32 %v2266_v7 }
 0x529   : > { %v2206_v0 = vadd.f32 -0.28449672, %v2198_v60  ;;  %v2200_v35 = vmul.f32 %v4847_v8, %v2192_v20  ;;  %v2179_v50 = vadd.f32 -1.4531521, %v2171_v24  ;;  %4153 = vpow2.f32 %v2268_v10 }
 0x52a   : > { %v2207_v6 = vadd.f32 -0.28449672, %v2199_v13  ;;  %v2201_v46 = vmul.f32 %v4851_v61, %v2193_v28  ;;  %v2172_v13 = vmul.f32 1.0614054, %v4873_v39  ;;  %v2194_v49 = vadd.f32 1.4214138, %v2186_v32 }
 0x52b   : > { %v2214_v3 = vmul.f32 %v4839_v33, %v2206_v0  ;;  %v2208_v60 = vadd.f32 -0.28449672, %v2200_v35  ;;  %v4140_v0 = vpop.eup %4139 }
 0x52c   : > { %v2215_v53 = vmul.f32 %v4842_v34, %v2207_v6  ;;  %v2209_v26 = vadd.f32 -0.28449672, %v2201_v46  ;;  %v4880_v58 = vpop.eup %4141  ;;  %v2180_v35 = vadd.f32 -1.4531521, %v2172_v13  ;;  %v2202_v24 = vmul.f32 %v4857_v37, %v2194_v49 }
 0x52d   : > { %v2222_v27 = vadd.f32 0.2548296, %v2214_v3  ;;  %v2216_v56 = vmul.f32 %v4847_v8, %v2208_v60  ;;  %v2187_v3 = vmul.f32 %v4867_v38, %v2179_v50  ;;  %v4144_v28 = vpop.eup %4143  ;;  %v2173_v32 = vmul.f32 1.0614054, %v4880_v58 }
 0x52e   : > { %v2223_v21 = vadd.f32 0.2548296, %v2215_v53  ;;  %v2217_v7 = vmul.f32 %v4851_v61, %v2209_v26  ;;  %v2188_v46 = vmul.f32 %v4873_v39, %v2180_v35  ;;  %v2210_v50 = vadd.f32 -0.28449672, %v2202_v24 }
 0x52f   : > { %v2230_v20 = vmul.f32 %v4839_v33, %v2222_v27  ;;  %v2224_v53 = vadd.f32 0.2548296, %v2216_v56  ;;  %v4146_v33 = vpop.eup %4145  ;;  %v2195_v60 = vadd.f32 1.4214138, %v2187_v3  ;;  %v2181_v56 = vadd.f32 -1.4531521, %v2173_v32 }
 0x530   : > { %v2231_v6 = vmul.f32 %v4842_v34, %v2223_v21  ;;  %v2225_v21 = vadd.f32 0.2548296, %v2217_v7  ;;  %v4148_v10 = vpop.eup %4147 }
 0x531   : > { %v2270_v57 = vmul.f32 %v4134_v18, %v2230_v20  ;;  %v2232_v34 = vmul.f32 %v4847_v8, %v2224_v53  ;;  %v2203_v18 = vmul.f32 %v4867_v38, %v2195_v60  ;;  %v2196_v20 = vadd.f32 1.4214138, %v2188_v46  ;;  %v4150_v3 = vpop.eup %4149 }
 0x532   : > { %v2271_v27 = vmul.f32 %v4140_v0, %v2231_v6  ;;  %v2233_v0 = vmul.f32 %v4851_v61, %v2225_v21  ;;  %v2218_v6 = vmul.f32 %v4857_v37, %v2210_v50  ;;  %v2189_v53 = vmul.f32 %v4880_v58, %v2181_v56  ;;  %v4152_v46 = vpop.eup %4151 }
 0x533   : > { %v2278_v15 = vsub.f32 1.0, %v2270_v57  ;;  %v2272_v49 = vmul.f32 %v4144_v28, %v2232_v34  ;;  %v2211_v57 = vadd.f32 -0.28449672, %v2203_v18  ;;  %v2204_v8 = vmul.f32 %v4873_v39, %v2196_v20  ;;  %v4154_v50 = vpop.eup %4153 }
 0x534   : > { %v2279_v13 = vsub.f32 1.0, %v2271_v27  ;;  %v2273_v27 = vmul.f32 %v4146_v33, %v2233_v0  ;;  %v2226_v60 = vadd.f32 0.2548296, %v2218_v6  ;;  %v2197_v61 = vadd.f32 1.4214138, %v2189_v53 }
 0x535   : > { %v2286_v26 = vmul.f32 %v2278_v15, %v4823_v25  ;;  %v2280_v24 = vsub.f32 1.0, %v2272_v49  ;;  %v2219_v15 = vmul.f32 %v4867_v38, %v2211_v57  ;;  %v2212_v25 = vadd.f32 -0.28449672, %v2204_v8 }
 0x536   : > { %v2287_v35 = vmul.f32 %v2279_v13, %v4833_v17  ;;  %v2281_v17 = vsub.f32 1.0, %v2273_v27  ;;  %v2234_v21 = vmul.f32 %v4857_v37, %v2226_v60  ;;  %v2205_v20 = vmul.f32 %v4880_v58, %v2197_v61 }
 0x537   : > { %v2294_v7 = vadd.f32 1.0, %v2286_v26  ;;  %v2288_v34 = vmul.f32 %v2280_v24, %v4836_v22  ;;  %v2227_v18 = vadd.f32 0.2548296, %v2219_v15  ;;  %v2220_v33 = vmul.f32 %v4873_v39, %v2212_v25 }
 0x538   : > { %v2295_v32 = vadd.f32 1.0, %v2287_v35  ;;  %v2289_v26 = vmul.f32 %v2281_v17, %v4865_v12  ;;  %v2122_v12 = vsel %vm2114_vm3, 1.0, %v5275_v62  ;;  %v2100_v61 = vmul.f32 0.5, %v4808_v2 }
 0x539   : > { %v2302_v28 = vmul.f32 %v2294_v7, %v4812_v1  ;;  %v2296_v56 = vadd.f32 1.0, %v2288_v34  ;;  %v2274_v1 = vmul.f32 %v4148_v10, %v2234_v21  ;;  %v2235_v37 = vmul.f32 %v4867_v38, %v2227_v18 }
 0x53a   : > { %v2303_v13 = vmul.f32 %v2295_v32, %v4814_v43  ;;  %v2228_v49 = vadd.f32 0.2548296, %v2220_v33  ;;  %v2213_v43 = vadd.f32 -0.28449672, %v2205_v20  ;;  %v2297_v6 = vadd.f32 1.0, %v2289_v26 }
 0x53b   : > { %3923 = vmatprep.mubr.msk.f32.mxu0 %vm676_vm5, %v2302_v28  ;;  %v2304_v0 = vmul.f32 %v2296_v56, %v4817_v9  ;;  %v2282_v35 = vsub.f32 1.0, %v2274_v1  ;;  %v2275_v4 = vmul.f32 %v4150_v3, %v2235_v37  ;;  %v2098_v3 = vmul.f32 0.5, %v4797_v63  ;;  %v3582_v26 = vld [vmem:[%s5260_s13] ss:$0 sm:$0xff] }
 0x53c   : > { %3924 = vmatmul.mubr.msk.f32.vlgmr.msra.gmra.mrb[16].mxu0 %vm676_vm5, %v2303_v13  ;;  %v4011_v22 = vpack.c.bf16 %v2303_v13, %v2302_v28  ;;  %v2236_v10 = vmul.f32 %v4873_v39, %v2228_v49  ;;  %v2221_v57 = vmul.f32 %v4880_v58, %v2213_v43  ;;  %v2305_v38 = vmul.f32 %v2297_v6, %v4819_v29 }
 0x53d   : > { %3936 = vmatpush3.msra.mxu0 %v4776_v52  ;;  %3926 = vmatprep.mubr.msk.f32.mxu0 %vm676_vm5, %v2304_v0  ;;  %v2290_v9 = vmul.f32 %v2282_v35, %v2122_v12  ;;  %v2283_v8 = vsub.f32 1.0, %v2275_v4  ;;  %v2123_v39 = vsel %vm2115_vm7, 1.0, %v5275_v62 }
 0x53e   : > { %4012 = vmatprep.subr.bf16.mxu1 %v4011_v22  ;;  %v2276_v53 = vmul.f32 %v4152_v46, %v2236_v10  ;;  %v2229_v7 = vadd.f32 0.2548296, %v2221_v57  ;;  %v4015_v52 = vpack.c.bf16 %v2305_v38, %v2304_v0  ;;  %v2124_v46 = vsel %vm2116_vm8, 1.0, %v5275_v62 }
 0x53f   : > { %4014 = vmatpush3.bf16.msra.mxu1 %v4011_v22  ;;  %v2298_v24 = vadd.f32 1.0, %v2290_v9  ;;  %v2291_v27 = vmul.f32 %v2283_v8, %v2123_v39 }
 0x540   : > { %3927 = vmatmul.mubr.msk.f32.gmra.mrb[18].mxu0 %vm676_vm5, %v2305_v38  ;;  %v2284_v60 = vsub.f32 1.0, %v2276_v53  ;;  %v2237_v29 = vmul.f32 %v4880_v58, %v2229_v7  ;;  %4016 = vmatprep.subr.bf16.mxu1 %v4015_v52  ;;  %v2125_v58 = vsel %vm2117_vm9, 1.0, %v5275_v62 }
 0x541   : > { %v2306_v32 = vmul.f32 %v2298_v24, %v2098_v3  ;;  %v2299_v15 = vadd.f32 1.0, %v2291_v27 }
 0x542   : > { %v2292_v25 = vmul.f32 %v2284_v60, %v2124_v46  ;;  %v2277_v63 = vmul.f32 %v4154_v50, %v2237_v29 }
 0x543   : > { %4018 = vmatpush3.bf16.msra.mxu1 %v4015_v52  ;;  %3929 = vmatprep.mubr.msk.f32.mxu0 %vm676_vm5, %v2306_v32  ;;  %v2307_v59 = vmul.f32 %v2299_v15, %v2099_v19 }
 0x544   : > { %v2300_v28 = vadd.f32 1.0, %v2292_v25  ;;  %v2285_v34 = vsub.f32 1.0, %v2277_v63 }
 0x545   : > { %v4019_v17 = vpack.c.bf16 %v2307_v59, %v2306_v32  ;;  %3930 = vmatmul.mubr.msk.f32.gmra.mrb[20].mxu0 %vm676_vm5, %v2307_v59 }
 0x546   : > { %v2308_v41 = vmul.f32 %v2300_v28, %v2100_v61  ;;  %v2293_v21 = vmul.f32 %v2285_v34, %v2125_v58 }
 0x547   : > { %4020 = vmatprep.subr.bf16.mxu1 %v4019_v17 }
 0x548   : > { %3932 = vmatprep.mubr.msk.f32.mxu0 %vm676_vm5, %v2308_v41  ;;  %v2301_v50 = vadd.f32 1.0, %v2293_v21  ;;  %4022 = vmatpush3.bf16.msra.mxu1 %v4019_v17 }
 0x54a   : > { %v2309_v13 = vmul.f32 %v2301_v50, %v2101_v16 }
 0x54c   : > { %v4023_v18 = vpack.c.bf16 %v2309_v13, %v2308_v41  ;;  %3933 = vmatmul.mubr.msk.f32.gmra.mrb[22].mxu0 %vm676_vm5, %v2309_v13 }
 0x54e   : > { %4024 = vmatprep.subr.bf16.mxu1 %v4023_v18 }
 0x54f   : > { %4026 = vmatpush3.bf16.msra.mxu1 %v4023_v18 }
 0x550   : > { %4028 = vmatprep.subr.bf16.mxu1 %v4011_v22 }
 0x552   : > { %3882 = vmatmul.mubr.msk.f32.vlgmr.msra.gmra.mrb[24].mxu1 %vm1156_vm6, %v4571_v30  ;;  %v5276_v30 = vmov 0.0  }
 0x553   : > { %4030 = vmatpush3.bf16.msra.mxu1 %v4011_v22  ;;  %3884 = vmatprep.mubr.msk.f32.mxu1 %vm1156_vm6, %v4577_v36  ;;  %v5277_v36 = vld [vmem:[#allocation3_spill] sm:$0xff] }
 0x554   : > { %4032 = vmatprep.subr.bf16.mxu1 %v4015_v52 }
 0x556   : > { %3885 = vmatmul.mubr.msk.f32.gmra.mrb[26].mxu1 %vm1156_vm6, %v4587_v31  ;;  %v3573_v31 = vld [vmem:[%s5259_s12 + $0x10] sm:$0xff] }
 0x557   : > { %4034 = vmatpush3.bf16.msra.mxu1 %v4015_v52  ;;  %3887 = vmatprep.mubr.msk.f32.mxu1 %vm1156_vm6, %v4592_v47 }
 0x558   : > { %4036 = vmatprep.subr.bf16.mxu1 %v4019_v17  ;;  %3949 = vmatprep.subr.mxu0 %v3573_v31 }
 0x55a   : > { %3888 = vmatmul.mubr.msk.f32.gmra.mrb[28].mxu1 %vm1156_vm6, %v4601_v40 }
 0x55b   : > { %4038 = vmatpush3.bf16.msra.mxu1 %v4019_v17  ;;  %3890 = vmatprep.mubr.msk.f32.mxu1 %vm1156_vm6, %v4606_v14 }
 0x55c   : > { %4040 = vmatprep.subr.bf16.mxu1 %v4023_v18 }
 0x55e   : > { %3891 = vmatmul.mubr.msk.f32.gmra.mrb[30].mxu1 %vm1156_vm6, %v4615_v42 }
 0x55f   : > { %4042 = vmatpush3.bf16.msra.mxu1 %v4023_v18  ;;  %3909 = vmatprep.mubr.msk.f32.mxu1 %vm1156_vm6, %v4620_v44 }
 0x560   : > { %3963 = vmatprep.subr.mxu1 %v5276_v30 }
 0x562   : > { %3910 = vmatmul.mubr.msk.f32.vlgmr.msra.gmra.mrb[32].mxu1 %vm1156_vm6, %v4629_v23 }
 0x563   : > { %3912 = vmatprep.mubr.msk.f32.mxu1 %vm1156_vm6, %v4634_v48  ;;  %3964 = vmatpush3.msra.mxu1 %v4762_v55 }
 0x564   : > { %3968 = vmatprep.subr.mxu1 %v5276_v30 }
 0x566   : > { %3913 = vmatmul.mubr.msk.f32.gmra.mrb[34].mxu1 %vm1156_vm6, %v4644_v51 }
 0x567   : > { %3915 = vmatprep.mubr.msk.f32.mxu1 %vm1156_vm6, %v4650_v45 }
 0x56a   : > { %3916 = vmatmul.mubr.msk.f32.gmra.mrb[36].mxu1 %vm1156_vm6, %v4660_v54 }
 0x56b   : > { %3918 = vmatprep.mubr.msk.f32.mxu1 %vm1156_vm6, %v4665_v11 }
 0x56e   : > { %3919 = vmatmul.mubr.msk.f32.gmra.mrb[38].mxu1 %vm1156_vm6, %v5277_v36 }
 0x56f   : > { %3965 = vmatprep.mubr.msk.f32.mxu1 %vm4200_vm4, %v5276_v30 }
 0x625   : > { %v3883_v47 = vpop.f32.mrb[24].mxu1 }
 0x626   : > { %v2376_v40 = vpop.f32.mrb[25].mxu1 }
 0x627   : > { %3937 = vmatprep.mubr.msk.f32.mxu0 %vm676_vm5, %v2376_v40 }
 0x628   : > { %3938 = vmatmul.mubr.msk.f32.vlgmr.msra.gmra.mrb[16].mxu0 %vm676_vm5, %v3883_v47 }
 0x629   : > { %v3886_v14 = vpop.f32.mrb[26].mxu1  ;;  %3950 = vmatpush3.msra.mxu0 %v3573_v31 }
 0x62a   : > { %v2386_v42 = vpop.f32.mrb[27].mxu1 }
 0x62b   : > { %3940 = vmatprep.mubr.msk.f32.mxu0 %vm676_vm5, %v2386_v42 }
 0x62c   : > { %3941 = vmatmul.mubr.msk.f32.gmra.mrb[18].mxu0 %vm676_vm5, %v3886_v14 }
 0x62d   : > { %v3889_v44 = vpop.f32.mrb[28].mxu1 }
 0x62e   : > { %v2396_v23 = vpop.f32.mrb[29].mxu1 }
 0x62f   : > { %3943 = vmatprep.mubr.msk.f32.mxu0 %vm676_vm5, %v2396_v23 }
 0x630   : > { %3944 = vmatmul.mubr.msk.f32.gmra.mrb[20].mxu0 %vm676_vm5, %v3889_v44 }
 0x631   : > { %v3892_v48 = vpop.f32.mrb[30].mxu1 }
 0x632   : > { %v2406_v51 = vpop.f32.mrb[31].mxu1 }
 0x633   : > { %3946 = vmatprep.mubr.msk.f32.mxu0 %vm676_vm5, %v2406_v51 }
 0x634   : > { %3947 = vmatmul.mubr.msk.f32.gmra.mrb[22].mxu0 %vm676_vm5, %v3892_v48 }
 0x635   : > { %v3911_v45 = vpop.f32.mrb[32].mxu1 }
 0x636   : > { %v2481_v54 = vpop.f32.mrb[33].mxu1 }
 0x637   : > { %3951 = vmatprep.mubr.msk.f32.mxu0 %vm676_vm5, %v2481_v54 }
 0x638   : > { %3952 = vmatmul.mubr.msk.f32.vlgmr.msra.gmra.mrb[16].mxu0 %vm676_vm5, %v3911_v45 }
 0x639   : > { %v3914_v11 = vpop.f32.mrb[34].mxu1 }
 0x63a   : > { %v2491_v2 = vpop.f32.mrb[35].mxu1 }
 0x63b   : > { %3954 = vmatprep.mubr.msk.f32.mxu0 %vm676_vm5, %v2491_v2 }
 0x63c   : > { %3955 = vmatmul.mubr.msk.f32.gmra.mrb[18].mxu0 %vm676_vm5, %v3914_v11 }
 0x63d   : > { %v3917_v5 = vpop.f32.mrb[36].mxu1 }
 0x63e   : > { %v2501_v33 = vpop.f32.mrb[37].mxu1 }
 0x63f   : > { %3957 = vmatprep.mubr.msk.f32.mxu0 %vm676_vm5, %v2501_v33 }
 0x640   : > { %3958 = vmatmul.mubr.msk.f32.gmra.mrb[20].mxu0 %vm676_vm5, %v3917_v5 }
 0x641   : > { %v3920_v20 = vpop.f32.mrb[38].mxu1 }
 0x642   : > { %v2511_v56 = vpop.f32.mrb[39].mxu1 }
 0x643   : > { %3960 = vmatprep.mubr.msk.f32.mxu0 %vm676_vm5, %v2511_v56 }
 0x644   : > { %3961 = vmatmul.mubr.msk.f32.gmra.mrb[22].mxu0 %vm676_vm5, %v3920_v20 }
 0x70b   : > { %v3953_v1 = vpop.f32.mrb[16].mxu0 }
 0x70c   : > { %v4990_v22 = vadd.f32 %v3953_v1, %v3582_v26  ;;  %v2873_v37 = vpop.f32.mrb[17].mxu0 }
 0x70d   : > { %v4992_v49 = vadd.f32 %v3582_v26, %v2873_v37 }
 0x70e   : > { %v3033_v43 = vmul.f32 %v4990_v22, %v4990_v22  ;;  %v2938_v0 = vsel %vm676_vm5, %v4990_v22, 0.0 }
 0x70f   : > { %v2937_v6 = vsel %vm676_vm5, %v4992_v49, 0.0  ;;  %v3032_v35 = vmul.f32 %v4992_v49, %v4992_v49  ;;  %v3956_v12 = vpop.f32.mrb[18].mxu0 }
 0x710   : > { %v5002_v4 = vadd.f32 %v3956_v12, %v3582_v26  ;;  %v2883_v10 = vpop.f32.mrb[19].mxu0  ;;  %v3041_v57 = vsel %vm676_vm5, %v3033_v43, 0.0  ;;  %v2939_v8 = vadd.f32 %v2938_v0, %v2937_v6 }
 0x711   : > { %v3040_v38 = vsel %vm676_vm5, %v3032_v35, 0.0  ;;  %v5006_v9 = vadd.f32 %v3582_v26, %v2883_v10 }
 0x712   : > { %v3035_v53 = vmul.f32 %v5002_v4, %v5002_v4  ;;  %v3042_v24 = vadd.f32 %v3041_v57, %v3040_v38  ;;  %v2942_v29 = vsel %vm676_vm5, %v5002_v4, 0.0 }
 0x713   : > { %v2940_v7 = vsel %vm676_vm5, %v5006_v9, 0.0  ;;  %v3034_v52 = vmul.f32 %v5006_v9, %v5006_v9  ;;  %v3959_v3 = vpop.f32.mrb[20].mxu0 }
 0x714   : > { %v2941_v39 = vadd.f32 %v2940_v7, %v2939_v8  ;;  %v5014_v27 = vadd.f32 %v3959_v3, %v3582_v26  ;;  %v2893_v60 = vpop.f32.mrb[21].mxu0  ;;  %v3045_v25 = vsel %vm676_vm5, %v3035_v53, 0.0  ;;  %v5278_v3 = vld [vmem:[#allocation2_spill] sm:$0xff] }
 0x715   : > { %v3043_v32 = vsel %vm676_vm5, %v3034_v52, 0.0  ;;  %v5019_v19 = vadd.f32 %v3582_v26, %v2893_v60 }
 0x716   : > { %v3044_v46 = vadd.f32 %v3043_v32, %v3042_v24  ;;  %v2943_v15 = vadd.f32 %v2942_v29, %v2941_v39  ;;  %v3037_v63 = vmul.f32 %v5014_v27, %v5014_v27  ;;  %v2946_v21 = vsel %vm676_vm5, %v5014_v27, 0.0 }
 0x717   : > { %v2944_v59 = vsel %vm676_vm5, %v5019_v19, 0.0  ;;  %v3036_v61 = vmul.f32 %v5019_v19, %v5019_v19  ;;  %v3962_v28 = vpop.f32.mrb[22].mxu0 }
 0x718   : > { %v2945_v34 = vadd.f32 %v2944_v59, %v2943_v15  ;;  %v3046_v58 = vadd.f32 %v3045_v25, %v3044_v46  ;;  %v5028_v17 = vadd.f32 %v3962_v28, %v3582_v26  ;;  %v2903_v41 = vpop.f32.mrb[23].mxu0  ;;  %v3049_v36 = vsel %vm676_vm5, %v3037_v63, 0.0  ;;  %v3585_v59 = vld [vmem:[%s5261_s14] ss:$0 sm:$0xff] }
 0x719   : > { %v3047_v16 = vsel %vm676_vm5, %v3036_v61, 0.0  ;;  %v2933_v50 = vadd.f32 %v3582_v26, %v2903_v41 }
 0x71a   : > { %v3048_v13 = vadd.f32 %v3047_v16, %v3046_v58  ;;  %v2947_v18 = vadd.f32 %v2946_v21, %v2945_v34  ;;  %v3039_v31 = vmul.f32 %v5028_v17, %v5028_v17  ;;  %v2950_v44 = vsel %vm676_vm5, %v5028_v17, 0.0 }
 0x71b   : > { %v2948_v47 = vsel %vm676_vm5, %v2933_v50, 0.0  ;;  %v3038_v40 = vmul.f32 %v2933_v50, %v2933_v50 }
 0x71c   : > { %v2949_v14 = vadd.f32 %v2948_v47, %v2947_v18  ;;  %v3050_v42 = vadd.f32 %v3049_v36, %v3048_v13  ;;  %v3053_v45 = vsel %vm676_vm5, %v3039_v31, 0.0 }
 0x71d   : > { %v3051_v23 = vsel %vm676_vm5, %v3038_v40, 0.0 }
 0x71e   : > { %v2951_v48 = vadd.f32 %v2950_v44, %v2949_v14  ;;  %v3052_v51 = vadd.f32 %v3051_v23, %v3050_v42 }
 0x720   : > { %v2952_v54 = vrot.slane %v2951_v48, 4  ;;  %v3054_v11 = vadd.f32 %v3053_v45, %v3052_v51 }
 0x722   : > { %v2953_v2 = vadd.f32 %v2952_v54, %v2951_v48  ;;  %v3055_v5 = vrot.slane %v3054_v11, 4 }
 0x724   : > { %v2954_v33 = vrot.slane %v2953_v2, 2  ;;  %v3056_v20 = vadd.f32 %v3055_v5, %v3054_v11 }
 0x726   : > { %v2955_v56 = vadd.f32 %v2954_v33, %v2953_v2  ;;  %v3057_v26 = vrot.slane %v3056_v20, 2 }
 0x728   : > { %v2956_v1 = vrot.slane %v2955_v56, 1  ;;  %v3058_v37 = vadd.f32 %v3057_v26, %v3056_v20 }
 0x72a   : > { %v2957_v43 = vadd.f32 %v2956_v1, %v2955_v56  ;;  %v3059_v0 = vrot.slane %v3058_v37, 1 }
 0x72c   : > { %v2958_v6 = vmul.f32 0.015625, %v2957_v43  ;;  %v3060_v35 = vadd.f32 %v3059_v0, %v3058_v37 }
 0x72e   : > { %3966 = vmatmul.mubr.msk.f32.vlgmr.msra.gmra.mrb[40].mxu1 %vm676_vm5, %v2958_v6  ;;  %v3061_v12 = vmul.f32 0.015625, %v3060_v35 }
 0x72f   : > { %3969 = vmatpush3.msra.mxu1 %v4762_v55  ;;  %3970 = vmatprep.mubr.msk.f32.mxu1 %vm4200_vm4, %v5276_v30 }
 0x732   : > { %3971 = vmatmul.mubr.msk.f32.vlgmr.msra.gmra.mrb[42].mxu1 %vm676_vm5, %v3061_v12 }
 0x801   : > { %v3028_v10 = vpop.f32.mrb[40].mxu1 }
 0x802   : > { %v3967_v57 = vpop.f32.mrb[41].mxu1  ;;  %v3135_v38 = vmul.f32 %v3028_v10, %v3028_v10  ;;  %v3140_v24 = vrot.slane %v3028_v10, %v5278_v3 }
 0x804   : > { %v3141_v60 = vsub.f32 %v4992_v49, %v3140_v24  ;;  %v3142_v55 = vsub.f32 %v4990_v22, %v3140_v24  ;;  %v3143_v30 = vsub.f32 %v5006_v9, %v3140_v24  ;;  %v3144_v29 = vsub.f32 %v5002_v4, %v3140_v24 }
 0x805   : > { %v3131_v8 = vpop.f32.mrb[42].mxu1  ;;  %v3145_v46 = vsub.f32 %v5019_v19, %v3140_v24  ;;  %v3146_v15 = vsub.f32 %v5014_v27, %v3140_v24  ;;  %v3147_v25 = vsub.f32 %v2933_v50, %v3140_v24  ;;  %v3148_v63 = vsub.f32 %v5028_v17, %v3140_v24  ;;  %v3586_v27 = vld [vmem:[%s5262_s15] ss:$0 sm:$0xff] }
 0x806   : > { %v3136_v53 = vsub.f32 %v3131_v8, %v3135_v38  ;;  %v3972_v7 = vpop.f32.mrb[43].mxu1 }
 0x808   : > { %v3149_v52 = vadd.f32 1e-05, %v3136_v53 }
 0x80a   : > { %4155 = vrsqrt.f32 %v3149_v52 }
 0x814   : > { %v4156_v39 = vpop.eup %4155 }
 0x815   : > { %v3154_v32 = vrot.slane %v4156_v39, %v5278_v3 }
 0x817   : > { %v3155_v49 = vmul.f32 %v3154_v32, %v3141_v60  ;;  %v3156_v61 = vmul.f32 %v3154_v32, %v3142_v55  ;;  %v3157_v22 = vmul.f32 %v3154_v32, %v3143_v30  ;;  %v3158_v28 = vmul.f32 %v3154_v32, %v3144_v29 }
 0x818   : > { %v3159_v9 = vmul.f32 %v3154_v32, %v3145_v46  ;;  %v3160_v34 = vmul.f32 %v3154_v32, %v3146_v15  ;;  %v3161_v4 = vmul.f32 %v3154_v32, %v3147_v25  ;;  %v3162_v58 = vmul.f32 %v3154_v32, %v3148_v63 }
 0x819   : > { %v3169_v41 = vmul.f32 %v3585_v59, %v3155_v49  ;;  %v3170_v21 = vmul.f32 %v3585_v59, %v3156_v61  ;;  %v3171_v19 = vmul.f32 %v3585_v59, %v3157_v22  ;;  %v3172_v17 = vmul.f32 %v3585_v59, %v3158_v28 }
 0x81a   : > { %v3173_v16 = vmul.f32 %v3585_v59, %v3159_v9  ;;  %v3174_v50 = vmul.f32 %v3585_v59, %v3160_v34  ;;  %v3175_v13 = vmul.f32 %v3585_v59, %v3161_v4  ;;  %v3176_v18 = vmul.f32 %v3585_v59, %v3162_v58 }
 0x81b   : > { %v3183_v36 = vadd.f32 %v3586_v27, %v3169_v41  ;;  %v3184_v31 = vadd.f32 %v3586_v27, %v3170_v21  ;;  %v3185_v47 = vadd.f32 %v3586_v27, %v3171_v19  ;;  %v3186_v40 = vadd.f32 %v3586_v27, %v3172_v17 }
 0x81c   : > { %v3187_v14 = vadd.f32 %v3586_v27, %v3173_v16  ;;  %v5061_v42 = vadd.f32 %v3586_v27, %v3174_v50  ;;  %v5063_v44 = vadd.f32 %v3586_v27, %v3175_v13  ;;  %v5065_v23 = vadd.f32 %v3586_v27, %v3176_v18 }
 0x81d   : > { %v5067_v48 = vmul.f32 0.70710677, %v3183_v36  ;;  %v5069_v51 = vmul.f32 0.70710677, %v3184_v31  ;;  %v5071_v45 = vmul.f32 0.70710677, %v3185_v47 }
 0x81e   : > { %v5073_v54 = vmul.f32 0.70710677, %v3186_v40  ;;  %v5075_v11 = vmul.f32 0.70710677, %v3187_v14  ;;  %v5078_v2 = vmul.f32 0.70710677, %v5061_v42 }
 0x81f   : > { %v5081_v5 = vmul.f32 0.70710677, %v5063_v44  ;;  %v5084_v33 = vmul.f32 0.70710677, %v5065_v23  ;;  %v5086_v20 = vmul.f32 0.5, %v3183_v36  ;;  %v5088_v56 = vmul.f32 0.5, %v3184_v31 }
 0x820   : > { %v5090_v26 = vmul.f32 0.5, %v3185_v47  ;;  %v5092_v1 = vmul.f32 0.5, %v3186_v40  ;;  %v5094_v37 = vmul.f32 0.5, %v3187_v14  ;;  %v3223_v43 = vand.u32 2147483647, %v5067_v48 }
 0x821   : > { %v3224_v0 = vand.u32 2147483647, %v5069_v51  ;;  %v3225_v6 = vand.u32 2147483647, %v5071_v45  ;;  %v3226_v35 = vand.u32 2147483647, %v5073_v54 }
 0x822   : > { %v3227_v12 = vand.u32 2147483647, %v5075_v11  ;;  %v3228_v10 = vand.u32 2147483647, %v5078_v2  ;;  %v3229_v57 = vand.u32 2147483647, %v5081_v5 }
 0x823   : > { %v3230_v38 = vand.u32 2147483647, %v5084_v33  ;;  %v3231_v8 = vmul.f32 0.3275911, %v3223_v43  ;;  %v3232_v53 = vmul.f32 0.3275911, %v3224_v0 }
 0x824   : > { %v3233_v7 = vmul.f32 0.3275911, %v3225_v6  ;;  %v3234_v52 = vmul.f32 0.3275911, %v3226_v35  ;;  %v3235_v3 = vmul.f32 0.3275911, %v3227_v12 }
 0x825   : > { %v3236_v24 = vmul.f32 0.3275911, %v3228_v10  ;;  %v3237_v39 = vmul.f32 0.3275911, %v3229_v57  ;;  %v3238_v60 = vmul.f32 0.3275911, %v3230_v38 }
 0x826   : > { %v3239_v55 = vadd.f32 1.0, %v3231_v8  ;;  %v3240_v30 = vadd.f32 1.0, %v3232_v53  ;;  %vm3207_vm4 = vcmp.ge.f32.partialorder %v5067_v48, 0.0  ;;  %v3241_v29 = vadd.f32 1.0, %v3233_v7 }
 0x827   : > { %v3242_v32 = vadd.f32 1.0, %v3234_v52  ;;  %v3243_v46 = vadd.f32 1.0, %v3235_v3  ;;  %v3244_v15 = vadd.f32 1.0, %v3236_v24  ;;  %v3245_v25 = vadd.f32 1.0, %v3237_v39 }
 0x828   : > { %4157 = vrcp.f32 %v3239_v55  ;;  %v3335_v63 = vsub.f32 0.0, %v3223_v43  ;;  %v3336_v59 = vsub.f32 0.0, %v3224_v0  ;;  %v3337_v49 = vsub.f32 0.0, %v3225_v6 }
 0x829   : > { %4159 = vrcp.f32 %v3240_v30  ;;  %v3338_v61 = vsub.f32 0.0, %v3226_v35  ;;  %v3246_v22 = vadd.f32 1.0, %v3238_v60  ;;  %v3339_v28 = vsub.f32 0.0, %v3227_v12 }
 0x82a   : > { %4161 = vrcp.f32 %v3241_v29  ;;  %v3340_v9 = vsub.f32 0.0, %v3228_v10  ;;  %v3341_v34 = vsub.f32 0.0, %v3229_v57  ;;  %v3343_v4 = vmul.f32 %v3335_v63, %v3223_v43 }
 0x82b   : > { %4163 = vrcp.f32 %v3242_v32  ;;  %v3344_v58 = vmul.f32 %v3336_v59, %v3224_v0  ;;  %v3342_v41 = vsub.f32 0.0, %v3230_v38  ;;  %v3345_v21 = vmul.f32 %v3337_v49, %v3225_v6 }
 0x82c   : > { %4165 = vrcp.f32 %v3243_v46  ;;  %v3346_v27 = vmul.f32 %v3338_v61, %v3226_v35  ;;  %vm3208_vm6 = vcmp.ge.f32.partialorder %v5069_v51, 0.0  ;;  %vm3209_vm10 = vcmp.ge.f32.partialorder %v5071_v45, 0.0 }
 0x82d   : > { %4167 = vrcp.f32 %v3244_v15  ;;  %v3347_v19 = vmul.f32 %v3339_v28, %v3227_v12  ;;  %v3348_v17 = vmul.f32 %v3340_v9, %v3228_v10  ;;  %v3351_v16 = vmul.f32 1.442695, %v3343_v4 }
 0x82e   : > { %4169 = vrcp.f32 %v3245_v25  ;;  %v3353_v50 = vmul.f32 1.442695, %v3344_v58  ;;  %vm3210_vm11 = vcmp.ge.f32.partialorder %v5073_v54, 0.0  ;;  %v3349_v13 = vmul.f32 %v3341_v34, %v3229_v57 }
 0x82f   : > { %4171 = vrcp.f32 %v3246_v22  ;;  %v3355_v18 = vmul.f32 1.442695, %v3345_v21  ;;  %vm3211_vm12 = vcmp.ge.f32.partialorder %v5075_v11, 0.0  ;;  %vm3212_vm13 = vcmp.ge.f32.partialorder %v5078_v2, 0.0 }
 0x830   : > { %v3350_v36 = vmul.f32 %v3342_v41, %v3230_v38  ;;  %v3357_v31 = vmul.f32 1.442695, %v3346_v27  ;;  %vm3213_vm14 = vcmp.ge.f32.partialorder %v5081_v5, 0.0  ;;  %v5114_v47 = vsel %vm3207_vm4, 1.0, %v5275_v62 }
 0x831   : > { %4173 = vpow2.f32 %v3351_v16  ;;  %v3359_v40 = vmul.f32 1.442695, %v3347_v19  ;;  %v5121_v43 = vsel %vm3208_vm6, 1.0, %v5275_v62  ;;  %v5126_v0 = vsel %vm3209_vm10, 1.0, %v5275_v62 }
 0x832   : > { %v5116_v14 = vpop.eup %4157  ;;  %4175 = vpow2.f32 %v3353_v50  ;;  %v3361_v6 = vmul.f32 1.442695, %v3348_v17  ;;  %v5133_v48 = vsel %vm3210_vm11, 1.0, %v5275_v62  ;;  %v3363_v51 = vmul.f32 1.442695, %v3349_v13 }
 0x833   : > { %v5128_v35 = vpop.eup %4159  ;;  %v3263_v12 = vmul.f32 1.0614054, %v5116_v14  ;;  %4177 = vpow2.f32 %v3355_v18  ;;  %v5141_v45 = vsel %vm3211_vm12, 1.0, %v5275_v62  ;;  %v3365_v38 = vmul.f32 1.442695, %v3350_v36 }
 0x834   : > { %v5136_v10 = vpop.eup %4161  ;;  %v3264_v57 = vmul.f32 1.0614054, %v5128_v35  ;;  %4179 = vpow2.f32 %v3357_v31  ;;  %v5149_v54 = vsel %vm3212_vm13, 1.0, %v5275_v62  ;;  %v5157_v11 = vsel %vm3213_vm14, 1.0, %v5275_v62 }
 0x835   : > { %v5144_v8 = vpop.eup %4163  ;;  %v3265_v53 = vmul.f32 1.0614054, %v5136_v10  ;;  %v3271_v7 = vadd.f32 -1.4531521, %v3263_v12  ;;  %4181 = vpow2.f32 %v3359_v40  ;;  %vm3214_vm15 = vcmp.ge.f32.partialorder %v5084_v33, 0.0 }
 0x836   : > { %v5152_v52 = vpop.eup %4165  ;;  %v3266_v3 = vmul.f32 1.0614054, %v5144_v8  ;;  %v3272_v24 = vadd.f32 -1.4531521, %v3264_v57  ;;  %4183 = vpow2.f32 %v3361_v6 }
 0x837   : > { %v5160_v39 = vpop.eup %4167  ;;  %v3267_v2 = vmul.f32 1.0614054, %v5152_v52  ;;  %v3273_v60 = vadd.f32 -1.4531521, %v3265_v53  ;;  %v3279_v55 = vmul.f32 %v5116_v14, %v3271_v7  ;;  %4185 = vpow2.f32 %v3363_v51 }
 0x838   : > { %v5164_v30 = vpop.eup %4169  ;;  %v3268_v29 = vmul.f32 1.0614054, %v5160_v39  ;;  %v3274_v32 = vadd.f32 -1.4531521, %v3266_v3  ;;  %v3280_v5 = vmul.f32 %v5128_v35, %v3272_v24  ;;  %4187 = vpow2.f32 %v3365_v38 }
 0x839   : > { %v5168_v46 = vpop.eup %4171  ;;  %v3269_v15 = vmul.f32 1.0614054, %v5164_v30  ;;  %v3275_v25 = vadd.f32 -1.4531521, %v3267_v2  ;;  %v3281_v63 = vmul.f32 %v5136_v10, %v3273_v60  ;;  %v3287_v59 = vadd.f32 1.4214138, %v3279_v55 }
 0x83a   : > { %v3270_v49 = vmul.f32 1.0614054, %v5168_v46  ;;  %v3276_v61 = vadd.f32 -1.4531521, %v3268_v29  ;;  %v3282_v22 = vmul.f32 %v5144_v8, %v3274_v32  ;;  %v3288_v28 = vadd.f32 1.4214138, %v3280_v5 }
 0x83b   : > { %v4174_v9 = vpop.eup %4173  ;;  %v3277_v34 = vadd.f32 -1.4531521, %v3269_v15  ;;  %v3283_v4 = vmul.f32 %v5152_v52, %v3275_v25  ;;  %v3289_v58 = vadd.f32 1.4214138, %v3281_v63  ;;  %v3295_v41 = vmul.f32 %v5116_v14, %v3287_v59 }
 0x83c   : > { %v4176_v21 = vpop.eup %4175  ;;  %v3278_v27 = vadd.f32 -1.4531521, %v3270_v49  ;;  %v3284_v19 = vmul.f32 %v5160_v39, %v3276_v61  ;;  %v3290_v17 = vadd.f32 1.4214138, %v3282_v22  ;;  %v3296_v16 = vmul.f32 %v5128_v35, %v3288_v28 }
 0x83d   : > { %v4178_v50 = vpop.eup %4177  ;;  %v3285_v13 = vmul.f32 %v5164_v30, %v3277_v34  ;;  %v3291_v18 = vadd.f32 1.4214138, %v3283_v4  ;;  %v3297_v36 = vmul.f32 %v5136_v10, %v3289_v58  ;;  %v3303_v31 = vadd.f32 -0.28449672, %v3295_v41 }
 0x83e   : > { %v4180_v40 = vpop.eup %4179  ;;  %v3286_v6 = vmul.f32 %v5168_v46, %v3278_v27  ;;  %v3292_v12 = vadd.f32 1.4214138, %v3284_v19  ;;  %v3298_v51 = vmul.f32 %v5144_v8, %v3290_v17  ;;  %v3304_v57 = vadd.f32 -0.28449672, %v3296_v16 }
 0x83f   : > { %v4182_v38 = vpop.eup %4181  ;;  %v3293_v53 = vadd.f32 1.4214138, %v3285_v13  ;;  %v3299_v7 = vmul.f32 %v5152_v52, %v3291_v18  ;;  %v3305_v3 = vadd.f32 -0.28449672, %v3297_v36  ;;  %v3311_v24 = vmul.f32 %v5116_v14, %v3303_v31 }
 0x840   : > { %v4184_v2 = vpop.eup %4183  ;;  %v3294_v60 = vadd.f32 1.4214138, %v3286_v6  ;;  %v3300_v55 = vmul.f32 %v5160_v39, %v3292_v12  ;;  %v3306_v29 = vadd.f32 -0.28449672, %v3298_v51  ;;  %v3312_v32 = vmul.f32 %v5128_v35, %v3304_v57 }
 0x841   : > { %v4186_v5 = vpop.eup %4185  ;;  %v3301_v15 = vmul.f32 %v5164_v30, %v3293_v53  ;;  %v3307_v25 = vadd.f32 -0.28449672, %v3299_v7  ;;  %v3313_v63 = vmul.f32 %v5136_v10, %v3305_v3  ;;  %v3319_v59 = vadd.f32 0.2548296, %v3311_v24 }
 0x842   : > { %v4188_v49 = vpop.eup %4187  ;;  %v3302_v61 = vmul.f32 %v5168_v46, %v3294_v60  ;;  %v3308_v22 = vadd.f32 -0.28449672, %v3300_v55  ;;  %v3314_v28 = vmul.f32 %v5144_v8, %v3306_v29  ;;  %v3320_v34 = vadd.f32 0.2548296, %v3312_v32 }
 0x843   : > { %v3309_v4 = vadd.f32 -0.28449672, %v3301_v15  ;;  %v3315_v58 = vmul.f32 %v5152_v52, %v3307_v25  ;;  %v3321_v41 = vadd.f32 0.2548296, %v3313_v63  ;;  %v3327_v27 = vmul.f32 %v5116_v14, %v3319_v59 }
 0x844   : > { %v3310_v19 = vadd.f32 -0.28449672, %v3302_v61  ;;  %v3316_v17 = vmul.f32 %v5160_v39, %v3308_v22  ;;  %v3322_v16 = vadd.f32 0.2548296, %v3314_v28  ;;  %v3328_v13 = vmul.f32 %v5128_v35, %v3320_v34 }
 0x845   : > { %v3317_v18 = vmul.f32 %v5164_v30, %v3309_v4  ;;  %v3323_v36 = vadd.f32 0.2548296, %v3315_v58  ;;  %v3329_v31 = vmul.f32 %v5136_v10, %v3321_v41  ;;  %v3367_v6 = vmul.f32 %v4174_v9, %v3327_v27 }
 0x846   : > { %v3318_v12 = vmul.f32 %v5168_v46, %v3310_v19  ;;  %v3324_v51 = vadd.f32 0.2548296, %v3316_v17  ;;  %v3330_v57 = vmul.f32 %v5144_v8, %v3322_v16  ;;  %v3368_v14 = vmul.f32 %v4176_v21, %v3328_v13 }
 0x847   : > { %v3325_v53 = vadd.f32 0.2548296, %v3317_v18  ;;  %v3331_v7 = vmul.f32 %v5152_v52, %v3323_v36  ;;  %v3369_v3 = vmul.f32 %v4178_v50, %v3329_v31  ;;  %v3375_v24 = vsub.f32 1.0, %v3367_v6 }
 0x848   : > { %v3326_v60 = vadd.f32 0.2548296, %v3318_v12  ;;  %v3332_v35 = vmul.f32 %v5160_v39, %v3324_v51  ;;  %v3370_v55 = vmul.f32 %v4180_v40, %v3330_v57  ;;  %v3376_v29 = vsub.f32 1.0, %v3368_v14 }
 0x849   : > { %v3333_v10 = vmul.f32 %v5164_v30, %v3325_v53  ;;  %v3371_v9 = vmul.f32 %v4182_v38, %v3331_v7  ;;  %v3377_v32 = vsub.f32 1.0, %v3369_v3  ;;  %v3383_v15 = vmul.f32 %v3375_v24, %v5114_v47 }
 0x84a   : > { %v3334_v8 = vmul.f32 %v5168_v46, %v3326_v60  ;;  %v3372_v21 = vmul.f32 %v4184_v2, %v3332_v35  ;;  %v3378_v25 = vsub.f32 1.0, %v3370_v55  ;;  %v3384_v52 = vmul.f32 %v3376_v29, %v5121_v43 }
 0x84b   : > { %v3373_v50 = vmul.f32 %v4186_v5, %v3333_v10  ;;  %v3379_v63 = vsub.f32 1.0, %v3371_v9  ;;  %v3385_v59 = vmul.f32 %v3377_v32, %v5126_v0  ;;  %v3391_v61 = vadd.f32 1.0, %v3383_v15 }
 0x84c   : > { %v3374_v39 = vmul.f32 %v4188_v49, %v3334_v8  ;;  %v3380_v47 = vsub.f32 1.0, %v3372_v21  ;;  %v3386_v30 = vmul.f32 %v3378_v25, %v5133_v48  ;;  %v3392_v46 = vadd.f32 1.0, %v3384_v52 }
 0x84d   : > { %v3381_v40 = vsub.f32 1.0, %v3373_v50  ;;  %v3387_v43 = vmul.f32 %v3379_v63, %v5141_v45  ;;  %v3393_v38 = vadd.f32 1.0, %v3385_v59  ;;  %v3399_v0 = vmul.f32 %v3391_v61, %v5086_v20 }
 0x84e   : > { %v3382_v2 = vsub.f32 1.0, %v3374_v39  ;;  %v3388_v5 = vmul.f32 %v3380_v47, %v5149_v54  ;;  %v3394_v22 = vadd.f32 1.0, %v3386_v30  ;;  %v3400_v28 = vmul.f32 %v3392_v46, %v5088_v56 }
 0x84f   : > { %v3222_v49 = vsel %vm3214_vm15, 1.0, %v5275_v62  ;;  %v3389_v48 = vmul.f32 %v3381_v40, %v5157_v11  ;;  %v3395_v34 = vadd.f32 1.0, %v3387_v43  ;;  %v3401_v45 = vmul.f32 %v3393_v38, %v5090_v26  ;;  %3407 = vst.msk [vmem:[%s5211_s28] sm:$0xff] %vm676_vm5, %v3399_v0 }
 0x850   : > { %v3196_v20 = vmul.f32 0.5, %v5061_v42  ;;  %v3390_v54 = vmul.f32 %v3382_v2, %v3222_v49  ;;  %v3396_v4 = vadd.f32 1.0, %v3388_v5  ;;  %v3402_v56 = vmul.f32 %v3394_v22, %v5092_v1  ;;  %3408 = vst.msk [vmem:[%s5211_s28 + $0x8] sm:$0xff] %vm676_vm5, %v3400_v28 }
 0x851   : > { %v3197_v62 = vmul.f32 0.5, %v5063_v44  ;;  %v3397_v33 = vadd.f32 1.0, %v3389_v48  ;;  %v3403_v11 = vmul.f32 %v3395_v34, %v5094_v37  ;;  %3409 = vst.msk [vmem:[%s5211_s28 + $0x10] sm:$0xff] %vm676_vm5, %v3401_v45  ;;  %v3198_v26 = vmul.f32 0.5, %v5065_v23 }
 0x852   : > { %v3398_v58 = vadd.f32 1.0, %v3390_v54  ;;  %v3404_v42 = vmul.f32 %v3396_v4, %v3196_v20  ;;  %3410 = vst.msk [vmem:[%s5211_s28 + $0x18] sm:$0xff] %vm676_vm5, %v3402_v56 }
 0x853   : > { %v3405_v41 = vmul.f32 %v3397_v33, %v3197_v62  ;;  %3411 = vst.msk [vmem:[%s5211_s28 + $0x20] sm:$0xff] %vm676_vm5, %v3403_v11 }
 0x854   : > { %v3406_v27 = vmul.f32 %v3398_v58, %v3198_v26  ;;  %3412 = vst.msk [vmem:[%s5211_s28 + $0x28] sm:$0xff] %vm676_vm5, %v3404_v42 }
 0x855   : > { %3413 = vst.msk [vmem:[%s5211_s28 + $0x30] sm:$0xff] %vm676_vm5, %v3405_v41 }
 0x856   : > { %3414 = vst.msk [vmem:[%s5211_s28 + $0x38] sm:$0xff] %vm676_vm5, %v3406_v27 }
 0x857 PF: > { %s26_s21 = sadd.s32 1, %s4196_s21  }
 0x858   : > { %p23_p4 = scmp.ge.s32.totalorder %s26_s21, 4  }
 0x85a   :  { %25 = sbr.rel (!%p23_p4) target bundleno = 2 (0x2), region = 118 }

// kernel: labram_forward.3
= control target key start
LH: loop header
LB: loop body
LE: loop exit
PB: predicated region body
PF: predicated region fallthrough
CT: control target
= control target key end

     0   :  { %s16618_s0 = inlined_call_operand.vmem [shape: f32[2,9,64], index: 0, kind: input, shape index: {}]   ;;  %s16619_s1 = inlined_call_operand.vmem [shape: f32[9,64], index: 1, kind: input, shape index: {}]   ;;  %s16620_s2 = inlined_call_operand.vmem [shape: f32[2,1,64], index: 2, kind: input, shape index: {}]   ;;  %s16621_s3 = inlined_call_operand.vmem [shape: f32[2,1,64], index: 3, kind: input, shape index: {}]   ;;  %s16622_s4 = inlined_call_operand.vmem [shape: bf16[2,8,64,8], index: 4, kind: input, shape index: {}]   ;;  %s16623_s5 = inlined_call_operand.vmem [shape: bf16[2,8,64,8], index: 5, kind: input, shape index: {}]   ;;  %s16624_s6 = inlined_call_operand.vmem [shape: bf16[2,8,64,8], index: 6, kind: input, shape index: {}]   ;;  %s16625_s7 = inlined_call_operand.vmem [shape: f32[2,1,8], index: 7, kind: input, shape index: {}]   ;;  %s16626_s8 = inlined_call_operand.vmem [shape: f32[2,1,8], index: 8, kind: input, shape index: {}]   ;;  %s16627_s9 = inlined_call_operand.vmem [shape: f32[2,1,8], index: 9, kind: input, shape index: {}]   ;;  %s16628_s10 = inlined_call_operand.vmem [shape: f32[2,1,8], index: 10, kind: input, shape index: {}]   ;;  %s16629_s11 = inlined_call_operand.vmem [shape: bf16[2,8,8,64], index: 11, kind: input, shape index: {}]   ;;  %s16630_s12 = inlined_call_operand.vmem [shape: f32[2,1,64], index: 12, kind: input, shape index: {}]   ;;  %s16631_s13 = inlined_call_operand.vmem [shape: f32[2,1,64], index: 13, kind: input, shape index: {}]   ;;  %s16632_s14 = inlined_call_operand.vmem [shape: f32[2,1,64], index: 14, kind: input, shape index: {}]   ;;  %s16633_s15 = inlined_call_operand.vmem [shape: f32[2,1,64], index: 15, kind: input, shape index: {}]   ;;  %s16634_s16 = inlined_call_operand.vmem [shape: bf16[2,64,256], index: 16, kind: input, shape index: {}]   ;;  %s16635_s17 = inlined_call_operand.vmem [shape: f32[2,1,256], index: 17, kind: input, shape index: {}]   ;;  %s16636_s18 = inlined_call_operand.vmem [shape: bf16[2,256,64], index: 18, kind: input, shape index: {}]   ;;  %s16637_s19 = inlined_call_operand.vmem [shape: f32[2,1,64], index: 19, kind: input, shape index: {}]   ;;  %s16638_s20 = inlined_call_operand.vmem [shape: f32[2,1,64], index: 20, kind: input, shape index: {}]   ;;  %s16639_s21 = inlined_call_operand.vmem [shape: f32[1,64], index: 21, kind: input, shape index: {}]   ;;  %s16640_s22 = inlined_call_operand.vmem [shape: f32[1,64], index: 22, kind: input, shape index: {}]   ;;  %s16641_s23 = inlined_call_operand.vmem [shape: f32[64,128], index: 23, kind: input, shape index: {}]   ;;  %s16642_s24 = inlined_call_operand.vmem [shape: f32[1,128], index: 24, kind: input, shape index: {}]   ;;  %s16643_s25 = inlined_call_operand.hbm [shape: f32[2,1,128], index: 25, kind: output, shape index: {}]  }
   0x1   :  { %16683 = sst [smem:[#allocation17_spill]] %s16618_s0 }
   0x2   :  { %16684 = sst [smem:[#allocation18_spill]] %s16619_s1 }
   0x3   :  { %16685 = sst [smem:[#allocation19_spill]] %s16620_s2 }
   0x4   :  { %16686 = sst [smem:[#allocation20_spill]] %s16621_s3 }
   0x5   :  { %16687 = sst [smem:[#allocation21_spill]] %s16622_s4 }
   0x6   :  { %16688 = sst [smem:[#allocation22_spill]] %s16623_s5 }
   0x7   :  { %16689 = sst [smem:[#allocation23_spill]] %s16624_s6 }
   0x8   :  { %16690 = sst [smem:[#allocation24_spill]] %s16625_s7 }
   0x9   :  { %16691 = sst [smem:[#allocation25_spill]] %s16626_s8 }
   0xa   :  { %16692 = sst [smem:[#allocation26_spill]] %s16627_s9 }
   0xb   :  { %16693 = sst [smem:[#allocation27_spill]] %s16639_s21 }
   0xc   :  { %16694 = sst [smem:[#allocation28_spill]] %s16640_s22 }
   0xd   :  { %16695 = sst [smem:[#allocation29_spill]] %s16642_s24 }
   0xe   :  { %16696 = sst [smem:[#allocation30_spill]] %s16643_s25 }
   0xf   :  { %30 = vsyncpa [#allocation3], 0 }
  0x10   :  { %32 = vsyncpa [#allocation3 + $0x1], 0  ;;  %s13571_s29 = smov 0   ;;  %s13573_s2 = smov 0  }
  0x11   :  { %s13575_s6 = smov 0   ;;  %s13577_s30 = smov 0  }
  0x12 LB: > { %16697 = sst [smem:[#allocation5_spill]] %s13420_s29  ;;  %s13592_s7 = sadd.s32 4294967295, %s13432_s30   ;;  %s13432_s30 = sphi %s13577_s30, %s16750_s30   ;;  %s13428_s6 = sphi %s13575_s6, %s16752_s6   ;;  %s13424_s2 = sphi %s13573_s2, %s16754_s2   ;;  %s13420_s29 = sphi %s13571_s29, %s16753_s29  }
  0x13   : > { %16698 = sst [smem:[#allocation6_spill]] %s13428_s6  ;;  %s10493_s3 = sadd.s32 4294967294, %s13432_s30  }
  0x14   : > { %16699 = sst [smem:[#allocation7_spill]] %s13432_s30  ;;  %s13596_s26 = sadd.s32 1, %s13432_s30  }
  0x15   : > { %16700 = sst [smem:[#allocation8_spill]] %s13592_s7  ;;  %s575_s1 = sadd.s32 1, %s13428_s6 }
  0x16   : > { %16701 = sst [smem:[#allocation9_spill]] %s13596_s26  ;;  %s572_s8 = ssub.s32 %s13432_s30, %s13596_s26 }
  0x17   : > { %p585_p0 = scmp.ne.s32.totalorder %s13428_s6, %s13424_s2  ;;  %p573_p1 = scmp.eq.s32.totalorder %s572_s8, 0 }
  0x18   : > { %p586_p2 = scmp.eq.s32.totalorder %s13592_s7, 1  ;;  %p591_p3 = scmp.ne.s32.totalorder %s13424_s2, %s13420_s29 }
  0x19   : > { %p592_p4 = scmp.eq.s32.totalorder %s10493_s3, 1  ;;  %p10496_p7 = scmp.ge.s32.totalorder %s13432_s30, 1 }
  0x1a   : > { %s13607_s27 = scalar_select %p573_p1, %s13428_s6, %s575_s1  }
  0x1b   : > { %p13609_p5 = por %p586_p2, %p585_p0  ;;  %p13613_p6 = por %p592_p4, %p591_p3 }
  0x1c   : > { %16702 = sst [smem:[#allocation10_spill]] %s13607_s27  ;;  %p690_p8 = scmp.lt.s32.totalorder %s13432_s30, 3 }
  0x1d   : > { %s16703_s4 = scalar_select %p13609_p5, 1, 0 }
  0x1e   : > { %s16705_s28 = scalar_select %p13613_p6, 1, 0 }
  0x1f   : > { %16704 = sst [smem:[#allocation11_spill]] %s16703_s4  ;;  %p691_p9 = pnand %p10496_p7, %p690_p8 }
  0x20   : > { %16706 = sst [smem:[#allocation12_spill]] %s16705_s28 }
  0x21   : > { %694 = sbr.rel (%p691_p9) target bundleno = 6105 (0x17d9), region = 120 }
  0x28   : > { %p757_p10 = scmp.lt.s32.totalorder %s13592_s7, 1  ;;  %vm771_vm0 = vcmask 523264   ;;  %s16707_s3 = sld [smem:[#allocation18_spill]]  ;;  %vm775_vm1 = vcmask 516096   ;;  %v16661_v20 = vmov 0.0   ;;  %vm13435_vm2 = vmmov 0  }
  0x29   : > { %s16708_s28 = sld [smem:[#allocation17_spill]]  ;;  %s16711_s26 = sld [smem:[#allocation21_spill]]  ;;  %11652 = vmatprep.subr.bf16.mxu0 %v16661_v20  ;;  %11664 = vmatprep.subr.bf16.mxu1 %v16661_v20  ;;  %vm2574_vm3 = vcmask 64512   ;;  %vm2578_vm4 = vcmask 57344   ;;  %vm3979_vm6 = vcmask 1040384   ;;  %vm13436_vm7 = vmmov 1  }
  0x2a   : > { %s758_s9 = scalar_select %p757_p10, %s13592_s7, 1  ;;  %11660 = vmatprep.mubr.msk.bf16.mxu0 %vm13435_vm2, %v16661_v20  ;;  %11672 = vmatprep.mubr.msk.bf16.mxu1 %vm13435_vm2, %v16661_v20  ;;  %vm14512_vm5 = vmpackc.low %vm2574_vm3, %vm2574_vm3  ;;  %vm3799_vm9 = vcmask 65536   ;;  %vm3795_vm10 = vcmask 72704   ;;  %vm4665_vm11 = vcmask 1043456  }
  0x2b   : > { %s16715_s8 = sld [smem:[#allocation22_spill]]  ;;  %s16720_s6 = sld [smem:[#allocation24_spill]]  ;;  %vm14617_vm8 = vmpackc.low %vm3979_vm6, %vm13436_vm7 }
  0x2c   : > { %s11198_s27 = sshll.u32 %s758_s9, 4  ;;  %s16714_s9 = sld [smem:[#allocation20_spill]] }
  0x2d   : > { %s16722_s5 = sld [smem:[#allocation25_spill]]  ;;  %s16723_s1 = sld [smem:[#allocation26_spill]] }
  0x2e   : > { %v765_v0 = vld [vmem:[%s16707_s3] sm:$0xff]  ;;  %v766_v1 = vld [vmem:[%s16707_s3 + $0x8] sm:$0x1]  ;;  %s16741_s21 = sld [smem:[#allocation8_spill]]  ;;  %s16742_s4 = sld [smem:[#allocation27_spill]] }
  0x2f   : > { %s761_s29 = scalar_lea.vmem %s16708_s28, %s11198_s27  ;;  %v12816_v18 = vld [vmem:[%s16711_s26] sm:$0xff]   ;;  %v12818_v21 = vld [vmem:[%s16711_s26 + $0x8] sm:$0xff]   ;;  %v12820_v23 = vld [vmem:[%s16711_s26 + $0x10] sm:$0xff]   ;;  %s755_s30 = sand.u32 1, %s13424_s2  }
  0x30   : > { %v763_v2 = vld [vmem:[%s761_s29] sm:$0xff]  ;;  %v764_v3 = vld [vmem:[%s761_s29 + $0x8] sm:$0x1]  ;;  %11653 = vmatpush3.bf16.msra.mxu0 %v12816_v18  ;;  %v12821_v24 = vld [vmem:[%s16711_s26 + $0x30] sm:$0xff]   ;;  %s16712_s29 = sld [smem:[#allocation19_spill]]  ;;  %s10426_s0 = scalar_lea.sflag [#allocation3], %s755_s30 }
  0x31   : > { %v13630_v4 = vadd.f32 %v765_v0, %v763_v2  ;;  %v13632_v5 = vadd.f32 %v766_v1, %v764_v3  ;;  %v12817_v19 = vld [vmem:[%s16711_s26 + $0x20] sm:$0xff]   ;;  %11654 = vmatprep.subr.bf16.mxu0 %v16661_v20  ;;  %v12819_v22 = vld [vmem:[%s16711_s26 + $0x28] sm:$0xff]   ;;  %v12822_v25 = vld [vmem:[%s16711_s26 + $0x18] sm:$0xff]   ;;  %s16721_s3 = smov %s16720_s6 }
  0x32   : > { %11665 = vmatpush3.bf16.msra.mxu1 %v12817_v19  ;;  %v12823_v26 = vld [vmem:[%s16711_s26 + $0x38] sm:$0xff]   ;;  %v10500_v39 = vld [vmem:[%s16714_s9] ss:$0 sm:$0xff]  ;;  %v12826_v46 = vld [vmem:[%s16711_s26 + $0x48] sm:$0xff]  }
  0x33   : > { %16709 = vst [vmem:[#allocation13_spill] sm:$0xff] %v13630_v4  ;;  %16710 = vst [vmem:[#allocation14_spill] sm:$0xff] %v13632_v5  ;;  %v772_v6 = vsel %vm771_vm0, %v13630_v4, 0.0  ;;  %v776_v7 = vsel %vm775_vm1, %v13632_v5, 0.0  ;;  %11666 = vmatprep.subr.bf16.mxu1 %v16661_v20  ;;  %v12824_v43 = vld [vmem:[%s16711_s26 + $0x40] sm:$0xff]   ;;  %v12827_v47 = vld [vmem:[%s16711_s26 + $0x68] sm:$0xff]  }
  0x34   : > { %773 = vadd.xlane.f32.xlu0 %v772_v6  ;;  %11655 = vmatpush3.bf16.msra.mxu0 %v12818_v21  ;;  %v12825_v44 = vld [vmem:[%s16711_s26 + $0x60] sm:$0xff]   ;;  %v12828_v48 = vld [vmem:[%s16711_s26 + $0x50] sm:$0xff]   ;;  %v12830_v50 = vld [vmem:[%s16711_s26 + $0x58] sm:$0xff]  }
  0x35   : > { %11656 = vmatprep.subr.bf16.mxu0 %v16661_v20  ;;  %v12829_v49 = vld [vmem:[%s16711_s26 + $0x70] sm:$0xff]   ;;  %v12831_v51 = vld [vmem:[%s16711_s26 + $0x78] sm:$0xff]   ;;  %v12832_v52 = vld [vmem:[%s16711_s26 + $0x80] sm:$0xff]  }
  0x36   : > { %11667 = vmatpush3.bf16.msra.mxu1 %v12819_v22  ;;  %s16713_s27 = smov %s16712_s29  ;;  %v10499_v35 = vld [vmem:[%s16712_s29] ss:$0 sm:$0xff]  ;;  %v12834_v54 = vld [vmem:[%s16711_s26 + $0x88] sm:$0xff]   ;;  %v12836_v56 = vld [vmem:[%s16711_s26 + $0x90] sm:$0xff]   ;;  %s16716_s29 = sld [smem:[#allocation23_spill]] }
  0x37   : > { %11668 = vmatprep.subr.bf16.mxu1 %v16661_v20  ;;  %v12833_v53 = vld [vmem:[%s16711_s26 + $0xa0] sm:$0xff]   ;;  %v12835_v55 = vld [vmem:[%s16711_s26 + $0xa8] sm:$0xff]   ;;  %v12837_v57 = vld [vmem:[%s16711_s26 + $0xb0] sm:$0xff]  }
  0x38   : > { %777 = vadd.xlane.f32.xlu0 %v776_v7  ;;  %11657 = vmatpush3.bf16.msra.mxu0 %v12820_v23  ;;  %v12838_v58 = vld [vmem:[%s16711_s26 + $0x98] sm:$0xff]   ;;  %v12840_v60 = vld [vmem:[%s16711_s26 + $0xc0] sm:$0xff]   ;;  %v12842_v62 = vld [vmem:[%s16711_s26 + $0xc8] sm:$0xff]  }
  0x39   : > { %11658 = vmatprep.subr.bf16.mxu0 %v16661_v20  ;;  %v12839_v59 = vld [vmem:[%s16711_s26 + $0xb8] sm:$0xff]   ;;  %v12841_v61 = vld [vmem:[%s16711_s26 + $0xe0] sm:$0xff]   ;;  %v12843_v63 = vld [vmem:[%s16711_s26 + $0xe8] sm:$0xff]  }
  0x3a   : > { %11669 = vmatpush3.bf16.msra.mxu1 %v12821_v24  ;;  %v12844_v0 = vld [vmem:[%s16711_s26 + $0xd0] sm:$0xff]   ;;  %v12846_v2 = vld [vmem:[%s16711_s26 + $0xd8] sm:$0xff]   ;;  %v12848_v6 = vld [vmem:[%s16715_s8] sm:$0xff]  }
  0x3b   : > { %11670 = vmatprep.subr.bf16.mxu1 %v16661_v20  ;;  %v12845_v1 = vld [vmem:[%s16711_s26 + $0xf0] sm:$0xff]   ;;  %v12847_v3 = vld [vmem:[%s16711_s26 + $0xf8] sm:$0xff]   ;;  %v12849_v7 = vld [vmem:[%s16715_s8 + $0x20] sm:$0xff]  }
  0x3c   : > { %11659 = vmatpush3.bf16.msra.mxu0 %v12822_v25  ;;  %v12860_v18 = vld [vmem:[%s16715_s8 + $0x50] sm:$0xff]   ;;  %v12862_v21 = vld [vmem:[%s16715_s8 + $0x58] sm:$0xff]   ;;  %v12864_v23 = vld [vmem:[%s16715_s8 + $0x80] sm:$0xff]   ;;  %s16717_s25 = smov %s16716_s29 }
  0x3d   : > { %11676 = vmatprep.subr.bf16.mxu0 %v16661_v20  ;;  %v12861_v19 = vld [vmem:[%s16715_s8 + $0x70] sm:$0xff]   ;;  %v12863_v22 = vld [vmem:[%s16715_s8 + $0x78] sm:$0xff]   ;;  %v12865_v24 = vld [vmem:[%s16715_s8 + $0xa0] sm:$0xff]  }
  0x3e   : > { %11671 = vmatpush3.bf16.msra.mxu1 %v12823_v26  ;;  %v12866_v25 = vld [vmem:[%s16715_s8 + $0x88] sm:$0xff]  }
  0x3f   : > { %11688 = vmatprep.subr.bf16.mxu1 %v16661_v20  ;;  %v12867_v26 = vld [vmem:[%s16715_s8 + $0xa8] sm:$0xff]  }
  0xc1   : > { %v774_v8 = vpop.xlane.xlu0 %773 }
  0xc2   : > { %v780_v9 = vmul.f32 0.015625, %v774_v8  ;;  %v12850_v8 = vld [vmem:[%s16715_s8 + $0x8] sm:$0xff]  }
  0xc4   : > { %v782_v10 = vsub.f32 %v13630_v4, %v780_v9  ;;  %v12851_v9 = vld [vmem:[%s16715_s8 + $0x28] sm:$0xff]  }
  0xc5   : > { %v778_v11 = vpop.xlane.xlu0 %777 }
  0xc6   : > { %v781_v12 = vmul.f32 0.015625, %v778_v11  ;;  %v784_v13 = vmul.f32 %v782_v10, %v782_v10  ;;  %v12853_v11 = vld [vmem:[%s16715_s8 + $0x30] sm:$0xff]  }
  0xc8   : > { %v783_v14 = vsub.f32 %v13632_v5, %v781_v12  ;;  %v786_v15 = vsel %vm771_vm0, %v784_v13, 0.0  ;;  %v12854_v12 = vld [vmem:[%s16715_s8 + $0x18] sm:$0xff]  }
  0xc9   : > { %787 = vadd.xlane.f32.xlu1 %v786_v15  ;;  %v12855_v13 = vld [vmem:[%s16715_s8 + $0x38] sm:$0xff]   ;;  %v12857_v15 = vld [vmem:[%s16715_s8 + $0x60] sm:$0xff]  }
  0xca   : > { %v785_v16 = vmul.f32 %v783_v14, %v783_v14 }
  0xcc   : > { %v789_v17 = vsel %vm775_vm1, %v785_v16, 0.0  ;;  %v12858_v16 = vld [vmem:[%s16715_s8 + $0x48] sm:$0xff]  }
  0xcd   : > { %790 = vadd.xlane.f32.xlu1 %v789_v17  ;;  %v12859_v17 = vld [vmem:[%s16715_s8 + $0x68] sm:$0xff]  }
 0x156   : > { %v788_v27 = vpop.xlane.xlu1 %787 }
 0x157   : > { %v792_v28 = vmul.f32 0.015625, %v788_v27  ;;  %v12868_v27 = vld [vmem:[%s16715_s8 + $0x90] sm:$0xff]  }
 0x159   : > { %v794_v29 = vadd.f32 1e-06, %v792_v28  ;;  %v12869_v28 = vld [vmem:[%s16715_s8 + $0xb0] sm:$0xff]  }
 0x15a   : > { %v791_v30 = vpop.xlane.xlu1 %790 }
 0x15b   : > { %13064 = vrsqrt.f32 %v794_v29  ;;  %v793_v31 = vmul.f32 0.015625, %v791_v30  ;;  %v12870_v29 = vld [vmem:[%s16715_s8 + $0x98] sm:$0xff]  }
 0x15c   : > { %v12871_v30 = vld [vmem:[%s16715_s8 + $0xb8] sm:$0xff]  }
 0x15d   : > { %v795_v32 = vadd.f32 1e-06, %v793_v31  ;;  %v12872_v31 = vld [vmem:[%s16715_s8 + $0xc0] sm:$0xff]  }
 0x15f   : > { %13066 = vrsqrt.f32 %v795_v32  ;;  %v12873_v32 = vld [vmem:[%s16715_s8 + $0xe0] sm:$0xff]  }
 0x165   : > { %v13065_v33 = vpop.eup %13064 }
 0x166   : > { %v798_v34 = vmul.f32 %v13065_v33, %v782_v10  ;;  %v12852_v10 = vld [vmem:[%s16715_s8 + $0x10] sm:$0xff]   ;;  %v12874_v33 = vld [vmem:[%s16715_s8 + $0xc8] sm:$0xff]  }
 0x168   : > { %v806_v37 = vmul.f32 %v10499_v35, %v798_v34  ;;  %v12875_v34 = vld [vmem:[%s16715_s8 + $0xe8] sm:$0xff]  }
 0x169   : > { %v13067_v36 = vpop.eup %13066 }
 0x16a   : > { %v799_v38 = vmul.f32 %v13067_v36, %v783_v14  ;;  %v814_v41 = vadd.f32 %v10500_v39, %v806_v37  ;;  %v12856_v14 = vld [vmem:[%s16715_s8 + $0x40] sm:$0xff]   ;;  %v12877_v36 = vld [vmem:[%s16715_s8 + $0xf0] sm:$0xff]   ;;  %v12878_v37 = vld [vmem:[%s16715_s8 + $0xd8] sm:$0xff]  }
 0x16c   : > { %v807_v40 = vmul.f32 %v10499_v35, %v799_v38  ;;  %v12876_v35 = vld [vmem:[%s16715_s8 + $0xd0] sm:$0xff]   ;;  %v12879_v38 = vld [vmem:[%s16715_s8 + $0xf8] sm:$0xff]  }
 0x16e   : > { %v815_v42 = vadd.f32 %v10500_v39, %v807_v40  ;;  %v12880_v39 = vld [vmem:[%s16716_s29] sm:$0xff]   ;;  %s16743_s29 = sld [smem:[#allocation28_spill]] }
 0x16f   : > { %v12881_v40 = vld [vmem:[%s16717_s25 + $0x20] sm:$0xff]  }
 0x170   : > { %v13692_v45 = vpack.c.bf16 %v815_v42, %v814_v41  ;;  %v12882_v41 = vld [vmem:[%s16717_s25 + $0x8] sm:$0xff]  }
 0x171   : > { %v12883_v42 = vld [vmem:[%s16717_s25 + $0x28] sm:$0xff]  }
 0x172   : > { %11661 = vmatmul.mubr.msk.bf16.vlgmr.msra.gmra.mrb[0].mxu0 %vm771_vm0, %v13692_v45  ;;  %11673 = vmatmul.mubr.msk.bf16.vlgmr.msra.gmra.mrb[0].mxu1 %vm771_vm0, %v13692_v45 }
 0x173   : > { %11677 = vmatpush3.bf16.msra.mxu0 %v12824_v43  ;;  %11689 = vmatpush3.bf16.msra.mxu1 %v12825_v44  ;;  %v12884_v43 = vld [vmem:[%s16717_s25 + $0x10] sm:$0xff]  }
 0x174   : > { %11678 = vmatprep.subr.bf16.mxu0 %v16661_v20  ;;  %11690 = vmatprep.subr.bf16.mxu1 %v16661_v20  ;;  %v12885_v44 = vld [vmem:[%s16717_s25 + $0x30] sm:$0xff]  }
 0x175   : > { %11684 = vmatprep.mubr.msk.bf16.mxu0 %vm13435_vm2, %v16661_v20  ;;  %11696 = vmatprep.mubr.msk.bf16.mxu1 %vm13435_vm2, %v16661_v20 }
 0x177   : > { %11679 = vmatpush3.bf16.msra.mxu0 %v12826_v46  ;;  %11691 = vmatpush3.bf16.msra.mxu1 %v12827_v47  ;;  %v12886_v46 = vld [vmem:[%s16717_s25 + $0x18] sm:$0xff]  }
 0x178   : > { %11680 = vmatprep.subr.bf16.mxu0 %v16661_v20  ;;  %11692 = vmatprep.subr.bf16.mxu1 %v16661_v20  ;;  %v12887_v47 = vld [vmem:[%s16717_s25 + $0x38] sm:$0xff]  }
 0x17b   : > { %11681 = vmatpush3.bf16.msra.mxu0 %v12828_v48  ;;  %11693 = vmatpush3.bf16.msra.mxu1 %v12829_v49  ;;  %v12888_v48 = vld [vmem:[%s16717_s25 + $0x40] sm:$0xff]  }
 0x17c   : > { %11682 = vmatprep.subr.bf16.mxu0 %v16661_v20  ;;  %11694 = vmatprep.subr.bf16.mxu1 %v16661_v20  ;;  %v12889_v49 = vld [vmem:[%s16717_s25 + $0x60] sm:$0xff]  }
 0x17f   : > { %11683 = vmatpush3.bf16.msra.mxu0 %v12830_v50  ;;  %11695 = vmatpush3.bf16.msra.mxu1 %v12831_v51  ;;  %v12890_v50 = vld [vmem:[%s16717_s25 + $0x48] sm:$0xff]  }
 0x180   : > { %11700 = vmatprep.subr.bf16.mxu0 %v16661_v20  ;;  %11712 = vmatprep.subr.bf16.mxu1 %v16661_v20  ;;  %v12891_v51 = vld [vmem:[%s16717_s25 + $0x68] sm:$0xff]  }
 0x182   : > { %11685 = vmatmul.mubr.msk.bf16.vlgmr.msra.gmra.mrb[4].mxu0 %vm771_vm0, %v13692_v45  ;;  %11697 = vmatmul.mubr.msk.bf16.vlgmr.msra.gmra.mrb[4].mxu1 %vm771_vm0, %v13692_v45 }
 0x183   : > { %11701 = vmatpush3.bf16.msra.mxu0 %v12832_v52  ;;  %11713 = vmatpush3.bf16.msra.mxu1 %v12833_v53  ;;  %v12892_v52 = vld [vmem:[%s16717_s25 + $0x50] sm:$0xff]  }
 0x184   : > { %11702 = vmatprep.subr.bf16.mxu0 %v16661_v20  ;;  %11714 = vmatprep.subr.bf16.mxu1 %v16661_v20  ;;  %v12893_v53 = vld [vmem:[%s16717_s25 + $0x70] sm:$0xff]  }
 0x185   : > { %11708 = vmatprep.mubr.msk.bf16.mxu0 %vm13435_vm2, %v16661_v20  ;;  %11720 = vmatprep.mubr.msk.bf16.mxu1 %vm13435_vm2, %v16661_v20 }
 0x187   : > { %11703 = vmatpush3.bf16.msra.mxu0 %v12834_v54  ;;  %11715 = vmatpush3.bf16.msra.mxu1 %v12835_v55  ;;  %v12894_v54 = vld [vmem:[%s16717_s25 + $0x58] sm:$0xff]  }
 0x188   : > { %11704 = vmatprep.subr.bf16.mxu0 %v16661_v20  ;;  %11716 = vmatprep.subr.bf16.mxu1 %v16661_v20  ;;  %v12895_v55 = vld [vmem:[%s16717_s25 + $0x78] sm:$0xff]  }
 0x18b   : > { %11705 = vmatpush3.bf16.msra.mxu0 %v12836_v56  ;;  %11717 = vmatpush3.bf16.msra.mxu1 %v12837_v57  ;;  %v12896_v56 = vld [vmem:[%s16717_s25 + $0x80] sm:$0xff]  }
 0x18c   : > { %11706 = vmatprep.subr.bf16.mxu0 %v16661_v20  ;;  %11718 = vmatprep.subr.bf16.mxu1 %v16661_v20  ;;  %v12897_v57 = vld [vmem:[%s16717_s25 + $0xa0] sm:$0xff]  }
 0x18f   : > { %11707 = vmatpush3.bf16.msra.mxu0 %v12838_v58  ;;  %11719 = vmatpush3.bf16.msra.mxu1 %v12839_v59  ;;  %v12898_v58 = vld [vmem:[%s16717_s25 + $0x88] sm:$0xff]  }
 0x190   : > { %11724 = vmatprep.subr.bf16.mxu0 %v16661_v20  ;;  %11736 = vmatprep.subr.bf16.mxu1 %v16661_v20  ;;  %v12899_v59 = vld [vmem:[%s16717_s25 + $0xa8] sm:$0xff]  }
 0x192   : > { %11709 = vmatmul.mubr.msk.bf16.vlgmr.msra.gmra.mrb[8].mxu0 %vm771_vm0, %v13692_v45  ;;  %11721 = vmatmul.mubr.msk.bf16.vlgmr.msra.gmra.mrb[8].mxu1 %vm771_vm0, %v13692_v45 }
 0x193   : > { %11725 = vmatpush3.bf16.msra.mxu0 %v12840_v60  ;;  %11737 = vmatpush3.bf16.msra.mxu1 %v12841_v61  ;;  %v12900_v60 = vld [vmem:[%s16717_s25 + $0x90] sm:$0xff]  }
 0x194   : > { %11726 = vmatprep.subr.bf16.mxu0 %v16661_v20  ;;  %11738 = vmatprep.subr.bf16.mxu1 %v16661_v20  ;;  %v12901_v61 = vld [vmem:[%s16717_s25 + $0xb0] sm:$0xff]  }
 0x195   : > { %11732 = vmatprep.mubr.msk.bf16.mxu0 %vm13435_vm2, %v16661_v20  ;;  %11744 = vmatprep.mubr.msk.bf16.mxu1 %vm13435_vm2, %v16661_v20 }
 0x197   : > { %11727 = vmatpush3.bf16.msra.mxu0 %v12842_v62  ;;  %11739 = vmatpush3.bf16.msra.mxu1 %v12843_v63  ;;  %v12902_v62 = vld [vmem:[%s16717_s25 + $0x98] sm:$0xff]  }
 0x198   : > { %11728 = vmatprep.subr.bf16.mxu0 %v16661_v20  ;;  %11740 = vmatprep.subr.bf16.mxu1 %v16661_v20  ;;  %v12903_v63 = vld [vmem:[%s16717_s25 + $0xb8] sm:$0xff]  }
 0x19b   : > { %11729 = vmatpush3.bf16.msra.mxu0 %v12844_v0  ;;  %11741 = vmatpush3.bf16.msra.mxu1 %v12845_v1  ;;  %v12904_v0 = vld [vmem:[%s16717_s25 + $0xc0] sm:$0xff]  }
 0x19c   : > { %11730 = vmatprep.subr.bf16.mxu0 %v16661_v20  ;;  %11742 = vmatprep.subr.bf16.mxu1 %v16661_v20  ;;  %v12905_v1 = vld [vmem:[%s16717_s25 + $0xe0] sm:$0xff]  }
 0x19f   : > { %11731 = vmatpush3.bf16.msra.mxu0 %v12846_v2  ;;  %11743 = vmatpush3.bf16.msra.mxu1 %v12847_v3  ;;  %v12906_v2 = vld [vmem:[%s16717_s25 + $0xc8] sm:$0xff]  }
 0x1a0   : > { %11748 = vmatprep.subr.bf16.mxu0 %v16661_v20  ;;  %11760 = vmatprep.subr.bf16.mxu1 %v16661_v20  ;;  %v12907_v3 = vld [vmem:[%s16717_s25 + $0xe8] sm:$0xff]  }
 0x1a2   : > { %11733 = vmatmul.mubr.msk.bf16.vlgmr.msra.gmra.mrb[12].mxu0 %vm771_vm0, %v13692_v45  ;;  %11745 = vmatmul.mubr.msk.bf16.vlgmr.msra.gmra.mrb[12].mxu1 %vm771_vm0, %v13692_v45 }
 0x1a3   : > { %11749 = vmatpush3.bf16.msra.mxu0 %v12848_v6  ;;  %11761 = vmatpush3.bf16.msra.mxu1 %v12849_v7  ;;  %v12908_v6 = vld [vmem:[%s16717_s25 + $0xd0] sm:$0xff]  }
 0x1a4   : > { %11750 = vmatprep.subr.bf16.mxu0 %v16661_v20  ;;  %11762 = vmatprep.subr.bf16.mxu1 %v16661_v20  ;;  %v12909_v7 = vld [vmem:[%s16717_s25 + $0xf0] sm:$0xff]  }
 0x1a5   : > { %11756 = vmatprep.mubr.msk.bf16.mxu0 %vm13435_vm2, %v16661_v20  ;;  %11768 = vmatprep.mubr.msk.bf16.mxu1 %vm13435_vm2, %v16661_v20 }
 0x1a7   : > { %11751 = vmatpush3.bf16.msra.mxu0 %v12850_v8  ;;  %11763 = vmatpush3.bf16.msra.mxu1 %v12851_v9  ;;  %v12910_v8 = vld [vmem:[%s16717_s25 + $0xd8] sm:$0xff]  }
 0x1a8   : > { %11752 = vmatprep.subr.bf16.mxu0 %v16661_v20  ;;  %11764 = vmatprep.subr.bf16.mxu1 %v16661_v20  ;;  %v12911_v9 = vld [vmem:[%s16717_s25 + $0xf8] sm:$0xff]  }
 0x1ab   : > { %11753 = vmatpush3.bf16.msra.mxu0 %v12852_v10  ;;  %11765 = vmatpush3.bf16.msra.mxu1 %v12853_v11 }
 0x1ac   : > { %11754 = vmatprep.subr.bf16.mxu0 %v16661_v20  ;;  %11766 = vmatprep.subr.bf16.mxu1 %v16661_v20 }
 0x1af   : > { %11755 = vmatpush3.bf16.msra.mxu0 %v12854_v12  ;;  %11767 = vmatpush3.bf16.msra.mxu1 %v12855_v13 }
 0x1b0   : > { %11772 = vmatprep.subr.bf16.mxu0 %v16661_v20  ;;  %11784 = vmatprep.subr.bf16.mxu1 %v16661_v20 }
 0x1b2   : > { %11757 = vmatmul.mubr.msk.bf16.vlgmr.msra.gmra.mrb[16].mxu0 %vm771_vm0, %v13692_v45  ;;  %11769 = vmatmul.mubr.msk.bf16.vlgmr.msra.gmra.mrb[16].mxu1 %vm771_vm0, %v13692_v45 }
 0x1b3   : > { %11773 = vmatpush3.bf16.msra.mxu0 %v12856_v14  ;;  %11785 = vmatpush3.bf16.msra.mxu1 %v12857_v15 }
 0x1b4   : > { %11774 = vmatprep.subr.bf16.mxu0 %v16661_v20  ;;  %11786 = vmatprep.subr.bf16.mxu1 %v16661_v20 }
 0x1b5   : > { %11780 = vmatprep.mubr.msk.bf16.mxu0 %vm13435_vm2, %v16661_v20  ;;  %11792 = vmatprep.mubr.msk.bf16.mxu1 %vm13435_vm2, %v16661_v20 }
 0x1b7   : > { %11775 = vmatpush3.bf16.msra.mxu0 %v12858_v16  ;;  %11787 = vmatpush3.bf16.msra.mxu1 %v12859_v17 }
 0x1b8   : > { %11776 = vmatprep.subr.bf16.mxu0 %v16661_v20  ;;  %11788 = vmatprep.subr.bf16.mxu1 %v16661_v20 }
 0x1bb   : > { %11777 = vmatpush3.bf16.msra.mxu0 %v12860_v18  ;;  %11789 = vmatpush3.bf16.msra.mxu1 %v12861_v19 }
 0x1bc   : > { %11778 = vmatprep.subr.bf16.mxu0 %v16661_v20  ;;  %11790 = vmatprep.subr.bf16.mxu1 %v16661_v20 }
 0x1bf   : > { %11779 = vmatpush3.bf16.msra.mxu0 %v12862_v21  ;;  %11791 = vmatpush3.bf16.msra.mxu1 %v12863_v22 }
 0x1c0   : > { %11796 = vmatprep.subr.bf16.mxu0 %v16661_v20  ;;  %11808 = vmatprep.subr.bf16.mxu1 %v16661_v20 }
 0x1c2   : > { %11781 = vmatmul.mubr.msk.bf16.vlgmr.msra.gmra.mrb[20].mxu0 %vm771_vm0, %v13692_v45  ;;  %11793 = vmatmul.mubr.msk.bf16.vlgmr.msra.gmra.mrb[20].mxu1 %vm771_vm0, %v13692_v45 }
 0x1c3   : > { %11797 = vmatpush3.bf16.msra.mxu0 %v12864_v23  ;;  %11809 = vmatpush3.bf16.msra.mxu1 %v12865_v24 }
 0x1c4   : > { %11798 = vmatprep.subr.bf16.mxu0 %v16661_v20  ;;  %11810 = vmatprep.subr.bf16.mxu1 %v16661_v20 }
 0x1c5   : > { %11804 = vmatprep.mubr.msk.bf16.mxu0 %vm13435_vm2, %v16661_v20  ;;  %11816 = vmatprep.mubr.msk.bf16.mxu1 %vm13435_vm2, %v16661_v20 }
 0x1c7   : > { %11799 = vmatpush3.bf16.msra.mxu0 %v12866_v25  ;;  %11811 = vmatpush3.bf16.msra.mxu1 %v12867_v26 }
 0x1c8   : > { %11800 = vmatprep.subr.bf16.mxu0 %v16661_v20  ;;  %11812 = vmatprep.subr.bf16.mxu1 %v16661_v20 }
 0x1cb   : > { %11801 = vmatpush3.bf16.msra.mxu0 %v12868_v27  ;;  %11813 = vmatpush3.bf16.msra.mxu1 %v12869_v28 }
 0x1cc   : > { %11802 = vmatprep.subr.bf16.mxu0 %v16661_v20  ;;  %11814 = vmatprep.subr.bf16.mxu1 %v16661_v20 }
 0x1cf   : > { %11803 = vmatpush3.bf16.msra.mxu0 %v12870_v29  ;;  %11815 = vmatpush3.bf16.msra.mxu1 %v12871_v30 }
 0x1d0   : > { %11820 = vmatprep.subr.bf16.mxu0 %v16661_v20  ;;  %11832 = vmatprep.subr.bf16.mxu1 %v16661_v20 }
 0x1d2   : > { %11805 = vmatmul.mubr.msk.bf16.vlgmr.msra.gmra.mrb[24].mxu0 %vm771_vm0, %v13692_v45  ;;  %11817 = vmatmul.mubr.msk.bf16.vlgmr.msra.gmra.mrb[24].mxu1 %vm771_vm0, %v13692_v45 }
 0x1d3   : > { %11821 = vmatpush3.bf16.msra.mxu0 %v12872_v31  ;;  %11833 = vmatpush3.bf16.msra.mxu1 %v12873_v32 }
 0x1d4   : > { %11822 = vmatprep.subr.bf16.mxu0 %v16661_v20  ;;  %11834 = vmatprep.subr.bf16.mxu1 %v16661_v20 }
 0x1d5   : > { %11828 = vmatprep.mubr.msk.bf16.mxu0 %vm13435_vm2, %v16661_v20  ;;  %11840 = vmatprep.mubr.msk.bf16.mxu1 %vm13435_vm2, %v16661_v20 }
 0x1d7   : > { %11823 = vmatpush3.bf16.msra.mxu0 %v12874_v33  ;;  %11835 = vmatpush3.bf16.msra.mxu1 %v12875_v34 }
 0x1d8   : > { %11824 = vmatprep.subr.bf16.mxu0 %v16661_v20  ;;  %11836 = vmatprep.subr.bf16.mxu1 %v16661_v20 }
 0x1db   : > { %11825 = vmatpush3.bf16.msra.mxu0 %v12876_v35  ;;  %11837 = vmatpush3.bf16.msra.mxu1 %v12877_v36 }
 0x1dc   : > { %11826 = vmatprep.subr.bf16.mxu0 %v16661_v20  ;;  %11838 = vmatprep.subr.bf16.mxu1 %v16661_v20 }
 0x1df   : > { %11827 = vmatpush3.bf16.msra.mxu0 %v12878_v37  ;;  %11839 = vmatpush3.bf16.msra.mxu1 %v12879_v38 }
 0x1e0   : > { %11844 = vmatprep.subr.bf16.mxu0 %v16661_v20  ;;  %11856 = vmatprep.subr.bf16.mxu1 %v16661_v20 }
 0x1e2   : > { %11829 = vmatmul.mubr.msk.bf16.vlgmr.msra.gmra.mrb[28].mxu0 %vm771_vm0, %v13692_v45  ;;  %11841 = vmatmul.mubr.msk.bf16.vlgmr.msra.gmra.mrb[28].mxu1 %vm771_vm0, %v13692_v45 }
 0x1e3   : > { %11845 = vmatpush3.bf16.msra.mxu0 %v12880_v39  ;;  %11857 = vmatpush3.bf16.msra.mxu1 %v12881_v40 }
 0x1e4   : > { %11846 = vmatprep.subr.bf16.mxu0 %v16661_v20  ;;  %11858 = vmatprep.subr.bf16.mxu1 %v16661_v20 }
 0x1e5   : > { %11852 = vmatprep.mubr.msk.bf16.mxu0 %vm13435_vm2, %v16661_v20  ;;  %11864 = vmatprep.mubr.msk.bf16.mxu1 %vm13435_vm2, %v16661_v20 }
 0x1e7   : > { %11847 = vmatpush3.bf16.msra.mxu0 %v12882_v41  ;;  %11859 = vmatpush3.bf16.msra.mxu1 %v12883_v42 }
 0x1e8   : > { %11848 = vmatprep.subr.bf16.mxu0 %v16661_v20  ;;  %11860 = vmatprep.subr.bf16.mxu1 %v16661_v20 }
 0x1eb   : > { %11849 = vmatpush3.bf16.msra.mxu0 %v12884_v43  ;;  %11861 = vmatpush3.bf16.msra.mxu1 %v12885_v44 }
 0x1ec   : > { %11850 = vmatprep.subr.bf16.mxu0 %v16661_v20  ;;  %11862 = vmatprep.subr.bf16.mxu1 %v16661_v20 }
 0x1ef   : > { %11851 = vmatpush3.bf16.msra.mxu0 %v12886_v46  ;;  %11863 = vmatpush3.bf16.msra.mxu1 %v12887_v47 }
 0x1f0   : > { %11868 = vmatprep.subr.bf16.mxu0 %v16661_v20  ;;  %11880 = vmatprep.subr.bf16.mxu1 %v16661_v20 }
 0x1f2   : > { %11853 = vmatmul.mubr.msk.bf16.vlgmr.msra.gmra.mrb[32].mxu0 %vm771_vm0, %v13692_v45  ;;  %11865 = vmatmul.mubr.msk.bf16.vlgmr.msra.gmra.mrb[32].mxu1 %vm771_vm0, %v13692_v45 }
 0x1f3   : > { %11869 = vmatpush3.bf16.msra.mxu0 %v12888_v48  ;;  %11881 = vmatpush3.bf16.msra.mxu1 %v12889_v49 }
 0x1f4   : > { %11870 = vmatprep.subr.bf16.mxu0 %v16661_v20  ;;  %11882 = vmatprep.subr.bf16.mxu1 %v16661_v20 }
 0x1f5   : > { %11876 = vmatprep.mubr.msk.bf16.mxu0 %vm13435_vm2, %v16661_v20  ;;  %11888 = vmatprep.mubr.msk.bf16.mxu1 %vm13435_vm2, %v16661_v20 }
 0x1f7   : > { %11871 = vmatpush3.bf16.msra.mxu0 %v12890_v50  ;;  %11883 = vmatpush3.bf16.msra.mxu1 %v12891_v51 }
 0x1f8   : > { %11872 = vmatprep.subr.bf16.mxu0 %v16661_v20  ;;  %11884 = vmatprep.subr.bf16.mxu1 %v16661_v20 }
 0x1fb   : > { %11873 = vmatpush3.bf16.msra.mxu0 %v12892_v52  ;;  %11885 = vmatpush3.bf16.msra.mxu1 %v12893_v53 }
 0x1fc   : > { %11874 = vmatprep.subr.bf16.mxu0 %v16661_v20  ;;  %11886 = vmatprep.subr.bf16.mxu1 %v16661_v20 }
 0x1ff   : > { %11875 = vmatpush3.bf16.msra.mxu0 %v12894_v54  ;;  %11887 = vmatpush3.bf16.msra.mxu1 %v12895_v55 }
 0x200   : > { %11892 = vmatprep.subr.bf16.mxu0 %v16661_v20  ;;  %11904 = vmatprep.subr.bf16.mxu1 %v16661_v20 }
 0x202   : > { %11877 = vmatmul.mubr.msk.bf16.vlgmr.msra.gmra.mrb[36].mxu0 %vm771_vm0, %v13692_v45  ;;  %11889 = vmatmul.mubr.msk.bf16.vlgmr.msra.gmra.mrb[36].mxu1 %vm771_vm0, %v13692_v45 }
 0x203   : > { %11893 = vmatpush3.bf16.msra.mxu0 %v12896_v56  ;;  %11905 = vmatpush3.bf16.msra.mxu1 %v12897_v57 }
 0x204   : > { %11894 = vmatprep.subr.bf16.mxu0 %v16661_v20  ;;  %11906 = vmatprep.subr.bf16.mxu1 %v16661_v20 }
 0x205   : > { %11900 = vmatprep.mubr.msk.bf16.mxu0 %vm13435_vm2, %v16661_v20  ;;  %11912 = vmatprep.mubr.msk.bf16.mxu1 %vm13435_vm2, %v16661_v20 }
 0x207   : > { %11895 = vmatpush3.bf16.msra.mxu0 %v12898_v58  ;;  %11907 = vmatpush3.bf16.msra.mxu1 %v12899_v59 }
 0x208   : > { %11896 = vmatprep.subr.bf16.mxu0 %v16661_v20  ;;  %11908 = vmatprep.subr.bf16.mxu1 %v16661_v20 }
 0x20b   : > { %11897 = vmatpush3.bf16.msra.mxu0 %v12900_v60  ;;  %11909 = vmatpush3.bf16.msra.mxu1 %v12901_v61 }
 0x20c   : > { %11898 = vmatprep.subr.bf16.mxu0 %v16661_v20  ;;  %11910 = vmatprep.subr.bf16.mxu1 %v16661_v20 }
 0x20f   : > { %11899 = vmatpush3.bf16.msra.mxu0 %v12902_v62  ;;  %11911 = vmatpush3.bf16.msra.mxu1 %v12903_v63 }
 0x210   : > { %11916 = vmatprep.subr.bf16.mxu0 %v16661_v20  ;;  %11928 = vmatprep.subr.bf16.mxu1 %v16661_v20 }
 0x212   : > { %11901 = vmatmul.mubr.msk.bf16.vlgmr.msra.gmra.mrb[40].mxu0 %vm771_vm0, %v13692_v45  ;;  %11913 = vmatmul.mubr.msk.bf16.vlgmr.msra.gmra.mrb[40].mxu1 %vm771_vm0, %v13692_v45 }
 0x213   : > { %11917 = vmatpush3.bf16.msra.mxu0 %v12904_v0  ;;  %11929 = vmatpush3.bf16.msra.mxu1 %v12905_v1 }
 0x214   : > { %11918 = vmatprep.subr.bf16.mxu0 %v16661_v20  ;;  %11930 = vmatprep.subr.bf16.mxu1 %v16661_v20 }
 0x215   : > { %11924 = vmatprep.mubr.msk.bf16.mxu0 %vm13435_vm2, %v16661_v20  ;;  %11936 = vmatprep.mubr.msk.bf16.mxu1 %vm13435_vm2, %v16661_v20 }
 0x217   : > { %11919 = vmatpush3.bf16.msra.mxu0 %v12906_v2  ;;  %11931 = vmatpush3.bf16.msra.mxu1 %v12907_v3 }
 0x218   : > { %11920 = vmatprep.subr.bf16.mxu0 %v16661_v20  ;;  %11932 = vmatprep.subr.bf16.mxu1 %v16661_v20 }
 0x21b   : > { %11921 = vmatpush3.bf16.msra.mxu0 %v12908_v6  ;;  %11933 = vmatpush3.bf16.msra.mxu1 %v12909_v7 }
 0x21c   : > { %11922 = vmatprep.subr.bf16.mxu0 %v16661_v20  ;;  %11934 = vmatprep.subr.bf16.mxu1 %v16661_v20 }
 0x21f   : > { %11923 = vmatpush3.bf16.msra.mxu0 %v12910_v8  ;;  %11935 = vmatpush3.bf16.msra.mxu1 %v12911_v9 }
 0x222   : > { %11925 = vmatmul.mubr.msk.bf16.vlgmr.msra.gmra.mrb[44].mxu0 %vm771_vm0, %v13692_v45  ;;  %11937 = vmatmul.mubr.msk.bf16.vlgmr.msra.gmra.mrb[44].mxu1 %vm771_vm0, %v13692_v45 }
 0x245   : > { %v14130_v10 = vpop.f32.mrb[0].mxu0  ;;  %v14132_v11 = vpop.f32.mrb[0].mxu1 }
 0x246   : > { %v11662_v12 = vpop.f32.mrb[1].mxu0  ;;  %v11674_v13 = vpop.f32.mrb[1].mxu1  ;;  %v2575_v14 = vsel %vm2574_vm3, %v14130_v10, 0.0  ;;  %v2582_v19 = vsel %vm2574_vm3, %v14132_v11, 0.0 }
 0x247   : > { %v14136_v15 = vpop.f32.mrb[2].mxu1  ;;  %2576 = vadd.xlane.f32.xlu0 %v2575_v14  ;;  %v14138_v16 = vpop.f32.mrb[2].mxu0 }
 0x248   : > { %v11663_v17 = vpop.f32.mrb[3].mxu0  ;;  %v11675_v18 = vpop.f32.mrb[3].mxu1  ;;  %v2579_v45 = vsel %vm2578_vm4, %v14138_v16, 0.0  ;;  %v2585_v21 = vsel %vm2578_vm4, %v14136_v15, 0.0 }
 0x249   : > { %2580 = vadd.xlane.f32.xlu1 %v2579_v45 }
 0x24b   : > { %2583 = vadd.xlane.f32.xlu0 %v2582_v19 }
 0x24d   : > { %2586 = vadd.xlane.f32.xlu1 %v2585_v21 }
 0x255   : > { %v14146_v22 = vpop.f32.mrb[4].mxu0  ;;  %v14148_v23 = vpop.f32.mrb[4].mxu1 }
 0x256   : > { %v11686_v24 = vpop.f32.mrb[5].mxu0  ;;  %v11698_v25 = vpop.f32.mrb[5].mxu1  ;;  %v2588_v26 = vsel %vm2574_vm3, %v14146_v22, 0.0  ;;  %v2594_v32 = vsel %vm2574_vm3, %v14148_v23, 0.0 }
 0x257   : > { %v14152_v27 = vpop.f32.mrb[6].mxu1  ;;  %2589 = vadd.xlane.f32.xlu0 %v2588_v26  ;;  %v14154_v28 = vpop.f32.mrb[6].mxu0 }
 0x258   : > { %v11687_v29 = vpop.f32.mrb[7].mxu0  ;;  %v11699_v30 = vpop.f32.mrb[7].mxu1  ;;  %v2591_v31 = vsel %vm2578_vm4, %v14154_v28, 0.0  ;;  %v2597_v33 = vsel %vm2578_vm4, %v14152_v27, 0.0 }
 0x259   : > { %2592 = vadd.xlane.f32.xlu1 %v2591_v31 }
 0x25b   : > { %2595 = vadd.xlane.f32.xlu0 %v2594_v32 }
 0x25d   : > { %2598 = vadd.xlane.f32.xlu1 %v2597_v33 }
 0x265   : > { %v14162_v34 = vpop.f32.mrb[8].mxu0  ;;  %v14164_v35 = vpop.f32.mrb[8].mxu1 }
 0x266   : > { %v11710_v36 = vpop.f32.mrb[9].mxu0  ;;  %v11722_v37 = vpop.f32.mrb[9].mxu1  ;;  %v2600_v38 = vsel %vm2574_vm3, %v14162_v34, 0.0  ;;  %v2606_v44 = vsel %vm2574_vm3, %v14164_v35, 0.0 }
 0x267   : > { %v14168_v39 = vpop.f32.mrb[10].mxu1  ;;  %2601 = vadd.xlane.f32.xlu0 %v2600_v38  ;;  %v14170_v40 = vpop.f32.mrb[10].mxu0 }
 0x268   : > { %v11711_v41 = vpop.f32.mrb[11].mxu0  ;;  %v11723_v42 = vpop.f32.mrb[11].mxu1  ;;  %v2603_v43 = vsel %vm2578_vm4, %v14170_v40, 0.0  ;;  %v2609_v46 = vsel %vm2578_vm4, %v14168_v39, 0.0 }
 0x269   : > { %2604 = vadd.xlane.f32.xlu1 %v2603_v43 }
 0x26b   : > { %2607 = vadd.xlane.f32.xlu0 %v2606_v44 }
 0x26d   : > { %2610 = vadd.xlane.f32.xlu1 %v2609_v46 }
 0x275   : > { %v14178_v47 = vpop.f32.mrb[12].mxu0  ;;  %v14180_v48 = vpop.f32.mrb[12].mxu1 }
 0x276   : > { %v11734_v49 = vpop.f32.mrb[13].mxu0  ;;  %v11746_v50 = vpop.f32.mrb[13].mxu1 }
 0x277   : > { %v14182_v51 = vpop.f32.mrb[14].mxu0  ;;  %v14184_v52 = vpop.f32.mrb[14].mxu1 }
 0x278   : > { %v11735_v53 = vpop.f32.mrb[15].mxu0  ;;  %v11747_v54 = vpop.f32.mrb[15].mxu1 }
 0x285   : > { %v14186_v55 = vpop.f32.mrb[16].mxu0  ;;  %v14188_v56 = vpop.f32.mrb[16].mxu1 }
 0x286   : > { %v11758_v57 = vpop.f32.mrb[17].mxu0  ;;  %v11770_v58 = vpop.f32.mrb[17].mxu1  ;;  %v2847_v59 = vsel %vm2574_vm3, %v14186_v55, 0.0  ;;  %v2853_v1 = vsel %vm2574_vm3, %v14188_v56, 0.0 }
 0x287   : > { %v14192_v60 = vpop.f32.mrb[18].mxu1  ;;  %2848 = vadd.xlane.f32.xlu0 %v2847_v59  ;;  %v14194_v61 = vpop.f32.mrb[18].mxu0 }
 0x288   : > { %v11759_v62 = vpop.f32.mrb[19].mxu0  ;;  %v11771_v63 = vpop.f32.mrb[19].mxu1  ;;  %v2850_v0 = vsel %vm2578_vm4, %v14194_v61, 0.0  ;;  %v2856_v2 = vsel %vm2578_vm4, %v14192_v60, 0.0 }
 0x289   : > { %2851 = vadd.xlane.f32.xlu1 %v2850_v0  ;;  %v2612_v62 = vsel %vm2574_vm3, %v14178_v47, 0.0  ;;  %v2615_v63 = vsel %vm2578_vm4, %v14182_v51, 0.0  ;;  %v2618_v0 = vsel %vm2574_vm3, %v14180_v48, 0.0 }
 0x28b   : > { %2854 = vadd.xlane.f32.xlu0 %v2853_v1  ;;  %v2621_v1 = vsel %vm2578_vm4, %v14184_v52, 0.0 }
 0x28d   : > { %2857 = vadd.xlane.f32.xlu1 %v2856_v2 }
 0x295   : > { %v14202_v3 = vpop.f32.mrb[20].mxu0  ;;  %v14204_v6 = vpop.f32.mrb[20].mxu1 }
 0x296   : > { %v11782_v7 = vpop.f32.mrb[21].mxu0  ;;  %v11794_v8 = vpop.f32.mrb[21].mxu1  ;;  %v2859_v9 = vsel %vm2574_vm3, %v14202_v3, 0.0  ;;  %v2865_v45 = vsel %vm2574_vm3, %v14204_v6, 0.0 }
 0x297   : > { %v14208_v12 = vpop.f32.mrb[22].mxu1  ;;  %2860 = vadd.xlane.f32.xlu0 %v2859_v9  ;;  %v14210_v13 = vpop.f32.mrb[22].mxu0 }
 0x298   : > { %v11783_v14 = vpop.f32.mrb[23].mxu0  ;;  %v11795_v17 = vpop.f32.mrb[23].mxu1  ;;  %v2862_v18 = vsel %vm2578_vm4, %v14210_v13, 0.0  ;;  %v2868_v19 = vsel %vm2578_vm4, %v14208_v12, 0.0 }
 0x299   : > { %2863 = vadd.xlane.f32.xlu1 %v2862_v18 }
 0x29b   : > { %2866 = vadd.xlane.f32.xlu0 %v2865_v45 }
 0x29d   : > { %2869 = vadd.xlane.f32.xlu1 %v2868_v19 }
 0x2a5   : > { %v14218_v21 = vpop.f32.mrb[24].mxu0  ;;  %v14220_v24 = vpop.f32.mrb[24].mxu1 }
 0x2a6   : > { %v11806_v25 = vpop.f32.mrb[25].mxu0  ;;  %v11818_v26 = vpop.f32.mrb[25].mxu1  ;;  %v2871_v29 = vsel %vm2574_vm3, %v14218_v21, 0.0  ;;  %v2877_v37 = vsel %vm2574_vm3, %v14220_v24, 0.0 }
 0x2a7   : > { %v14224_v30 = vpop.f32.mrb[26].mxu1  ;;  %2872 = vadd.xlane.f32.xlu0 %v2871_v29  ;;  %v14226_v31 = vpop.f32.mrb[26].mxu0 }
 0x2a8   : > { %v11807_v32 = vpop.f32.mrb[27].mxu0  ;;  %v11819_v33 = vpop.f32.mrb[27].mxu1  ;;  %v2874_v36 = vsel %vm2578_vm4, %v14226_v31, 0.0  ;;  %v2880_v38 = vsel %vm2578_vm4, %v14224_v30, 0.0 }
 0x2a9   : > { %2875 = vadd.xlane.f32.xlu1 %v2874_v36 }
 0x2ab   : > { %2878 = vadd.xlane.f32.xlu0 %v2877_v37 }
 0x2ad   : > { %2881 = vadd.xlane.f32.xlu1 %v2880_v38 }
 0x2b5   : > { %v14234_v41 = vpop.f32.mrb[28].mxu0  ;;  %v14236_v42 = vpop.f32.mrb[28].mxu1 }
 0x2b6   : > { %v11830_v43 = vpop.f32.mrb[29].mxu0  ;;  %v11842_v44 = vpop.f32.mrb[29].mxu1  ;;  %v2883_v46 = vsel %vm2574_vm3, %v14234_v41, 0.0  ;;  %v2889_v58 = vsel %vm2574_vm3, %v14236_v42, 0.0 }
 0x2b7   : > { %v14240_v49 = vpop.f32.mrb[30].mxu1  ;;  %2884 = vadd.xlane.f32.xlu0 %v2883_v46  ;;  %v14242_v50 = vpop.f32.mrb[30].mxu0 }
 0x2b8   : > { %v11831_v53 = vpop.f32.mrb[31].mxu0  ;;  %v11843_v54 = vpop.f32.mrb[31].mxu1  ;;  %v2886_v57 = vsel %vm2578_vm4, %v14242_v50, 0.0  ;;  %v2892_v59 = vsel %vm2578_vm4, %v14240_v49, 0.0 }
 0x2b9   : > { %2887 = vadd.xlane.f32.xlu1 %v2886_v57 }
 0x2bb   : > { %2890 = vadd.xlane.f32.xlu0 %v2889_v58 }
 0x2bd   : > { %2893 = vadd.xlane.f32.xlu1 %v2892_v59 }
 0x2bf   : > { %2613 = vadd.xlane.f32.xlu0 %v2612_v62 }
 0x2c1   : > { %2616 = vadd.xlane.f32.xlu1 %v2615_v63 }
 0x2c3   : > { %2619 = vadd.xlane.f32.xlu0 %v2618_v0 }
 0x2c5   : > { %v2175_v2 = vpop.f32.mrb[32].mxu1  ;;  %2622 = vadd.xlane.f32.xlu1 %v2621_v1  ;;  %v2110_v7 = vpop.f32.mrb[32].mxu0 }
 0x2c6   : > { %v11854_v8 = vpop.f32.mrb[33].mxu0  ;;  %v11866_v9 = vpop.f32.mrb[33].mxu1 }
 0x2c7   : > { %v2113_v14 = vpop.f32.mrb[34].mxu0  ;;  %v2178_v17 = vpop.f32.mrb[34].mxu1 }
 0x2c8   : > { %v14258_v18 = vpack.c.bf16 %v2113_v14, %v2110_v7  ;;  %v14260_v45 = vpack.c.bf16 %v2178_v17, %v2175_v2  ;;  %v11855_v19 = vpop.f32.mrb[35].mxu0  ;;  %v11867_v25 = vpop.f32.mrb[35].mxu1 }
 0x2d4   : > { %v2577_v26 = vpop.xlane.xlu0 %2576 }
 0x2d5   : > { %v2305_v29 = vpop.f32.mrb[36].mxu1  ;;  %v2625_v32 = vmul.f32 0.125, %v2577_v26  ;;  %v2240_v33 = vpop.f32.mrb[36].mxu0 }
 0x2d6   : > { %v11878_v36 = vpop.f32.mrb[37].mxu0  ;;  %v11890_v37 = vpop.f32.mrb[37].mxu1 }
 0x2d7   : > { %v14263_v38 = vsub.f32 %v14130_v10, %v2625_v32  ;;  %v2308_v43 = vpop.f32.mrb[38].mxu1  ;;  %v2581_v44 = vpop.xlane.xlu1 %2580 }
 0x2d8   : > { %v14265_v46 = vpack.c.bf16 %v2308_v43, %v2305_v29  ;;  %v2626_v53 = vmul.f32 0.125, %v2581_v44  ;;  %v2243_v54 = vpop.f32.mrb[38].mxu0  ;;  %v11891_v57 = vpop.f32.mrb[39].mxu1 }
 0x2d9   : > { %v14267_v58 = vpack.c.bf16 %v2243_v54, %v2240_v33  ;;  %v11879_v59 = vpop.f32.mrb[39].mxu0  ;;  %v2584_v62 = vpop.xlane.xlu0 %2583  ;;  %v2657_v63 = vmul.f32 %v14263_v38, %v14263_v38 }
 0x2da   : > { %v14272_v0 = vsub.f32 %v14138_v16, %v2626_v53  ;;  %v2627_v1 = vmul.f32 0.125, %v2584_v62 }
 0x2db   : > { %v2587_v10 = vpop.xlane.xlu1 %2586  ;;  %v2673_v2 = vsel %vm2574_vm3, %v2657_v63, 0.0 }
 0x2dc   : > { %v14276_v7 = vsub.f32 %v14132_v11, %v2627_v1  ;;  %v2628_v8 = vmul.f32 0.125, %v2587_v10  ;;  %2674 = vadd.xlane.f32.xlu0 %v2673_v2  ;;  %v2658_v9 = vmul.f32 %v14272_v0, %v14272_v0 }
 0x2de   : > { %v14281_v14 = vsub.f32 %v14136_v15, %v2628_v8  ;;  %v2676_v17 = vsel %vm2578_vm4, %v2658_v9, 0.0  ;;  %v2659_v16 = vmul.f32 %v14276_v7, %v14276_v7 }
 0x2df   : > { %2677 = vadd.xlane.f32.xlu1 %v2676_v17 }
 0x2e0   : > { %v2679_v19 = vsel %vm2574_vm3, %v2659_v16, 0.0  ;;  %v2660_v11 = vmul.f32 %v14281_v14, %v14281_v14 }
 0x2e1   : > { %2680 = vadd.xlane.f32.xlu0 %v2679_v19 }
 0x2e2   : > { %v2682_v25 = vsel %vm2578_vm4, %v2660_v11, 0.0 }
 0x2e3   : > { %2683 = vadd.xlane.f32.xlu1 %v2682_v25 }
 0x2e4   : > { %v2590_v26 = vpop.xlane.xlu0 %2589 }
 0x2e5   : > { %v2629_v29 = vmul.f32 0.125, %v2590_v26  ;;  %v2370_v32 = vpop.f32.mrb[40].mxu0  ;;  %v2435_v15 = vpop.f32.mrb[40].mxu1 }
 0x2e6   : > { %v11914_v33 = vpop.f32.mrb[41].mxu1  ;;  %v2593_v36 = vpop.xlane.xlu1 %2592 }
 0x2e7   : > { %v14291_v37 = vsub.f32 %v14146_v22, %v2629_v29  ;;  %v2630_v43 = vmul.f32 0.125, %v2593_v36  ;;  %v11902_v44 = vpop.f32.mrb[41].mxu0  ;;  %v2438_v53 = vpop.f32.mrb[42].mxu1 }
 0x2e8   : > { %v2373_v54 = vpop.f32.mrb[42].mxu0  ;;  %v14293_v57 = vpack.c.bf16 %v2438_v53, %v2435_v15  ;;  %v11915_v59 = vpop.f32.mrb[43].mxu1 }
 0x2e9   : > { %v14296_v62 = vsub.f32 %v14154_v28, %v2630_v43  ;;  %v14298_v63 = vpack.c.bf16 %v2373_v54, %v2370_v32  ;;  %v2596_v1 = vpop.xlane.xlu0 %2595  ;;  %v11903_v10 = vpop.f32.mrb[43].mxu0  ;;  %v2661_v2 = vmul.f32 %v14291_v37, %v14291_v37 }
 0x2ea   : > { %v2631_v8 = vmul.f32 0.125, %v2596_v1  ;;  %v2599_v22 = vpop.xlane.xlu1 %2598 }
 0x2eb   : > { %v2632_v9 = vmul.f32 0.125, %v2599_v22  ;;  %v2685_v17 = vsel %vm2574_vm3, %v2661_v2, 0.0  ;;  %v2662_v16 = vmul.f32 %v14296_v62, %v14296_v62 }
 0x2ec   : > { %v14306_v19 = vsub.f32 %v14148_v23, %v2631_v8  ;;  %2686 = vadd.xlane.f32.xlu0 %v2685_v17 }
 0x2ed   : > { %v14309_v28 = vsub.f32 %v14152_v27, %v2632_v9  ;;  %v2688_v11 = vsel %vm2578_vm4, %v2662_v16, 0.0 }
 0x2ee   : > { %2689 = vadd.xlane.f32.xlu1 %v2688_v11  ;;  %v2663_v25 = vmul.f32 %v14306_v19, %v14306_v19 }
 0x2ef   : > { %v2664_v26 = vmul.f32 %v14309_v28, %v14309_v28 }
 0x2f0   : > { %v2691_v29 = vsel %vm2574_vm3, %v2663_v25, 0.0 }
 0x2f1   : > { %2692 = vadd.xlane.f32.xlu0 %v2691_v29  ;;  %v2694_v32 = vsel %vm2578_vm4, %v2664_v26, 0.0 }
 0x2f2   : > { %2695 = vadd.xlane.f32.xlu1 %v2694_v32 }
 0x2f4   : > { %v2602_v23 = vpop.xlane.xlu0 %2601 }
 0x2f5   : > { %v2633_v15 = vmul.f32 0.125, %v2602_v23  ;;  %v2500_v33 = vpop.f32.mrb[44].mxu0  ;;  %v2565_v27 = vpop.f32.mrb[44].mxu1 }
 0x2f6   : > { %v11938_v36 = vpop.f32.mrb[45].mxu1  ;;  %v2605_v43 = vpop.xlane.xlu1 %2604 }
 0x2f7   : > { %v14319_v44 = vsub.f32 %v14162_v34, %v2633_v15  ;;  %v2634_v53 = vmul.f32 0.125, %v2605_v43  ;;  %v11926_v54 = vpop.f32.mrb[45].mxu0  ;;  %v2568_v59 = vpop.f32.mrb[46].mxu1 }
 0x2f8   : > { %v2503_v1 = vpop.f32.mrb[46].mxu0  ;;  %v14321_v10 = vpack.c.bf16 %v2568_v59, %v2565_v27  ;;  %v11939_v2 = vpop.f32.mrb[47].mxu1 }
 0x2f9   : > { %v14324_v8 = vsub.f32 %v14170_v40, %v2634_v53  ;;  %v14326_v22 = vpack.c.bf16 %v2503_v1, %v2500_v33  ;;  %v2608_v9 = vpop.xlane.xlu0 %2607  ;;  %v11927_v17 = vpop.f32.mrb[47].mxu0  ;;  %v2665_v16 = vmul.f32 %v14319_v44, %v14319_v44 }
 0x2fa   : > { %16718 = vst [vmem:[#allocation15_spill] sm:$0xff] %v14321_v10  ;;  %v2635_v11 = vmul.f32 0.125, %v2608_v9  ;;  %v2611_v34 = vpop.xlane.xlu1 %2610 }
 0x2fb   : > { %16719 = vst [vmem:[#allocation16_spill] sm:$0xff] %v14326_v22  ;;  %v2636_v25 = vmul.f32 0.125, %v2611_v34  ;;  %v2697_v26 = vsel %vm2574_vm3, %v2665_v16, 0.0  ;;  %v2666_v29 = vmul.f32 %v14324_v8, %v14324_v8 }
 0x2fc   : > { %v14334_v32 = vsub.f32 %v14164_v35, %v2635_v11  ;;  %2698 = vadd.xlane.f32.xlu0 %v2697_v26 }
 0x2fd   : > { %v14337_v40 = vsub.f32 %v14168_v39, %v2636_v25  ;;  %v2700_v23 = vsel %vm2578_vm4, %v2666_v29, 0.0 }
 0x2fe   : > { %2701 = vadd.xlane.f32.xlu1 %v2700_v23  ;;  %v2667_v15 = vmul.f32 %v14334_v32, %v14334_v32 }
 0x2ff   : > { %v2668_v33 = vmul.f32 %v14337_v40, %v14337_v40 }
 0x300   : > { %v2703_v27 = vsel %vm2574_vm3, %v2667_v15, 0.0 }
 0x301   : > { %2704 = vadd.xlane.f32.xlu0 %v2703_v27  ;;  %v2706_v36 = vsel %vm2578_vm4, %v2668_v33, 0.0 }
 0x302   : > { %2707 = vadd.xlane.f32.xlu1 %v2706_v36 }
 0x314   : > { %v2849_v35 = vpop.xlane.xlu0 %2848 }
 0x315   : > { %v2895_v43 = vmul.f32 0.125, %v2849_v35 }
 0x316   : > { %v2852_v53 = vpop.xlane.xlu1 %2851 }
 0x317   : > { %v14347_v39 = vsub.f32 %v14186_v55, %v2895_v43  ;;  %v2896_v54 = vmul.f32 0.125, %v2852_v53 }
 0x318   : > { %v2855_v59 = vpop.xlane.xlu0 %2854 }
 0x319   : > { %v14350_v1 = vsub.f32 %v14194_v61, %v2896_v54  ;;  %v2897_v2 = vmul.f32 0.125, %v2855_v59  ;;  %v2927_v9 = vmul.f32 %v14347_v39, %v14347_v39 }
 0x31a   : > { %v2858_v17 = vpop.xlane.xlu1 %2857 }
 0x31b   : > { %v14355_v16 = vsub.f32 %v14188_v56, %v2897_v2  ;;  %v2898_v11 = vmul.f32 0.125, %v2858_v17  ;;  %v2943_v34 = vsel %vm2574_vm3, %v2927_v9, 0.0  ;;  %v2928_v55 = vmul.f32 %v14350_v1, %v14350_v1 }
 0x31c   : > { %2944 = vadd.xlane.f32.xlu0 %v2943_v34 }
 0x31d   : > { %v14361_v25 = vsub.f32 %v14192_v60, %v2898_v11  ;;  %v2946_v61 = vsel %vm2578_vm4, %v2928_v55, 0.0  ;;  %v2929_v26 = vmul.f32 %v14355_v16, %v14355_v16 }
 0x31e   : > { %2947 = vadd.xlane.f32.xlu1 %v2946_v61 }
 0x31f   : > { %v2949_v29 = vsel %vm2574_vm3, %v2929_v26, 0.0  ;;  %v2930_v56 = vmul.f32 %v14361_v25, %v14361_v25 }
 0x320   : > { %2950 = vadd.xlane.f32.xlu0 %v2949_v29 }
 0x321   : > { %v2952_v23 = vsel %vm2578_vm4, %v2930_v56, 0.0 }
 0x322   : > { %2953 = vadd.xlane.f32.xlu1 %v2952_v23 }
 0x324   : > { %v2861_v15 = vpop.xlane.xlu0 %2860 }
 0x325   : > { %v2899_v33 = vmul.f32 0.125, %v2861_v15 }
 0x326   : > { %v2864_v27 = vpop.xlane.xlu1 %2863 }
 0x327   : > { %v14371_v60 = vsub.f32 %v14202_v3, %v2899_v33  ;;  %v2900_v36 = vmul.f32 0.125, %v2864_v27 }
 0x328   : > { %v2867_v35 = vpop.xlane.xlu0 %2866 }
 0x329   : > { %v14374_v43 = vsub.f32 %v14210_v13, %v2900_v36  ;;  %v2901_v53 = vmul.f32 0.125, %v2867_v35  ;;  %v2931_v54 = vmul.f32 %v14371_v60, %v14371_v60 }
 0x32a   : > { %v2870_v59 = vpop.xlane.xlu1 %2869 }
 0x32b   : > { %v14379_v2 = vsub.f32 %v14204_v6, %v2901_v53  ;;  %v2902_v9 = vmul.f32 0.125, %v2870_v59  ;;  %v2955_v17 = vsel %vm2574_vm3, %v2931_v54, 0.0  ;;  %v2932_v3 = vmul.f32 %v14374_v43, %v14374_v43 }
 0x32c   : > { %2956 = vadd.xlane.f32.xlu0 %v2955_v17 }
 0x32d   : > { %v14385_v11 = vsub.f32 %v14208_v12, %v2902_v9  ;;  %v2958_v13 = vsel %vm2578_vm4, %v2932_v3, 0.0  ;;  %v2933_v34 = vmul.f32 %v14379_v2, %v14379_v2 }
 0x32e   : > { %2959 = vadd.xlane.f32.xlu1 %v2958_v13 }
 0x32f   : > { %v2961_v55 = vsel %vm2574_vm3, %v2933_v34, 0.0  ;;  %v2934_v6 = vmul.f32 %v14385_v11, %v14385_v11 }
 0x330   : > { %2962 = vadd.xlane.f32.xlu0 %v2961_v55 }
 0x331   : > { %v2964_v61 = vsel %vm2578_vm4, %v2934_v6, 0.0 }
 0x332   : > { %2965 = vadd.xlane.f32.xlu1 %v2964_v61 }
 0x334   : > { %v2873_v26 = vpop.xlane.xlu0 %2872 }
 0x335   : > { %v2903_v29 = vmul.f32 0.125, %v2873_v26 }
 0x336   : > { %v2876_v56 = vpop.xlane.xlu1 %2875 }
 0x337   : > { %v14395_v12 = vsub.f32 %v14218_v21, %v2903_v29  ;;  %v2904_v23 = vmul.f32 0.125, %v2876_v56 }
 0x338   : > { %v2879_v15 = vpop.xlane.xlu0 %2878 }
 0x339   : > { %v14398_v33 = vsub.f32 %v14226_v31, %v2904_v23  ;;  %v2905_v27 = vmul.f32 0.125, %v2879_v15  ;;  %v2935_v36 = vmul.f32 %v14395_v12, %v14395_v12 }
 0x33a   : > { %v2882_v35 = vpop.xlane.xlu1 %2881 }
 0x33b   : > { %v14403_v53 = vsub.f32 %v14220_v24, %v2905_v27  ;;  %v2906_v54 = vmul.f32 0.125, %v2882_v35  ;;  %v2967_v59 = vsel %vm2574_vm3, %v2935_v36, 0.0  ;;  %v2936_v21 = vmul.f32 %v14398_v33, %v14398_v33 }
 0x33c   : > { %2968 = vadd.xlane.f32.xlu0 %v2967_v59 }
 0x33d   : > { %v14409_v9 = vsub.f32 %v14224_v30, %v2906_v54  ;;  %v2970_v31 = vsel %vm2578_vm4, %v2936_v21, 0.0  ;;  %v2937_v17 = vmul.f32 %v14403_v53, %v14403_v53 }
 0x33e   : > { %2971 = vadd.xlane.f32.xlu1 %v2970_v31 }
 0x33f   : > { %v2973_v3 = vsel %vm2574_vm3, %v2937_v17, 0.0  ;;  %v2938_v24 = vmul.f32 %v14409_v9, %v14409_v9 }
 0x340   : > { %2974 = vadd.xlane.f32.xlu0 %v2973_v3 }
 0x341   : > { %v2976_v13 = vsel %vm2578_vm4, %v2938_v24, 0.0 }
 0x342   : > { %2977 = vadd.xlane.f32.xlu1 %v2976_v13 }
 0x344   : > { %v2885_v34 = vpop.xlane.xlu0 %2884 }
 0x345   : > { %v2907_v55 = vmul.f32 0.125, %v2885_v34 }
 0x346   : > { %v2888_v6 = vpop.xlane.xlu1 %2887 }
 0x347   : > { %v14419_v30 = vsub.f32 %v14234_v41, %v2907_v55  ;;  %v2908_v61 = vmul.f32 0.125, %v2888_v6 }
 0x348   : > { %v2891_v26 = vpop.xlane.xlu0 %2890 }
 0x349   : > { %v14422_v29 = vsub.f32 %v14242_v50, %v2908_v61  ;;  %v2909_v56 = vmul.f32 0.125, %v2891_v26  ;;  %v2939_v23 = vmul.f32 %v14419_v30, %v14419_v30 }
 0x34a   : > { %v2894_v15 = vpop.xlane.xlu1 %2893 }
 0x34b   : > { %v14427_v27 = vsub.f32 %v14236_v42, %v2909_v56  ;;  %v2910_v36 = vmul.f32 0.125, %v2894_v15  ;;  %v2979_v35 = vsel %vm2574_vm3, %v2939_v23, 0.0  ;;  %v2940_v41 = vmul.f32 %v14422_v29, %v14422_v29 }
 0x34c   : > { %2980 = vadd.xlane.f32.xlu0 %v2979_v35  ;;  %v2614_v54 = vpop.xlane.xlu0 %2613 }
 0x34d   : > { %v14433_v59 = vsub.f32 %v14240_v49, %v2910_v36  ;;  %v2637_v50 = vmul.f32 0.125, %v2614_v54  ;;  %v2982_v21 = vsel %vm2578_vm4, %v2940_v41, 0.0  ;;  %v2941_v31 = vmul.f32 %v14427_v27, %v14427_v27 }
 0x34e   : > { %2983 = vadd.xlane.f32.xlu1 %v2982_v21  ;;  %v2617_v42 = vpop.xlane.xlu1 %2616 }
 0x34f   : > { %v14439_v17 = vsub.f32 %v14178_v47, %v2637_v50  ;;  %v2638_v3 = vmul.f32 0.125, %v2617_v42  ;;  %v2985_v24 = vsel %vm2574_vm3, %v2941_v31, 0.0  ;;  %v2942_v13 = vmul.f32 %v14433_v59, %v14433_v59 }
 0x350   : > { %2986 = vadd.xlane.f32.xlu0 %v2985_v24  ;;  %v2620_v49 = vpop.xlane.xlu0 %2619 }
 0x351   : > { %v14445_v34 = vsub.f32 %v14182_v51, %v2638_v3  ;;  %v2639_v55 = vmul.f32 0.125, %v2620_v49  ;;  %v2988_v6 = vsel %vm2578_vm4, %v2942_v13, 0.0  ;;  %v2669_v61 = vmul.f32 %v14439_v17, %v14439_v17  ;;  %v14469_v13 = vld [vmem:[%s16720_s6] ss:$0 sm:$0xff] }
 0x352   : > { %2989 = vadd.xlane.f32.xlu1 %v2988_v6  ;;  %v2623_v47 = vpop.xlane.xlu1 %2622 }
 0x353   : > { %v14451_v26 = vsub.f32 %v14180_v48, %v2639_v55  ;;  %v2640_v56 = vmul.f32 0.125, %v2623_v47  ;;  %v2709_v23 = vsel %vm2574_vm3, %v2669_v61, 0.0  ;;  %v2670_v15 = vmul.f32 %v14445_v34, %v14445_v34  ;;  %v14475_v55 = vld [vmem:[%s16722_s5] ss:$0 sm:$0xff] }
 0x354   : > { %2710 = vadd.xlane.f32.xlu0 %v2709_v23 }
 0x355   : > { %v14457_v51 = vsub.f32 %v14184_v52, %v2640_v56  ;;  %v2712_v36 = vsel %vm2578_vm4, %v2670_v15, 0.0  ;;  %v2671_v35 = vmul.f32 %v14451_v26, %v14451_v26 }
 0x356   : > { %2713 = vadd.xlane.f32.xlu1 %v2712_v36 }
 0x357   : > { %v2715_v41 = vsel %vm2574_vm3, %v2671_v35, 0.0  ;;  %v2672_v48 = vmul.f32 %v14457_v51, %v14457_v51 }
 0x358   : > { %2716 = vadd.xlane.f32.xlu0 %v2715_v41 }
 0x359   : > { %v2718_v54 = vsel %vm2578_vm4, %v2672_v48, 0.0 }
 0x35a   : > { %2719 = vadd.xlane.f32.xlu1 %v2718_v54 }
 0x369   : > { %v2675_v50 = vpop.xlane.xlu0 %2674 }
 0x36a   : > { %v2721_v21 = vmul.f32 0.125, %v2675_v50 }
 0x36c   : > { %v2737_v31 = vadd.f32 1e-06, %v2721_v21  ;;  %v2678_v35 = vpop.xlane.xlu1 %2677 }
 0x36e   : > { %13068 = vrsqrt.f32 %v2737_v31  ;;  %v2681_v52 = vpop.xlane.xlu0 %2680 }
 0x36f   : > { %v2723_v42 = vmul.f32 0.125, %v2681_v52 }
 0x370   : > { %v2684_v41 = vpop.xlane.xlu1 %2683 }
 0x371   : > { %v2739_v3 = vadd.f32 1e-06, %v2723_v42  ;;  %v2724_v42 = vmul.f32 0.125, %v2684_v41 }
 0x373   : > { %13070 = vrsqrt.f32 %v2739_v3 }
 0x378   : > { %v13069_v24 = vpop.eup %13068 }
 0x379   : > { %v2769_v49 = vmul.f32 %v13069_v24, %v14263_v38  ;;  %v2687_v48 = vpop.xlane.xlu0 %2686 }
 0x37b   : > { %v2791_v6 = vmul.f32 %v14469_v13, %v2769_v49  ;;  %v2690_v54 = vpop.xlane.xlu1 %2689 }
 0x37d   : > { %v13071_v61 = vpop.eup %13070  ;;  %v2813_v47 = vadd.f32 %v14475_v55, %v2791_v6  ;;  %v2740_v6 = vadd.f32 1e-06, %v2724_v42 }
 0x37e   : > { %v2771_v56 = vmul.f32 %v13071_v61, %v14276_v7  ;;  %v2693_v50 = vpop.xlane.xlu0 %2692  ;;  %v2722_v7 = vmul.f32 0.125, %v2678_v35  ;;  %v2725_v61 = vmul.f32 0.125, %v2687_v48 }
 0x37f   : > { %v2829_v23 = vmul.f32 0.35355338, %v2813_v47  ;;  %v2696_v21 = vpop.xlane.xlu1 %2695 }
 0x380   : > { %v2793_v15 = vmul.f32 %v14469_v13, %v2771_v56  ;;  %v2738_v49 = vadd.f32 1e-06, %v2722_v7  ;;  %v2741_v20 = vadd.f32 1e-06, %v2725_v61 }
 0x381   : > { %11944 = vmatprep.mubr.msk.f32.mxu0 %vm2574_vm3, %v2829_v23  ;;  %v2727_v23 = vmul.f32 0.125, %v2693_v50  ;;  %v2726_v50 = vmul.f32 0.125, %v2690_v54 }
 0x382   : > { %v2815_v36 = vadd.f32 %v14475_v55, %v2793_v15  ;;  %13072 = vrsqrt.f32 %v2738_v49 }
 0x383   : > { %13074 = vrsqrt.f32 %v2740_v6  ;;  %v2743_v41 = vadd.f32 1e-06, %v2727_v23  ;;  %v2742_v61 = vadd.f32 1e-06, %v2726_v50 }
 0x384   : > { %v2831_v38 = vmul.f32 0.35355338, %v2815_v36 }
 0x386   : > { %11951 = vmatprep.mubr.msk.f32.mxu1 %vm2574_vm3, %v2831_v38 }
 0x389   : > { %v2699_v31 = vpop.xlane.xlu0 %2698 }
 0x38a   : > { %v2729_v42 = vmul.f32 0.125, %v2699_v31 }
 0x38b   : > { %v14484_v52 = vpop.xlane.xlu1 %2701 }
 0x38c   : > { %v13073_v49 = vpop.eup %13072 }
 0x38d   : > { %v2770_v54 = vmul.f32 %v13073_v49, %v14272_v0 }
 0x38e   : > { %v2705_v3 = vpop.xlane.xlu0 %2704 }
 0x38f   : > { %v14486_v24 = vpop.xlane.xlu1 %2707  ;;  %v2731_v0 = vmul.f32 0.125, %v2705_v3 }
 0x3a9   : > { %v2945_v47 = vpop.xlane.xlu0 %2944 }
 0x3aa   : > { %v2991_v56 = vmul.f32 0.125, %v2945_v47  ;;  %v13075_v47 = vpop.eup %13074 }
 0x3ab   : > { %v2948_v15 = vpop.xlane.xlu1 %2947  ;;  %v2772_v31 = vmul.f32 %v13075_v47, %v14281_v14 }
 0x3ac   : > { %v3007_v36 = vadd.f32 1e-06, %v2991_v56  ;;  %v2992_v38 = vmul.f32 0.125, %v2948_v15  ;;  %v2728_v56 = vmul.f32 0.125, %v2696_v21  ;;  %v14499_v21 = vld [vmem:[%s16628_s10] ss:$0 sm:$0xff] }
 0x3ad   : > { %v2951_v5 = vpop.xlane.xlu0 %2950 }
 0x3ae   : > { %13076 = vrsqrt.f32 %v3007_v36  ;;  %v3008_v4 = vadd.f32 1e-06, %v2992_v38  ;;  %v2993_v35 = vmul.f32 0.125, %v2951_v5  ;;  %v14491_v5 = vld [vmem:[%s16723_s1] ss:$0 sm:$0xff] }
 0x3af   : > { %v2954_v10 = vpop.xlane.xlu1 %2953 }
 0x3b0   : > { %13078 = vrsqrt.f32 %v3008_v4  ;;  %v3009_v22 = vadd.f32 1e-06, %v2993_v35  ;;  %v2994_v7 = vmul.f32 0.125, %v2954_v10  ;;  %v2745_v4 = vadd.f32 1e-06, %v2729_v42 }
 0x3b1   : > { %13080 = vrsqrt.f32 %v2741_v20 }
 0x3b2   : > { %13082 = vrsqrt.f32 %v3009_v22  ;;  %v3010_v48 = vadd.f32 1e-06, %v2994_v7 }
 0x3b3   : > { %13084 = vrsqrt.f32 %v2743_v41 }
 0x3b4   : > { %13086 = vrsqrt.f32 %v3010_v48 }
 0x3b5   : > { %13088 = vrsqrt.f32 %v2742_v61 }
 0x3b6   : > { %13090 = vrsqrt.f32 %v2745_v4 }
 0x3b8   : > { %v13077_v6 = vpop.eup %13076 }
 0x3b9   : > { %v2957_v23 = vpop.xlane.xlu0 %2956  ;;  %v3039_v20 = vmul.f32 %v13077_v6, %v14347_v39  ;;  %v2744_v39 = vadd.f32 1e-06, %v2728_v56 }
 0x3ba   : > { %v13079_v10 = vpop.eup %13078  ;;  %v2995_v22 = vmul.f32 0.125, %v2957_v23 }
 0x3bb   : > { %v13081_v15 = vpop.eup %13080  ;;  %v2960_v36 = vpop.xlane.xlu1 %2959  ;;  %v3040_v38 = vmul.f32 %v13079_v10, %v14350_v1  ;;  %v3061_v35 = vmul.f32 %v14491_v5, %v3039_v20 }
 0x3bc   : > { %v13083_v41 = vpop.eup %13082  ;;  %v3011_v7 = vadd.f32 1e-06, %v2995_v22  ;;  %v2996_v48 = vmul.f32 0.125, %v2960_v36  ;;  %v2773_v1 = vmul.f32 %v13081_v15, %v14291_v37  ;;  %v2792_v37 = vmul.f32 %v14469_v13, %v2770_v54 }
 0x3bd   : > { %v13085_v50 = vpop.eup %13084  ;;  %v2963_v42 = vpop.xlane.xlu0 %2962  ;;  %v3062_v14 = vmul.f32 %v14491_v5, %v3040_v38  ;;  %v3041_v49 = vmul.f32 %v13083_v41, %v14355_v16  ;;  %v3083_v61 = vadd.f32 %v14499_v21, %v3061_v35  ;;  %v2747_v15 = vadd.f32 1e-06, %v2731_v0 }
 0x3be   : > { %v13087_v47 = vpop.eup %13086  ;;  %13092 = vrsqrt.f32 %v3011_v7  ;;  %v3012_v6 = vadd.f32 1e-06, %v2996_v48  ;;  %v2997_v23 = vmul.f32 0.125, %v2963_v42  ;;  %v2775_v35 = vmul.f32 %v13085_v50, %v14306_v19 }
 0x3bf   : > { %v2966_v20 = vpop.xlane.xlu1 %2965  ;;  %v3084_v56 = vadd.f32 %v14499_v21, %v3062_v14  ;;  %v3042_v10 = vmul.f32 %v13087_v47, %v14361_v25  ;;  %v3063_v3 = vmul.f32 %v14491_v5, %v3041_v49  ;;  %v2795_v41 = vmul.f32 %v14469_v13, %v2773_v1  ;;  %v13089_v42 = vpop.eup %13088 }
 0x3c0   : > { %13094 = vrsqrt.f32 %v3012_v6  ;;  %v3013_v4 = vadd.f32 1e-06, %v2997_v23  ;;  %v2998_v22 = vmul.f32 0.125, %v2966_v20  ;;  %v2794_v54 = vmul.f32 %v14469_v13, %v2772_v31  ;;  %v13091_v49 = vpop.eup %13090 }
 0x3c1   : > { %v12567_v36 = vpack.c.bf16 %v3084_v56, %v3083_v61  ;;  %v3064_v38 = vmul.f32 %v14491_v5, %v3042_v10  ;;  %v3085_v7 = vadd.f32 %v14499_v21, %v3063_v3  ;;  %v2730_v0 = vmul.f32 0.125, %v14484_v52 }
 0x3c2   : > { %13096 = vrsqrt.f32 %v3013_v4  ;;  %v3014_v25 = vadd.f32 1e-06, %v2998_v22  ;;  %v2814_v50 = vadd.f32 %v14475_v55, %v2792_v37  ;;  %v2817_v14 = vadd.f32 %v14475_v55, %v2795_v41 }
 0x3c3   : > { %13098 = vrsqrt.f32 %v2744_v39  ;;  %12569 = vmatprep.subr.msk.bf16.mxu0 %vm14512_vm5, %v12567_v36  ;;  %v3086_v48 = vadd.f32 %v14499_v21, %v3064_v38  ;;  %v2797_v39 = vmul.f32 %v14469_v13, %v2775_v35  ;;  %v2816_v31 = vadd.f32 %v14475_v55, %v2794_v54 }
 0x3c4   : > { %13100 = vrsqrt.f32 %v3014_v25  ;;  %12572 = vmatpush3.bf16.xpose.msk.msra.mxu0 %vm14512_vm5, %v12567_v36  ;;  %v2746_v47 = vadd.f32 1e-06, %v2730_v0  ;;  %v2732_v6 = vmul.f32 0.125, %v14486_v24  ;;  %v2830_v1 = vmul.f32 0.35355338, %v2814_v50 }
 0x3c5   : > { %13102 = vrsqrt.f32 %v2747_v15  ;;  %v12573_v19 = vpack.c.bf16 %v3086_v48, %v3085_v7  ;;  %v2819_v20 = vadd.f32 %v14475_v55, %v2797_v39  ;;  %v2833_v3 = vmul.f32 0.35355338, %v2817_v14 }
 0x3c6   : > { %v2832_v22 = vmul.f32 0.35355338, %v2816_v31  ;;  %v2774_v24 = vmul.f32 %v13089_v42, %v14296_v62  ;;  %13104 = vrsqrt.f32 %v2746_v47  ;;  %v2748_v25 = vadd.f32 1e-06, %v2732_v6 }
 0x3c7   : > { %12575 = vmatprep.subr.msk.bf16.mxu1 %vm14512_vm5, %v12573_v19  ;;  %v2835_v7 = vmul.f32 0.35355338, %v2819_v20  ;;  %v2777_v50 = vmul.f32 %v13091_v49, %v14319_v44 }
 0x3c8   : > { %v13093_v52 = vpop.eup %13092  ;;  %12578 = vmatpush3.bf16.xpose.msk.msra.mxu1 %vm14512_vm5, %v12573_v19 }
 0x3c9   : > { %v2969_v23 = vpop.xlane.xlu0 %2968  ;;  %v3043_v61 = vmul.f32 %v13093_v52, %v14371_v60  ;;  %v2799_v20 = vmul.f32 %v14469_v13, %v2777_v50 }
 0x3ca   : > { %v13095_v56 = vpop.eup %13094  ;;  %v2999_v10 = vmul.f32 0.125, %v2969_v23  ;;  %v2796_v23 = vmul.f32 %v14469_v13, %v2774_v24 }
 0x3cb   : > { %11945 = vmatmul.mubr.msk.f32.vlgmr.msra.gmra.mrb[48].mxu0 %vm2574_vm3, %v2830_v1  ;;  %v2972_v4 = vpop.xlane.xlu1 %2971  ;;  %v3044_v37 = vmul.f32 %v13095_v56, %v14374_v43  ;;  %v3065_v15 = vmul.f32 %v14491_v5, %v3043_v61 }
 0x3cc   : > { %v13097_v36 = vpop.eup %13096  ;;  %v3015_v38 = vadd.f32 1e-06, %v2999_v10  ;;  %v3000_v35 = vmul.f32 0.125, %v2972_v4  ;;  %11958 = vmatprep.mubr.msk.f32.mxu0 %vm2574_vm3, %v2833_v3  ;;  %v2818_v10 = vadd.f32 %v14475_v55, %v2796_v23 }
 0x3cd   : > { %v13099_v60 = vpop.eup %13098  ;;  %v2975_v41 = vpop.xlane.xlu0 %2974  ;;  %v3066_v48 = vmul.f32 %v14491_v5, %v3044_v37  ;;  %v3045_v54 = vmul.f32 %v13097_v36, %v14379_v2  ;;  %v3087_v42 = vadd.f32 %v14499_v21, %v3065_v15 }
 0x3ce   : > { %v13101_v0 = vpop.eup %13100  ;;  %13106 = vrsqrt.f32 %v3015_v38  ;;  %v3016_v43 = vadd.f32 1e-06, %v3000_v35  ;;  %v3001_v19 = vmul.f32 0.125, %v2975_v41  ;;  %v2776_v6 = vmul.f32 %v13099_v60, %v14309_v28 }
 0x3cf   : > { %v13103_v62 = vpop.eup %13102  ;;  %11952 = vmatmul.mubr.msk.f32.vlgmr.msra.gmra.mrb[48].mxu1 %vm2574_vm3, %v2832_v22  ;;  %v2978_v39 = vpop.xlane.xlu1 %2977  ;;  %v3088_v14 = vadd.f32 %v14499_v21, %v3066_v48  ;;  %v3046_v31 = vmul.f32 %v13101_v0, %v14385_v11  ;;  %v3067_v52 = vmul.f32 %v14491_v5, %v3045_v54  ;;  %v2834_v36 = vmul.f32 0.35355338, %v2818_v10 }
 0x3d0   : > { %13108 = vrsqrt.f32 %v3016_v43  ;;  %v3017_v2 = vadd.f32 1e-06, %v3001_v19  ;;  %v3002_v47 = vmul.f32 0.125, %v2978_v39  ;;  %11965 = vmatprep.mubr.msk.f32.mxu1 %vm2574_vm3, %v2835_v7  ;;  %v2779_v11 = vmul.f32 %v13103_v62, %v14334_v32  ;;  %v13105_v4 = vpop.eup %13104 }
 0x3d1   : > { %v12579_v44 = vpack.c.bf16 %v3088_v14, %v3087_v42  ;;  %v3068_v49 = vmul.f32 %v14491_v5, %v3046_v31  ;;  %v3089_v61 = vadd.f32 %v14499_v21, %v3067_v52  ;;  %v2798_v3 = vmul.f32 %v14469_v13, %v2776_v6 }
 0x3d2   : > { %13110 = vrsqrt.f32 %v3017_v2  ;;  %v3018_v1 = vadd.f32 1e-06, %v3002_v47  ;;  %v2821_v32 = vadd.f32 %v14475_v55, %v2799_v20  ;;  %v2801_v22 = vmul.f32 %v14469_v13, %v2779_v11 }
 0x3d3   : > { %13112 = vrsqrt.f32 %v2748_v25  ;;  %12581 = vmatprep.subr.msk.bf16.mxu0 %vm14512_vm5, %v12579_v44  ;;  %v3090_v56 = vadd.f32 %v14499_v21, %v3068_v49  ;;  %v2820_v24 = vadd.f32 %v14475_v55, %v2798_v3 }
 0x3d4   : > { %13114 = vrsqrt.f32 %v3018_v1  ;;  %12584 = vmatpush3.bf16.xpose.msk.msra.mxu0 %vm14512_vm5, %v12579_v44  ;;  %v2837_v25 = vmul.f32 0.35355338, %v2821_v32  ;;  %v2823_v41 = vadd.f32 %v14475_v55, %v2801_v22 }
 0x3d5   : > { %v12585_v28 = vpack.c.bf16 %v3090_v56, %v3089_v61  ;;  %v2836_v39 = vmul.f32 0.35355338, %v2820_v24 }
 0x3d6   : > { %v2839_v2 = vmul.f32 0.35355338, %v2823_v41 }
 0x3d7   : > { %12587 = vmatprep.subr.msk.bf16.mxu1 %vm14512_vm5, %v12585_v28 }
 0x3d8   : > { %v13107_v37 = vpop.eup %13106  ;;  %12590 = vmatpush3.bf16.xpose.msk.msra.mxu1 %vm14512_vm5, %v12585_v28 }
 0x3d9   : > { %v2981_v15 = vpop.xlane.xlu0 %2980  ;;  %v3047_v38 = vmul.f32 %v13107_v37, %v14395_v12  ;;  %v2778_v12 = vmul.f32 %v13105_v4, %v14324_v8 }
 0x3da   : > { %v13109_v35 = vpop.eup %13108  ;;  %v3003_v60 = vmul.f32 0.125, %v2981_v15 }
 0x3db   : > { %11959 = vmatmul.mubr.msk.f32.vlgmr.msra.gmra.mrb[50].mxu0 %vm2574_vm3, %v2834_v36  ;;  %v2984_v7 = vpop.xlane.xlu1 %2983  ;;  %v3048_v48 = vmul.f32 %v13109_v35, %v14398_v33  ;;  %v3069_v54 = vmul.f32 %v14491_v5, %v3047_v38  ;;  %v2800_v56 = vmul.f32 %v14469_v13, %v2778_v12 }
 0x3dc   : > { %v13111_v0 = vpop.eup %13110  ;;  %v3019_v43 = vadd.f32 1e-06, %v3003_v60  ;;  %v3004_v19 = vmul.f32 0.125, %v2984_v7  ;;  %11972 = vmatprep.mubr.msk.f32.mxu0 %vm2574_vm3, %v2837_v25 }
 0x3dd   : > { %v13113_v50 = vpop.eup %13112  ;;  %v2987_v62 = vpop.xlane.xlu0 %2986  ;;  %v3070_v42 = vmul.f32 %v14491_v5, %v3048_v48  ;;  %v3049_v14 = vmul.f32 %v13111_v0, %v14403_v53  ;;  %v3091_v6 = vadd.f32 %v14499_v21, %v3069_v54  ;;  %v2822_v15 = vadd.f32 %v14475_v55, %v2800_v56 }
 0x3de   : > { %v13115_v31 = vpop.eup %13114  ;;  %13116 = vrsqrt.f32 %v3019_v43  ;;  %v3020_v52 = vadd.f32 1e-06, %v3004_v19  ;;  %v3005_v33 = vmul.f32 0.125, %v2987_v62  ;;  %v2780_v53 = vmul.f32 %v13113_v50, %v14337_v40 }
 0x3df   : > { %11966 = vmatmul.mubr.msk.f32.vlgmr.msra.gmra.mrb[50].mxu1 %vm2574_vm3, %v2836_v39  ;;  %v2990_v47 = vpop.xlane.xlu1 %2989  ;;  %v3092_v44 = vadd.f32 %v14499_v21, %v3070_v42  ;;  %v3050_v8 = vmul.f32 %v13115_v31, %v14409_v9  ;;  %v3071_v49 = vmul.f32 %v14491_v5, %v3049_v14  ;;  %v2838_v7 = vmul.f32 0.35355338, %v2822_v15 }
 0x3e0   : > { %13118 = vrsqrt.f32 %v3020_v52  ;;  %v3021_v23 = vadd.f32 1e-06, %v3005_v33  ;;  %v3006_v1 = vmul.f32 0.125, %v2990_v47  ;;  %11979 = vmatprep.mubr.msk.f32.mxu1 %vm2574_vm3, %v2839_v2  ;;  %v2802_v36 = vmul.f32 %v14469_v13, %v2780_v53 }
 0x3e1   : > { %v2711_v20 = vpop.xlane.xlu0 %2710  ;;  %v12591_v11 = vpack.c.bf16 %v3092_v44, %v3091_v6  ;;  %v3072_v61 = vmul.f32 %v14491_v5, %v3050_v8  ;;  %v3093_v3 = vadd.f32 %v14499_v21, %v3071_v49 }
 0x3e2   : > { %13120 = vrsqrt.f32 %v3021_v23  ;;  %v3022_v28 = vadd.f32 1e-06, %v3006_v1  ;;  %v2733_v10 = vmul.f32 0.125, %v2711_v20  ;;  %v2824_v48 = vadd.f32 %v14475_v55, %v2802_v36 }
 0x3e3   : > { %12593 = vmatprep.subr.msk.bf16.mxu0 %vm14512_vm5, %v12591_v11  ;;  %v2714_v9 = vpop.xlane.xlu1 %2713  ;;  %v3094_v4 = vadd.f32 %v14499_v21, %v3072_v61 }
 0x3e4   : > { %13122 = vrsqrt.f32 %v3022_v28  ;;  %v2749_v32 = vadd.f32 1e-06, %v2733_v10  ;;  %v2734_v40 = vmul.f32 0.125, %v2714_v9  ;;  %12596 = vmatpush3.bf16.xpose.msk.msra.mxu0 %vm14512_vm5, %v12591_v11  ;;  %v2840_v62 = vmul.f32 0.35355338, %v2824_v48 }
 0x3e5   : > { %v2717_v22 = vpop.xlane.xlu0 %2716  ;;  %v12597_v37 = vpack.c.bf16 %v3094_v4, %v3093_v3 }
 0x3e6   : > { %13124 = vrsqrt.f32 %v2749_v32  ;;  %v2750_v24 = vadd.f32 1e-06, %v2734_v40  ;;  %v2735_v38 = vmul.f32 0.125, %v2717_v22 }
 0x3e7   : > { %12599 = vmatprep.subr.msk.bf16.mxu1 %vm14512_vm5, %v12597_v37  ;;  %v2720_v35 = vpop.xlane.xlu1 %2719 }
 0x3e8   : > { %v13117_v60 = vpop.eup %13116  ;;  %13126 = vrsqrt.f32 %v2750_v24  ;;  %v2751_v25 = vadd.f32 1e-06, %v2735_v38  ;;  %v2736_v41 = vmul.f32 0.125, %v2720_v35  ;;  %12602 = vmatpush3.bf16.xpose.msk.msra.mxu1 %vm14512_vm5, %v12597_v37 }
 0x3e9   : > { %v3051_v54 = vmul.f32 %v13117_v60, %v14419_v30 }
 0x3ea   : > { %v13119_v0 = vpop.eup %13118  ;;  %13128 = vrsqrt.f32 %v2751_v25  ;;  %v2752_v43 = vadd.f32 1e-06, %v2736_v41 }
 0x3eb   : > { %11973 = vmatmul.mubr.msk.f32.vlgmr.msra.gmra.mrb[52].mxu0 %vm2574_vm3, %v2838_v7  ;;  %v3052_v19 = vmul.f32 %v13119_v0, %v14422_v29  ;;  %v3073_v50 = vmul.f32 %v14491_v5, %v3051_v54 }
 0x3ec   : > { %v13121_v12 = vpop.eup %13120  ;;  %13130 = vrsqrt.f32 %v2752_v43 }
 0x3ed   : > { %v3074_v39 = vmul.f32 %v14491_v5, %v3052_v19  ;;  %v3053_v42 = vmul.f32 %v13121_v12, %v14427_v27  ;;  %v3095_v30 = vadd.f32 %v14499_v21, %v3073_v50 }
 0x3ee   : > { %v13123_v14 = vpop.eup %13122 }
 0x3ef   : > { %11980 = vmatmul.mubr.msk.f32.vlgmr.msra.gmra.mrb[52].mxu1 %vm2574_vm3, %v2840_v62  ;;  %v3096_v31 = vadd.f32 %v14499_v21, %v3074_v39  ;;  %v3054_v52 = vmul.f32 %v13123_v14, %v14433_v59  ;;  %v3075_v29 = vmul.f32 %v14491_v5, %v3053_v42 }
 0x3f0   : > { %v13125_v33 = vpop.eup %13124 }
 0x3f1   : > { %v12603_v2 = vpack.c.bf16 %v3096_v31, %v3095_v30  ;;  %v3076_v47 = vmul.f32 %v14491_v5, %v3054_v52  ;;  %v2781_v6 = vmul.f32 %v13125_v33, %v14439_v17  ;;  %v3097_v59 = vadd.f32 %v14499_v21, %v3075_v29 }
 0x3f2   : > { %v13127_v44 = vpop.eup %13126 }
 0x3f3   : > { %v2782_v8 = vmul.f32 %v13127_v44, %v14445_v34  ;;  %12605 = vmatprep.subr.msk.bf16.mxu0 %vm14512_vm5, %v12603_v2  ;;  %v3098_v49 = vadd.f32 %v14499_v21, %v3076_v47  ;;  %v2803_v23 = vmul.f32 %v14469_v13, %v2781_v6 }
 0x3f4   : > { %v13129_v5 = vpop.eup %13128  ;;  %12608 = vmatpush3.bf16.xpose.msk.msra.mxu0 %vm14512_vm5, %v12603_v2 }
 0x3f5   : > { %12617 = vmatprep.subr.msk.bf16.mxu0 %vm14617_vm8, %v14258_v18  ;;  %v12609_v17 = vpack.c.bf16 %v3098_v49, %v3097_v59  ;;  %v2825_v34 = vadd.f32 %v14475_v55, %v2803_v23  ;;  %v2804_v1 = vmul.f32 %v14469_v13, %v2782_v8  ;;  %v2783_v53 = vmul.f32 %v13129_v5, %v14451_v26 }
 0x3f6   : > { %v13131_v20 = vpop.eup %13130 }
 0x3f7   : > { %v2784_v21 = vmul.f32 %v13131_v20, %v14457_v51  ;;  %12611 = vmatprep.subr.msk.bf16.mxu1 %vm14512_vm5, %v12609_v17  ;;  %v2841_v11 = vmul.f32 0.35355338, %v2825_v34  ;;  %v2826_v61 = vadd.f32 %v14475_v55, %v2804_v1  ;;  %v2805_v56 = vmul.f32 %v14469_v13, %v2783_v53 }
 0x3f8   : > { %12614 = vmatpush3.bf16.xpose.msk.msra.mxu1 %vm14512_vm5, %v12609_v17 }
 0x3f9   : > { %11986 = vmatprep.mubr.msk.f32.mxu0 %vm2574_vm3, %v2841_v11  ;;  %12623 = vmatprep.subr.msk.bf16.mxu1 %vm14617_vm8, %v14260_v45  ;;  %v2842_v26 = vmul.f32 0.35355338, %v2826_v61  ;;  %v2827_v51 = vadd.f32 %v14475_v55, %v2805_v56  ;;  %v2806_v28 = vmul.f32 %v14469_v13, %v2784_v21 }
 0x3fb   : > { %11987 = vmatmul.mubr.msk.f32.vlgmr.msra.gmra.mrb[54].mxu0 %vm2574_vm3, %v2842_v26  ;;  %v2843_v10 = vmul.f32 0.35355338, %v2827_v51  ;;  %v2828_v9 = vadd.f32 %v14475_v55, %v2806_v28 }
 0x3fc   : > { %12620 = vmatpush3.bf16.msk.msra.mxu0 %vm14617_vm8, %v14258_v18 }
 0x3fd   : > { %11993 = vmatprep.mubr.msk.f32.mxu1 %vm2574_vm3, %v2843_v10  ;;  %12629 = vmatprep.subr.msk.bf16.mxu0 %vm14617_vm8, %v14267_v58  ;;  %v2844_v3 = vmul.f32 0.35355338, %v2828_v9 }
 0x3ff   : > { %11994 = vmatmul.mubr.msk.f32.vlgmr.msra.gmra.mrb[54].mxu1 %vm2574_vm3, %v2844_v3 }
 0x400   : > { %12626 = vmatpush3.bf16.msk.msra.mxu1 %vm14617_vm8, %v14260_v45 }
 0x401   : > { %12635 = vmatprep.subr.msk.bf16.mxu1 %vm14617_vm8, %v14265_v46 }
 0x49e   : > { %v11946_v18 = vpop.f32.mrb[48].mxu0 }
 0x49f   : > { %v3177_v13 = vpop.f32.mrb[49].mxu0  ;;  %v3800_v55 = vsel %vm3799_vm9, %v11946_v18, -inf }
 0x4a0   : > { %3801 = vmax.xlane.f32.xlu1 %v3800_v55  ;;  %v3796_v4 = vsel %vm3795_vm10, %v3177_v13, -inf }
 0x4a1   : > { %3797 = vmax.xlane.f32.xlu0 %v3796_v4 }
 0x4a2   : > { %v11953_v32 = vpop.f32.mrb[48].mxu1 }
 0x4a3   : > { %v3264_v40 = vpop.f32.mrb[49].mxu1  ;;  %v3806_v22 = vsel %vm3799_vm9, %v11953_v32, -inf }
 0x4a4   : > { %3807 = vmax.xlane.f32.xlu1 %v3806_v22  ;;  %v3803_v45 = vsel %vm3795_vm10, %v3264_v40, -inf }
 0x4a5   : > { %3804 = vmax.xlane.f32.xlu0 %v3803_v45 }
 0x4ae   : > { %v14668_v37 = vpop.f32.mrb[50].mxu0 }
 0x4af   : > { %v14670_v15 = vpop.f32.mrb[51].mxu0  ;;  %v3812_v36 = vsel %vm3799_vm9, %v14668_v37, -inf }
 0x4b0   : > { %3813 = vmax.xlane.f32.xlu1 %v3812_v36  ;;  %v3809_v24 = vsel %vm3795_vm10, %v14670_v15, -inf }
 0x4b1   : > { %3810 = vmax.xlane.f32.xlu0 %v3809_v24 }
 0x4b2   : > { %v14676_v38 = vpop.f32.mrb[50].mxu1 }
 0x4b3   : > { %v14678_v35 = vpop.f32.mrb[51].mxu1  ;;  %v3818_v60 = vsel %vm3799_vm9, %v14676_v38, -inf }
 0x4b4   : > { %3819 = vmax.xlane.f32.xlu1 %v3818_v60  ;;  %v3815_v25 = vsel %vm3795_vm10, %v14678_v35, -inf }
 0x4b5   : > { %3816 = vmax.xlane.f32.xlu0 %v3815_v25 }
 0x4be   : > { %v14684_v41 = vpop.f32.mrb[52].mxu0 }
 0x4bf   : > { %v14686_v7 = vpop.f32.mrb[53].mxu0  ;;  %v3824_v48 = vsel %vm3799_vm9, %v14684_v41, -inf }
 0x4c0   : > { %3825 = vmax.xlane.f32.xlu1 %v3824_v48  ;;  %v3821_v54 = vsel %vm3795_vm10, %v14686_v7, -inf }
 0x4c1   : > { %3822 = vmax.xlane.f32.xlu0 %v3821_v54 }
 0x4c2   : > { %v14692_v0 = vpop.f32.mrb[52].mxu1 }
 0x4c3   : > { %v14694_v43 = vpop.f32.mrb[53].mxu1  ;;  %v3830_v19 = vsel %vm3799_vm9, %v14692_v0, -inf }
 0x4c4   : > { %3831 = vmax.xlane.f32.xlu1 %v3830_v19  ;;  %v3827_v50 = vsel %vm3795_vm10, %v14694_v43, -inf }
 0x4c5   : > { %3828 = vmax.xlane.f32.xlu0 %v3827_v50 }
 0x4ce   : > { %v14700_v12 = vpop.f32.mrb[54].mxu0 }
 0x4cf   : > { %v14702_v62 = vpop.f32.mrb[55].mxu0  ;;  %v3836_v39 = vsel %vm3799_vm9, %v14700_v12, -inf }
 0x4d0   : > { %3837 = vmax.xlane.f32.xlu1 %v3836_v39  ;;  %v3833_v42 = vsel %vm3795_vm10, %v14702_v62, -inf }
 0x4d1   : > { %3834 = vmax.xlane.f32.xlu0 %v3833_v42 }
 0x4d2   : > { %v14708_v14 = vpop.f32.mrb[54].mxu1 }
 0x4d3   : > { %v14710_v30 = vpop.f32.mrb[55].mxu1  ;;  %v3842_v31 = vsel %vm3799_vm9, %v14708_v14, -inf }
 0x4d4   : > { %3843 = vmax.xlane.f32.xlu1 %v3842_v31  ;;  %v3839_v52 = vsel %vm3795_vm10, %v14710_v30, -inf }
 0x4d5   : > { %3840 = vmax.xlane.f32.xlu0 %v3839_v52 }
 0x52d   : > { %v3802_v29 = vpop.xlane.xlu1 %3801 }
 0x52e   : > { %v3846_v33 = vsub.f32 %v11946_v18, %v3802_v29  ;;  %v3798_v2 = vpop.xlane.xlu0 %3797 }
 0x52f   : > { %v3845_v47 = vsub.f32 %v3177_v13, %v3798_v2 }
 0x530   : > { %v3863_v6 = vmul.f32 1.442695, %v3846_v33 }
 0x531   : > { %v3861_v44 = vmul.f32 1.442695, %v3845_v47  ;;  %v3808_v8 = vpop.xlane.xlu1 %3807 }
 0x532   : > { %13132 = vpow2.f32 %v3863_v6  ;;  %v3848_v59 = vsub.f32 %v11953_v32, %v3808_v8  ;;  %v3805_v49 = vpop.xlane.xlu0 %3804 }
 0x533   : > { %13134 = vpow2.f32 %v3861_v44  ;;  %v3847_v23 = vsub.f32 %v3264_v40, %v3805_v49 }
 0x534   : > { %v3867_v5 = vmul.f32 1.442695, %v3848_v59 }
 0x535   : > { %v3865_v17 = vmul.f32 1.442695, %v3847_v23 }
 0x536   : > { %13136 = vpow2.f32 %v3867_v5 }
 0x537   : > { %13138 = vpow2.f32 %v3865_v17 }
 0x53c   : > { %v14716_v34 = vpop.eup %13132 }
 0x53d   : > { %v14718_v1 = vpop.eup %13134  ;;  %v3814_v53 = vpop.xlane.xlu1 %3813  ;;  %v3896_v20 = vsel %vm3799_vm9, %v14716_v34, 0.0 }
 0x53e   : > { %v3850_v21 = vsub.f32 %v14668_v37, %v3814_v53  ;;  %v3811_v11 = vpop.xlane.xlu0 %3810  ;;  %3897 = vadd.xlane.f32.xlu1 %v3896_v20  ;;  %v3893_v61 = vsel %vm3795_vm10, %v14718_v1, 0.0 }
 0x53f   : > { %v3849_v56 = vsub.f32 %v14670_v15, %v3811_v11  ;;  %3894 = vadd.xlane.f32.xlu0 %v3893_v61 }
 0x540   : > { %v14726_v26 = vpop.eup %13136  ;;  %v3871_v51 = vmul.f32 1.442695, %v3850_v21 }
 0x541   : > { %v14728_v28 = vpop.eup %13138  ;;  %v3869_v10 = vmul.f32 1.442695, %v3849_v56  ;;  %v3820_v9 = vpop.xlane.xlu1 %3819  ;;  %v3902_v3 = vsel %vm3799_vm9, %v14726_v26, 0.0 }
 0x542   : > { %13140 = vpow2.f32 %v3871_v51  ;;  %v3852_v18 = vsub.f32 %v14676_v38, %v3820_v9  ;;  %v3817_v13 = vpop.xlane.xlu0 %3816  ;;  %3903 = vadd.xlane.f32.xlu1 %v3902_v3  ;;  %v3899_v55 = vsel %vm3795_vm10, %v14728_v28, 0.0 }
 0x543   : > { %13142 = vpow2.f32 %v3869_v10  ;;  %v3851_v4 = vsub.f32 %v14678_v35, %v3817_v13  ;;  %3900 = vadd.xlane.f32.xlu0 %v3899_v55 }
 0x544   : > { %v3875_v32 = vmul.f32 1.442695, %v3852_v18 }
 0x545   : > { %v3873_v40 = vmul.f32 1.442695, %v3851_v4 }
 0x546   : > { %13144 = vpow2.f32 %v3875_v32 }
 0x547   : > { %13146 = vpow2.f32 %v3873_v40 }
 0x54c   : > { %v14736_v22 = vpop.eup %13140 }
 0x54d   : > { %v14738_v45 = vpop.eup %13142  ;;  %v3826_v37 = vpop.xlane.xlu1 %3825  ;;  %v3908_v15 = vsel %vm3799_vm9, %v14736_v22, 0.0 }
 0x54e   : > { %v3854_v36 = vsub.f32 %v14684_v41, %v3826_v37  ;;  %v3823_v24 = vpop.xlane.xlu0 %3822  ;;  %3909 = vadd.xlane.f32.xlu1 %v3908_v15  ;;  %v3905_v38 = vsel %vm3795_vm10, %v14738_v45, 0.0 }
 0x54f   : > { %v3853_v35 = vsub.f32 %v14686_v7, %v3823_v24  ;;  %3906 = vadd.xlane.f32.xlu0 %v3905_v38 }
 0x550   : > { %v14746_v60 = vpop.eup %13144  ;;  %v3879_v25 = vmul.f32 1.442695, %v3854_v36 }
 0x551   : > { %v14748_v48 = vpop.eup %13146  ;;  %v3877_v54 = vmul.f32 1.442695, %v3853_v35  ;;  %v3832_v19 = vpop.xlane.xlu1 %3831  ;;  %v3914_v50 = vsel %vm3799_vm9, %v14746_v60, 0.0 }
 0x552   : > { %13148 = vpow2.f32 %v3879_v25  ;;  %v3856_v41 = vsub.f32 %v14692_v0, %v3832_v19  ;;  %v3829_v39 = vpop.xlane.xlu0 %3828  ;;  %3915 = vadd.xlane.f32.xlu1 %v3914_v50  ;;  %v3911_v42 = vsel %vm3795_vm10, %v14748_v48, 0.0 }
 0x553   : > { %13150 = vpow2.f32 %v3877_v54  ;;  %v3855_v7 = vsub.f32 %v14694_v43, %v3829_v39  ;;  %3912 = vadd.xlane.f32.xlu0 %v3911_v42 }
 0x554   : > { %v3883_v31 = vmul.f32 1.442695, %v3856_v41 }
 0x555   : > { %v3881_v52 = vmul.f32 1.442695, %v3855_v7  ;;  %v16728_v7 = vld [vmem:[#allocation16_spill] sm:$0xff] }
 0x556   : > { %13152 = vpow2.f32 %v3883_v31  ;;  %v16729_v31 = vld [vmem:[#allocation15_spill] sm:$0xff] }
 0x557   : > { %13154 = vpow2.f32 %v3881_v52 }
 0x55c   : > { %v14756_v29 = vpop.eup %13148 }
 0x55d   : > { %v14758_v33 = vpop.eup %13150  ;;  %v3838_v2 = vpop.xlane.xlu1 %3837  ;;  %v3920_v0 = vsel %vm3799_vm9, %v14756_v29, 0.0 }
 0x55e   : > { %v3858_v47 = vsub.f32 %v14700_v12, %v3838_v2  ;;  %3921 = vadd.xlane.f32.xlu1 %v3920_v0  ;;  %v3835_v6 = vpop.xlane.xlu0 %3834  ;;  %v3917_v43 = vsel %vm3795_vm10, %v14758_v33, 0.0 }
 0x55f   : > { %v3857_v44 = vsub.f32 %v14702_v62, %v3835_v6  ;;  %3918 = vadd.xlane.f32.xlu0 %v3917_v43 }
 0x560   : > { %v14766_v8 = vpop.eup %13152  ;;  %v3887_v59 = vmul.f32 1.442695, %v3858_v47 }
 0x561   : > { %v14768_v49 = vpop.eup %13154  ;;  %v3885_v23 = vmul.f32 1.442695, %v3857_v44  ;;  %v3844_v5 = vpop.xlane.xlu1 %3843  ;;  %v3926_v17 = vsel %vm3799_vm9, %v14766_v8, 0.0  ;;  %v16730_v44 = vmov 0.0  }
 0x562   : > { %13156 = vpow2.f32 %v3887_v59  ;;  %v3860_v12 = vsub.f32 %v14708_v14, %v3844_v5  ;;  %3927 = vadd.xlane.f32.xlu1 %v3926_v17  ;;  %v3841_v53 = vpop.xlane.xlu0 %3840  ;;  %v3923_v20 = vsel %vm3795_vm10, %v14768_v49, 0.0 }
 0x563   : > { %13158 = vpow2.f32 %v3885_v23  ;;  %v3859_v62 = vsub.f32 %v14710_v30, %v3841_v53  ;;  %3924 = vadd.xlane.f32.xlu0 %v3923_v20 }
 0x564   : > { %v3891_v21 = vmul.f32 1.442695, %v3860_v12 }
 0x565   : > { %v3889_v11 = vmul.f32 1.442695, %v3859_v62  ;;  %v4654_v62 = vld [vmem:[%s16629_s11] sm:$0xf] }
 0x566   : > { %13160 = vpow2.f32 %v3891_v21  ;;  %v4667_v21 = vsel %vm4665_vm11, %v4654_v62, 0 }
 0x567   : > { %13162 = vpow2.f32 %v3889_v11  ;;  %v4655_v11 = vld [vmem:[%s16629_s11 + $0x4] sm:$0xf] }
 0x56c   : > { %v14776_v61 = vpop.eup %13156 }
 0x56d   : > { %v14778_v56 = vpop.eup %13158  ;;  %v3932_v14 = vsel %vm3799_vm9, %v14776_v61, 0.0 }
 0x56e   : > { %3933 = vadd.xlane.f32.xlu1 %v3932_v14  ;;  %v3929_v51 = vsel %vm3795_vm10, %v14778_v56, 0.0 }
 0x56f   : > { %3930 = vadd.xlane.f32.xlu0 %v3929_v51 }
 0x570   : > { %v14784_v10 = vpop.eup %13160 }
 0x571   : > { %v14786_v30 = vpop.eup %13162  ;;  %v3938_v9 = vsel %vm3799_vm9, %v14784_v10, 0.0 }
 0x572   : > { %3939 = vadd.xlane.f32.xlu1 %v3938_v9  ;;  %v3935_v3 = vsel %vm3795_vm10, %v14786_v30, 0.0  ;;  %v4657_v9 = vld [vmem:[%s16629_s11 + $0xc] sm:$0xf] }
 0x573   : > { %3936 = vadd.xlane.f32.xlu0 %v3935_v3 }
 0x5cb   : > { %v3898_v18 = vpop.xlane.xlu1 %3897 }
 0x5cc   : > { %13164 = vrcp.f32 %v3898_v18  ;;  %v3895_v13 = vpop.xlane.xlu0 %3894 }
 0x5cd   : > { %13166 = vrcp.f32 %v3895_v13 }
 0x5cf   : > { %v3904_v55 = vpop.xlane.xlu1 %3903 }
 0x5d0   : > { %13168 = vrcp.f32 %v3904_v55  ;;  %v3901_v4 = vpop.xlane.xlu0 %3900  ;;  %v4808_v55 = vsel %vm4665_vm11, %v4657_v9, 0 }
 0x5d1   : > { %13170 = vrcp.f32 %v3901_v4  ;;  %v4658_v4 = vld [vmem:[%s16629_s11 + $0x10] sm:$0xf] }
 0x5d6   : > { %v13165_v32 = vpop.eup %13164 }
 0x5d7   : > { %v13167_v40 = vpop.eup %13166  ;;  %v3958_v15 = vmul.f32 %v13165_v32, %v14716_v34 }
 0x5d8   : > { %v3957_v37 = vmul.f32 %v13167_v40, %v14718_v1 }
 0x5da   : > { %v13169_v36 = vpop.eup %13168  ;;  %12000 = vmatprep.mubr.msk.f32.mxu0 %vm3795_vm10, %v3957_v37 }
 0x5db   : > { %v13171_v24 = vpop.eup %13170  ;;  %v3910_v38 = vpop.xlane.xlu1 %3909  ;;  %12001 = vmatmul.mubr.msk.f32.vlgmr.msra.gmra.mrb[56].mxu0 %vm3795_vm10, %v3958_v15  ;;  %v3960_v34 = vmul.f32 %v13169_v36, %v14726_v26  ;;  %v4855_v15 = vsel %vm4665_vm11, %v4658_v4, 0  ;;  %v4659_v36 = vld [vmem:[%s16629_s11 + $0x14] sm:$0xf] }
 0x5dc   : > { %13172 = vrcp.f32 %v3910_v38  ;;  %12632 = vmatpush3.bf16.msk.msra.mxu0 %vm14617_vm8, %v14267_v58  ;;  %v3907_v35 = vpop.xlane.xlu0 %3906  ;;  %v3959_v25 = vmul.f32 %v13171_v24, %v14728_v28 }
 0x5dd   : > { %12641 = vmatprep.subr.msk.bf16.mxu0 %vm14617_vm8, %v14298_v63  ;;  %13174 = vrcp.f32 %v3907_v35 }
 0x5de   : > { %12007 = vmatprep.mubr.msk.f32.mxu1 %vm3795_vm10, %v3959_v25  ;;  %v4902_v25 = vsel %vm4665_vm11, %v4659_v36, 0 }
 0x5df   : > { %v3916_v1 = vpop.xlane.xlu1 %3915  ;;  %12008 = vmatmul.mubr.msk.f32.vlgmr.msra.gmra.mrb[56].mxu1 %vm3795_vm10, %v3960_v34  ;;  %v4660_v34 = vld [vmem:[%s16629_s11 + $0x18] sm:$0xf] }
 0x5e0   : > { %13176 = vrcp.f32 %v3916_v1  ;;  %12638 = vmatpush3.bf16.msk.msra.mxu1 %vm14617_vm8, %v14265_v46  ;;  %v3913_v58 = vpop.xlane.xlu0 %3912 }
 0x5e1   : > { %12647 = vmatprep.subr.msk.bf16.mxu1 %vm14617_vm8, %v14293_v57  ;;  %13178 = vrcp.f32 %v3913_v58 }
 0x5e6   : > { %v13173_v28 = vpop.eup %13172 }
 0x5e7   : > { %v13175_v54 = vpop.eup %13174  ;;  %v3962_v19 = vmul.f32 %v13173_v28, %v14736_v22 }
 0x5e8   : > { %v3961_v26 = vmul.f32 %v13175_v54, %v14738_v45  ;;  %v4949_v54 = vsel %vm4665_vm11, %v4660_v34, 0 }
 0x5ea   : > { %v13177_v50 = vpop.eup %13176  ;;  %12014 = vmatprep.mubr.msk.f32.mxu0 %vm3795_vm10, %v3961_v26  ;;  %v4661_v26 = vld [vmem:[%s16629_s11 + $0x1c] sm:$0xf] }
 0x5eb   : > { %v13179_v41 = vpop.eup %13178  ;;  %v3922_v39 = vpop.xlane.xlu1 %3921  ;;  %12015 = vmatmul.mubr.msk.f32.vlgmr.msra.gmra.mrb[58].mxu0 %vm3795_vm10, %v3962_v19  ;;  %v3964_v22 = vmul.f32 %v13177_v50, %v14746_v60 }
 0x5ec   : > { %13180 = vrcp.f32 %v3922_v39  ;;  %12644 = vmatpush3.bf16.msk.msra.mxu0 %vm14617_vm8, %v14298_v63  ;;  %v3919_v46 = vpop.xlane.xlu0 %3918  ;;  %v3963_v42 = vmul.f32 %v13179_v41, %v14748_v48  ;;  %v4996_v39 = vsel %vm4665_vm11, %v4661_v26, 0 }
 0x5ed   : > { %12653 = vmatprep.subr.msk.bf16.mxu0 %vm14617_vm8, %v16728_v7  ;;  %13182 = vrcp.f32 %v3919_v46 }
 0x5ee   : > { %12021 = vmatprep.mubr.msk.f32.mxu1 %vm3795_vm10, %v3963_v42 }
 0x5ef   : > { %v3928_v45 = vpop.xlane.xlu1 %3927  ;;  %12022 = vmatmul.mubr.msk.f32.vlgmr.msra.gmra.mrb[58].mxu1 %vm3795_vm10, %v3964_v22 }
 0x5f0   : > { %13184 = vrcp.f32 %v3928_v45  ;;  %12650 = vmatpush3.bf16.msk.msra.mxu1 %vm14617_vm8, %v14293_v57  ;;  %v3925_v63 = vpop.xlane.xlu0 %3924 }
 0x5f1   : > { %12659 = vmatprep.subr.msk.bf16.mxu1 %vm14617_vm8, %v16729_v31  ;;  %13186 = vrcp.f32 %v3925_v63 }
 0x5f6   : > { %v13181_v48 = vpop.eup %13180 }
 0x5f7   : > { %v13183_v52 = vpop.eup %13182  ;;  %v3966_v2 = vmul.f32 %v13181_v48, %v14756_v29 }
 0x5f8   : > { %v3965_v60 = vmul.f32 %v13183_v52, %v14758_v33 }
 0x5fa   : > { %v13185_v0 = vpop.eup %13184  ;;  %12028 = vmatprep.mubr.msk.f32.mxu0 %vm3795_vm10, %v3965_v60 }
 0x5fb   : > { %v13187_v47 = vpop.eup %13186  ;;  %v3934_v6 = vpop.xlane.xlu1 %3933  ;;  %12029 = vmatmul.mubr.msk.f32.vlgmr.msra.gmra.mrb[60].mxu0 %vm3795_vm10, %v3966_v2  ;;  %v3968_v33 = vmul.f32 %v13185_v0, %v14766_v8 }
 0x5fc   : > { %13188 = vrcp.f32 %v3934_v6  ;;  %12656 = vmatpush3.bf16.msk.msra.mxu0 %vm14617_vm8, %v16728_v7  ;;  %v3931_v57 = vpop.xlane.xlu0 %3930  ;;  %v3967_v43 = vmul.f32 %v13187_v47, %v14768_v49 }
 0x5fd   : > { %13190 = vrcp.f32 %v3931_v57  ;;  %12052 = vmatprep.subr.bf16.mxu0 %v16730_v44 }
 0x5fe   : > { %12035 = vmatprep.mubr.msk.f32.mxu1 %vm3795_vm10, %v3967_v43 }
 0x5ff   : > { %v3940_v29 = vpop.xlane.xlu1 %3939  ;;  %12036 = vmatmul.mubr.msk.f32.vlgmr.msra.gmra.mrb[60].mxu1 %vm3795_vm10, %v3968_v33 }
 0x600   : > { %13192 = vrcp.f32 %v3940_v29  ;;  %12662 = vmatpush3.bf16.msk.msra.mxu1 %vm14617_vm8, %v16729_v31  ;;  %v3937_v59 = vpop.xlane.xlu0 %3936 }
 0x601   : > { %13194 = vrcp.f32 %v3937_v59  ;;  %12058 = vmatprep.subr.bf16.mxu1 %v16730_v44 }
 0x606   : > { %v13189_v49 = vpop.eup %13188 }
 0x607   : > { %v13191_v23 = vpop.eup %13190  ;;  %v3970_v5 = vmul.f32 %v13189_v49, %v14776_v61  ;;  %v4714_v61 = vsel %vm4665_vm11, %v4655_v11, 0 }
 0x608   : > { %v3969_v8 = vmul.f32 %v13191_v23, %v14778_v56  ;;  %v4656_v56 = vld [vmem:[%s16629_s11 + $0x8] sm:$0xf] }
 0x60a   : > { %v13193_v17 = vpop.eup %13192  ;;  %12042 = vmatprep.mubr.msk.f32.mxu0 %vm3795_vm10, %v3969_v8 }
 0x60b   : > { %v13195_v12 = vpop.eup %13194  ;;  %12043 = vmatmul.mubr.msk.f32.vlgmr.msra.gmra.mrb[62].mxu0 %vm3795_vm10, %v3970_v5  ;;  %v3972_v20 = vmul.f32 %v13193_v17, %v14784_v10 }
 0x60c   : > { %v3971_v53 = vmul.f32 %v13195_v12, %v14786_v30  ;;  %12054 = vmatprep.mubr.msk.bf16.mxu0 %vm13435_vm2, %v16730_v44  ;;  %12053 = vmatpush3.bf16.msra.mxu0 %v4667_v21  ;;  %v4761_v30 = vsel %vm4665_vm11, %v4656_v56, 0 }
 0x60d   : > { %12064 = vmatprep.subr.bf16.mxu0 %v16730_v44 }
 0x60e   : > { %12049 = vmatprep.mubr.msk.f32.mxu1 %vm3795_vm10, %v3971_v53 }
 0x60f   : > { %12050 = vmatmul.mubr.msk.f32.vlgmr.msra.gmra.mrb[62].mxu1 %vm3795_vm10, %v3972_v20 }
 0x610   : > { %12060 = vmatprep.mubr.msk.bf16.mxu1 %vm13435_vm2, %v16730_v44  ;;  %12059 = vmatpush3.bf16.msra.mxu1 %v4714_v61 }
 0x611   : > { %12070 = vmatprep.subr.bf16.mxu1 %v16730_v44 }
 0x6ae   : > { %v12002_v14 = vpop.f32.mrb[56].mxu0 }
 0x6af   : > { %v4049_v51 = vpop.f32.mrb[57].mxu0 }
 0x6b0   : > { %v4646_v10 = vpack.c.bf16 %v12002_v14, %v4049_v51 }
 0x6b2   : > { %v12009_v3 = vpop.f32.mrb[56].mxu1  ;;  %12055 = vmatmul.mubr.msk.bf16.vlgmr.msra.gmra.mrb[64].mxu0 %vm2574_vm3, %v4646_v10 }
 0x6b3   : > { %v4133_v18 = vpop.f32.mrb[57].mxu1  ;;  %12065 = vmatpush3.bf16.msra.mxu0 %v4761_v30  ;;  %12066 = vmatprep.mubr.msk.bf16.mxu0 %vm13435_vm2, %v16730_v44 }
 0x6b4   : > { %v4647_v13 = vpack.c.bf16 %v12009_v3, %v4133_v18  ;;  %12076 = vmatprep.subr.bf16.mxu0 %v16730_v44 }
 0x6b6   : > { %12061 = vmatmul.mubr.msk.bf16.vlgmr.msra.gmra.mrb[64].mxu1 %vm2574_vm3, %v4647_v13 }
 0x6b7   : > { %12071 = vmatpush3.bf16.msra.mxu1 %v4808_v55  ;;  %12072 = vmatprep.mubr.msk.bf16.mxu1 %vm13435_vm2, %v16730_v44 }
 0x6b8   : > { %12082 = vmatprep.subr.bf16.mxu1 %v16730_v44 }
 0x6be   : > { %v12016_v32 = vpop.f32.mrb[58].mxu0 }
 0x6bf   : > { %v4217_v40 = vpop.f32.mrb[59].mxu0 }
 0x6c0   : > { %v4648_v37 = vpack.c.bf16 %v12016_v32, %v4217_v40 }
 0x6c2   : > { %v12023_v24 = vpop.f32.mrb[58].mxu1  ;;  %12067 = vmatmul.mubr.msk.bf16.vlgmr.msra.gmra.mrb[68].mxu0 %vm2574_vm3, %v4648_v37 }
 0x6c3   : > { %v4301_v38 = vpop.f32.mrb[59].mxu1  ;;  %12077 = vmatpush3.bf16.msra.mxu0 %v4855_v15  ;;  %12078 = vmatprep.mubr.msk.bf16.mxu0 %vm13435_vm2, %v16730_v44 }
 0x6c4   : > { %v4649_v35 = vpack.c.bf16 %v12023_v24, %v4301_v38  ;;  %12088 = vmatprep.subr.bf16.mxu0 %v16730_v44 }
 0x6c6   : > { %12073 = vmatmul.mubr.msk.bf16.vlgmr.msra.gmra.mrb[68].mxu1 %vm2574_vm3, %v4649_v35 }
 0x6c7   : > { %12083 = vmatpush3.bf16.msra.mxu1 %v4902_v25  ;;  %12084 = vmatprep.mubr.msk.bf16.mxu1 %vm13435_vm2, %v16730_v44 }
 0x6c8   : > { %12094 = vmatprep.subr.bf16.mxu1 %v16730_v44 }
 0x6ce   : > { %v12030_v1 = vpop.f32.mrb[60].mxu0 }
 0x6cf   : > { %v4385_v58 = vpop.f32.mrb[61].mxu0 }
 0x6d0   : > { %v4650_v28 = vpack.c.bf16 %v12030_v1, %v4385_v58 }
 0x6d2   : > { %v12037_v19 = vpop.f32.mrb[60].mxu1  ;;  %12079 = vmatmul.mubr.msk.bf16.vlgmr.msra.gmra.mrb[72].mxu0 %vm2574_vm3, %v4650_v28 }
 0x6d3   : > { %v4469_v50 = vpop.f32.mrb[61].mxu1  ;;  %12089 = vmatpush3.bf16.msra.mxu0 %v4949_v54  ;;  %12090 = vmatprep.mubr.msk.bf16.mxu0 %vm13435_vm2, %v16730_v44 }
 0x6d4   : > { %v4651_v41 = vpack.c.bf16 %v12037_v19, %v4469_v50 }
 0x6d6   : > { %12085 = vmatmul.mubr.msk.bf16.vlgmr.msra.gmra.mrb[72].mxu1 %vm2574_vm3, %v4651_v41 }
 0x6d7   : > { %12095 = vmatpush3.bf16.msra.mxu1 %v4996_v39  ;;  %12096 = vmatprep.mubr.msk.bf16.mxu1 %vm13435_vm2, %v16730_v44 }
 0x6de   : > { %v12044_v46 = vpop.f32.mrb[62].mxu0 }
 0x6df   : > { %v4553_v42 = vpop.f32.mrb[63].mxu0 }
 0x6e0   : > { %v4652_v7 = vpack.c.bf16 %v12044_v46, %v4553_v42  ;;  %v10689_v42 = vld [vmem:[%s16630_s12] ss:$0 sm:$0xff] }
 0x6e2   : > { %v12051_v22 = vpop.f32.mrb[62].mxu1  ;;  %12091 = vmatmul.mubr.msk.bf16.vlgmr.msra.gmra.mrb[76].mxu0 %vm2574_vm3, %v4652_v7 }
 0x6e3   : > { %v4637_v45 = vpop.f32.mrb[63].mxu1 }
 0x6e4   : > { %v4653_v63 = vpack.c.bf16 %v12051_v22, %v4637_v45 }
 0x6e6   : > { %12097 = vmatmul.mubr.msk.bf16.vlgmr.msra.gmra.mrb[76].mxu1 %vm2574_vm3, %v4653_v63  ;;  %v10690_v63 = vld [vmem:[%s16631_s13] ss:$0 sm:$0xff] }
 0x785   : > { %v4703_v31 = vpop.f32.mrb[64].mxu0 }
 0x786   : > { %v12056_v48 = vpop.f32.mrb[65].mxu0  ;;  %v5039_v0 = vsel %vm771_vm0, %v4703_v31, 0.0 }
 0x787   : > { %v4706_v52 = vpop.f32.mrb[66].mxu0 }
 0x788   : > { %v12057_v60 = vpop.f32.mrb[67].mxu0  ;;  %v5054_v33 = vsel %vm775_vm1, %v4706_v52, 0.0 }
 0x789   : > { %v4750_v2 = vpop.f32.mrb[64].mxu1 }
 0x78a   : > { %v5040_v47 = vsel %vm771_vm0, %v4750_v2, 0.0  ;;  %v12062_v6 = vpop.f32.mrb[65].mxu1 }
 0x78b   : > { %v5041_v57 = vadd.f32 %v5040_v47, %v5039_v0  ;;  %v4753_v43 = vpop.f32.mrb[66].mxu1  ;;  %v16731_v6 = vld [vmem:[#allocation13_spill] sm:$0xff] }
 0x78c   : > { %v5055_v29 = vsel %vm775_vm1, %v4753_v43, 0.0  ;;  %v12063_v59 = vpop.f32.mrb[67].mxu1 }
 0x78d   : > { %v5056_v49 = vadd.f32 %v5055_v29, %v5054_v33  ;;  %v16732_v33 = vld [vmem:[#allocation14_spill] sm:$0xff] }
 0x795   : > { %v4797_v23 = vpop.f32.mrb[68].mxu0 }
 0x796   : > { %v5042_v8 = vsel %vm771_vm0, %v4797_v23, 0.0  ;;  %v12068_v5 = vpop.f32.mrb[69].mxu0 }
 0x797   : > { %v5043_v17 = vadd.f32 %v5042_v8, %v5041_v57  ;;  %v4800_v12 = vpop.f32.mrb[70].mxu0 }
 0x798   : > { %v5057_v53 = vsel %vm775_vm1, %v4800_v12, 0.0  ;;  %v12069_v20 = vpop.f32.mrb[71].mxu0 }
 0x799   : > { %v5058_v62 = vadd.f32 %v5057_v53, %v5056_v49  ;;  %v4844_v21 = vpop.f32.mrb[68].mxu1 }
 0x79a   : > { %v5044_v11 = vsel %vm771_vm0, %v4844_v21, 0.0  ;;  %v12074_v61 = vpop.f32.mrb[69].mxu1 }
 0x79b   : > { %v5045_v56 = vadd.f32 %v5044_v11, %v5043_v17  ;;  %v4847_v14 = vpop.f32.mrb[70].mxu1  ;;  %v12914_v11 = vld [vmem:[%s16634_s16 + $0x4] ss:$8 sps:$4 sm:$0xff]   ;;  %v12912_v61 = vld [vmem:[%s16634_s16] ss:$8 sps:$4 sm:$0xff]  }
 0x79c   : > { %v5059_v51 = vsel %vm775_vm1, %v4847_v14, 0.0  ;;  %v12075_v10 = vpop.f32.mrb[71].mxu1  ;;  %5197 = vmatprep.subr.bf16.mxu0 %v12914_v11  ;;  %v12915_v14 = vld [vmem:[%s16634_s16 + $0x10] ss:$8 sps:$4 sm:$0xff]  }
 0x79d   : > { %v5060_v30 = vadd.f32 %v5059_v51, %v5058_v62  ;;  %5198 = vmatpush1.bf16.msra.mxu0 %v12912_v61  ;;  %v12920_v51 = vld [vmem:[%s16634_s16 + $0x24] ss:$8 sps:$4 sm:$0xff]   ;;  %v12918_v10 = vld [vmem:[%s16634_s16 + $0x20] ss:$8 sps:$4 sm:$0xff]  }
 0x7a5   : > { %v4891_v9 = vpop.f32.mrb[72].mxu0 }
 0x7a6   : > { %v5046_v3 = vsel %vm771_vm0, %v4891_v9, 0.0  ;;  %v12080_v18 = vpop.f32.mrb[73].mxu0  ;;  %v12923_v9 = vld [vmem:[%s16634_s16 + $0x34] ss:$8 sps:$4 sm:$0xff]  }
 0x7a7   : > { %v5047_v13 = vadd.f32 %v5046_v3, %v5045_v56  ;;  %v4894_v55 = vpop.f32.mrb[74].mxu0  ;;  %v12917_v56 = vld [vmem:[%s16634_s16 + $0x14] ss:$8 sps:$4 sm:$0xff]   ;;  %v16674_v3 = vmov 0  }
 0x7a8   : > { %v5061_v4 = vsel %vm775_vm1, %v4894_v55, 0.0  ;;  %v12081_v32 = vpop.f32.mrb[75].mxu0  ;;  %5199 = vmatprep.subr.bf16.mxu0 %v12917_v56  ;;  %5229 = vmatprep.mubr.bf16.mxu0 %v16674_v3 }
 0x7a9   : > { %v5062_v40 = vadd.f32 %v5061_v4, %v5060_v30  ;;  %v4938_v37 = vpop.f32.mrb[72].mxu1  ;;  %5200 = vmatpush1.bf16.msra.mxu0 %v12915_v14  ;;  %v12921_v30 = vld [vmem:[%s16634_s16 + $0x30] ss:$8 sps:$4 sm:$0xff]  }
 0x7aa   : > { %v5048_v15 = vsel %vm771_vm0, %v4938_v37, 0.0  ;;  %v12086_v36 = vpop.f32.mrb[73].mxu1  ;;  %5201 = vmatprep.subr.bf16.mxu0 %v12920_v51 }
 0x7ab   : > { %v5049_v24 = vadd.f32 %v5048_v15, %v5047_v13  ;;  %v4941_v38 = vpop.f32.mrb[74].mxu1  ;;  %v10691_v15 = vld [vmem:[%s16632_s14] ss:$0 sm:$0xff] }
 0x7ac   : > { %v5063_v35 = vsel %vm775_vm1, %v4941_v38, 0.0  ;;  %v12087_v25 = vpop.f32.mrb[75].mxu1 }
 0x7ad   : > { %v5064_v34 = vadd.f32 %v5063_v35, %v5062_v40  ;;  %5202 = vmatpush1.bf16.msra.mxu0 %v12918_v10  ;;  %v10692_v25 = vld [vmem:[%s16633_s15] ss:$0 sm:$0xff] }
 0x7ae   : > { %5203 = vmatprep.subr.bf16.mxu0 %v12923_v9 }
 0x7b1   : > { %5204 = vmatpush1.bf16.msra.mxu0 %v12921_v30 }
 0x7b2   : > { %12100 = vmatprep.subr.bf16.mxu0 %v16730_v44 }
 0x7b5   : > { %v4985_v1 = vpop.f32.mrb[76].mxu0 }
 0x7b6   : > { %v5050_v58 = vsel %vm771_vm0, %v4985_v1, 0.0  ;;  %v12092_v28 = vpop.f32.mrb[77].mxu0 }
 0x7b7   : > { %v5051_v54 = vadd.f32 %v5050_v58, %v5049_v24  ;;  %v4988_v26 = vpop.f32.mrb[78].mxu0 }
 0x7b8   : > { %v5065_v19 = vsel %vm775_vm1, %v4988_v26, 0.0  ;;  %v12093_v50 = vpop.f32.mrb[79].mxu0  ;;  %v12925_v26 = vld [vmem:[%s16636_s18] sm:$0xff]  }
 0x7b9   : > { %v5066_v41 = vadd.f32 %v5065_v19, %v5064_v34  ;;  %v5032_v39 = vpop.f32.mrb[76].mxu1  ;;  %v12926_v19 = vld [vmem:[%s16636_s18 + $0x48] sm:$0xff]  }
 0x7ba   : > { %v5052_v46 = vsel %vm771_vm0, %v5032_v39, 0.0  ;;  %v12098_v7 = vpop.f32.mrb[77].mxu1  ;;  %v12927_v50 = vld [vmem:[%s16636_s18 + $0x8] sm:$0xff]   ;;  %v12929_v39 = vld [vmem:[%s16636_s18 + $0x10] sm:$0xff]  }
 0x7bb   : > { %v5053_v22 = vadd.f32 %v5052_v46, %v5051_v54  ;;  %v5035_v45 = vpop.f32.mrb[78].mxu1  ;;  %v12924_v54 = vld [vmem:[%s16636_s18 + $0x40] sm:$0xff]   ;;  %v12930_v46 = vld [vmem:[%s16636_s18 + $0x58] sm:$0xff]  }
 0x7bc   : > { %v5067_v31 = vsel %vm775_vm1, %v5035_v45, 0.0  ;;  %v12099_v48 = vpop.f32.mrb[79].mxu1  ;;  %11399 = vmatprep.subr.bf16.mxu1 %v12924_v54  ;;  %v12932_v7 = vld [vmem:[%s16636_s18 + $0x60] sm:$0xff]   ;;  %v12934_v45 = vld [vmem:[%s16636_s18 + $0x68] sm:$0xff]  }
 0x7bd   : > { %v5076_v52 = vadd.f32 %v10689_v42, %v5053_v22  ;;  %v5068_v60 = vadd.f32 %v5067_v31, %v5066_v41  ;;  %11400 = vmatpush3.bf16.msra.mxu1 %v12925_v26  ;;  %v12928_v41 = vld [vmem:[%s16636_s18 + $0x50] sm:$0xff]   ;;  %v12933_v22 = vld [vmem:[%s16636_s18 + $0x20] sm:$0xff]  }
 0x7be   : > { %11401 = vmatprep.subr.bf16.mxu1 %v12926_v19  ;;  %v12936_v31 = vld [vmem:[%s16636_s18 + $0x70] sm:$0xff]  }
 0x7bf   : > { %v5085_v2 = vmul.f32 %v10690_v63, %v5076_v52  ;;  %v5077_v0 = vadd.f32 %v10689_v42, %v5068_v60  ;;  %v12931_v42 = vld [vmem:[%s16636_s18 + $0x18] sm:$0xff]   ;;  %v12937_v48 = vld [vmem:[%s16636_s18 + $0x30] sm:$0xff]  }
 0x7c0   : > { %v12938_v52 = vld [vmem:[%s16636_s18 + $0x78] sm:$0xff]  }
 0x7c1   : > { %v5086_v47 = vmul.f32 %v10690_v63, %v5077_v0  ;;  %v14941_v57 = vadd.f32 %v5085_v2, %v16731_v6  ;;  %11402 = vmatpush3.bf16.msra.mxu1 %v12927_v50  ;;  %v12935_v63 = vld [vmem:[%s16636_s18 + $0x28] sm:$0xff]   ;;  %v12939_v60 = vld [vmem:[%s16636_s18 + $0x38] sm:$0xff]   ;;  %v5144_v2 = vlaneseq  ;;  %v5142_v6 = vld [vmem:[%s16635_s17] sm:$0x3] }
 0x7c2   : > { %11403 = vmatprep.subr.bf16.mxu1 %v12928_v41 }
 0x7c3   : > { %v5091_v43 = vsel %vm771_vm0, %v14941_v57, 0.0  ;;  %v14946_v29 = vadd.f32 %v5086_v47, %v16732_v33  ;;  %v15038_v0 = vshrl.u32 %v5144_v2, 7 }
 0x7c4   : > { %5092 = vadd.xlane.f32.xlu0 %v5091_v43 }
 0x7c5   : > { %v5094_v59 = vsel %vm775_vm1, %v14946_v29, 0.0  ;;  %11404 = vmatpush3.bf16.msra.mxu1 %v12929_v39  ;;  %16733 = vst [vmem:[#allocation16_spill] sm:$0xff] %v15038_v0  ;;  %v16673_v47 = vsub.s32 0, %v15038_v0  ;;  %v16672_v43 = vsub.s32 1, %v15038_v0 }
 0x7c6   : > { %5095 = vadd.xlane.f32.xlu1 %v5094_v59  ;;  %11405 = vmatprep.subr.bf16.mxu1 %v12930_v46 }
 0x7c7   : > { %v5147_v33 = vrot.slane %v5142_v6, %v16673_v47  ;;  %v5151_v59 = vrot.slane %v5142_v6, %v16672_v43 }
 0x7c9   : > { %11406 = vmatpush3.bf16.msra.mxu1 %v12931_v42 }
 0x7ca   : > { %11407 = vmatprep.subr.bf16.mxu1 %v12932_v7 }
 0x7cd   : > { %11408 = vmatpush3.bf16.msra.mxu1 %v12933_v22 }
 0x7ce   : > { %11409 = vmatprep.subr.bf16.mxu1 %v12934_v45 }
 0x7d1   : > { %11410 = vmatpush3.bf16.msra.mxu1 %v12935_v63 }
 0x7d2   : > { %11411 = vmatprep.subr.bf16.mxu1 %v12936_v31 }
 0x7d5   : > { %11412 = vmatpush3.bf16.msra.mxu1 %v12937_v48 }
 0x7d6   : > { %11413 = vmatprep.subr.bf16.mxu1 %v12938_v52 }
 0x7d9   : > { %11414 = vmatpush3.bf16.msra.mxu1 %v12939_v60 }
 0x7da   : > { %12124 = vmatprep.subr.bf16.mxu1 %v16730_v44 }
 0x851   : > { %v5093_v49 = vpop.xlane.xlu0 %5092 }
 0x852   : > { %v5097_v23 = vmul.f32 0.015625, %v5093_v49 }
 0x853   : > { %v5096_v8 = vpop.xlane.xlu1 %5095 }
 0x854   : > { %v5099_v5 = vsub.f32 %v14941_v57, %v5097_v23  ;;  %v5098_v17 = vmul.f32 0.015625, %v5096_v8 }
 0x856   : > { %v5100_v12 = vsub.f32 %v14946_v29, %v5098_v17  ;;  %v5101_v53 = vmul.f32 %v5099_v5, %v5099_v5 }
 0x858   : > { %v5103_v20 = vsel %vm771_vm0, %v5101_v53, 0.0  ;;  %v5102_v62 = vmul.f32 %v5100_v12, %v5100_v12 }
 0x859   : > { %5104 = vadd.xlane.f32.xlu0 %v5103_v20 }
 0x85a   : > { %v5106_v21 = vsel %vm775_vm1, %v5102_v62, 0.0 }
 0x85b   : > { %5107 = vadd.xlane.f32.xlu1 %v5106_v21 }
 0x8e6   : > { %v5105_v18 = vpop.xlane.xlu0 %5104 }
 0x8e7   : > { %v5109_v13 = vmul.f32 0.015625, %v5105_v18 }
 0x8e8   : > { %v5108_v55 = vpop.xlane.xlu1 %5107 }
 0x8e9   : > { %v5111_v4 = vadd.f32 1e-06, %v5109_v13  ;;  %v5110_v32 = vmul.f32 0.015625, %v5108_v55 }
 0x8eb   : > { %13196 = vrsqrt.f32 %v5111_v4  ;;  %v5112_v40 = vadd.f32 1e-06, %v5110_v32 }
 0x8ed   : > { %13198 = vrsqrt.f32 %v5112_v40 }
 0x8f5   : > { %v13197_v37 = vpop.eup %13196 }
 0x8f6   : > { %v5115_v36 = vmul.f32 %v13197_v37, %v5099_v5 }
 0x8f7   : > { %v13199_v24 = vpop.eup %13198 }
 0x8f8   : > { %v5123_v38 = vmul.f32 %v10691_v15, %v5115_v36  ;;  %v5116_v35 = vmul.f32 %v13199_v24, %v5100_v12 }
 0x8fa   : > { %v5124_v34 = vmul.f32 %v10691_v15, %v5116_v35  ;;  %v5131_v1 = vadd.f32 %v10692_v25, %v5123_v38 }
 0x8fc   : > { %v5132_v58 = vadd.f32 %v10692_v25, %v5124_v34 }
 0x8fe   : > { %v5133_v28 = vpack.c.bf16 %v5132_v58, %v5131_v1 }
 0x900   : > { %10701 = vmatmul.mubr.msk.bf16.vlgmr.msra.gmra.mrb[80].mxu0 %vm771_vm0, %v5133_v28 }
 0x901   : > { %12108 = vmatprep.mubr.msk.bf16.mxu0 %vm13435_vm2, %v16730_v44 }
 0x9d3   : > { %v5231_v49 = vpop.f32.mrb[80].mxu0 }
 0x9d4   : > { %v15049_v23 = vadd.f32 %v5231_v49, %v5147_v33  ;;  %v5233_v8 = vpop.f32.mrb[81].mxu0 }
 0x9d5   : > { %v15051_v5 = vadd.f32 %v5233_v8, %v5151_v59  ;;  %v5235_v17 = vpop.f32.mrb[82].mxu0 }
 0x9d6   : > { %v15054_v12 = vmul.f32 0.70710677, %v15049_v23  ;;  %v15056_v53 = vadd.f32 %v5235_v17, %v5147_v33  ;;  %v5237_v20 = vpop.f32.mrb[83].mxu0 }
 0x9d7   : > { %v15059_v62 = vmul.f32 0.70710677, %v15051_v5  ;;  %v15065_v61 = vadd.f32 %v5237_v20, %v5151_v59 }
 0x9d8   : > { %v5256_v21 = vand.u32 2147483647, %v15054_v12  ;;  %v15063_v11 = vmul.f32 0.70710677, %v15056_v53  ;;  %vm5248_vm12 = vcmp.ge.f32.partialorder %v15054_v12, 0.0 }
 0x9d9   : > { %v5257_v56 = vand.u32 2147483647, %v15059_v62  ;;  %v15070_v9 = vmul.f32 0.70710677, %v15065_v61  ;;  %vm5249_vm13 = vcmp.ge.f32.partialorder %v15059_v62, 0.0 }
 0x9da   : > { %v5260_v14 = vmul.f32 0.3275911, %v5256_v21  ;;  %v5258_v10 = vand.u32 2147483647, %v15063_v11  ;;  %v5312_v37 = vsub.f32 0.0, %v5256_v21  ;;  %vm5250_vm14 = vcmp.ge.f32.partialorder %v15063_v11, 0.0 }
 0x9db   : > { %v5261_v51 = vmul.f32 0.3275911, %v5257_v56  ;;  %v5259_v55 = vand.u32 2147483647, %v15070_v9  ;;  %v5313_v15 = vsub.f32 0.0, %v5257_v56  ;;  %vm5251_vm15 = vcmp.ge.f32.partialorder %v15070_v9, 0.0 }
 0x9dc   : > { %v5264_v30 = vadd.f32 1.0, %v5260_v14  ;;  %v5262_v13 = vmul.f32 0.3275911, %v5258_v10  ;;  %v5316_v24 = vmul.f32 %v5312_v37, %v5256_v21  ;;  %v5314_v38 = vsub.f32 0.0, %v5258_v10 }
 0x9dd   : > { %v5265_v18 = vadd.f32 1.0, %v5261_v51  ;;  %v5263_v32 = vmul.f32 0.3275911, %v5259_v55  ;;  %v5317_v34 = vmul.f32 %v5313_v15, %v5257_v56  ;;  %v5315_v58 = vsub.f32 0.0, %v5259_v55 }
 0x9de   : > { %13200 = vrcp.f32 %v5264_v30  ;;  %v5266_v4 = vadd.f32 1.0, %v5262_v13  ;;  %v5320_v26 = vmul.f32 1.442695, %v5316_v24  ;;  %v5318_v50 = vmul.f32 %v5314_v38, %v5258_v10 }
 0x9df   : > { %13202 = vrcp.f32 %v5265_v18  ;;  %v5267_v40 = vadd.f32 1.0, %v5263_v32  ;;  %v5322_v39 = vmul.f32 1.442695, %v5317_v34  ;;  %v5319_v22 = vmul.f32 %v5315_v58, %v5259_v55 }
 0x9e0   : > { %13204 = vrcp.f32 %v5266_v4  ;;  %v5324_v52 = vmul.f32 1.442695, %v5318_v50  ;;  %v5243_v9 = vmul.f32 0.5, %v15065_v61  ;;  %v10719_v61 = vld [vmem:[%s16638_s20] ss:$0 sm:$0xff] }
 0x9e1   : > { %13206 = vrcp.f32 %v5267_v40  ;;  %v5326_v59 = vmul.f32 1.442695, %v5319_v22 }
 0x9e2   : > { %13208 = vpow2.f32 %v5320_v26 }
 0x9e3   : > { %13210 = vpow2.f32 %v5322_v39 }
 0x9e4   : > { %13212 = vpow2.f32 %v5324_v52 }
 0x9e5   : > { %13214 = vpow2.f32 %v5326_v59 }
 0x9e8   : > { %v13201_v36 = vpop.eup %13200 }
 0x9e9   : > { %v13203_v35 = vpop.eup %13202  ;;  %v5276_v25 = vmul.f32 1.0614054, %v13201_v36 }
 0x9ea   : > { %v5277_v1 = vmul.f32 1.0614054, %v13203_v35  ;;  %v13205_v54 = vpop.eup %13204 }
 0x9eb   : > { %v5280_v28 = vadd.f32 -1.4531521, %v5276_v25  ;;  %v5278_v46 = vmul.f32 1.0614054, %v13205_v54  ;;  %v13207_v42 = vpop.eup %13206 }
 0x9ec   : > { %v5281_v19 = vadd.f32 -1.4531521, %v5277_v1  ;;  %v5279_v31 = vmul.f32 1.0614054, %v13207_v42  ;;  %v13209_v40 = vpop.eup %13208 }
 0x9ed   : > { %v5284_v41 = vmul.f32 %v13201_v36, %v5280_v28  ;;  %v5282_v63 = vadd.f32 -1.4531521, %v5278_v46  ;;  %v13211_v15 = vpop.eup %13210 }
 0x9ee   : > { %v5285_v7 = vmul.f32 %v13203_v35, %v5281_v19  ;;  %v5283_v6 = vadd.f32 -1.4531521, %v5279_v31  ;;  %v13213_v26 = vpop.eup %13212  ;;  %v16670_v19 = vmov -1.0  }
 0x9ef   : > { %v5288_v45 = vadd.f32 1.4214138, %v5284_v41  ;;  %v5286_v2 = vmul.f32 %v13205_v54, %v5282_v63  ;;  %v13215_v12 = vpop.eup %13214  ;;  %v5253_v46 = vsel %vm5249_vm13, 1.0, %v16670_v19  ;;  %v5255_v52 = vsel %vm5251_vm15, 1.0, %v16670_v19 }
 0x9f0   : > { %v5289_v48 = vadd.f32 1.4214138, %v5285_v7  ;;  %v5287_v17 = vmul.f32 %v13207_v42, %v5283_v6  ;;  %v5241_v6 = vmul.f32 0.5, %v15051_v5 }
 0x9f1   : > { %v5292_v60 = vmul.f32 %v13201_v36, %v5288_v45  ;;  %v5290_v8 = vadd.f32 1.4214138, %v5286_v2 }
 0x9f2   : > { %v5293_v33 = vmul.f32 %v13203_v35, %v5289_v48  ;;  %v5291_v14 = vadd.f32 1.4214138, %v5287_v17  ;;  %v5240_v48 = vmul.f32 0.5, %v15049_v23 }
 0x9f3   : > { %v5296_v49 = vadd.f32 -0.28449672, %v5292_v60  ;;  %v5294_v56 = vmul.f32 %v13205_v54, %v5290_v8 }
 0x9f4   : > { %v5297_v20 = vadd.f32 -0.28449672, %v5293_v33  ;;  %v5295_v18 = vmul.f32 %v13207_v42, %v5291_v14 }
 0x9f5   : > { %v5300_v21 = vmul.f32 %v13201_v36, %v5296_v49  ;;  %v5298_v30 = vadd.f32 -0.28449672, %v5294_v56 }
 0x9f6   : > { %v5301_v51 = vmul.f32 %v13203_v35, %v5297_v20  ;;  %v5299_v32 = vadd.f32 -0.28449672, %v5295_v18 }
 0x9f7   : > { %v5304_v10 = vadd.f32 0.2548296, %v5300_v21  ;;  %v5302_v4 = vmul.f32 %v13205_v54, %v5298_v30 }
 0x9f8   : > { %v5305_v13 = vadd.f32 0.2548296, %v5301_v51  ;;  %v5303_v25 = vmul.f32 %v13207_v42, %v5299_v32 }
 0x9f9   : > { %v5308_v55 = vmul.f32 %v13201_v36, %v5304_v10  ;;  %v5306_v38 = vadd.f32 0.2548296, %v5302_v4  ;;  %v5252_v36 = vsel %vm5248_vm12, 1.0, %v16670_v19 }
 0x9fa   : > { %v5309_v37 = vmul.f32 %v13203_v35, %v5305_v13  ;;  %v5307_v28 = vadd.f32 0.2548296, %v5303_v25 }
 0x9fb   : > { %v5328_v24 = vmul.f32 %v13209_v40, %v5308_v55  ;;  %v5310_v58 = vmul.f32 %v13205_v54, %v5306_v38  ;;  %v5254_v54 = vsel %vm5250_vm14, 1.0, %v16670_v19 }
 0x9fc   : > { %v5329_v34 = vmul.f32 %v13211_v15, %v5309_v37  ;;  %v5311_v39 = vmul.f32 %v13207_v42, %v5307_v28  ;;  %v5242_v42 = vmul.f32 0.5, %v15056_v53  ;;  %v10702_v53 = vld [vmem:[%s16637_s19] ss:$0 sm:$0xff] }
 0x9fd   : > { %v5332_v1 = vsub.f32 1.0, %v5328_v24  ;;  %v5330_v35 = vmul.f32 %v13213_v26, %v5310_v58  ;;  %v12940_v26 = vld [vmem:[%s16711_s26 + $0x100] sm:$0xff]  }
 0x9fe   : > { %v5333_v50 = vsub.f32 1.0, %v5329_v34  ;;  %v5331_v62 = vmul.f32 %v13215_v12, %v5311_v39  ;;  %12101 = vmatpush3.bf16.msra.mxu0 %v12940_v26  ;;  %v12945_v39 = vld [vmem:[%s16711_s26 + $0x150] sm:$0xff]   ;;  %v12946_v12 = vld [vmem:[%s16711_s26 + $0x118] sm:$0xff]  }
 0x9ff   : > { %v5336_v41 = vmul.f32 %v5332_v1, %v5252_v36  ;;  %v5334_v22 = vsub.f32 1.0, %v5330_v35  ;;  %v12941_v36 = vld [vmem:[%s16711_s26 + $0x140] sm:$0xff]   ;;  %12102 = vmatprep.subr.bf16.mxu0 %v16730_v44  ;;  %v12944_v35 = vld [vmem:[%s16711_s26 + $0x110] sm:$0xff]  }
 0xa00   : > { %v5337_v7 = vmul.f32 %v5333_v50, %v5253_v46  ;;  %v5335_v31 = vsub.f32 1.0, %v5331_v62  ;;  %v12942_v50 = vld [vmem:[%s16711_s26 + $0x108] sm:$0xff]   ;;  %v12947_v46 = vld [vmem:[%s16711_s26 + $0x158] sm:$0xff]   ;;  %v12977_v26 = vld [vmem:[%s16715_s8 + $0x150] sm:$0xff]  }
 0xa01   : > { %v5340_v45 = vadd.f32 1.0, %v5336_v41  ;;  %v5338_v63 = vmul.f32 %v5334_v22, %v5254_v54  ;;  %v12943_v41 = vld [vmem:[%s16711_s26 + $0x148] sm:$0xff]  }
 0xa02   : > { %v5341_v11 = vadd.f32 1.0, %v5337_v7  ;;  %v5339_v2 = vmul.f32 %v5335_v31, %v5255_v52  ;;  %12103 = vmatpush3.bf16.msra.mxu0 %v12942_v50  ;;  %v12979_v50 = vld [vmem:[%s16715_s8 + $0x158] sm:$0xff]  }
 0xa03   : > { %v5342_v60 = vadd.f32 1.0, %v5338_v63  ;;  %v5344_v33 = vmul.f32 %v5340_v45, %v5240_v48  ;;  %12104 = vmatprep.subr.bf16.mxu0 %v16730_v44  ;;  %v10722_v48 = vld [vmem:[%s16713_s27 + $0x1] ss:$0 sm:$0xff] }
 0xa04   : > { %v5343_v49 = vadd.f32 1.0, %v5339_v2  ;;  %v5345_v8 = vmul.f32 %v5341_v11, %v5241_v6  ;;  %v10723_v2 = vld [vmem:[%s16714_s9 + $0x1] ss:$0 sm:$0xff] }
 0xa05   : > { %v5346_v59 = vmul.f32 %v5342_v60, %v5242_v42 }
 0xa06   : > { %v5347_v20 = vmul.f32 %v5343_v49, %v5243_v9  ;;  %12105 = vmatpush3.bf16.msra.mxu0 %v12944_v35  ;;  %v12948_v9 = vld [vmem:[%s16711_s26 + $0x120] sm:$0xff]  }
 0xa07   : > { %v5348_v17 = vpack.c.bf16 %v5346_v59, %v5344_v33  ;;  %12106 = vmatprep.subr.bf16.mxu0 %v16730_v44  ;;  %v12949_v49 = vld [vmem:[%s16711_s26 + $0x180] sm:$0xff]  }
 0xa08   : > { %v5349_v21 = vpack.c.bf16 %v5347_v20, %v5345_v8  ;;  %v12951_v20 = vld [vmem:[%s16711_s26 + $0x188] sm:$0xff]   ;;  %v12981_v35 = vld [vmem:[%s16715_s8 + $0x180] sm:$0xff]  }
 0xa0a   : > { %5517 = vmatprep.mubr.bf16.mxu1 %v5349_v21  ;;  %12107 = vmatpush3.bf16.msra.mxu0 %v12946_v12  ;;  %v12952_v21 = vld [vmem:[%s16711_s26 + $0x130] sm:$0xff]   ;;  %v12983_v12 = vld [vmem:[%s16715_s8 + $0x188] sm:$0xff]  }
 0xa0b   : > { %5518 = vmatmul.mubr.bf16.vlgmr.msra.gmra.mrb[80].mxu1 %v5348_v17  ;;  %12112 = vmatprep.subr.bf16.mxu0 %v16730_v44  ;;  %v12950_v17 = vld [vmem:[%s16711_s26 + $0x128] sm:$0xff]  }
 0xa0c   : > { %12132 = vmatprep.mubr.msk.bf16.mxu1 %vm13435_vm2, %v16730_v44  ;;  %12125 = vmatpush3.bf16.msra.mxu1 %v12941_v36  ;;  %v12978_v36 = vld [vmem:[%s16711_s26 + $0x1f8] sm:$0xff]  }
 0xa0d   : > { %12126 = vmatprep.subr.bf16.mxu1 %v16730_v44 }
 0xa10   : > { %12127 = vmatpush3.bf16.msra.mxu1 %v12943_v41  ;;  %v12980_v41 = vld [vmem:[%s16715_s8 + $0x120] sm:$0xff]  }
 0xa11   : > { %12128 = vmatprep.subr.bf16.mxu1 %v16730_v44 }
 0xa14   : > { %12129 = vmatpush3.bf16.msra.mxu1 %v12945_v39  ;;  %v12982_v39 = vld [vmem:[%s16715_s8 + $0x128] sm:$0xff]  }
 0xa15   : > { %12130 = vmatprep.subr.bf16.mxu1 %v16730_v44 }
 0xa18   : > { %12131 = vmatpush3.bf16.msra.mxu1 %v12947_v46  ;;  %v12984_v46 = vld [vmem:[%s16715_s8 + $0x130] sm:$0xff]  }
 0xa19   : > { %12148 = vmatprep.subr.bf16.mxu1 %v16730_v44 }
 0xade   : > { %v11415_v23 = vpop.f32.mrb[80].mxu1 }
 0xadf   : > { %v11416_v5 = vpop.f32.mrb[81].mxu1 }
 0xae0   : > { %v11417_v56 = vadd.f32 %v11416_v5, %v11415_v23  ;;  %v11418_v14 = vpop.f32.mrb[82].mxu1  ;;  %v12953_v23 = vld [vmem:[%s16711_s26 + $0x190] sm:$0xff]   ;;  %v12955_v5 = vld [vmem:[%s16711_s26 + $0x198] sm:$0xff]  }
 0xae1   : > { %v11419_v51 = vpop.f32.mrb[83].mxu1 }
 0xae2   : > { %v5520_v10 = vadd.f32 %v11417_v56, %v10702_v53  ;;  %v11420_v30 = vadd.f32 %v11419_v51, %v11418_v14  ;;  %v12956_v56 = vld [vmem:[%s16711_s26 + $0x160] sm:$0xff]   ;;  %v12959_v51 = vld [vmem:[%s16711_s26 + $0x1c8] sm:$0xff]  }
 0xae3   : > { %v12957_v14 = vld [vmem:[%s16711_s26 + $0x1c0] sm:$0xff]  }
 0xae4   : > { %v5533_v18 = vmul.f32 %v10719_v61, %v5520_v10  ;;  %v5523_v13 = vadd.f32 %v11420_v30, %v10702_v53  ;;  %v12954_v53 = vld [vmem:[%s16711_s26 + $0x138] sm:$0xff]   ;;  %v12960_v10 = vld [vmem:[%s16711_s26 + $0x170] sm:$0xff]  }
 0xae5   : > { %v12961_v30 = vld [vmem:[%s16711_s26 + $0x1d0] sm:$0xff]  }
 0xae6   : > { %v5534_v55 = vmul.f32 %v10719_v61, %v5523_v13  ;;  %v15094_v4 = vadd.f32 %v5533_v18, %v14941_v57  ;;  %v12958_v61 = vld [vmem:[%s16711_s26 + $0x168] sm:$0xff]   ;;  %v12962_v18 = vld [vmem:[%s16711_s26 + $0x178] sm:$0xff]  }
 0xae7   : > { %v12963_v13 = vld [vmem:[%s16711_s26 + $0x1d8] sm:$0xff]  }
 0xae8   : > { %v5541_v32 = vsel %vm771_vm0, %v15094_v4, 0.0  ;;  %v15099_v40 = vadd.f32 %v5534_v55, %v14946_v29  ;;  %v12964_v55 = vld [vmem:[%s16711_s26 + $0x1a0] sm:$0xff]  }
 0xae9   : > { %5542 = vadd.xlane.f32.xlu0 %v5541_v32  ;;  %v12965_v32 = vld [vmem:[%s16715_s8 + $0x100] sm:$0xff]  }
 0xaea   : > { %16734 = vst [vmem:[#allocation15_spill] sm:$0xff] %v15099_v40  ;;  %v5544_v37 = vsel %vm775_vm1, %v15099_v40, 0.0 }
 0xaeb   : > { %5545 = vadd.xlane.f32.xlu1 %v5544_v37  ;;  %v12966_v37 = vld [vmem:[%s16711_s26 + $0x1a8] sm:$0xff]  }
 0xb76   : > { %v5543_v15 = vpop.xlane.xlu0 %5542 }
 0xb77   : > { %v5547_v24 = vmul.f32 0.015625, %v5543_v15  ;;  %v12967_v15 = vld [vmem:[%s16715_s8 + $0x108] sm:$0xff]  }
 0xb78   : > { %v5546_v38 = vpop.xlane.xlu1 %5545 }
 0xb79   : > { %v5549_v25 = vsub.f32 %v15094_v4, %v5547_v24  ;;  %v5548_v34 = vmul.f32 0.015625, %v5546_v38  ;;  %v12968_v24 = vld [vmem:[%s16711_s26 + $0x1b0] sm:$0xff]  }
 0xb7a   : > { %v12969_v38 = vld [vmem:[%s16715_s8 + $0x110] sm:$0xff]  }
 0xb7b   : > { %v5550_v57 = vsub.f32 %v15099_v40, %v5548_v34  ;;  %v5551_v1 = vmul.f32 %v5549_v25, %v5549_v25  ;;  %v12971_v34 = vld [vmem:[%s16715_s8 + $0x118] sm:$0xff]  }
 0xb7d   : > { %v5553_v58 = vsel %vm771_vm0, %v5551_v1, 0.0  ;;  %v5552_v28 = vmul.f32 %v5550_v57, %v5550_v57  ;;  %v12973_v1 = vld [vmem:[%s16715_s8 + $0x140] sm:$0xff]  }
 0xb7e   : > { %5554 = vadd.xlane.f32.xlu0 %v5553_v58  ;;  %v12974_v58 = vld [vmem:[%s16711_s26 + $0x1e8] sm:$0xff]  }
 0xb7f   : > { %v5556_v29 = vsel %vm775_vm1, %v5552_v28, 0.0  ;;  %v12975_v28 = vld [vmem:[%s16715_s8 + $0x148] sm:$0xff]  }
 0xb80   : > { %5557 = vadd.xlane.f32.xlu1 %v5556_v29  ;;  %v12976_v29 = vld [vmem:[%s16711_s26 + $0x1f0] sm:$0xff]  }
 0xc0b   : > { %v5555_v7 = vpop.xlane.xlu0 %5554 }
 0xc0c   : > { %v5559_v22 = vmul.f32 0.015625, %v5555_v7  ;;  %v12985_v7 = vld [vmem:[%s16715_s8 + $0x190] sm:$0xff]  }
 0xc0d   : > { %v5558_v62 = vpop.xlane.xlu1 %5557 }
 0xc0e   : > { %v5561_v54 = vadd.f32 1e-06, %v5559_v22  ;;  %v5560_v45 = vmul.f32 0.015625, %v5558_v62  ;;  %v12986_v22 = vld [vmem:[%s16715_s8 + $0x138] sm:$0xff]  }
 0xc0f   : > { %v12987_v62 = vld [vmem:[%s16715_s8 + $0x198] sm:$0xff]  }
 0xc10   : > { %13216 = vrsqrt.f32 %v5561_v54  ;;  %v5562_v63 = vadd.f32 1e-06, %v5560_v45  ;;  %v12988_v54 = vld [vmem:[%s16715_s8 + $0x160] sm:$0xff]  }
 0xc11   : > { %v12989_v45 = vld [vmem:[%s16715_s8 + $0x1c0] sm:$0xff]  }
 0xc12   : > { %13218 = vrsqrt.f32 %v5562_v63  ;;  %v12990_v63 = vld [vmem:[%s16715_s8 + $0x168] sm:$0xff]  }
 0xc1a   : > { %v13217_v31 = vpop.eup %13216 }
 0xc1b   : > { %v5565_v52 = vmul.f32 %v13217_v31, %v5549_v25  ;;  %v12970_v25 = vld [vmem:[%s16711_s26 + $0x1b8] sm:$0xff]   ;;  %v12991_v31 = vld [vmem:[%s16715_s8 + $0x1c8] sm:$0xff]  }
 0xc1c   : > { %v13219_v11 = vpop.eup %13218 }
 0xc1d   : > { %v5573_v42 = vmul.f32 %v10722_v48, %v5565_v52  ;;  %v5566_v60 = vmul.f32 %v13219_v11, %v5550_v57  ;;  %v12972_v57 = vld [vmem:[%s16711_s26 + $0x1e0] sm:$0xff]   ;;  %v12993_v52 = vld [vmem:[%s16715_s8 + $0x1d0] sm:$0xff]   ;;  %v12994_v11 = vld [vmem:[%s16715_s8 + $0x178] sm:$0xff]  }
 0xc1f   : > { %v5574_v6 = vmul.f32 %v10722_v48, %v5566_v60  ;;  %v5581_v33 = vadd.f32 %v10723_v2, %v5573_v42  ;;  %v12992_v48 = vld [vmem:[%s16715_s8 + $0x170] sm:$0xff]   ;;  %v12995_v42 = vld [vmem:[%s16715_s8 + $0x1d8] sm:$0xff]   ;;  %v12996_v60 = vld [vmem:[%s16715_s8 + $0x1a0] sm:$0xff]  }
 0xc21   : > { %v5582_v59 = vadd.f32 %v10723_v2, %v5574_v6  ;;  %v12997_v2 = vld [vmem:[%s16717_s25 + $0x100] sm:$0xff]   ;;  %v12998_v6 = vld [vmem:[%s16715_s8 + $0x1a8] sm:$0xff]  }
 0xc23   : > { %v15151_v8 = vpack.c.bf16 %v5582_v59, %v5581_v33  ;;  %v12999_v33 = vld [vmem:[%s16717_s25 + $0x108] sm:$0xff]   ;;  %v13000_v59 = vld [vmem:[%s16715_s8 + $0x1b0] sm:$0xff]  }
 0xc25   : > { %12109 = vmatmul.mubr.msk.bf16.vlgmr.msra.gmra.mrb[84].mxu0 %vm771_vm0, %v15151_v8  ;;  %12133 = vmatmul.mubr.msk.bf16.vlgmr.msra.gmra.mrb[84].mxu1 %vm771_vm0, %v15151_v8 }
 0xc26   : > { %12113 = vmatpush3.bf16.msra.mxu0 %v12948_v9  ;;  %12149 = vmatpush3.bf16.msra.mxu1 %v12949_v49  ;;  %v13001_v9 = vld [vmem:[%s16717_s25 + $0x110] sm:$0xff]   ;;  %v13002_v49 = vld [vmem:[%s16715_s8 + $0x1b8] sm:$0xff]  }
 0xc27   : > { %12114 = vmatprep.subr.bf16.mxu0 %v16730_v44  ;;  %12150 = vmatprep.subr.bf16.mxu1 %v16730_v44 }
 0xc28   : > { %12120 = vmatprep.mubr.msk.bf16.mxu0 %vm13435_vm2, %v16730_v44  ;;  %12156 = vmatprep.mubr.msk.bf16.mxu1 %vm13435_vm2, %v16730_v44 }
 0xc2a   : > { %12115 = vmatpush3.bf16.msra.mxu0 %v12950_v17  ;;  %12151 = vmatpush3.bf16.msra.mxu1 %v12951_v20  ;;  %v13003_v17 = vld [vmem:[%s16717_s25 + $0x118] sm:$0xff]   ;;  %v13004_v20 = vld [vmem:[%s16715_s8 + $0x1e0] sm:$0xff]  }
 0xc2b   : > { %12116 = vmatprep.subr.bf16.mxu0 %v16730_v44  ;;  %12152 = vmatprep.subr.bf16.mxu1 %v16730_v44 }
 0xc2e   : > { %12117 = vmatpush3.bf16.msra.mxu0 %v12952_v21  ;;  %12153 = vmatpush3.bf16.msra.mxu1 %v12953_v23  ;;  %v13005_v21 = vld [vmem:[%s16717_s25 + $0x140] sm:$0xff]   ;;  %v13006_v23 = vld [vmem:[%s16715_s8 + $0x1e8] sm:$0xff]  }
 0xc2f   : > { %12118 = vmatprep.subr.bf16.mxu0 %v16730_v44  ;;  %12154 = vmatprep.subr.bf16.mxu1 %v16730_v44 }
 0xc32   : > { %12119 = vmatpush3.bf16.msra.mxu0 %v12954_v53  ;;  %12155 = vmatpush3.bf16.msra.mxu1 %v12955_v5  ;;  %v13007_v53 = vld [vmem:[%s16717_s25 + $0x148] sm:$0xff]   ;;  %v13008_v5 = vld [vmem:[%s16715_s8 + $0x1f0] sm:$0xff]  }
 0xc33   : > { %12136 = vmatprep.subr.bf16.mxu0 %v16730_v44  ;;  %12172 = vmatprep.subr.bf16.mxu1 %v16730_v44 }
 0xc35   : > { %12121 = vmatmul.mubr.msk.bf16.vlgmr.msra.gmra.mrb[88].mxu0 %vm771_vm0, %v15151_v8  ;;  %12157 = vmatmul.mubr.msk.bf16.vlgmr.msra.gmra.mrb[88].mxu1 %vm771_vm0, %v15151_v8 }
 0xc36   : > { %12137 = vmatpush3.bf16.msra.mxu0 %v12956_v56  ;;  %12173 = vmatpush3.bf16.msra.mxu1 %v12957_v14  ;;  %v13009_v56 = vld [vmem:[%s16717_s25 + $0x150] sm:$0xff]   ;;  %v13010_v14 = vld [vmem:[%s16715_s8 + $0x1f8] sm:$0xff]   ;;  %s756_s8 = scalar_lea.vmem [#allocation2], %s755_s30 }
 0xc37   : > { %12138 = vmatprep.subr.bf16.mxu0 %v16730_v44  ;;  %12174 = vmatprep.subr.bf16.mxu1 %v16730_v44  ;;  %s10438_s9 = sshll.u32 %s756_s8, 4  ;;  %s16578_s9 = int_to_ptr.vmem [resolvable:$true] %s10438_s9 }
 0xc38   : > { %12144 = vmatprep.mubr.msk.bf16.mxu0 %vm13435_vm2, %v16730_v44  ;;  %12180 = vmatprep.mubr.msk.bf16.mxu1 %vm13435_vm2, %v16730_v44 }
 0xc3a   : > { %12139 = vmatpush3.bf16.msra.mxu0 %v12958_v61  ;;  %12175 = vmatpush3.bf16.msra.mxu1 %v12959_v51  ;;  %v13011_v61 = vld [vmem:[%s16717_s25 + $0x158] sm:$0xff]   ;;  %v13012_v51 = vld [vmem:[%s16717_s25 + $0x120] sm:$0xff]  }
 0xc3b   : > { %12140 = vmatprep.subr.bf16.mxu0 %v16730_v44  ;;  %12176 = vmatprep.subr.bf16.mxu1 %v16730_v44 }
 0xc3e   : > { %12141 = vmatpush3.bf16.msra.mxu0 %v12960_v10  ;;  %12177 = vmatpush3.bf16.msra.mxu1 %v12961_v30  ;;  %v13013_v10 = vld [vmem:[%s16717_s25 + $0x180] sm:$0xff]   ;;  %v13014_v30 = vld [vmem:[%s16717_s25 + $0x128] sm:$0xff]  }
 0xc3f   : > { %12142 = vmatprep.subr.bf16.mxu0 %v16730_v44  ;;  %12178 = vmatprep.subr.bf16.mxu1 %v16730_v44 }
 0xc42   : > { %12143 = vmatpush3.bf16.msra.mxu0 %v12962_v18  ;;  %12179 = vmatpush3.bf16.msra.mxu1 %v12963_v13  ;;  %v13015_v18 = vld [vmem:[%s16717_s25 + $0x188] sm:$0xff]   ;;  %v13016_v13 = vld [vmem:[%s16717_s25 + $0x130] sm:$0xff]  }
 0xc43   : > { %12160 = vmatprep.subr.bf16.mxu0 %v16730_v44  ;;  %12196 = vmatprep.subr.bf16.mxu1 %v16730_v44 }
 0xc45   : > { %12145 = vmatmul.mubr.msk.bf16.vlgmr.msra.gmra.mrb[92].mxu0 %vm771_vm0, %v15151_v8  ;;  %12181 = vmatmul.mubr.msk.bf16.vlgmr.msra.gmra.mrb[92].mxu1 %vm771_vm0, %v15151_v8 }
 0xc46   : > { %12161 = vmatpush3.bf16.msra.mxu0 %v12964_v55  ;;  %12197 = vmatpush3.bf16.msra.mxu1 %v12965_v32  ;;  %v13017_v55 = vld [vmem:[%s16717_s25 + $0x190] sm:$0xff]   ;;  %v13018_v32 = vld [vmem:[%s16717_s25 + $0x138] sm:$0xff]  }
 0xc47   : > { %12162 = vmatprep.subr.bf16.mxu0 %v16730_v44  ;;  %12198 = vmatprep.subr.bf16.mxu1 %v16730_v44 }
 0xc48   : > { %12168 = vmatprep.mubr.msk.bf16.mxu0 %vm13435_vm2, %v16730_v44  ;;  %12204 = vmatprep.mubr.msk.bf16.mxu1 %vm13435_vm2, %v16730_v44 }
 0xc4a   : > { %12163 = vmatpush3.bf16.msra.mxu0 %v12966_v37  ;;  %12199 = vmatpush3.bf16.msra.mxu1 %v12967_v15  ;;  %v13019_v37 = vld [vmem:[%s16717_s25 + $0x198] sm:$0xff]   ;;  %v13020_v15 = vld [vmem:[%s16717_s25 + $0x160] sm:$0xff]  }
 0xc4b   : > { %12164 = vmatprep.subr.bf16.mxu0 %v16730_v44  ;;  %12200 = vmatprep.subr.bf16.mxu1 %v16730_v44 }
 0xc4e   : > { %12165 = vmatpush3.bf16.msra.mxu0 %v12968_v24  ;;  %12201 = vmatpush3.bf16.msra.mxu1 %v12969_v38  ;;  %v13021_v24 = vld [vmem:[%s16717_s25 + $0x1c0] sm:$0xff]   ;;  %v13022_v38 = vld [vmem:[%s16717_s25 + $0x168] sm:$0xff]  }
 0xc4f   : > { %12166 = vmatprep.subr.bf16.mxu0 %v16730_v44  ;;  %12202 = vmatprep.subr.bf16.mxu1 %v16730_v44 }
 0xc52   : > { %12167 = vmatpush3.bf16.msra.mxu0 %v12970_v25  ;;  %12203 = vmatpush3.bf16.msra.mxu1 %v12971_v34  ;;  %v13023_v25 = vld [vmem:[%s16717_s25 + $0x1c8] sm:$0xff]   ;;  %v13024_v34 = vld [vmem:[%s16717_s25 + $0x170] sm:$0xff]  }
 0xc53   : > { %12184 = vmatprep.subr.bf16.mxu0 %v16730_v44  ;;  %12220 = vmatprep.subr.bf16.mxu1 %v16730_v44 }
 0xc55   : > { %12169 = vmatmul.mubr.msk.bf16.vlgmr.msra.gmra.mrb[96].mxu0 %vm771_vm0, %v15151_v8  ;;  %12205 = vmatmul.mubr.msk.bf16.vlgmr.msra.gmra.mrb[96].mxu1 %vm771_vm0, %v15151_v8 }
 0xc56   : > { %12185 = vmatpush3.bf16.msra.mxu0 %v12972_v57  ;;  %12221 = vmatpush3.bf16.msra.mxu1 %v12973_v1  ;;  %v13025_v57 = vld [vmem:[%s16717_s25 + $0x1d0] sm:$0xff]   ;;  %v13026_v1 = vld [vmem:[%s16717_s25 + $0x178] sm:$0xff]  }
 0xc57   : > { %12186 = vmatprep.subr.bf16.mxu0 %v16730_v44  ;;  %12222 = vmatprep.subr.bf16.mxu1 %v16730_v44 }
 0xc58   : > { %12192 = vmatprep.mubr.msk.bf16.mxu0 %vm13435_vm2, %v16730_v44  ;;  %12228 = vmatprep.mubr.msk.bf16.mxu1 %vm13435_vm2, %v16730_v44 }
 0xc5a   : > { %12187 = vmatpush3.bf16.msra.mxu0 %v12974_v58  ;;  %12223 = vmatpush3.bf16.msra.mxu1 %v12975_v28  ;;  %v13027_v58 = vld [vmem:[%s16717_s25 + $0x1d8] sm:$0xff]   ;;  %v13028_v28 = vld [vmem:[%s16717_s25 + $0x1a0] sm:$0xff]  }
 0xc5b   : > { %12188 = vmatprep.subr.bf16.mxu0 %v16730_v44  ;;  %12224 = vmatprep.subr.bf16.mxu1 %v16730_v44 }
 0xc5e   : > { %12189 = vmatpush3.bf16.msra.mxu0 %v12976_v29  ;;  %12225 = vmatpush3.bf16.msra.mxu1 %v12977_v26  ;;  %v13029_v29 = vld [vmem:[%s16717_s25 + $0x1a8] sm:$0xff]   ;;  %v13030_v26 = vld [vmem:[%s16717_s25 + $0x1b0] sm:$0xff]  }
 0xc5f   : > { %12190 = vmatprep.subr.bf16.mxu0 %v16730_v44  ;;  %12226 = vmatprep.subr.bf16.mxu1 %v16730_v44 }
 0xc62   : > { %12191 = vmatpush3.bf16.msra.mxu0 %v12978_v36  ;;  %12227 = vmatpush3.bf16.msra.mxu1 %v12979_v50  ;;  %v13031_v36 = vld [vmem:[%s16717_s25 + $0x1b8] sm:$0xff]   ;;  %v13032_v50 = vld [vmem:[%s16717_s25 + $0x1e0] sm:$0xff]  }
 0xc63   : > { %12208 = vmatprep.subr.bf16.mxu0 %v16730_v44  ;;  %12244 = vmatprep.subr.bf16.mxu1 %v16730_v44 }
 0xc65   : > { %12193 = vmatmul.mubr.msk.bf16.vlgmr.msra.gmra.mrb[100].mxu0 %vm771_vm0, %v15151_v8  ;;  %12229 = vmatmul.mubr.msk.bf16.vlgmr.msra.gmra.mrb[100].mxu1 %vm771_vm0, %v15151_v8 }
 0xc66   : > { %12209 = vmatpush3.bf16.msra.mxu0 %v12980_v41  ;;  %12245 = vmatpush3.bf16.msra.mxu1 %v12981_v35  ;;  %v13033_v41 = vld [vmem:[%s16717_s25 + $0x1e8] sm:$0xff]   ;;  %v13034_v35 = vld [vmem:[%s16717_s25 + $0x1f0] sm:$0xff]  }
 0xc67   : > { %12210 = vmatprep.subr.bf16.mxu0 %v16730_v44  ;;  %12246 = vmatprep.subr.bf16.mxu1 %v16730_v44 }
 0xc68   : > { %12216 = vmatprep.mubr.msk.bf16.mxu0 %vm13435_vm2, %v16730_v44  ;;  %12252 = vmatprep.mubr.msk.bf16.mxu1 %vm13435_vm2, %v16730_v44 }
 0xc6a   : > { %12211 = vmatpush3.bf16.msra.mxu0 %v12982_v39  ;;  %12247 = vmatpush3.bf16.msra.mxu1 %v12983_v12  ;;  %v13035_v39 = vld [vmem:[%s16717_s25 + $0x1f8] sm:$0xff]  }
 0xc6b   : > { %12212 = vmatprep.subr.bf16.mxu0 %v16730_v44  ;;  %12248 = vmatprep.subr.bf16.mxu1 %v16730_v44 }
 0xc6e   : > { %12213 = vmatpush3.bf16.msra.mxu0 %v12984_v46  ;;  %12249 = vmatpush3.bf16.msra.mxu1 %v12985_v7 }
 0xc6f   : > { %12214 = vmatprep.subr.bf16.mxu0 %v16730_v44  ;;  %12250 = vmatprep.subr.bf16.mxu1 %v16730_v44 }
 0xc72   : > { %12215 = vmatpush3.bf16.msra.mxu0 %v12986_v22  ;;  %12251 = vmatpush3.bf16.msra.mxu1 %v12987_v62 }
 0xc73   : > { %12232 = vmatprep.subr.bf16.mxu0 %v16730_v44  ;;  %12268 = vmatprep.subr.bf16.mxu1 %v16730_v44 }
 0xc75   : > { %12217 = vmatmul.mubr.msk.bf16.vlgmr.msra.gmra.mrb[104].mxu0 %vm771_vm0, %v15151_v8  ;;  %12253 = vmatmul.mubr.msk.bf16.vlgmr.msra.gmra.mrb[104].mxu1 %vm771_vm0, %v15151_v8 }
 0xc76   : > { %12233 = vmatpush3.bf16.msra.mxu0 %v12988_v54  ;;  %12269 = vmatpush3.bf16.msra.mxu1 %v12989_v45 }
 0xc77   : > { %12234 = vmatprep.subr.bf16.mxu0 %v16730_v44  ;;  %12270 = vmatprep.subr.bf16.mxu1 %v16730_v44 }
 0xc78   : > { %12240 = vmatprep.mubr.msk.bf16.mxu0 %vm13435_vm2, %v16730_v44  ;;  %12276 = vmatprep.mubr.msk.bf16.mxu1 %vm13435_vm2, %v16730_v44 }
 0xc7a   : > { %12235 = vmatpush3.bf16.msra.mxu0 %v12990_v63  ;;  %12271 = vmatpush3.bf16.msra.mxu1 %v12991_v31 }
 0xc7b   : > { %12236 = vmatprep.subr.bf16.mxu0 %v16730_v44  ;;  %12272 = vmatprep.subr.bf16.mxu1 %v16730_v44 }
 0xc7e   : > { %12237 = vmatpush3.bf16.msra.mxu0 %v12992_v48  ;;  %12273 = vmatpush3.bf16.msra.mxu1 %v12993_v52 }
 0xc7f   : > { %12238 = vmatprep.subr.bf16.mxu0 %v16730_v44  ;;  %12274 = vmatprep.subr.bf16.mxu1 %v16730_v44 }
 0xc82   : > { %12239 = vmatpush3.bf16.msra.mxu0 %v12994_v11  ;;  %12275 = vmatpush3.bf16.msra.mxu1 %v12995_v42 }
 0xc83   : > { %12256 = vmatprep.subr.bf16.mxu0 %v16730_v44  ;;  %12292 = vmatprep.subr.bf16.mxu1 %v16730_v44 }
 0xc85   : > { %12241 = vmatmul.mubr.msk.bf16.vlgmr.msra.gmra.mrb[108].mxu0 %vm771_vm0, %v15151_v8  ;;  %12277 = vmatmul.mubr.msk.bf16.vlgmr.msra.gmra.mrb[108].mxu1 %vm771_vm0, %v15151_v8 }
 0xc86   : > { %12257 = vmatpush3.bf16.msra.mxu0 %v12996_v60  ;;  %12293 = vmatpush3.bf16.msra.mxu1 %v12997_v2 }
 0xc87   : > { %12258 = vmatprep.subr.bf16.mxu0 %v16730_v44  ;;  %12294 = vmatprep.subr.bf16.mxu1 %v16730_v44 }
 0xc88   : > { %12264 = vmatprep.mubr.msk.bf16.mxu0 %vm13435_vm2, %v16730_v44  ;;  %12300 = vmatprep.mubr.msk.bf16.mxu1 %vm13435_vm2, %v16730_v44 }
 0xc8a   : > { %12259 = vmatpush3.bf16.msra.mxu0 %v12998_v6  ;;  %12295 = vmatpush3.bf16.msra.mxu1 %v12999_v33 }
 0xc8b   : > { %12260 = vmatprep.subr.bf16.mxu0 %v16730_v44  ;;  %12296 = vmatprep.subr.bf16.mxu1 %v16730_v44 }
 0xc8e   : > { %12261 = vmatpush3.bf16.msra.mxu0 %v13000_v59  ;;  %12297 = vmatpush3.bf16.msra.mxu1 %v13001_v9 }
 0xc8f   : > { %12262 = vmatprep.subr.bf16.mxu0 %v16730_v44  ;;  %12298 = vmatprep.subr.bf16.mxu1 %v16730_v44 }
 0xc92   : > { %12263 = vmatpush3.bf16.msra.mxu0 %v13002_v49  ;;  %12299 = vmatpush3.bf16.msra.mxu1 %v13003_v17 }
 0xc93   : > { %12280 = vmatprep.subr.bf16.mxu0 %v16730_v44  ;;  %12316 = vmatprep.subr.bf16.mxu1 %v16730_v44 }
 0xc95   : > { %12265 = vmatmul.mubr.msk.bf16.vlgmr.msra.gmra.mrb[112].mxu0 %vm771_vm0, %v15151_v8  ;;  %12301 = vmatmul.mubr.msk.bf16.vlgmr.msra.gmra.mrb[112].mxu1 %vm771_vm0, %v15151_v8 }
 0xc96   : > { %12281 = vmatpush3.bf16.msra.mxu0 %v13004_v20  ;;  %12317 = vmatpush3.bf16.msra.mxu1 %v13005_v21 }
 0xc97   : > { %12282 = vmatprep.subr.bf16.mxu0 %v16730_v44  ;;  %12318 = vmatprep.subr.bf16.mxu1 %v16730_v44 }
 0xc98   : > { %12288 = vmatprep.mubr.msk.bf16.mxu0 %vm13435_vm2, %v16730_v44  ;;  %12324 = vmatprep.mubr.msk.bf16.mxu1 %vm13435_vm2, %v16730_v44 }
 0xc9a   : > { %12283 = vmatpush3.bf16.msra.mxu0 %v13006_v23  ;;  %12319 = vmatpush3.bf16.msra.mxu1 %v13007_v53 }
 0xc9b   : > { %12284 = vmatprep.subr.bf16.mxu0 %v16730_v44  ;;  %12320 = vmatprep.subr.bf16.mxu1 %v16730_v44 }
 0xc9e   : > { %12285 = vmatpush3.bf16.msra.mxu0 %v13008_v5  ;;  %12321 = vmatpush3.bf16.msra.mxu1 %v13009_v56 }
 0xc9f   : > { %12286 = vmatprep.subr.bf16.mxu0 %v16730_v44  ;;  %12322 = vmatprep.subr.bf16.mxu1 %v16730_v44 }
 0xca2   : > { %12287 = vmatpush3.bf16.msra.mxu0 %v13010_v14  ;;  %12323 = vmatpush3.bf16.msra.mxu1 %v13011_v61 }
 0xca3   : > { %12304 = vmatprep.subr.bf16.mxu0 %v16730_v44  ;;  %12340 = vmatprep.subr.bf16.mxu1 %v16730_v44 }
 0xca5   : > { %12289 = vmatmul.mubr.msk.bf16.vlgmr.msra.gmra.mrb[116].mxu0 %vm771_vm0, %v15151_v8  ;;  %12325 = vmatmul.mubr.msk.bf16.vlgmr.msra.gmra.mrb[116].mxu1 %vm771_vm0, %v15151_v8 }
 0xca6   : > { %12305 = vmatpush3.bf16.msra.mxu0 %v13012_v51  ;;  %12341 = vmatpush3.bf16.msra.mxu1 %v13013_v10 }
 0xca7   : > { %12306 = vmatprep.subr.bf16.mxu0 %v16730_v44  ;;  %12342 = vmatprep.subr.bf16.mxu1 %v16730_v44 }
 0xca8   : > { %12312 = vmatprep.mubr.msk.bf16.mxu0 %vm13435_vm2, %v16730_v44  ;;  %12348 = vmatprep.mubr.msk.bf16.mxu1 %vm13435_vm2, %v16730_v44 }
 0xcaa   : > { %12307 = vmatpush3.bf16.msra.mxu0 %v13014_v30  ;;  %12343 = vmatpush3.bf16.msra.mxu1 %v13015_v18 }
 0xcab   : > { %12308 = vmatprep.subr.bf16.mxu0 %v16730_v44  ;;  %12344 = vmatprep.subr.bf16.mxu1 %v16730_v44 }
 0xcae   : > { %12309 = vmatpush3.bf16.msra.mxu0 %v13016_v13  ;;  %12345 = vmatpush3.bf16.msra.mxu1 %v13017_v55 }
 0xcaf   : > { %12310 = vmatprep.subr.bf16.mxu0 %v16730_v44  ;;  %12346 = vmatprep.subr.bf16.mxu1 %v16730_v44 }
 0xcb2   : > { %12311 = vmatpush3.bf16.msra.mxu0 %v13018_v32  ;;  %12347 = vmatpush3.bf16.msra.mxu1 %v13019_v37 }
 0xcb3   : > { %12328 = vmatprep.subr.bf16.mxu0 %v16730_v44  ;;  %12364 = vmatprep.subr.bf16.mxu1 %v16730_v44 }
 0xcb5   : > { %12313 = vmatmul.mubr.msk.bf16.vlgmr.msra.gmra.mrb[120].mxu0 %vm771_vm0, %v15151_v8  ;;  %12349 = vmatmul.mubr.msk.bf16.vlgmr.msra.gmra.mrb[120].mxu1 %vm771_vm0, %v15151_v8 }
 0xcb6   : > { %12329 = vmatpush3.bf16.msra.mxu0 %v13020_v15  ;;  %12365 = vmatpush3.bf16.msra.mxu1 %v13021_v24 }
 0xcb7   : > { %12330 = vmatprep.subr.bf16.mxu0 %v16730_v44  ;;  %12366 = vmatprep.subr.bf16.mxu1 %v16730_v44 }
 0xcb8   : > { %12336 = vmatprep.mubr.msk.bf16.mxu0 %vm13435_vm2, %v16730_v44  ;;  %12372 = vmatprep.mubr.msk.bf16.mxu1 %vm13435_vm2, %v16730_v44 }
 0xcba   : > { %12331 = vmatpush3.bf16.msra.mxu0 %v13022_v38  ;;  %12367 = vmatpush3.bf16.msra.mxu1 %v13023_v25 }
 0xcbb   : > { %12332 = vmatprep.subr.bf16.mxu0 %v16730_v44  ;;  %12368 = vmatprep.subr.bf16.mxu1 %v16730_v44 }
 0xcbe   : > { %12333 = vmatpush3.bf16.msra.mxu0 %v13024_v34  ;;  %12369 = vmatpush3.bf16.msra.mxu1 %v13025_v57 }
 0xcbf   : > { %12334 = vmatprep.subr.bf16.mxu0 %v16730_v44  ;;  %12370 = vmatprep.subr.bf16.mxu1 %v16730_v44 }
 0xcc2   : > { %12335 = vmatpush3.bf16.msra.mxu0 %v13026_v1  ;;  %12371 = vmatpush3.bf16.msra.mxu1 %v13027_v58 }
 0xcc3   : > { %12352 = vmatprep.subr.bf16.mxu0 %v16730_v44 }
 0xcc5   : > { %12337 = vmatmul.mubr.msk.bf16.vlgmr.msra.gmra.mrb[124].mxu0 %vm771_vm0, %v15151_v8  ;;  %12373 = vmatmul.mubr.msk.bf16.vlgmr.msra.gmra.mrb[124].mxu1 %vm771_vm0, %v15151_v8 }
 0xcc6   : > { %12353 = vmatpush3.bf16.msra.mxu0 %v13028_v28  ;;  %12360 = vmatprep.mubr.msk.bf16.mxu0 %vm13435_vm2, %v16730_v44 }
 0xcc7   : > { %12354 = vmatprep.subr.bf16.mxu0 %v16730_v44 }
 0xcca   : > { %12355 = vmatpush3.bf16.msra.mxu0 %v13029_v29 }
 0xccb   : > { %12356 = vmatprep.subr.bf16.mxu0 %v16730_v44 }
 0xcce   : > { %12357 = vmatpush3.bf16.msra.mxu0 %v13030_v26 }
 0xccf   : > { %12358 = vmatprep.subr.bf16.mxu0 %v16730_v44 }
 0xcd2   : > { %12359 = vmatpush3.bf16.msra.mxu0 %v13031_v36 }
 0xcd3   : > { %12376 = vmatprep.subr.bf16.mxu0 %v16730_v44 }
 0xcd5   : > { %12361 = vmatmul.mubr.msk.bf16.vlgmr.msra.gmra.mrb[128].mxu0 %vm771_vm0, %v15151_v8 }
 0xcd6   : > { %12377 = vmatpush3.bf16.msra.mxu0 %v13032_v50  ;;  %12384 = vmatprep.mubr.msk.bf16.mxu0 %vm13435_vm2, %v16730_v44 }
 0xcd7   : > { %12378 = vmatprep.subr.bf16.mxu0 %v16730_v44 }
 0xcda   : > { %12379 = vmatpush3.bf16.msra.mxu0 %v13033_v41 }
 0xcdb   : > { %12380 = vmatprep.subr.bf16.mxu0 %v16730_v44 }
 0xcde   : > { %12381 = vmatpush3.bf16.msra.mxu0 %v13034_v35 }
 0xcdf   : > { %12382 = vmatprep.subr.bf16.mxu0 %v16730_v44 }
 0xce2   : > { %12383 = vmatpush3.bf16.msra.mxu0 %v13035_v39 }
 0xce5   : > { %12385 = vmatmul.mubr.msk.bf16.vlgmr.msra.gmra.mrb[132].mxu0 %vm771_vm0, %v15151_v8 }
 0xcf8   : > { %v15589_v12 = vpop.f32.mrb[84].mxu0  ;;  %v15591_v46 = vpop.f32.mrb[84].mxu1 }
 0xcf9   : > { %v12110_v7 = vpop.f32.mrb[85].mxu0  ;;  %v12134_v22 = vpop.f32.mrb[85].mxu1  ;;  %v7346_v62 = vsel %vm2574_vm3, %v15589_v12, 0.0  ;;  %v7358_v8 = vsel %vm2574_vm3, %v15591_v46, 0.0 }
 0xcfa   : > { %v15595_v54 = vpop.f32.mrb[86].mxu1  ;;  %7347 = vadd.xlane.f32.xlu0 %v7346_v62  ;;  %v15597_v45 = vpop.f32.mrb[86].mxu0 }
 0xcfb   : > { %v12111_v63 = vpop.f32.mrb[87].mxu0  ;;  %v12135_v31 = vpop.f32.mrb[87].mxu1  ;;  %v7349_v48 = vsel %vm2578_vm4, %v15597_v45, 0.0  ;;  %v7361_v52 = vsel %vm2578_vm4, %v15595_v54, 0.0 }
 0xcfc   : > { %7350 = vadd.xlane.f32.xlu1 %v7349_v48 }
 0xcfe   : > { %7359 = vadd.xlane.f32.xlu0 %v7358_v8 }
 0xd00   : > { %7362 = vadd.xlane.f32.xlu1 %v7361_v52 }
 0xd08   : > { %v15605_v11 = vpop.f32.mrb[88].mxu0  ;;  %v15607_v42 = vpop.f32.mrb[88].mxu1 }
 0xd09   : > { %v12122_v60 = vpop.f32.mrb[89].mxu0  ;;  %v12158_v2 = vpop.f32.mrb[89].mxu1  ;;  %v7352_v6 = vsel %vm2574_vm3, %v15605_v11, 0.0 }
 0xd0a   : > { %v15611_v33 = vpop.f32.mrb[90].mxu1  ;;  %7353 = vadd.xlane.f32.xlu0 %v7352_v6  ;;  %v15613_v59 = vpop.f32.mrb[90].mxu0 }
 0xd0b   : > { %v12123_v9 = vpop.f32.mrb[91].mxu0  ;;  %v12159_v49 = vpop.f32.mrb[91].mxu1  ;;  %v7355_v17 = vsel %vm2578_vm4, %v15613_v59, 0.0  ;;  %v7373_v60 = vsel %vm2578_vm4, %v15611_v33, 0.0 }
 0xd0c   : > { %7356 = vadd.xlane.f32.xlu1 %v7355_v17  ;;  %v7370_v9 = vsel %vm2574_vm3, %v15607_v42, 0.0 }
 0xd18   : > { %v15617_v20 = vpop.f32.mrb[92].mxu0  ;;  %v15619_v21 = vpop.f32.mrb[92].mxu1 }
 0xd19   : > { %v12146_v23 = vpop.f32.mrb[93].mxu0  ;;  %v12182_v53 = vpop.f32.mrb[93].mxu1  ;;  %v7364_v5 = vsel %vm2574_vm3, %v15617_v20, 0.0 }
 0xd1a   : > { %v15623_v56 = vpop.f32.mrb[94].mxu1  ;;  %7365 = vadd.xlane.f32.xlu0 %v7364_v5  ;;  %v15625_v14 = vpop.f32.mrb[94].mxu0 }
 0xd1b   : > { %v12147_v61 = vpop.f32.mrb[95].mxu0  ;;  %v12183_v51 = vpop.f32.mrb[95].mxu1  ;;  %v7367_v10 = vsel %vm2578_vm4, %v15625_v14, 0.0 }
 0xd1c   : > { %7368 = vadd.xlane.f32.xlu1 %v7367_v10 }
 0xd28   : > { %v15629_v30 = vpop.f32.mrb[96].mxu0  ;;  %v15631_v18 = vpop.f32.mrb[96].mxu1 }
 0xd29   : > { %v12170_v13 = vpop.f32.mrb[97].mxu0  ;;  %v12206_v55 = vpop.f32.mrb[97].mxu1  ;;  %v7618_v32 = vsel %vm2574_vm3, %v15631_v18, 0.0 }
 0xd2a   : > { %v15635_v37 = vpop.f32.mrb[98].mxu1  ;;  %7619 = vadd.xlane.f32.xlu0 %v7618_v32  ;;  %v15637_v15 = vpop.f32.mrb[98].mxu0 }
 0xd2b   : > { %v12171_v24 = vpop.f32.mrb[99].mxu0  ;;  %v12207_v38 = vpop.f32.mrb[99].mxu1  ;;  %v7621_v25 = vsel %vm2578_vm4, %v15635_v37, 0.0 }
 0xd2c   : > { %7622 = vadd.xlane.f32.xlu1 %v7621_v25 }
 0xd38   : > { %v15641_v34 = vpop.f32.mrb[100].mxu0  ;;  %v15643_v57 = vpop.f32.mrb[100].mxu1 }
 0xd39   : > { %v12194_v1 = vpop.f32.mrb[101].mxu0  ;;  %v12230_v58 = vpop.f32.mrb[101].mxu1  ;;  %v7630_v28 = vsel %vm2574_vm3, %v15643_v57, 0.0 }
 0xd3a   : > { %v15647_v29 = vpop.f32.mrb[102].mxu1  ;;  %7631 = vadd.xlane.f32.xlu0 %v7630_v28  ;;  %v15649_v26 = vpop.f32.mrb[102].mxu0 }
 0xd3b   : > { %v12195_v36 = vpop.f32.mrb[103].mxu0  ;;  %v12231_v50 = vpop.f32.mrb[103].mxu1  ;;  %v7633_v41 = vsel %vm2578_vm4, %v15647_v29, 0.0 }
 0xd3c   : > { %7634 = vadd.xlane.f32.xlu1 %v7633_v41 }
 0xd48   : > { %v15653_v35 = vpop.f32.mrb[104].mxu0  ;;  %v15655_v39 = vpop.f32.mrb[104].mxu1 }
 0xd49   : > { %v12218_v7 = vpop.f32.mrb[105].mxu0  ;;  %v12254_v22 = vpop.f32.mrb[105].mxu1  ;;  %v7642_v62 = vsel %vm2574_vm3, %v15655_v39, 0.0  ;;  %v7624_v63 = vsel %vm2574_vm3, %v15653_v35, 0.0 }
 0xd4a   : > { %v15661_v31 = vpop.f32.mrb[106].mxu1  ;;  %7643 = vadd.xlane.f32.xlu0 %v7642_v62  ;;  %7625 = vadd.xlane.f32.xlu1 %v7624_v63  ;;  %v15663_v48 = vpop.f32.mrb[106].mxu0  ;;  %v7376_v63 = vsel %vm2574_vm3, %v15629_v30, 0.0 }
 0xd4b   : > { %v12219_v8 = vpop.f32.mrb[107].mxu0  ;;  %v12255_v52 = vpop.f32.mrb[107].mxu1  ;;  %v7627_v2 = vsel %vm2578_vm4, %v15663_v48, 0.0  ;;  %v7645_v6 = vsel %vm2578_vm4, %v15661_v31, 0.0 }
 0xd4c   : > { %v7379_v8 = vsel %vm2578_vm4, %v15637_v15, 0.0 }
 0xd4e   : > { %7374 = vadd.xlane.f32.xlu1 %v7373_v60  ;;  %7628 = vadd.xlane.f32.xlu0 %v7627_v2 }
 0xd52   : > { %7646 = vadd.xlane.f32.xlu1 %v7645_v6  ;;  %7371 = vadd.xlane.f32.xlu0 %v7370_v9 }
 0xd58   : > { %v15673_v49 = vpop.f32.mrb[108].mxu0  ;;  %v15675_v17 = vpop.f32.mrb[108].mxu1 }
 0xd59   : > { %v12242_v23 = vpop.f32.mrb[109].mxu0  ;;  %v12278_v53 = vpop.f32.mrb[109].mxu1  ;;  %v7636_v5 = vsel %vm2574_vm3, %v15673_v49, 0.0  ;;  %v7654_v32 = vsel %vm2574_vm3, %v15675_v17, 0.0 }
 0xd5a   : > { %v15679_v61 = vpop.f32.mrb[110].mxu1  ;;  %7637 = vadd.xlane.f32.xlu0 %v7636_v5  ;;  %v15681_v51 = vpop.f32.mrb[110].mxu0 }
 0xd5b   : > { %v12243_v10 = vpop.f32.mrb[111].mxu0  ;;  %v12279_v13 = vpop.f32.mrb[111].mxu1  ;;  %v7639_v55 = vsel %vm2578_vm4, %v15681_v51, 0.0  ;;  %v7657_v24 = vsel %vm2578_vm4, %v15679_v61, 0.0 }
 0xd5c   : > { %7640 = vadd.xlane.f32.xlu1 %v7639_v55 }
 0xd5e   : > { %7655 = vadd.xlane.f32.xlu0 %v7654_v32  ;;  %v7382_v32 = vsel %vm2574_vm3, %v15619_v21, 0.0 }
 0xd60   : > { %7658 = vadd.xlane.f32.xlu1 %v7657_v24  ;;  %v7385_v24 = vsel %vm2578_vm4, %v15623_v56, 0.0 }
 0xd68   : > { %v15689_v38 = vpop.f32.mrb[112].mxu0  ;;  %v6880_v25 = vpop.f32.mrb[112].mxu1 }
 0xd69   : > { %v12266_v1 = vpop.f32.mrb[113].mxu0  ;;  %v12302_v58 = vpop.f32.mrb[113].mxu1  ;;  %v7648_v28 = vsel %vm2574_vm3, %v15689_v38, 0.0 }
 0xd6a   : > { %v6883_v36 = vpop.f32.mrb[114].mxu1  ;;  %7649 = vadd.xlane.f32.xlu0 %v7648_v28  ;;  %v15693_v50 = vpop.f32.mrb[114].mxu0  ;;  %v7391_v1 = vsel %vm2578_vm4, %v15649_v26, 0.0 }
 0xd6b   : > { %v15695_v41 = vpack.c.bf16 %v6883_v36, %v6880_v25  ;;  %v12267_v7 = vpop.f32.mrb[115].mxu0  ;;  %v12303_v22 = vpop.f32.mrb[115].mxu1  ;;  %v7651_v62 = vsel %vm2578_vm4, %v15693_v50, 0.0  ;;  %v7388_v25 = vsel %vm2574_vm3, %v15641_v34, 0.0 }
 0xd6c   : > { %7652 = vadd.xlane.f32.xlu1 %v7651_v62 }
 0xd6e   : > { %7377 = vadd.xlane.f32.xlu0 %v7376_v63 }
 0xd70   : > { %7380 = vadd.xlane.f32.xlu1 %v7379_v8 }
 0xd78   : > { %v15703_v52 = vpop.f32.mrb[116].mxu0  ;;  %v7010_v60 = vpop.f32.mrb[116].mxu1 }
 0xd79   : > { %v12290_v2 = vpop.f32.mrb[117].mxu0  ;;  %v12326_v6 = vpop.f32.mrb[117].mxu1  ;;  %v7660_v9 = vsel %vm2574_vm3, %v15703_v52, 0.0 }
 0xd7a   : > { %v7013_v23 = vpop.f32.mrb[118].mxu1  ;;  %7661 = vadd.xlane.f32.xlu0 %v7660_v9  ;;  %v15707_v53 = vpop.f32.mrb[118].mxu0 }
 0xd7b   : > { %v15709_v5 = vpack.c.bf16 %v7013_v23, %v7010_v60  ;;  %v12291_v10 = vpop.f32.mrb[119].mxu0  ;;  %v12327_v13 = vpop.f32.mrb[119].mxu1  ;;  %v7663_v55 = vsel %vm2578_vm4, %v15707_v53, 0.0 }
 0xd7c   : > { %7664 = vadd.xlane.f32.xlu1 %v7663_v55 }
 0xd7e   : > { %7383 = vadd.xlane.f32.xlu0 %v7382_v32 }
 0xd80   : > { %7386 = vadd.xlane.f32.xlu1 %v7385_v24 }
 0xd82   : > { %7389 = vadd.xlane.f32.xlu0 %v7388_v25 }
 0xd84   : > { %7392 = vadd.xlane.f32.xlu1 %v7391_v1 }
 0xd87   : > { %v7348_v58 = vpop.xlane.xlu0 %7347 }
 0xd88   : > { %v7140_v28 = vpop.f32.mrb[120].mxu1  ;;  %v7394_v36 = vmul.f32 0.125, %v7348_v58  ;;  %v6945_v7 = vpop.f32.mrb[120].mxu0 }
 0xd89   : > { %v12314_v22 = vpop.f32.mrb[121].mxu0  ;;  %v12350_v62 = vpop.f32.mrb[121].mxu1 }
 0xd8a   : > { %v15722_v63 = vsub.f32 %v15589_v12, %v7394_v36  ;;  %v7143_v8 = vpop.f32.mrb[122].mxu1  ;;  %v7351_v60 = vpop.xlane.xlu1 %7350 }
 0xd8b   : > { %v15724_v2 = vpack.c.bf16 %v7143_v8, %v7140_v28  ;;  %v7395_v6 = vmul.f32 0.125, %v7351_v60  ;;  %v6948_v9 = vpop.f32.mrb[122].mxu0  ;;  %v12351_v23 = vpop.f32.mrb[123].mxu1 }
 0xd8c   : > { %v15726_v10 = vpack.c.bf16 %v6948_v9, %v6945_v7  ;;  %v12315_v13 = vpop.f32.mrb[123].mxu0  ;;  %v7360_v55 = vpop.xlane.xlu0 %7359  ;;  %v7426_v32 = vmul.f32 %v15722_v63, %v15722_v63 }
 0xd8d   : > { %v15731_v24 = vsub.f32 %v15597_v45, %v7395_v6  ;;  %v7398_v25 = vmul.f32 0.125, %v7360_v55 }
 0xd8e   : > { %v7363_v12 = vpop.xlane.xlu1 %7362  ;;  %v7442_v1 = vsel %vm2574_vm3, %v7426_v32, 0.0 }
 0xd8f   : > { %v15735_v58 = vsub.f32 %v15591_v46, %v7398_v25  ;;  %v7399_v28 = vmul.f32 0.125, %v7363_v12  ;;  %7443 = vadd.xlane.f32.xlu0 %v7442_v1  ;;  %v7427_v36 = vmul.f32 %v15731_v24, %v15731_v24 }
 0xd91   : > { %v15740_v7 = vsub.f32 %v15595_v54, %v7399_v28  ;;  %v7445_v22 = vsel %vm2578_vm4, %v7427_v36, 0.0  ;;  %v7430_v45 = vmul.f32 %v15735_v58, %v15735_v58 }
 0xd92   : > { %7446 = vadd.xlane.f32.xlu1 %v7445_v22 }
 0xd93   : > { %v7454_v62 = vsel %vm2574_vm3, %v7430_v45, 0.0  ;;  %v7431_v46 = vmul.f32 %v15740_v7, %v15740_v7 }
 0xd94   : > { %7455 = vadd.xlane.f32.xlu0 %v7454_v62 }
 0xd95   : > { %v7457_v8 = vsel %vm2578_vm4, %v7431_v46, 0.0 }
 0xd96   : > { %7458 = vadd.xlane.f32.xlu1 %v7457_v8 }
 0xd97   : > { %v7354_v60 = vpop.xlane.xlu0 %7353 }
 0xd98   : > { %v7396_v6 = vmul.f32 0.125, %v7354_v60  ;;  %v7075_v9 = vpop.f32.mrb[124].mxu0  ;;  %v7270_v54 = vpop.f32.mrb[124].mxu1 }
 0xd99   : > { %v12374_v23 = vpop.f32.mrb[125].mxu1  ;;  %v7357_v13 = vpop.xlane.xlu1 %7356 }
 0xd9a   : > { %v15750_v55 = vsub.f32 %v15605_v11, %v7396_v6  ;;  %v7397_v32 = vmul.f32 0.125, %v7357_v13  ;;  %v12338_v25 = vpop.f32.mrb[125].mxu0  ;;  %v7273_v12 = vpop.f32.mrb[126].mxu1 }
 0xd9b   : > { %v7078_v1 = vpop.f32.mrb[126].mxu0  ;;  %v15752_v28 = vpack.c.bf16 %v7273_v12, %v7270_v54  ;;  %v12375_v36 = vpop.f32.mrb[127].mxu1 }
 0xd9c   : > { %v15755_v22 = vsub.f32 %v15613_v59, %v7397_v32  ;;  %v15757_v45 = vpack.c.bf16 %v7078_v1, %v7075_v9  ;;  %v12339_v62 = vpop.f32.mrb[127].mxu0  ;;  %v7428_v46 = vmul.f32 %v15750_v55, %v15750_v55 }
 0xd9e   : > { %v7448_v8 = vsel %vm2574_vm3, %v7428_v46, 0.0  ;;  %v7429_v11 = vmul.f32 %v15755_v22, %v15755_v22 }
 0xd9f   : > { %7449 = vadd.xlane.f32.xlu0 %v7448_v8 }
 0xda0   : > { %v7451_v60 = vsel %vm2578_vm4, %v7429_v11, 0.0 }
 0xda1   : > { %7452 = vadd.xlane.f32.xlu1 %v7451_v60 }
 0xda7   : > { %v7366_v6 = vpop.xlane.xlu0 %7365 }
 0xda8   : > { %v7400_v54 = vmul.f32 0.125, %v7366_v6  ;;  %v7205_v23 = vpop.f32.mrb[128].mxu0 }
 0xda9   : > { %v7369_v59 = vpop.xlane.xlu1 %7368  ;;  %v12362_v13 = vpop.f32.mrb[129].mxu0 }
 0xdaa   : > { %v15766_v9 = vsub.f32 %v15617_v20, %v7400_v54  ;;  %v7401_v32 = vmul.f32 0.125, %v7369_v59  ;;  %v7208_v25 = vpop.f32.mrb[130].mxu0 }
 0xdab   : > { %v15768_v12 = vpack.c.bf16 %v7208_v25, %v7205_v23  ;;  %v12363_v1 = vpop.f32.mrb[131].mxu0 }
 0xdac   : > { %v15771_v36 = vsub.f32 %v15625_v14, %v7401_v32  ;;  %v7432_v62 = vmul.f32 %v15766_v9, %v15766_v9 }
 0xdae   : > { %v7460_v46 = vsel %vm2574_vm3, %v7432_v62, 0.0  ;;  %v7433_v8 = vmul.f32 %v15771_v36, %v15771_v36 }
 0xdaf   : > { %7461 = vadd.xlane.f32.xlu0 %v7460_v46 }
 0xdb0   : > { %v7463_v20 = vsel %vm2578_vm4, %v7433_v8, 0.0 }
 0xdb1   : > { %7464 = vadd.xlane.f32.xlu1 %v7463_v20 }
 0xdb7   : > { %v7620_v11 = vpop.xlane.xlu0 %7619 }
 0xdb8   : > { %v7666_v60 = vmul.f32 0.125, %v7620_v11  ;;  %v7335_v6 = vpop.f32.mrb[132].mxu0 }
 0xdb9   : > { %v7623_v54 = vpop.xlane.xlu1 %7622  ;;  %v12386_v23 = vpop.f32.mrb[133].mxu0 }
 0xdba   : > { %v15780_v14 = vsub.f32 %v15631_v18, %v7666_v60  ;;  %v7667_v59 = vmul.f32 0.125, %v7623_v54  ;;  %v7338_v13 = vpop.f32.mrb[134].mxu0 }
 0xdbb   : > { %v15782_v32 = vpack.c.bf16 %v7338_v13, %v7335_v6  ;;  %v12387_v25 = vpop.f32.mrb[135].mxu0 }
 0xdbc   : > { %v15785_v1 = vsub.f32 %v15635_v37, %v7667_v59  ;;  %v7698_v62 = vmul.f32 %v15780_v14, %v15780_v14 }
 0xdbe   : > { %v7714_v46 = vsel %vm2574_vm3, %v7698_v62, 0.0  ;;  %v7699_v8 = vmul.f32 %v15785_v1, %v15785_v1 }
 0xdbf   : > { %7715 = vadd.xlane.f32.xlu0 %v7714_v46 }
 0xdc0   : > { %v7717_v18 = vsel %vm2578_vm4, %v7699_v8, 0.0 }
 0xdc1   : > { %7718 = vadd.xlane.f32.xlu1 %v7717_v18 }
 0xdc7   : > { %v7632_v20 = vpop.xlane.xlu0 %7631 }
 0xdc8   : > { %v7670_v11 = vmul.f32 0.125, %v7632_v20 }
 0xdc9   : > { %v7635_v60 = vpop.xlane.xlu1 %7634 }
 0xdca   : > { %v15794_v6 = vsub.f32 %v15643_v57, %v7670_v11  ;;  %v7671_v37 = vmul.f32 0.125, %v7635_v60 }
 0xdcc   : > { %v15797_v54 = vsub.f32 %v15647_v29, %v7671_v37  ;;  %v7702_v23 = vmul.f32 %v15794_v6, %v15794_v6 }
 0xdce   : > { %v7726_v59 = vsel %vm2574_vm3, %v7702_v23, 0.0  ;;  %v7703_v13 = vmul.f32 %v15797_v54, %v15797_v54 }
 0xdcf   : > { %7727 = vadd.xlane.f32.xlu0 %v7726_v59 }
 0xdd0   : > { %v7729_v25 = vsel %vm2578_vm4, %v7703_v13, 0.0 }
 0xdd1   : > { %7730 = vadd.xlane.f32.xlu1 %v7729_v25 }
 0xdd7   : > { %v7644_v62 = vpop.xlane.xlu0 %7643  ;;  %v7626_v46 = vpop.xlane.xlu1 %7625 }
 0xdd8   : > { %v7674_v57 = vmul.f32 0.125, %v7644_v62  ;;  %v7668_v8 = vmul.f32 0.125, %v7626_v46 }
 0xdda   : > { %v15806_v18 = vsub.f32 %v15655_v39, %v7674_v57  ;;  %v15809_v29 = vsub.f32 %v15653_v35, %v7668_v8 }
 0xddb   : > { %v7375_v20 = vpop.xlane.xlu1 %7374  ;;  %v7629_v11 = vpop.xlane.xlu0 %7628 }
 0xddc   : > { %v7403_v60 = vmul.f32 0.125, %v7375_v20  ;;  %v7669_v37 = vmul.f32 0.125, %v7629_v11  ;;  %v7706_v23 = vmul.f32 %v15806_v18, %v15806_v18  ;;  %v7700_v59 = vmul.f32 %v15809_v29, %v15809_v29 }
 0xdde   : > { %v15816_v13 = vsub.f32 %v15611_v33, %v7403_v60  ;;  %v15819_v25 = vsub.f32 %v15663_v48, %v7669_v37  ;;  %v7738_v39 = vsel %vm2574_vm3, %v7706_v23, 0.0  ;;  %v7720_v35 = vsel %vm2574_vm3, %v7700_v59, 0.0 }
 0xddf   : > { %v7647_v62 = vpop.xlane.xlu1 %7646  ;;  %v7372_v46 = vpop.xlane.xlu0 %7371  ;;  %7739 = vadd.xlane.f32.xlu0 %v7738_v39  ;;  %7721 = vadd.xlane.f32.xlu1 %v7720_v35 }
 0xde0   : > { %v7675_v57 = vmul.f32 0.125, %v7647_v62  ;;  %v7402_v8 = vmul.f32 0.125, %v7372_v46  ;;  %v7701_v20 = vmul.f32 %v15819_v25, %v15819_v25  ;;  %v7435_v33 = vmul.f32 %v15816_v13, %v15816_v13 }
 0xde2   : > { %v15828_v11 = vsub.f32 %v15661_v31, %v7675_v57  ;;  %v15831_v48 = vsub.f32 %v15607_v42, %v7402_v8  ;;  %v7723_v60 = vsel %vm2578_vm4, %v7701_v20, 0.0  ;;  %v7469_v37 = vsel %vm2578_vm4, %v7435_v33, 0.0 }
 0xde3   : > { %7724 = vadd.xlane.f32.xlu0 %v7723_v60  ;;  %7470 = vadd.xlane.f32.xlu1 %v7469_v37 }
 0xde4   : > { %v7434_v23 = vmul.f32 %v15831_v48, %v15831_v48  ;;  %v7707_v59 = vmul.f32 %v15828_v11, %v15828_v11 }
 0xde6   : > { %v7466_v39 = vsel %vm2574_vm3, %v7434_v23, 0.0  ;;  %v7741_v31 = vsel %vm2578_vm4, %v7707_v59, 0.0 }
 0xde7   : > { %v7638_v35 = vpop.xlane.xlu0 %7637  ;;  %7467 = vadd.xlane.f32.xlu0 %v7466_v39  ;;  %7742 = vadd.xlane.f32.xlu1 %v7741_v31 }
 0xde8   : > { %v7672_v42 = vmul.f32 0.125, %v7638_v35 }
 0xde9   : > { %v7641_v62 = vpop.xlane.xlu1 %7640 }
 0xdea   : > { %v15842_v46 = vsub.f32 %v15673_v49, %v7672_v42  ;;  %v7673_v57 = vmul.f32 0.125, %v7641_v62 }
 0xdeb   : > { %v7656_v8 = vpop.xlane.xlu0 %7655 }
 0xdec   : > { %v15845_v20 = vsub.f32 %v15681_v51, %v7673_v57  ;;  %v7678_v33 = vmul.f32 0.125, %v7656_v8  ;;  %v7704_v60 = vmul.f32 %v15842_v46, %v15842_v46 }
 0xded   : > { %v7659_v37 = vpop.xlane.xlu1 %7658 }
 0xdee   : > { %v15850_v23 = vsub.f32 %v15675_v17, %v7678_v33  ;;  %v7679_v59 = vmul.f32 0.125, %v7659_v37  ;;  %v7732_v39 = vsel %vm2574_vm3, %v7704_v60, 0.0  ;;  %v7705_v49 = vmul.f32 %v15845_v20, %v15845_v20 }
 0xdef   : > { %7733 = vadd.xlane.f32.xlu0 %v7732_v39 }
 0xdf0   : > { %v15856_v31 = vsub.f32 %v15679_v61, %v7679_v59  ;;  %v7735_v51 = vsel %vm2578_vm4, %v7705_v49, 0.0  ;;  %v7710_v35 = vmul.f32 %v15850_v23, %v15850_v23 }
 0xdf1   : > { %7736 = vadd.xlane.f32.xlu1 %v7735_v51 }
 0xdf2   : > { %v7750_v42 = vsel %vm2574_vm3, %v7710_v35, 0.0  ;;  %v7711_v17 = vmul.f32 %v15856_v31, %v15856_v31 }
 0xdf3   : > { %7751 = vadd.xlane.f32.xlu0 %v7750_v42 }
 0xdf4   : > { %v7753_v62 = vsel %vm2578_vm4, %v7711_v17, 0.0 }
 0xdf5   : > { %7754 = vadd.xlane.f32.xlu1 %v7753_v62 }
 0xdf7   : > { %v7650_v57 = vpop.xlane.xlu0 %7649 }
 0xdf8   : > { %v7676_v8 = vmul.f32 0.125, %v7650_v57 }
 0xdf9   : > { %v7653_v33 = vpop.xlane.xlu1 %7652 }
 0xdfa   : > { %v15866_v61 = vsub.f32 %v15689_v38, %v7676_v8  ;;  %v7677_v60 = vmul.f32 0.125, %v7653_v33 }
 0xdfb   : > { %v7378_v37 = vpop.xlane.xlu0 %7377 }
 0xdfc   : > { %v15869_v59 = vsub.f32 %v15693_v50, %v7677_v60  ;;  %v7404_v39 = vmul.f32 0.125, %v7378_v37  ;;  %v7708_v49 = vmul.f32 %v15866_v61, %v15866_v61 }
 0xdfd   : > { %v7381_v51 = vpop.xlane.xlu1 %7380 }
 0xdfe   : > { %v15874_v35 = vsub.f32 %v15629_v30, %v7404_v39  ;;  %v7405_v42 = vmul.f32 0.125, %v7381_v51  ;;  %v7744_v17 = vsel %vm2574_vm3, %v7708_v49, 0.0  ;;  %v7709_v38 = vmul.f32 %v15869_v59, %v15869_v59 }
 0xdff   : > { %7745 = vadd.xlane.f32.xlu0 %v7744_v17 }
 0xe00   : > { %v15880_v62 = vsub.f32 %v15637_v15, %v7405_v42  ;;  %v7747_v50 = vsel %vm2578_vm4, %v7709_v38, 0.0  ;;  %v7436_v57 = vmul.f32 %v15874_v35, %v15874_v35 }
 0xe01   : > { %7748 = vadd.xlane.f32.xlu1 %v7747_v50 }
 0xe02   : > { %v7472_v8 = vsel %vm2574_vm3, %v7436_v57, 0.0  ;;  %v7437_v30 = vmul.f32 %v15880_v62, %v15880_v62 }
 0xe03   : > { %7473 = vadd.xlane.f32.xlu0 %v7472_v8 }
 0xe04   : > { %v7475_v33 = vsel %vm2578_vm4, %v7437_v30, 0.0 }
 0xe05   : > { %7476 = vadd.xlane.f32.xlu1 %v7475_v33 }
 0xe07   : > { %v7662_v60 = vpop.xlane.xlu0 %7661 }
 0xe08   : > { %v7680_v37 = vmul.f32 0.125, %v7662_v60 }
 0xe09   : > { %v7665_v39 = vpop.xlane.xlu1 %7664 }
 0xe0a   : > { %v15890_v15 = vsub.f32 %v15703_v52, %v7680_v37  ;;  %v7681_v49 = vmul.f32 0.125, %v7665_v39 }
 0xe0b   : > { %v7384_v51 = vpop.xlane.xlu0 %7383 }
 0xe0c   : > { %v15893_v42 = vsub.f32 %v15707_v53, %v7681_v49  ;;  %v7406_v17 = vmul.f32 0.125, %v7384_v51  ;;  %v7712_v38 = vmul.f32 %v15890_v15, %v15890_v15 }
 0xe0d   : > { %v7387_v50 = vpop.xlane.xlu1 %7386 }
 0xe0e   : > { %v15898_v57 = vsub.f32 %v15619_v21, %v7406_v17  ;;  %v7407_v8 = vmul.f32 0.125, %v7387_v50  ;;  %v7756_v30 = vsel %vm2574_vm3, %v7712_v38, 0.0  ;;  %v7713_v52 = vmul.f32 %v15893_v42, %v15893_v42 }
 0xe0f   : > { %7757 = vadd.xlane.f32.xlu0 %v7756_v30  ;;  %v7390_v33 = vpop.xlane.xlu0 %7389 }
 0xe10   : > { %v15904_v60 = vsub.f32 %v15623_v56, %v7407_v8  ;;  %v7408_v53 = vmul.f32 0.125, %v7390_v33  ;;  %v7759_v37 = vsel %vm2578_vm4, %v7713_v52, 0.0  ;;  %v7438_v39 = vmul.f32 %v15898_v57, %v15898_v57 }
 0xe11   : > { %7760 = vadd.xlane.f32.xlu1 %v7759_v37  ;;  %v7393_v21 = vpop.xlane.xlu1 %7392 }
 0xe12   : > { %v15910_v49 = vsub.f32 %v15641_v34, %v7408_v53  ;;  %v7409_v51 = vmul.f32 0.125, %v7393_v21  ;;  %v7478_v17 = vsel %vm2574_vm3, %v7438_v39, 0.0  ;;  %v7439_v38 = vmul.f32 %v15904_v60, %v15904_v60 }
 0xe13   : > { %7479 = vadd.xlane.f32.xlu0 %v7478_v17  ;;  %v15928_v17 = vld [vmem:[%s16721_s3 + $0x1] ss:$0 sm:$0xff]  ;;  %s16745_s3 = sld [smem:[#allocation29_spill]] }
 0xe14   : > { %v15916_v56 = vsub.f32 %v15649_v26, %v7409_v51  ;;  %v7481_v50 = vsel %vm2578_vm4, %v7439_v38, 0.0  ;;  %v7440_v8 = vmul.f32 %v15910_v49, %v15910_v49 }
 0xe15   : > { %7482 = vadd.xlane.f32.xlu1 %v7481_v50  ;;  %v15934_v50 = vld [vmem:[%s16722_s5 + $0x1] ss:$0 sm:$0xff]  ;;  %s11195_s5 = sshll.u32 %s16741_s21, 4 }
 0xe16   : > { %v7484_v30 = vsel %vm2574_vm3, %v7440_v8, 0.0  ;;  %v7441_v34 = vmul.f32 %v15916_v56, %v15916_v56 }
 0xe17   : > { %7485 = vadd.xlane.f32.xlu0 %v7484_v30 }
 0xe18   : > { %v7487_v52 = vsel %vm2578_vm4, %v7441_v34, 0.0 }
 0xe19   : > { %7488 = vadd.xlane.f32.xlu1 %v7487_v52 }
 0xe1c   : > { %v7444_v33 = vpop.xlane.xlu0 %7443 }
 0xe1d   : > { %v7490_v53 = vmul.f32 0.125, %v7444_v33 }
 0xe1f   : > { %v7506_v37 = vadd.f32 1e-06, %v7490_v53 }
 0xe21   : > { %13220 = vrsqrt.f32 %v7506_v37  ;;  %v7456_v26 = vpop.xlane.xlu0 %7455 }
 0xe22   : > { %v7494_v39 = vmul.f32 0.125, %v7456_v26  ;;  %v7447_v26 = vpop.xlane.xlu1 %7446 }
 0xe23   : > { %v7491_v19 = vmul.f32 0.125, %v7447_v26  ;;  %v15948_v26 = vld [vmem:[%s16723_s1 + $0x1] ss:$0 sm:$0xff]  ;;  %s13370_s1 = scalar_lea.vmem %s16578_s9, 16 }
 0xe24   : > { %v7510_v21 = vadd.f32 1e-06, %v7494_v39  ;;  %p13371_p11 = scmp.ne.s32.totalorder %s16578_s9, %s13370_s1 }
 0xe26   : > { %13222 = vrsqrt.f32 %v7510_v21  ;;  %v7459_v39 = vpop.xlane.xlu1 %7458  ;;  %p13372_p12 = pnand %p13371_p11, %p13609_p5 }
 0xe28   : > { %p13373_p13 = pneg %p13372_p12 }
 0xe2b   : > { %v13221_v51 = vpop.eup %13220 }
 0xe2c   : > { %v7538_v38 = vmul.f32 %v13221_v51, %v15722_v63  ;;  %v7450_v21 = vpop.xlane.xlu0 %7449 }
 0xe2e   : > { %v7560_v8 = vmul.f32 %v15928_v17, %v7538_v38  ;;  %v7453_v51 = vpop.xlane.xlu1 %7452 }
 0xe30   : > { %v13223_v30 = vpop.eup %13222  ;;  %v7582_v34 = vadd.f32 %v15934_v50, %v7560_v8  ;;  %v7492_v8 = vmul.f32 0.125, %v7450_v21 }
 0xe31   : > { %v7542_v52 = vmul.f32 %v13223_v30, %v15735_v58 }
 0xe32   : > { %v7598_v33 = vmul.f32 0.35355338, %v7582_v34  ;;  %v7507_v34 = vadd.f32 1e-06, %v7491_v19  ;;  %v7508_v3 = vadd.f32 1e-06, %v7492_v8 }
 0xe33   : > { %v7564_v53 = vmul.f32 %v15928_v17, %v7542_v52 }
 0xe34   : > { %12392 = vmatprep.mubr.msk.f32.mxu1 %vm2574_vm3, %v7598_v33 }
 0xe35   : > { %v7586_v37 = vadd.f32 %v15934_v50, %v7564_v53 }
 0xe37   : > { %v7602_v63 = vmul.f32 0.35355338, %v7586_v37  ;;  %v7495_v37 = vmul.f32 0.125, %v7459_v39 }
 0xe39   : > { %12406 = vmatprep.mubr.msk.f32.mxu0 %vm2574_vm3, %v7602_v63  ;;  %v7511_v8 = vadd.f32 1e-06, %v7495_v37 }
 0xe3c   : > { %v7462_v38 = vpop.xlane.xlu0 %7461 }
 0xe3e   : > { %v15943_v43 = vpop.xlane.xlu1 %7464 }
 0xe4c   : > { %v7716_v58 = vpop.xlane.xlu0 %7715 }
 0xe4d   : > { %v7762_v30 = vmul.f32 0.125, %v7716_v58 }
 0xe4e   : > { %v7719_v52 = vpop.xlane.xlu1 %7718 }
 0xe4f   : > { %v7778_v47 = vadd.f32 1e-06, %v7762_v30  ;;  %v7763_v33 = vmul.f32 0.125, %v7719_v52 }
 0xe51   : > { %13224 = vrsqrt.f32 %v7778_v47  ;;  %v7779_v53 = vadd.f32 1e-06, %v7763_v33 }
 0xe52   : > { %13226 = vrsqrt.f32 %v7507_v34 }
 0xe53   : > { %13228 = vrsqrt.f32 %v7779_v53  ;;  %v15956_v53 = vld [vmem:[%s16628_s10 + $0x1] ss:$0 sm:$0xff] }
 0xe54   : > { %13230 = vrsqrt.f32 %v7508_v3 }
 0xe5b   : > { %v13225_v63 = vpop.eup %13224 }
 0xe5c   : > { %v13227_v21 = vpop.eup %13226  ;;  %v7810_v58 = vmul.f32 %v13225_v63, %v15780_v14  ;;  %v7728_v19 = vpop.xlane.xlu0 %7727 }
 0xe5d   : > { %v13229_v0 = vpop.eup %13228  ;;  %v7766_v30 = vmul.f32 0.125, %v7728_v19  ;;  %v7539_v40 = vmul.f32 %v13227_v21, %v15731_v24 }
 0xe5e   : > { %v13231_v52 = vpop.eup %13230  ;;  %v7811_v47 = vmul.f32 %v13229_v0, %v15785_v1  ;;  %v7731_v34 = vpop.xlane.xlu1 %7730  ;;  %v7832_v3 = vmul.f32 %v15948_v26, %v7810_v58 }
 0xe5f   : > { %v7782_v39 = vadd.f32 1e-06, %v7766_v30  ;;  %v7767_v33 = vmul.f32 0.125, %v7731_v34  ;;  %v7540_v37 = vmul.f32 %v13231_v52, %v15750_v55  ;;  %v7561_v19 = vmul.f32 %v15928_v17, %v7539_v40 }
 0xe60   : > { %v7833_v14 = vmul.f32 %v15948_v26, %v7811_v47  ;;  %v7854_v0 = vadd.f32 %v15956_v53, %v7832_v3  ;;  %v7493_v52 = vmul.f32 0.125, %v7453_v51 }
 0xe61   : > { %13232 = vrsqrt.f32 %v7782_v39  ;;  %v7783_v63 = vadd.f32 1e-06, %v7767_v33  ;;  %v7562_v30 = vmul.f32 %v15928_v17, %v7540_v37  ;;  %v7583_v24 = vadd.f32 %v15934_v50, %v7561_v19 }
 0xe62   : > { %13234 = vrsqrt.f32 %v7511_v8  ;;  %v7855_v1 = vadd.f32 %v15956_v53, %v7833_v14  ;;  %v7496_v37 = vmul.f32 0.125, %v7462_v38 }
 0xe63   : > { %13236 = vrsqrt.f32 %v7783_v63  ;;  %v7584_v55 = vadd.f32 %v15934_v50, %v7562_v30  ;;  %v7599_v40 = vmul.f32 0.35355338, %v7583_v24 }
 0xe64   : > { %v12663_v58 = vpack.c.bf16 %v7855_v1, %v7854_v0  ;;  %v7512_v38 = vadd.f32 1e-06, %v7496_v37 }
 0xe65   : > { %v7600_v63 = vmul.f32 0.35355338, %v7584_v55 }
 0xe66   : > { %12665 = vmatprep.subr.msk.bf16.mxu1 %vm14512_vm5, %v12663_v58 }
 0xe67   : > { %12668 = vmatpush3.bf16.xpose.msk.msra.mxu1 %vm14512_vm5, %v12663_v58  ;;  %v7509_v58 = vadd.f32 1e-06, %v7493_v52 }
 0xe6b   : > { %v13233_v21 = vpop.eup %13232 }
 0xe6c   : > { %v13235_v8 = vpop.eup %13234  ;;  %v7814_v47 = vmul.f32 %v13233_v21, %v15794_v6  ;;  %v7740_v34 = vpop.xlane.xlu0 %7739 }
 0xe6d   : > { %v7722_v3 = vpop.xlane.xlu1 %7721  ;;  %v13237_v39 = vpop.eup %13236  ;;  %v7770_v33 = vmul.f32 0.125, %v7740_v34  ;;  %v7543_v6 = vmul.f32 %v13235_v8, %v15740_v7 }
 0xe6e   : > { %v7764_v14 = vmul.f32 0.125, %v7722_v3  ;;  %v7815_v0 = vmul.f32 %v13237_v39, %v15797_v54  ;;  %12393 = vmatmul.mubr.msk.f32.vlgmr.msra.gmra.mrb[128].mxu1 %vm2574_vm3, %v7599_v40  ;;  %v7836_v1 = vmul.f32 %v15948_v26, %v7814_v47 }
 0xe6f   : > { %12399 = vmatprep.mubr.msk.f32.mxu1 %vm2574_vm3, %v7600_v63  ;;  %v7786_v51 = vadd.f32 1e-06, %v7770_v33  ;;  %v7565_v8 = vmul.f32 %v15928_v17, %v7543_v6 }
 0xe70   : > { %v7780_v19 = vadd.f32 1e-06, %v7764_v14  ;;  %v7725_v30 = vpop.xlane.xlu0 %7724  ;;  %v7837_v21 = vmul.f32 %v15948_v26, %v7815_v0  ;;  %v7858_v54 = vadd.f32 %v15956_v53, %v7836_v1  ;;  %v7497_v1 = vmul.f32 0.125, %v15943_v43 }
 0xe71   : > { %v7471_v24 = vpop.xlane.xlu1 %7470  ;;  %v7765_v34 = vmul.f32 0.125, %v7725_v30  ;;  %v7587_v0 = vadd.f32 %v15934_v50, %v7565_v8 }
 0xe72   : > { %v7499_v55 = vmul.f32 0.125, %v7471_v24  ;;  %13238 = vrsqrt.f32 %v7780_v19  ;;  %v7859_v3 = vadd.f32 %v15956_v53, %v7837_v21 }
 0xe73   : > { %13240 = vrsqrt.f32 %v7509_v58  ;;  %v7781_v52 = vadd.f32 1e-06, %v7765_v34  ;;  %v7603_v6 = vmul.f32 0.35355338, %v7587_v0  ;;  %v7513_v34 = vadd.f32 1e-06, %v7497_v1 }
 0xe74   : > { %13242 = vrsqrt.f32 %v7786_v51  ;;  %v7515_v47 = vadd.f32 1e-06, %v7499_v55  ;;  %v7468_v40 = vpop.xlane.xlu0 %7467  ;;  %v12675_v7 = vpack.c.bf16 %v7859_v3, %v7858_v54 }
 0xe75   : > { %v7743_v39 = vpop.xlane.xlu1 %7742  ;;  %13244 = vrsqrt.f32 %v7781_v52  ;;  %v7498_v33 = vmul.f32 0.125, %v7468_v40 }
 0xe76   : > { %v7771_v14 = vmul.f32 0.125, %v7743_v39  ;;  %13246 = vrsqrt.f32 %v7512_v38  ;;  %12677 = vmatprep.subr.msk.bf16.mxu0 %vm14512_vm5, %v12675_v7 }
 0xe77   : > { %v7514_v63 = vadd.f32 1e-06, %v7498_v33  ;;  %12680 = vmatpush3.bf16.xpose.msk.msra.mxu0 %vm14512_vm5, %v12675_v7  ;;  %13248 = vrsqrt.f32 %v7515_v47 }
 0xe78   : > { %v7787_v37 = vadd.f32 1e-06, %v7771_v14 }
 0xe79   : > { %13250 = vrsqrt.f32 %v7514_v63 }
 0xe7a   : > { %13252 = vrsqrt.f32 %v7787_v37 }
 0xe7c   : > { %v13239_v58 = vpop.eup %13238  ;;  %v7734_v19 = vpop.xlane.xlu0 %7733 }
 0xe7d   : > { %v13241_v51 = vpop.eup %13240  ;;  %v7812_v30 = vmul.f32 %v13239_v58, %v15809_v29  ;;  %v7768_v24 = vmul.f32 0.125, %v7734_v19 }
 0xe7e   : > { %v13243_v21 = vpop.eup %13242  ;;  %12407 = vmatmul.mubr.msk.f32.vlgmr.msra.gmra.mrb[136].mxu0 %vm2574_vm3, %v7603_v6  ;;  %v7737_v55 = vpop.xlane.xlu1 %7736  ;;  %v7541_v33 = vmul.f32 %v13241_v51, %v15755_v22 }
 0xe7f   : > { %v13245_v38 = vpop.eup %13244  ;;  %v7784_v54 = vadd.f32 1e-06, %v7768_v24  ;;  %v7769_v3 = vmul.f32 0.125, %v7737_v55  ;;  %v7834_v40 = vmul.f32 %v15948_v26, %v7812_v30  ;;  %v7818_v39 = vmul.f32 %v13243_v21, %v15806_v18 }
 0xe80   : > { %v13247_v52 = vpop.eup %13246  ;;  %v7813_v47 = vmul.f32 %v13245_v38, %v15819_v25  ;;  %v7752_v43 = vpop.xlane.xlu0 %7751 }
 0xe81   : > { %13254 = vrsqrt.f32 %v7784_v54  ;;  %v7785_v7 = vadd.f32 1e-06, %v7769_v3  ;;  %v7774_v29 = vmul.f32 0.125, %v7752_v43  ;;  %v13249_v8 = vpop.eup %13248  ;;  %v7544_v25 = vmul.f32 %v13247_v52, %v15766_v9 }
 0xe82   : > { %13256 = vrsqrt.f32 %v7513_v34  ;;  %v7755_v14 = vpop.xlane.xlu1 %7754  ;;  %v7835_v63 = vmul.f32 %v15948_v26, %v7813_v47  ;;  %v7856_v19 = vadd.f32 %v15956_v53, %v7834_v40  ;;  %v7840_v51 = vmul.f32 %v15948_v26, %v7818_v39 }
 0xe83   : > { %v13251_v37 = vpop.eup %13250  ;;  %13258 = vrsqrt.f32 %v7785_v7  ;;  %v7790_v0 = vadd.f32 1e-06, %v7774_v29  ;;  %v7775_v1 = vmul.f32 0.125, %v7755_v14  ;;  %v7563_v34 = vmul.f32 %v15928_v17, %v7541_v33 }
 0xe84   : > { %v13253_v58 = vpop.eup %13252  ;;  %v7857_v18 = vadd.f32 %v15956_v53, %v7835_v63  ;;  %v7546_v6 = vmul.f32 %v13251_v37, %v15831_v48  ;;  %v7547_v9 = vmul.f32 %v13249_v8, %v15816_v13  ;;  %v7566_v38 = vmul.f32 %v15928_v17, %v7544_v25 }
 0xe85   : > { %v7819_v30 = vmul.f32 %v13253_v58, %v15828_v11  ;;  %13260 = vrsqrt.f32 %v7790_v0  ;;  %v7791_v22 = vadd.f32 1e-06, %v7775_v1  ;;  %v7862_v48 = vadd.f32 %v15956_v53, %v7840_v51 }
 0xe86   : > { %v12669_v24 = vpack.c.bf16 %v7857_v18, %v7856_v19  ;;  %v7568_v21 = vmul.f32 %v15928_v17, %v7546_v6  ;;  %v7585_v13 = vadd.f32 %v15934_v50, %v7563_v34  ;;  %v7588_v43 = vadd.f32 %v15934_v50, %v7566_v38 }
 0xe87   : > { %13262 = vrsqrt.f32 %v7791_v22  ;;  %v7841_v55 = vmul.f32 %v15948_v26, %v7819_v30  ;;  %v7569_v40 = vmul.f32 %v15928_v17, %v7547_v9 }
 0xe88   : > { %12671 = vmatprep.subr.msk.bf16.mxu1 %vm14512_vm5, %v12669_v24  ;;  %v7590_v11 = vadd.f32 %v15934_v50, %v7568_v21  ;;  %v7601_v37 = vmul.f32 0.35355338, %v7585_v13  ;;  %v7604_v58 = vmul.f32 0.35355338, %v7588_v43 }
 0xe89   : > { %12674 = vmatpush3.bf16.xpose.msk.msra.mxu1 %vm14512_vm5, %v12669_v24  ;;  %v7863_v54 = vadd.f32 %v15956_v53, %v7841_v55  ;;  %v7591_v19 = vadd.f32 %v15934_v50, %v7569_v40 }
 0xe8a   : > { %v7606_v3 = vmul.f32 0.35355338, %v7590_v11 }
 0xe8b   : > { %v13255_v52 = vpop.eup %13254  ;;  %v12687_v47 = vpack.c.bf16 %v7863_v54, %v7862_v48  ;;  %v7607_v11 = vmul.f32 0.35355338, %v7591_v19 }
 0xe8c   : > { %v13257_v39 = vpop.eup %13256  ;;  %v7816_v7 = vmul.f32 %v13255_v52, %v15842_v46  ;;  %v7746_v29 = vpop.xlane.xlu0 %7745  ;;  %12420 = vmatprep.mubr.msk.f32.mxu0 %vm2574_vm3, %v7606_v3 }
 0xe8d   : > { %v13259_v8 = vpop.eup %13258  ;;  %v7772_v33 = vmul.f32 0.125, %v7746_v29  ;;  %12689 = vmatprep.subr.msk.bf16.mxu0 %vm14512_vm5, %v12687_v47  ;;  %v7545_v18 = vmul.f32 %v13257_v39, %v15771_v36 }
 0xe8e   : > { %v7817_v14 = vmul.f32 %v13259_v8, %v15845_v20  ;;  %12692 = vmatpush3.bf16.xpose.msk.msra.mxu0 %vm14512_vm5, %v12687_v47  ;;  %v7749_v63 = vpop.xlane.xlu1 %7748  ;;  %v7838_v0 = vmul.f32 %v15948_v26, %v7816_v7 }
 0xe8f   : > { %v13261_v1 = vpop.eup %13260  ;;  %v7788_v25 = vadd.f32 1e-06, %v7772_v33  ;;  %v7773_v46 = vmul.f32 0.125, %v7749_v63  ;;  %v7567_v3 = vmul.f32 %v15928_v17, %v7545_v18 }
 0xe90   : > { %v7822_v6 = vmul.f32 %v13261_v1, %v15850_v23  ;;  %v7474_v30 = vpop.xlane.xlu0 %7473  ;;  %12400 = vmatmul.mubr.msk.f32.vlgmr.msra.gmra.mrb[130].mxu1 %vm2574_vm3, %v7601_v37  ;;  %v7839_v20 = vmul.f32 %v15948_v26, %v7817_v14  ;;  %v7860_v9 = vadd.f32 %v15956_v53, %v7838_v0 }
 0xe91   : > { %v13263_v22 = vpop.eup %13262  ;;  %13264 = vrsqrt.f32 %v7788_v25  ;;  %v7789_v51 = vadd.f32 1e-06, %v7773_v46  ;;  %v7500_v24 = vmul.f32 0.125, %v7474_v30  ;;  %12413 = vmatprep.mubr.msk.f32.mxu1 %vm2574_vm3, %v7604_v58  ;;  %v7589_v43 = vadd.f32 %v15934_v50, %v7567_v3 }
 0xe92   : > { %v7823_v21 = vmul.f32 %v13263_v22, %v15856_v31  ;;  %v7477_v34 = vpop.xlane.xlu1 %7476  ;;  %v7861_v36 = vadd.f32 %v15956_v53, %v7839_v20  ;;  %v7844_v23 = vmul.f32 %v15948_v26, %v7822_v6 }
 0xe93   : > { %13266 = vrsqrt.f32 %v7789_v51  ;;  %v7516_v55 = vadd.f32 1e-06, %v7500_v24  ;;  %v7501_v38 = vmul.f32 0.125, %v7477_v34  ;;  %v7605_v29 = vmul.f32 0.35355338, %v7589_v43 }
 0xe94   : > { %v12681_v48 = vpack.c.bf16 %v7861_v36, %v7860_v9  ;;  %v7845_v54 = vmul.f32 %v15948_v26, %v7823_v21  ;;  %v7866_v31 = vadd.f32 %v15956_v53, %v7844_v23 }
 0xe95   : > { %13268 = vrsqrt.f32 %v7516_v55  ;;  %v7517_v13 = vadd.f32 1e-06, %v7501_v38  ;;  %12421 = vmatmul.mubr.msk.f32.vlgmr.msra.gmra.mrb[138].mxu0 %vm2574_vm3, %v7607_v11 }
 0xe96   : > { %12683 = vmatprep.subr.msk.bf16.mxu1 %vm14512_vm5, %v12681_v48  ;;  %v7867_v52 = vadd.f32 %v15956_v53, %v7845_v54 }
 0xe97   : > { %13270 = vrsqrt.f32 %v7517_v13  ;;  %12686 = vmatpush3.bf16.xpose.msk.msra.mxu1 %vm14512_vm5, %v12681_v48 }
 0xe98   : > { %v12699_v47 = vpack.c.bf16 %v7867_v52, %v7866_v31 }
 0xe9a   : > { %12701 = vmatprep.subr.msk.bf16.mxu0 %vm14512_vm5, %v12699_v47 }
 0xe9b   : > { %v13265_v40 = vpop.eup %13264  ;;  %12704 = vmatpush3.bf16.xpose.msk.msra.mxu0 %vm14512_vm5, %v12699_v47 }
 0xe9c   : > { %v7820_v39 = vmul.f32 %v13265_v40, %v15866_v61  ;;  %v7758_v7 = vpop.xlane.xlu0 %7757  ;;  %12713 = vmatprep.subr.msk.bf16.mxu0 %vm14617_vm8, %v15695_v41 }
 0xe9d   : > { %v13267_v8 = vpop.eup %13266  ;;  %v7776_v33 = vmul.f32 0.125, %v7758_v7 }
 0xe9e   : > { %v7821_v14 = vmul.f32 %v13267_v8, %v15869_v59  ;;  %12414 = vmatmul.mubr.msk.f32.vlgmr.msra.gmra.mrb[132].mxu1 %vm2574_vm3, %v7605_v29  ;;  %v7761_v63 = vpop.xlane.xlu1 %7760  ;;  %v7842_v37 = vmul.f32 %v15948_v26, %v7820_v39 }
 0xe9f   : > { %v13269_v0 = vpop.eup %13268  ;;  %v7792_v1 = vadd.f32 1e-06, %v7776_v33  ;;  %v7777_v25 = vmul.f32 0.125, %v7761_v63 }
 0xea0   : > { %v7480_v46 = vpop.xlane.xlu0 %7479  ;;  %v7843_v61 = vmul.f32 %v15948_v26, %v7821_v14  ;;  %v7548_v58 = vmul.f32 %v13269_v0, %v15874_v35  ;;  %v7864_v20 = vadd.f32 %v15956_v53, %v7842_v37 }
 0xea1   : > { %v13271_v19 = vpop.eup %13270  ;;  %13272 = vrsqrt.f32 %v7792_v1  ;;  %v7793_v18 = vadd.f32 1e-06, %v7777_v25  ;;  %v7502_v6 = vmul.f32 0.125, %v7480_v46 }
 0xea2   : > { %v7549_v30 = vmul.f32 %v13271_v19, %v15880_v62  ;;  %v7483_v59 = vpop.xlane.xlu1 %7482  ;;  %v7865_v22 = vadd.f32 %v15956_v53, %v7843_v61  ;;  %v7570_v51 = vmul.f32 %v15928_v17, %v7548_v58 }
 0xea3   : > { %13274 = vrsqrt.f32 %v7793_v18  ;;  %v7518_v24 = vadd.f32 1e-06, %v7502_v6  ;;  %v7503_v21 = vmul.f32 0.125, %v7483_v59 }
 0xea4   : > { %v7486_v34 = vpop.xlane.xlu0 %7485  ;;  %v12693_v9 = vpack.c.bf16 %v7865_v22, %v7864_v20  ;;  %v7592_v35 = vadd.f32 %v15934_v50, %v7570_v51  ;;  %v7571_v36 = vmul.f32 %v15928_v17, %v7549_v30 }
 0xea5   : > { %13276 = vrsqrt.f32 %v7518_v24  ;;  %v7519_v23 = vadd.f32 1e-06, %v7503_v21  ;;  %v7504_v55 = vmul.f32 0.125, %v7486_v34 }
 0xea6   : > { %12695 = vmatprep.subr.msk.bf16.mxu1 %vm14512_vm5, %v12693_v9  ;;  %v7489_v62 = vpop.xlane.xlu1 %7488  ;;  %v7608_v38 = vmul.f32 0.35355338, %v7592_v35  ;;  %v7593_v54 = vadd.f32 %v15934_v50, %v7571_v36 }
 0xea7   : > { %13278 = vrsqrt.f32 %v7519_v23  ;;  %v7520_v11 = vadd.f32 1e-06, %v7504_v55  ;;  %v7505_v48 = vmul.f32 0.125, %v7489_v62  ;;  %12698 = vmatpush3.bf16.xpose.msk.msra.mxu1 %vm14512_vm5, %v12693_v9 }
 0xea8   : > { %12427 = vmatprep.mubr.msk.f32.mxu1 %vm2574_vm3, %v7608_v38  ;;  %v7609_v52 = vmul.f32 0.35355338, %v7593_v54 }
 0xea9   : > { %13280 = vrsqrt.f32 %v7520_v11  ;;  %v7521_v3 = vadd.f32 1e-06, %v7505_v48 }
 0xeab   : > { %v13273_v13 = vpop.eup %13272  ;;  %13282 = vrsqrt.f32 %v7521_v3 }
 0xeac   : > { %v7824_v31 = vmul.f32 %v13273_v13, %v15890_v15 }
 0xead   : > { %v13275_v47 = vpop.eup %13274 }
 0xeae   : > { %v7825_v43 = vmul.f32 %v13275_v47, %v15893_v42  ;;  %12428 = vmatmul.mubr.msk.f32.vlgmr.msra.gmra.mrb[134].mxu1 %vm2574_vm3, %v7609_v52  ;;  %v7846_v40 = vmul.f32 %v15948_v26, %v7824_v31 }
 0xeaf   : > { %v13277_v39 = vpop.eup %13276 }
 0xeb0   : > { %v7847_v7 = vmul.f32 %v15948_v26, %v7825_v43  ;;  %v7550_v29 = vmul.f32 %v13277_v39, %v15898_v57  ;;  %v7868_v14 = vadd.f32 %v15956_v53, %v7846_v40 }
 0xeb1   : > { %v13279_v8 = vpop.eup %13278 }
 0xeb2   : > { %v7551_v33 = vmul.f32 %v13279_v8, %v15904_v60  ;;  %v7869_v15 = vadd.f32 %v15956_v53, %v7847_v7  ;;  %v7572_v63 = vmul.f32 %v15928_v17, %v7550_v29 }
 0xeb3   : > { %v13281_v37 = vpop.eup %13280 }
 0xeb4   : > { %v12705_v42 = vpack.c.bf16 %v7869_v15, %v7868_v14  ;;  %v7594_v0 = vadd.f32 %v15934_v50, %v7572_v63  ;;  %v7573_v1 = vmul.f32 %v15928_v17, %v7551_v33  ;;  %v7552_v25 = vmul.f32 %v13281_v37, %v15910_v49 }
 0xeb5   : > { %v13283_v26 = vpop.eup %13282 }
 0xeb6   : > { %v7553_v57 = vmul.f32 %v13283_v26, %v15916_v56  ;;  %12707 = vmatprep.subr.msk.bf16.mxu1 %vm14512_vm5, %v12705_v42  ;;  %v7610_v60 = vmul.f32 0.35355338, %v7594_v0  ;;  %v7595_v46 = vadd.f32 %v15934_v50, %v7573_v1  ;;  %v7574_v53 = vmul.f32 %v15928_v17, %v7552_v25 }
 0xeb7   : > { %12710 = vmatpush3.bf16.xpose.msk.msra.mxu1 %vm14512_vm5, %v12705_v42 }
 0xeb8   : > { %12434 = vmatprep.mubr.msk.f32.mxu0 %vm2574_vm3, %v7610_v60  ;;  %12719 = vmatprep.subr.msk.bf16.mxu1 %vm14617_vm8, %v15726_v10  ;;  %v7611_v49 = vmul.f32 0.35355338, %v7595_v46  ;;  %v7596_v56 = vadd.f32 %v15934_v50, %v7574_v53  ;;  %v7575_v61 = vmul.f32 %v15928_v17, %v7553_v57 }
 0xeba   : > { %12435 = vmatmul.mubr.msk.f32.vlgmr.msra.gmra.mrb[140].mxu0 %vm2574_vm3, %v7611_v49  ;;  %v7612_v58 = vmul.f32 0.35355338, %v7596_v56  ;;  %v7597_v19 = vadd.f32 %v15934_v50, %v7575_v61 }
 0xebb   : > { %12716 = vmatpush3.bf16.msk.msra.mxu0 %vm14617_vm8, %v15695_v41 }
 0xebc   : > { %12725 = vmatprep.subr.msk.bf16.mxu0 %vm14617_vm8, %v15709_v5  ;;  %12441 = vmatprep.mubr.msk.f32.mxu1 %vm2574_vm3, %v7612_v58  ;;  %v7613_v16 = vmul.f32 0.35355338, %v7597_v19 }
 0xebe   : > { %12442 = vmatmul.mubr.msk.f32.vlgmr.msra.gmra.mrb[136].mxu1 %vm2574_vm3, %v7613_v16 }
 0xebf   : > { %12722 = vmatpush3.bf16.msk.msra.mxu1 %vm14617_vm8, %v15726_v10 }
 0xec0   : > { %12731 = vmatprep.subr.msk.bf16.mxu1 %vm14617_vm8, %v15757_v45 }
 0xf41   : > { %v12394_v17 = vpop.f32.mrb[128].mxu1 }
 0xf42   : > { %v7948_v50 = vpop.f32.mrb[129].mxu1  ;;  %v8569_v41 = vsel %vm3799_vm9, %v12394_v17, -inf }
 0xf43   : > { %8570 = vmax.xlane.f32.xlu1 %v8569_v41  ;;  %v8566_v18 = vsel %vm3795_vm10, %v7948_v50, -inf }
 0xf44   : > { %8567 = vmax.xlane.f32.xlu0 %v8566_v18 }
 0xf51   : > { %v16112_v6 = vpop.f32.mrb[136].mxu0 }
 0xf52   : > { %v16114_v30 = vpop.f32.mrb[137].mxu0  ;;  %v8581_v24 = vsel %vm3799_vm9, %v16112_v6, -inf }
 0xf53   : > { %v8578_v34 = vsel %vm3795_vm10, %v16114_v30, -inf }
 0xf63   : > { %v12401_v59 = vpop.f32.mrb[130].mxu1 }
 0xf64   : > { %v8035_v20 = vpop.f32.mrb[131].mxu1  ;;  %v8575_v10 = vsel %vm3799_vm9, %v12401_v59, -inf }
 0xf65   : > { %8576 = vmax.xlane.f32.xlu1 %v8575_v10  ;;  %v8572_v22 = vsel %vm3795_vm10, %v8035_v20, -inf }
 0xf66   : > { %8573 = vmax.xlane.f32.xlu0 %v8572_v22 }
 0xf68   : > { %v16118_v51 = vpop.f32.mrb[138].mxu0 }
 0xf69   : > { %v16122_v21 = vpop.f32.mrb[139].mxu0  ;;  %8582 = vmax.xlane.f32.xlu1 %v8581_v24  ;;  %v8593_v55 = vsel %vm3799_vm9, %v16118_v51, -inf }
 0xf6a   : > { %8579 = vmax.xlane.f32.xlu0 %v8578_v34  ;;  %v8590_v62 = vsel %vm3795_vm10, %v16122_v21, -inf }
 0xf71   : > { %v16126_v9 = vpop.f32.mrb[132].mxu1 }
 0xf72   : > { %v16128_v35 = vpop.f32.mrb[133].mxu1  ;;  %v8587_v36 = vsel %vm3799_vm9, %v16126_v9, -inf }
 0xf73   : > { %8588 = vmax.xlane.f32.xlu1 %v8587_v36  ;;  %v8584_v23 = vsel %vm3795_vm10, %v16128_v35, -inf }
 0xf74   : > { %8585 = vmax.xlane.f32.xlu0 %v8584_v23 }
 0xf77   : > { %8594 = vmax.xlane.f32.xlu1 %v8593_v55 }
 0xf78   : > { %8591 = vmax.xlane.f32.xlu0 %v8590_v62 }
 0xf81   : > { %v16138_v38 = vpop.f32.mrb[134].mxu1 }
 0xf82   : > { %v16140_v11 = vpop.f32.mrb[135].mxu1  ;;  %v8599_v48 = vsel %vm3799_vm9, %v16138_v38, -inf }
 0xf83   : > { %8600 = vmax.xlane.f32.xlu1 %v8599_v48  ;;  %v8596_v54 = vsel %vm3795_vm10, %v16140_v11, -inf }
 0xf84   : > { %8597 = vmax.xlane.f32.xlu0 %v8596_v54 }
 0xf8d   : > { %v16146_v3 = vpop.f32.mrb[140].mxu0 }
 0xf8e   : > { %v16148_v13 = vpop.f32.mrb[141].mxu0  ;;  %v8605_v31 = vsel %vm3799_vm9, %v16146_v3, -inf }
 0xf8f   : > { %8606 = vmax.xlane.f32.xlu1 %v8605_v31  ;;  %v8602_v52 = vsel %vm3795_vm10, %v16148_v13, -inf }
 0xf90   : > { %8603 = vmax.xlane.f32.xlu0 %v8602_v52 }
 0xf91   : > { %v16154_v47 = vpop.f32.mrb[136].mxu1 }
 0xf92   : > { %v16156_v43 = vpop.f32.mrb[137].mxu1  ;;  %v8611_v40 = vsel %vm3799_vm9, %v16154_v47, -inf }
 0xf93   : > { %8612 = vmax.xlane.f32.xlu1 %v8611_v40  ;;  %v8608_v39 = vsel %vm3795_vm10, %v16156_v43, -inf }
 0xf94   : > { %8609 = vmax.xlane.f32.xlu0 %v8608_v39 }
 0xfd0   : > { %v8571_v7 = vpop.xlane.xlu1 %8570 }
 0xfd1   : > { %v8615_v29 = vsub.f32 %v12394_v17, %v8571_v7  ;;  %v8568_v8 = vpop.xlane.xlu0 %8567 }
 0xfd2   : > { %v8614_v33 = vsub.f32 %v7948_v50, %v8568_v8 }
 0xfd3   : > { %v8632_v14 = vmul.f32 1.442695, %v8615_v29 }
 0xfd4   : > { %v8630_v15 = vmul.f32 1.442695, %v8614_v33 }
 0xfd5   : > { %13284 = vpow2.f32 %v8632_v14 }
 0xfd6   : > { %13286 = vpow2.f32 %v8630_v15 }
 0xfdf   : > { %v16162_v63 = vpop.eup %13284 }
 0xfe0   : > { %v16164_v37 = vpop.eup %13286  ;;  %v8665_v42 = vsel %vm3799_vm9, %v16162_v63, 0.0 }
 0xfe1   : > { %8666 = vadd.xlane.f32.xlu1 %v8665_v42  ;;  %v8662_v0 = vsel %vm3795_vm10, %v16164_v37, 0.0 }
 0xfe2   : > { %8663 = vadd.xlane.f32.xlu0 %v8662_v0 }
 0xff2   : > { %v8577_v1 = vpop.xlane.xlu1 %8576 }
 0xff3   : > { %v8617_v25 = vsub.f32 %v12401_v59, %v8577_v1  ;;  %v8574_v26 = vpop.xlane.xlu0 %8573 }
 0xff4   : > { %v8616_v57 = vsub.f32 %v8035_v20, %v8574_v26 }
 0xff5   : > { %v8636_v60 = vmul.f32 1.442695, %v8617_v25 }
 0xff6   : > { %v8634_v46 = vmul.f32 1.442695, %v8616_v57  ;;  %v8583_v53 = vpop.xlane.xlu1 %8582 }
 0xff7   : > { %13288 = vpow2.f32 %v8636_v60  ;;  %v8619_v49 = vsub.f32 %v16112_v6, %v8583_v53  ;;  %v8580_v56 = vpop.xlane.xlu0 %8579 }
 0xff8   : > { %13290 = vpow2.f32 %v8634_v46  ;;  %v8618_v61 = vsub.f32 %v16114_v30, %v8580_v56 }
 0xff9   : > { %v8640_v58 = vmul.f32 1.442695, %v8619_v49 }
 0xffa   : > { %v8638_v19 = vmul.f32 1.442695, %v8618_v61 }
 0xffb   : > { %13292 = vpow2.f32 %v8640_v58 }
 0xffc   : > { %13294 = vpow2.f32 %v8638_v19 }
0x1000   : > { %v8589_v16 = vpop.xlane.xlu1 %8588 }
0x1001   : > { %v16172_v17 = vpop.eup %13288  ;;  %v8621_v50 = vsub.f32 %v16126_v9, %v8589_v16  ;;  %v8586_v41 = vpop.xlane.xlu0 %8585 }
0x1002   : > { %v16175_v18 = vpop.eup %13290  ;;  %v8620_v59 = vsub.f32 %v16128_v35, %v8586_v41  ;;  %v8671_v6 = vsel %vm3799_vm9, %v16172_v17, 0.0 }
0x1003   : > { %v8644_v20 = vmul.f32 1.442695, %v8621_v50  ;;  %8672 = vadd.xlane.f32.xlu1 %v8671_v6  ;;  %v8668_v30 = vsel %vm3795_vm10, %v16175_v18, 0.0 }
0x1004   : > { %v8642_v10 = vmul.f32 1.442695, %v8620_v59  ;;  %v8595_v22 = vpop.xlane.xlu1 %8594  ;;  %8669 = vadd.xlane.f32.xlu0 %v8668_v30 }
0x1005   : > { %v16182_v24 = vpop.eup %13292  ;;  %13296 = vpow2.f32 %v8644_v20  ;;  %v8623_v34 = vsub.f32 %v16118_v51, %v8595_v22  ;;  %v8592_v9 = vpop.xlane.xlu0 %8591 }
0x1006   : > { %v16185_v36 = vpop.eup %13294  ;;  %13298 = vpow2.f32 %v8642_v10  ;;  %v8622_v35 = vsub.f32 %v16122_v21, %v8592_v9  ;;  %v8677_v23 = vsel %vm3799_vm9, %v16182_v24, 0.0 }
0x1007   : > { %v8648_v55 = vmul.f32 1.442695, %v8623_v34  ;;  %8678 = vadd.xlane.f32.xlu1 %v8677_v23  ;;  %v8674_v62 = vsel %vm3795_vm10, %v16185_v36, 0.0 }
0x1008   : > { %v8646_v48 = vmul.f32 1.442695, %v8622_v35  ;;  %8675 = vadd.xlane.f32.xlu0 %v8674_v62 }
0x1009   : > { %13300 = vpow2.f32 %v8648_v55 }
0x100a   : > { %13302 = vpow2.f32 %v8646_v48 }
0x100f   : > { %v16192_v54 = vpop.eup %13296 }
0x1010   : > { %v16194_v51 = vpop.eup %13298  ;;  %v8601_v31 = vpop.xlane.xlu1 %8600  ;;  %v8683_v21 = vsel %vm3799_vm9, %v16192_v54, 0.0 }
0x1011   : > { %v8625_v52 = vsub.f32 %v16138_v38, %v8601_v31  ;;  %v8598_v40 = vpop.xlane.xlu0 %8597  ;;  %8684 = vadd.xlane.f32.xlu1 %v8683_v21  ;;  %v8680_v39 = vsel %vm3795_vm10, %v16194_v51, 0.0 }
0x1012   : > { %v8624_v7 = vsub.f32 %v16140_v11, %v8598_v40  ;;  %8681 = vadd.xlane.f32.xlu0 %v8680_v39 }
0x1013   : > { %v16202_v29 = vpop.eup %13300  ;;  %v8652_v8 = vmul.f32 1.442695, %v8625_v52 }
0x1014   : > { %v16204_v33 = vpop.eup %13302  ;;  %v8650_v14 = vmul.f32 1.442695, %v8624_v7  ;;  %v8689_v15 = vsel %vm3799_vm9, %v16202_v29, 0.0 }
0x1015   : > { %13304 = vpow2.f32 %v8652_v8  ;;  %8690 = vadd.xlane.f32.xlu1 %v8689_v15  ;;  %v8686_v38 = vsel %vm3795_vm10, %v16204_v33, 0.0 }
0x1016   : > { %13306 = vpow2.f32 %v8650_v14  ;;  %8687 = vadd.xlane.f32.xlu0 %v8686_v38 }
0x101c   : > { %v8607_v42 = vpop.xlane.xlu1 %8606 }
0x101d   : > { %v8627_v11 = vsub.f32 %v16146_v3, %v8607_v42  ;;  %v8604_v0 = vpop.xlane.xlu0 %8603 }
0x101e   : > { %v8626_v1 = vsub.f32 %v16148_v13, %v8604_v0 }
0x101f   : > { %v16212_v25 = vpop.eup %13304  ;;  %v8656_v26 = vmul.f32 1.442695, %v8627_v11 }
0x1020   : > { %v16214_v57 = vpop.eup %13306  ;;  %v8654_v60 = vmul.f32 1.442695, %v8626_v1  ;;  %v8613_v46 = vpop.xlane.xlu1 %8612  ;;  %v8695_v53 = vsel %vm3799_vm9, %v16212_v25, 0.0 }
0x1021   : > { %13308 = vpow2.f32 %v8656_v26  ;;  %v8629_v49 = vsub.f32 %v16154_v47, %v8613_v46  ;;  %8696 = vadd.xlane.f32.xlu1 %v8695_v53  ;;  %v8610_v56 = vpop.xlane.xlu0 %8609  ;;  %v8692_v3 = vsel %vm3795_vm10, %v16214_v57, 0.0 }
0x1022   : > { %13310 = vpow2.f32 %v8654_v60  ;;  %v8628_v13 = vsub.f32 %v16156_v43, %v8610_v56  ;;  %8693 = vadd.xlane.f32.xlu0 %v8692_v3  ;;  %v11101_v3 = vld [vmem:[%s16629_s11 + $0x24] sm:$0xf] }
0x1023   : > { %v8660_v61 = vmul.f32 1.442695, %v8629_v49 }
0x1024   : > { %v8658_v58 = vmul.f32 1.442695, %v8628_v13  ;;  %v9482_v13 = vsel %vm4665_vm11, %v11101_v3, 0 }
0x1025   : > { %13312 = vpow2.f32 %v8660_v61  ;;  %v11102_v61 = vld [vmem:[%s16629_s11 + $0x28] sm:$0xf] }
0x1026   : > { %13314 = vpow2.f32 %v8658_v58 }
0x102b   : > { %v16222_v19 = vpop.eup %13308 }
0x102c   : > { %v16224_v16 = vpop.eup %13310  ;;  %v8701_v47 = vsel %vm3799_vm9, %v16222_v19, 0.0 }
0x102d   : > { %8702 = vadd.xlane.f32.xlu1 %v8701_v47  ;;  %v8698_v50 = vsel %vm3795_vm10, %v16224_v16, 0.0  ;;  %v9529_v47 = vsel %vm4665_vm11, %v11102_v61, 0 }
0x102e   : > { %8699 = vadd.xlane.f32.xlu0 %v8698_v50  ;;  %v11103_v50 = vld [vmem:[%s16629_s11 + $0x2c] sm:$0xf] }
0x102f   : > { %v16230_v41 = vpop.eup %13312 }
0x1030   : > { %v16232_v43 = vpop.eup %13314  ;;  %v8707_v59 = vsel %vm3799_vm9, %v16230_v41, 0.0 }
0x1031   : > { %8708 = vadd.xlane.f32.xlu1 %v8707_v59  ;;  %v8704_v6 = vsel %vm3795_vm10, %v16232_v43, 0.0 }
0x1032   : > { %8705 = vadd.xlane.f32.xlu0 %v8704_v6  ;;  %v9576_v6 = vsel %vm4665_vm11, %v11103_v50, 0 }
0x106e   : > { %v8667_v20 = vpop.xlane.xlu1 %8666 }
0x106f   : > { %13316 = vrcp.f32 %v8667_v20  ;;  %v8664_v30 = vpop.xlane.xlu0 %8663  ;;  %v11104_v20 = vld [vmem:[%s16629_s11 + $0x30] sm:$0xf] }
0x1070   : > { %13318 = vrcp.f32 %v8664_v30 }
0x1079   : > { %v13317_v10 = vpop.eup %13316 }
0x107a   : > { %v13319_v22 = vpop.eup %13318  ;;  %v8727_v9 = vmul.f32 %v13317_v10, %v16162_v63 }
0x107b   : > { %v8726_v34 = vmul.f32 %v13319_v22, %v16164_v37 }
0x107d   : > { %12448 = vmatprep.mubr.msk.f32.mxu0 %vm3795_vm10, %v8726_v34  ;;  %v9623_v34 = vsel %vm4665_vm11, %v11104_v20, 0 }
0x107e   : > { %12449 = vmatmul.mubr.msk.f32.vlgmr.msra.gmra.mrb[142].mxu0 %vm3795_vm10, %v8727_v9  ;;  %v11105_v9 = vld [vmem:[%s16629_s11 + $0x34] sm:$0xf] }
0x107f   : > { %12728 = vmatpush3.bf16.msk.msra.mxu0 %vm14617_vm8, %v15709_v5 }
0x1080   : > { %12737 = vmatprep.subr.msk.bf16.mxu0 %vm14617_vm8, %v15724_v2 }
0x1090   : > { %v8673_v35 = vpop.xlane.xlu1 %8672 }
0x1091   : > { %13320 = vrcp.f32 %v8673_v35  ;;  %v8670_v23 = vpop.xlane.xlu0 %8669 }
0x1092   : > { %13322 = vrcp.f32 %v8670_v23 }
0x1094   : > { %v8679_v55 = vpop.xlane.xlu1 %8678 }
0x1095   : > { %13324 = vrcp.f32 %v8679_v55  ;;  %v8676_v37 = vpop.xlane.xlu0 %8675 }
0x1096   : > { %13326 = vrcp.f32 %v8676_v37  ;;  %v9670_v37 = vsel %vm4665_vm11, %v11105_v9, 0 }
0x109b   : > { %v13321_v63 = vpop.eup %13320 }
0x109c   : > { %v13323_v62 = vpop.eup %13322  ;;  %v8729_v31 = vmul.f32 %v13321_v63, %v16172_v17  ;;  %v11106_v63 = vld [vmem:[%s16629_s11 + $0x38] sm:$0xf] }
0x109d   : > { %v8728_v48 = vmul.f32 %v13323_v62, %v16175_v18 }
0x109e   : > { %v8685_v21 = vpop.xlane.xlu1 %8684 }
0x109f   : > { %v13325_v5 = vpop.eup %13324  ;;  %13328 = vrcp.f32 %v8685_v21  ;;  %12455 = vmatprep.mubr.msk.f32.mxu1 %vm3795_vm10, %v8728_v48  ;;  %v8682_v52 = vpop.xlane.xlu0 %8681  ;;  %v9717_v21 = vsel %vm4665_vm11, %v11106_v63, 0 }
0x10a0   : > { %v13327_v40 = vpop.eup %13326  ;;  %13330 = vrcp.f32 %v8682_v52  ;;  %12456 = vmatmul.mubr.msk.f32.vlgmr.msra.gmra.mrb[138].mxu1 %vm3795_vm10, %v8729_v31  ;;  %v8731_v18 = vmul.f32 %v13325_v5, %v16182_v24  ;;  %v11107_v5 = vld [vmem:[%s16629_s11 + $0x3c] sm:$0xf] }
0x10a1   : > { %12734 = vmatpush3.bf16.msk.msra.mxu1 %vm14617_vm8, %v15757_v45  ;;  %v8730_v39 = vmul.f32 %v13327_v40, %v16185_v36 }
0x10a2   : > { %12743 = vmatprep.subr.msk.bf16.mxu1 %vm14617_vm8, %v15768_v12  ;;  %v8691_v17 = vpop.xlane.xlu1 %8690 }
0x10a3   : > { %13332 = vrcp.f32 %v8691_v17  ;;  %12462 = vmatprep.mubr.msk.f32.mxu0 %vm3795_vm10, %v8730_v39  ;;  %v8688_v7 = vpop.xlane.xlu0 %8687 }
0x10a4   : > { %13334 = vrcp.f32 %v8688_v7  ;;  %12463 = vmatmul.mubr.msk.f32.vlgmr.msra.gmra.mrb[144].mxu0 %vm3795_vm10, %v8731_v18  ;;  %v9764_v18 = vsel %vm4665_vm11, %v11107_v5, 0 }
0x10a5   : > { %12740 = vmatpush3.bf16.msk.msra.mxu0 %vm14617_vm8, %v15724_v2 }
0x10a6   : > { %12749 = vmatprep.subr.msk.bf16.mxu0 %vm14617_vm8, %v15752_v28 }
0x10a9   : > { %v13329_v45 = vpop.eup %13328 }
0x10aa   : > { %v13331_v24 = vpop.eup %13330  ;;  %v8733_v8 = vmul.f32 %v13329_v45, %v16192_v54 }
0x10ab   : > { %v8732_v36 = vmul.f32 %v13331_v24, %v16194_v51 }
0x10ad   : > { %v13333_v14 = vpop.eup %13332  ;;  %12469 = vmatprep.mubr.msk.f32.mxu1 %vm3795_vm10, %v8732_v36 }
0x10ae   : > { %v13335_v15 = vpop.eup %13334  ;;  %v8697_v38 = vpop.xlane.xlu1 %8696  ;;  %12470 = vmatmul.mubr.msk.f32.vlgmr.msra.gmra.mrb[140].mxu1 %vm3795_vm10, %v8733_v8  ;;  %v8735_v11 = vmul.f32 %v13333_v14, %v16202_v29  ;;  %v16735_v8 = vmov 0  }
0x10af   : > { %13336 = vrcp.f32 %v8697_v38  ;;  %12746 = vmatpush3.bf16.msk.msra.mxu1 %vm14617_vm8, %v15768_v12  ;;  %v8694_v2 = vpop.xlane.xlu0 %8693  ;;  %v8734_v42 = vmul.f32 %v13335_v15, %v16204_v33 }
0x10b0   : > { %12755 = vmatprep.subr.msk.bf16.mxu1 %vm14617_vm8, %v15782_v32  ;;  %13338 = vrcp.f32 %v8694_v2 }
0x10b1   : > { %12476 = vmatprep.mubr.msk.f32.mxu0 %vm3795_vm10, %v8734_v42 }
0x10b2   : > { %12477 = vmatmul.mubr.msk.f32.vlgmr.msra.gmra.mrb[146].mxu0 %vm3795_vm10, %v8735_v11 }
0x10b3   : > { %12752 = vmatpush3.bf16.msk.msra.mxu0 %vm14617_vm8, %v15752_v28 }
0x10b4   : > { %12500 = vmatprep.subr.bf16.mxu0 %v16730_v44 }
0x10b9   : > { %v13337_v12 = vpop.eup %13336 }
0x10ba   : > { %v13339_v54 = vpop.eup %13338  ;;  %v8703_v51 = vpop.xlane.xlu1 %8702  ;;  %v8737_v0 = vmul.f32 %v13337_v12, %v16212_v25 }
0x10bb   : > { %13340 = vrcp.f32 %v8703_v51  ;;  %v8700_v29 = vpop.xlane.xlu0 %8699  ;;  %v8736_v33 = vmul.f32 %v13339_v54, %v16214_v57 }
0x10bc   : > { %13342 = vrcp.f32 %v8700_v29 }
0x10bd   : > { %12483 = vmatprep.mubr.msk.f32.mxu1 %vm3795_vm10, %v8736_v33 }
0x10be   : > { %v8709_v1 = vpop.xlane.xlu1 %8708  ;;  %12484 = vmatmul.mubr.msk.f32.vlgmr.msra.gmra.mrb[142].mxu1 %vm3795_vm10, %v8737_v0 }
0x10bf   : > { %13344 = vrcp.f32 %v8709_v1  ;;  %12758 = vmatpush3.bf16.msk.msra.mxu1 %vm14617_vm8, %v15782_v32  ;;  %v8706_v28 = vpop.xlane.xlu0 %8705  ;;  %v11100_v32 = vld [vmem:[%s16629_s11 + $0x20] sm:$0xf] }
0x10c0   : > { %13346 = vrcp.f32 %v8706_v28  ;;  %12506 = vmatprep.subr.bf16.mxu1 %v16730_v44  ;;  %v9435_v56 = vsel %vm4665_vm11, %v11100_v32, 0 }
0x10c5   : > { %v13341_v26 = vpop.eup %13340 }
0x10c6   : > { %v13343_v60 = vpop.eup %13342  ;;  %v8739_v25 = vmul.f32 %v13341_v26, %v16222_v19 }
0x10c7   : > { %v8738_v57 = vmul.f32 %v13343_v60, %v16224_v16 }
0x10c9   : > { %v13345_v46 = vpop.eup %13344  ;;  %12490 = vmatprep.mubr.msk.f32.mxu0 %vm3795_vm10, %v8738_v57 }
0x10ca   : > { %v13347_v53 = vpop.eup %13346  ;;  %12491 = vmatmul.mubr.msk.f32.vlgmr.msra.gmra.mrb[148].mxu0 %vm3795_vm10, %v8739_v25  ;;  %v8741_v27 = vmul.f32 %v13345_v46, %v16230_v41 }
0x10cb   : > { %v8740_v49 = vmul.f32 %v13347_v53, %v16232_v43  ;;  %12502 = vmatprep.mubr.msk.bf16.mxu0 %vm13435_vm2, %v16730_v44  ;;  %12501 = vmatpush3.bf16.msra.mxu0 %v9435_v56 }
0x10cc   : > { %12512 = vmatprep.subr.bf16.mxu0 %v16730_v44 }
0x10cd   : > { %12497 = vmatprep.mubr.msk.f32.mxu1 %vm3795_vm10, %v8740_v49 }
0x10ce   : > { %12498 = vmatmul.mubr.msk.f32.vlgmr.msra.gmra.mrb[144].mxu1 %vm3795_vm10, %v8741_v27 }
0x10cf   : > { %12508 = vmatprep.mubr.msk.bf16.mxu1 %vm13435_vm2, %v16730_v44  ;;  %12507 = vmatpush3.bf16.msra.mxu1 %v9482_v13 }
0x10d0   : > { %12518 = vmatprep.subr.bf16.mxu1 %v16730_v44 }
0x1151   : > { %v12450_v58 = vpop.f32.mrb[142].mxu0 }
0x1152   : > { %v8817_v19 = vpop.f32.mrb[143].mxu0 }
0x1153   : > { %v9414_v16 = vpack.c.bf16 %v12450_v58, %v8817_v19 }
0x1155   : > { %12503 = vmatmul.mubr.msk.bf16.vlgmr.msra.gmra.mrb[152].mxu0 %vm2574_vm3, %v9414_v16 }
0x1156   : > { %12513 = vmatpush3.bf16.msra.mxu0 %v9529_v47  ;;  %12514 = vmatprep.mubr.msk.bf16.mxu0 %vm13435_vm2, %v16730_v44 }
0x1157   : > { %12524 = vmatprep.subr.bf16.mxu0 %v16730_v44 }
0x1173   : > { %v12457_v41 = vpop.f32.mrb[138].mxu1 }
0x1174   : > { %v8901_v43 = vpop.f32.mrb[139].mxu1 }
0x1175   : > { %v9415_v59 = vpack.c.bf16 %v12457_v41, %v8901_v43 }
0x1177   : > { %v12464_v30 = vpop.f32.mrb[144].mxu0  ;;  %12509 = vmatmul.mubr.msk.bf16.vlgmr.msra.gmra.mrb[148].mxu1 %vm2574_vm3, %v9415_v59 }
0x1178   : > { %v8985_v10 = vpop.f32.mrb[145].mxu0  ;;  %12519 = vmatpush3.bf16.msra.mxu1 %v9576_v6  ;;  %12520 = vmatprep.mubr.msk.bf16.mxu1 %vm13435_vm2, %v16730_v44 }
0x1179   : > { %v9416_v22 = vpack.c.bf16 %v12464_v30, %v8985_v10  ;;  %12530 = vmatprep.subr.bf16.mxu1 %v16730_v44 }
0x117b   : > { %12515 = vmatmul.mubr.msk.bf16.vlgmr.msra.gmra.mrb[156].mxu0 %vm2574_vm3, %v9416_v22 }
0x117c   : > { %12525 = vmatpush3.bf16.msra.mxu0 %v9623_v34  ;;  %12526 = vmatprep.mubr.msk.bf16.mxu0 %vm13435_vm2, %v16730_v44 }
0x117d   : > { %12536 = vmatprep.subr.bf16.mxu0 %v16730_v44 }
0x1181   : > { %v12471_v35 = vpop.f32.mrb[140].mxu1 }
0x1182   : > { %v9069_v23 = vpop.f32.mrb[141].mxu1 }
0x1183   : > { %v9417_v55 = vpack.c.bf16 %v12471_v35, %v9069_v23 }
0x1185   : > { %v12478_v62 = vpop.f32.mrb[146].mxu0  ;;  %12521 = vmatmul.mubr.msk.bf16.vlgmr.msra.gmra.mrb[152].mxu1 %vm2574_vm3, %v9417_v55 }
0x1186   : > { %v9153_v48 = vpop.f32.mrb[147].mxu0  ;;  %12531 = vmatpush3.bf16.msra.mxu1 %v9670_v37  ;;  %12532 = vmatprep.mubr.msk.bf16.mxu1 %vm13435_vm2, %v16730_v44 }
0x1187   : > { %v9418_v31 = vpack.c.bf16 %v12478_v62, %v9153_v48  ;;  %12542 = vmatprep.subr.bf16.mxu1 %v16730_v44 }
0x1189   : > { %12527 = vmatmul.mubr.msk.bf16.vlgmr.msra.gmra.mrb[160].mxu0 %vm2574_vm3, %v9418_v31 }
0x118a   : > { %12537 = vmatpush3.bf16.msra.mxu0 %v9717_v21  ;;  %12538 = vmatprep.mubr.msk.bf16.mxu0 %vm13435_vm2, %v16730_v44 }
0x1191   : > { %v12485_v52 = vpop.f32.mrb[142].mxu1 }
0x1192   : > { %v9237_v40 = vpop.f32.mrb[143].mxu1 }
0x1193   : > { %v9419_v39 = vpack.c.bf16 %v12485_v52, %v9237_v40 }
0x1195   : > { %12533 = vmatmul.mubr.msk.bf16.vlgmr.msra.gmra.mrb[156].mxu1 %vm2574_vm3, %v9419_v39 }
0x1196   : > { %12543 = vmatpush3.bf16.msra.mxu1 %v9764_v18  ;;  %12544 = vmatprep.mubr.msk.bf16.mxu1 %vm13435_vm2, %v16730_v44 }
0x119d   : > { %v12492_v17 = vpop.f32.mrb[148].mxu0 }
0x119e   : > { %v9321_v7 = vpop.f32.mrb[149].mxu0 }
0x119f   : > { %v9420_v45 = vpack.c.bf16 %v12492_v17, %v9321_v7  ;;  %v11117_v7 = vld [vmem:[%s16630_s12 + $0x1] ss:$0 sm:$0xff] }
0x11a1   : > { %v12499_v24 = vpop.f32.mrb[144].mxu1  ;;  %12539 = vmatmul.mubr.msk.bf16.vlgmr.msra.gmra.mrb[164].mxu0 %vm2574_vm3, %v9420_v45 }
0x11a2   : > { %v9405_v36 = vpop.f32.mrb[145].mxu1  ;;  %10003 = vmatprep.mubr.bf16.mxu0 %v16735_v8  ;;  %v11119_v8 = vld [vmem:[%s16631_s13 + $0x1] ss:$0 sm:$0xff] }
0x11a3   : > { %v9421_v14 = vpack.c.bf16 %v12499_v24, %v9405_v36 }
0x11a5   : > { %12545 = vmatmul.mubr.msk.bf16.vlgmr.msra.gmra.mrb[160].mxu1 %vm2574_vm3, %v9421_v14 }
0x1228   : > { %v9471_v15 = vpop.f32.mrb[152].mxu0 }
0x1229   : > { %v12504_v38 = vpop.f32.mrb[153].mxu0  ;;  %v9807_v12 = vsel %vm771_vm0, %v9471_v15, 0.0 }
0x122a   : > { %v9474_v2 = vpop.f32.mrb[154].mxu0 }
0x122b   : > { %v12505_v42 = vpop.f32.mrb[155].mxu0  ;;  %v9822_v0 = vsel %vm775_vm1, %v9474_v2, 0.0 }
0x124a   : > { %v9518_v11 = vpop.f32.mrb[148].mxu1 }
0x124b   : > { %v9808_v54 = vsel %vm771_vm0, %v9518_v11, 0.0  ;;  %v12510_v51 = vpop.f32.mrb[149].mxu1 }
0x124c   : > { %v9809_v29 = vadd.f32 %v9808_v54, %v9807_v12  ;;  %v9521_v33 = vpop.f32.mrb[150].mxu1 }
0x124d   : > { %v9823_v1 = vsel %vm775_vm1, %v9521_v33, 0.0  ;;  %v12511_v28 = vpop.f32.mrb[151].mxu1 }
0x124e   : > { %v9824_v26 = vadd.f32 %v9823_v1, %v9822_v0  ;;  %v9565_v60 = vpop.f32.mrb[156].mxu0 }
0x124f   : > { %v9810_v57 = vsel %vm771_vm0, %v9565_v60, 0.0  ;;  %v12516_v25 = vpop.f32.mrb[157].mxu0 }
0x1250   : > { %v9811_v46 = vadd.f32 %v9810_v57, %v9809_v29  ;;  %v9568_v53 = vpop.f32.mrb[158].mxu0  ;;  %v16736_v29 = vld [vmem:[#allocation15_spill] sm:$0xff] }
0x1251   : > { %v9825_v49 = vsel %vm775_vm1, %v9568_v53, 0.0  ;;  %v12517_v27 = vpop.f32.mrb[159].mxu0 }
0x1252   : > { %v9826_v32 = vadd.f32 %v9825_v49, %v9824_v26  ;;  %v13038_v27 = vld [vmem:[%s16634_s16 + $0x44] ss:$8 sps:$4 sm:$0xff]  }
0x1253   : > { %9971 = vmatprep.subr.bf16.mxu0 %v13038_v27 }
0x1258   : > { %v9612_v56 = vpop.f32.mrb[152].mxu1 }
0x1259   : > { %v9812_v3 = vsel %vm771_vm0, %v9612_v56, 0.0  ;;  %v12522_v13 = vpop.f32.mrb[153].mxu1  ;;  %v13041_v56 = vld [vmem:[%s16634_s16 + $0x54] ss:$8 sps:$4 sm:$0xff]  }
0x125a   : > { %v9813_v61 = vadd.f32 %v9812_v3, %v9811_v46  ;;  %v9615_v58 = vpop.f32.mrb[154].mxu1  ;;  %v13039_v3 = vld [vmem:[%s16634_s16 + $0x50] ss:$8 sps:$4 sm:$0xff]   ;;  %v13044_v13 = vld [vmem:[%s16634_s16 + $0x64] ss:$8 sps:$4 sm:$0xff]  }
0x125b   : > { %v9827_v19 = vsel %vm775_vm1, %v9615_v58, 0.0  ;;  %v12523_v16 = vpop.f32.mrb[155].mxu1  ;;  %v13047_v58 = vld [vmem:[%s16634_s16 + $0x74] ss:$8 sps:$4 sm:$0xff]  }
0x125c   : > { %v9828_v47 = vadd.f32 %v9827_v19, %v9826_v32  ;;  %v9659_v50 = vpop.f32.mrb[160].mxu0  ;;  %v13036_v32 = vld [vmem:[%s16634_s16 + $0x40] ss:$8 sps:$4 sm:$0xff]   ;;  %v13045_v19 = vld [vmem:[%s16634_s16 + $0x70] ss:$8 sps:$4 sm:$0xff]  }
0x125d   : > { %v9814_v41 = vsel %vm771_vm0, %v9659_v50, 0.0  ;;  %v12528_v43 = vpop.f32.mrb[161].mxu0  ;;  %9972 = vmatpush1.bf16.msra.mxu0 %v13036_v32 }
0x125e   : > { %v9815_v59 = vadd.f32 %v9814_v41, %v9813_v61  ;;  %v9662_v6 = vpop.f32.mrb[162].mxu0  ;;  %9973 = vmatprep.subr.bf16.mxu0 %v13041_v56  ;;  %v13042_v61 = vld [vmem:[%s16634_s16 + $0x60] ss:$8 sps:$4 sm:$0xff]  }
0x125f   : > { %v9829_v20 = vsel %vm775_vm1, %v9662_v6, 0.0  ;;  %v12529_v30 = vpop.f32.mrb[163].mxu0 }
0x1260   : > { %v9830_v10 = vadd.f32 %v9829_v20, %v9828_v47  ;;  %v11122_v20 = vld [vmem:[%s16632_s14 + $0x1] ss:$0 sm:$0xff] }
0x1261   : > { %9974 = vmatpush1.bf16.msra.mxu0 %v13039_v3 }
0x1262   : > { %9975 = vmatprep.subr.bf16.mxu0 %v13044_v13 }
0x1265   : > { %9976 = vmatpush1.bf16.msra.mxu0 %v13042_v61 }
0x1266   : > { %9977 = vmatprep.subr.bf16.mxu0 %v13047_v58 }
0x1268   : > { %v9706_v22 = vpop.f32.mrb[156].mxu1 }
0x1269   : > { %v9816_v34 = vsel %vm771_vm0, %v9706_v22, 0.0  ;;  %v12534_v9 = vpop.f32.mrb[157].mxu1  ;;  %9978 = vmatpush1.bf16.msra.mxu0 %v13045_v19 }
0x126a   : > { %v9817_v35 = vadd.f32 %v9816_v34, %v9815_v59  ;;  %v9709_v23 = vpop.f32.mrb[158].mxu1  ;;  %v11123_v9 = vld [vmem:[%s16633_s15 + $0x1] ss:$0 sm:$0xff] }
0x126b   : > { %v9831_v55 = vsel %vm775_vm1, %v9709_v23, 0.0  ;;  %v12535_v37 = vpop.f32.mrb[159].mxu1 }
0x126c   : > { %v9832_v63 = vadd.f32 %v9831_v55, %v9830_v10 }
0x1274   : > { %v9753_v62 = vpop.f32.mrb[164].mxu0 }
0x1275   : > { %v9818_v48 = vsel %vm771_vm0, %v9753_v62, 0.0  ;;  %v12540_v31 = vpop.f32.mrb[165].mxu0  ;;  %v13049_v62 = vld [vmem:[%s16636_s18 + $0x80] sm:$0xff]  }
0x1276   : > { %v9819_v21 = vadd.f32 %v9818_v48, %v9817_v35  ;;  %v9756_v5 = vpop.f32.mrb[166].mxu0  ;;  %v13050_v48 = vld [vmem:[%s16636_s18 + $0xc8] sm:$0xff]  }
0x1277   : > { %v9833_v52 = vsel %vm775_vm1, %v9756_v5, 0.0  ;;  %v12541_v40 = vpop.f32.mrb[167].mxu0  ;;  %v13051_v31 = vld [vmem:[%s16636_s18 + $0x88] sm:$0xff]   ;;  %v13054_v5 = vld [vmem:[%s16636_s18 + $0xd8] sm:$0xff]  }
0x1278   : > { %v9834_v39 = vadd.f32 %v9833_v52, %v9832_v63  ;;  %v9800_v18 = vpop.f32.mrb[160].mxu1  ;;  %v13048_v63 = vld [vmem:[%s16636_s18 + $0xc0] sm:$0xff]   ;;  %v13055_v52 = vld [vmem:[%s16636_s18 + $0x98] sm:$0xff]  }
0x1279   : > { %v9820_v17 = vsel %vm771_vm0, %v9800_v18, 0.0  ;;  %v12546_v45 = vpop.f32.mrb[161].mxu1  ;;  %11621 = vmatprep.subr.bf16.mxu1 %v13048_v63  ;;  %v13056_v40 = vld [vmem:[%s16636_s18 + $0xe0] sm:$0xff]   ;;  %v13058_v18 = vld [vmem:[%s16636_s18 + $0xe8] sm:$0xff]  }
0x127a   : > { %v9821_v24 = vadd.f32 %v9820_v17, %v9819_v21  ;;  %v9803_v36 = vpop.f32.mrb[162].mxu1  ;;  %11622 = vmatpush3.bf16.msra.mxu1 %v13049_v62  ;;  %v13053_v21 = vld [vmem:[%s16636_s18 + $0x90] sm:$0xff]   ;;  %v13059_v17 = vld [vmem:[%s16636_s18 + $0xa8] sm:$0xff]  }
0x127b   : > { %v9835_v14 = vsel %vm775_vm1, %v9803_v36, 0.0  ;;  %v12547_v15 = vpop.f32.mrb[163].mxu1  ;;  %11623 = vmatprep.subr.bf16.mxu1 %v13050_v48  ;;  %v13061_v45 = vld [vmem:[%s16636_s18 + $0xb0] sm:$0xff]   ;;  %v13063_v36 = vld [vmem:[%s16636_s18 + $0xb8] sm:$0xff]  }
0x127c   : > { %v9845_v38 = vadd.f32 %v11117_v7, %v9821_v24  ;;  %v9836_v2 = vadd.f32 %v9835_v14, %v9834_v39  ;;  %v13057_v39 = vld [vmem:[%s16636_s18 + $0xa0] sm:$0xff]   ;;  %v13062_v24 = vld [vmem:[%s16636_s18 + $0xf8] sm:$0xff]  }
0x127d   : > { %v16737_v14 = vld [vmem:[#allocation16_spill] sm:$0xff] }
0x127e   : > { %v9855_v42 = vmul.f32 %v11119_v8, %v9845_v38  ;;  %v9846_v11 = vadd.f32 %v11117_v7, %v9836_v2  ;;  %11624 = vmatpush3.bf16.msra.mxu1 %v13051_v31  ;;  %v13060_v7 = vld [vmem:[%s16636_s18 + $0xf0] sm:$0xff]   ;;  %v16738_v15 = vsub.s32 0, %v16737_v14  ;;  %v16739_v2 = vsub.s32 1, %v16737_v14 }
0x1280   : > { %v9856_v12 = vmul.f32 %v11119_v8, %v9846_v11  ;;  %v16388_v54 = vadd.f32 %v9855_v42, %v15094_v4  ;;  %v11132_v8 = vld [vmem:[%s16635_s17 + $0x2] sm:$0x3] }
0x1281   : > { %v9921_v38 = vrot.slane %v11132_v8, %v16738_v15  ;;  %v9925_v42 = vrot.slane %v11132_v8, %v16739_v2 }
0x1282   : > { %v9863_v51 = vsel %vm771_vm0, %v16388_v54, 0.0  ;;  %v16393_v33 = vadd.f32 %v9856_v12, %v16736_v29 }
0x1283   : > { %9864 = vadd.xlane.f32.xlu0 %v9863_v51 }
0x1284   : > { %v9866_v0 = vsel %vm775_vm1, %v16393_v33, 0.0 }
0x1285   : > { %9867 = vadd.xlane.f32.xlu1 %v9866_v0 }
0x1310   : > { %v9865_v1 = vpop.xlane.xlu0 %9864 }
0x1311   : > { %v9869_v28 = vmul.f32 0.015625, %v9865_v1 }
0x1312   : > { %v9868_v26 = vpop.xlane.xlu1 %9867 }
0x1313   : > { %v9871_v60 = vsub.f32 %v16388_v54, %v9869_v28  ;;  %v9870_v57 = vmul.f32 0.015625, %v9868_v26 }
0x1315   : > { %v9872_v4 = vsub.f32 %v16393_v33, %v9870_v57  ;;  %v9873_v25 = vmul.f32 %v9871_v60, %v9871_v60 }
0x1317   : > { %v9875_v46 = vsel %vm771_vm0, %v9873_v25, 0.0  ;;  %v9874_v53 = vmul.f32 %v9872_v4, %v9872_v4 }
0x1318   : > { %9876 = vadd.xlane.f32.xlu0 %v9875_v46 }
0x1319   : > { %v9878_v49 = vsel %vm775_vm1, %v9874_v53, 0.0 }
0x131a   : > { %9879 = vadd.xlane.f32.xlu1 %v9878_v49 }
0x13a5   : > { %v9877_v16 = vpop.xlane.xlu0 %9876 }
0x13a6   : > { %v9881_v47 = vmul.f32 0.015625, %v9877_v16 }
0x13a7   : > { %v9880_v50 = vpop.xlane.xlu1 %9879 }
0x13a8   : > { %v9883_v41 = vadd.f32 1e-06, %v9881_v47  ;;  %v9882_v43 = vmul.f32 0.015625, %v9880_v50 }
0x13aa   : > { %13348 = vrsqrt.f32 %v9883_v41  ;;  %v9884_v59 = vadd.f32 1e-06, %v9882_v43 }
0x13ac   : > { %13350 = vrsqrt.f32 %v9884_v59 }
0x13b4   : > { %v13349_v6 = vpop.eup %13348 }
0x13b5   : > { %v9887_v30 = vmul.f32 %v13349_v6, %v9871_v60 }
0x13b6   : > { %v13351_v10 = vpop.eup %13350 }
0x13b7   : > { %v9895_v22 = vmul.f32 %v11122_v20, %v9887_v30  ;;  %v9888_v34 = vmul.f32 %v13351_v10, %v9872_v4 }
0x13b9   : > { %v9896_v35 = vmul.f32 %v11122_v20, %v9888_v34  ;;  %v9903_v23 = vadd.f32 %v11123_v9, %v9895_v22 }
0x13bb   : > { %v9904_v55 = vadd.f32 %v11123_v9, %v9896_v35 }
0x13bd   : > { %v9905_v37 = vpack.c.bf16 %v9904_v55, %v9903_v23 }
0x13bf   : > { %11141 = vmatmul.mubr.msk.bf16.vlgmr.msra.gmra.mrb[168].mxu0 %vm771_vm0, %v9905_v37 }
0x13c0   : > { %12564 = vmatprep.mubr.msk.f32.mxu0 %vm13435_vm2, %v16730_v44  ;;  %v13052_v44 = vld [vmem:[%s16636_s18 + $0xd0] sm:$0xff]  }
0x13c1   : > { %11625 = vmatprep.subr.bf16.mxu1 %v13052_v44 }
0x13c2   : > { %11626 = vmatpush3.bf16.msra.mxu1 %v13053_v21 }
0x13c3   : > { %11627 = vmatprep.subr.bf16.mxu1 %v13054_v5 }
0x13c6   : > { %11628 = vmatpush3.bf16.msra.mxu1 %v13055_v52 }
0x13c7   : > { %11629 = vmatprep.subr.bf16.mxu1 %v13056_v40 }
0x13ca   : > { %11630 = vmatpush3.bf16.msra.mxu1 %v13057_v39 }
0x13cb   : > { %11631 = vmatprep.subr.bf16.mxu1 %v13058_v18 }
0x13ce   : > { %11632 = vmatpush3.bf16.msra.mxu1 %v13059_v17 }
0x13cf   : > { %11633 = vmatprep.subr.bf16.mxu1 %v13060_v7 }
0x13d2   : > { %11634 = vmatpush3.bf16.msra.mxu1 %v13061_v45 }
0x13d3   : > { %11635 = vmatprep.subr.bf16.mxu1 %v13062_v24 }
0x13d6   : > { %11636 = vmatpush3.bf16.msra.mxu1 %v13063_v36 }
0x1492   : > { %v10005_v11 = vpop.f32.mrb[168].mxu0 }
0x1493   : > { %v16489_v12 = vadd.f32 %v10005_v11, %v9921_v38  ;;  %v10007_v51 = vpop.f32.mrb[169].mxu0 }
0x1494   : > { %v16491_v29 = vadd.f32 %v10007_v51, %v9925_v42  ;;  %v10009_v0 = vpop.f32.mrb[170].mxu0 }
0x1495   : > { %v16494_v1 = vmul.f32 0.70710677, %v16489_v12  ;;  %v16496_v28 = vadd.f32 %v10009_v0, %v9921_v38  ;;  %v10011_v26 = vpop.f32.mrb[171].mxu0 }
0x1496   : > { %v16499_v60 = vmul.f32 0.70710677, %v16491_v29  ;;  %v16505_v25 = vadd.f32 %v10011_v26, %v9925_v42 }
0x1497   : > { %v10030_v57 = vand.u32 2147483647, %v16494_v1  ;;  %v16503_v4 = vmul.f32 0.70710677, %v16496_v28  ;;  %vm10022_vm2 = vcmp.ge.f32.partialorder %v16494_v1, 0.0 }
0x1498   : > { %v10031_v46 = vand.u32 2147483647, %v16499_v60  ;;  %v16510_v56 = vmul.f32 0.70710677, %v16505_v25  ;;  %vm10023_vm3 = vcmp.ge.f32.partialorder %v16499_v60, 0.0 }
0x1499   : > { %v10034_v53 = vmul.f32 0.3275911, %v10030_v57  ;;  %v10032_v27 = vand.u32 2147483647, %v16503_v4  ;;  %v10086_v47 = vsub.f32 0.0, %v10030_v57  ;;  %vm10024_vm4 = vcmp.ge.f32.partialorder %v16503_v4, 0.0 }
0x149a   : > { %v10035_v49 = vmul.f32 0.3275911, %v10031_v46  ;;  %v10033_v61 = vand.u32 2147483647, %v16510_v56  ;;  %v10087_v50 = vsub.f32 0.0, %v10031_v46  ;;  %vm10025_vm5 = vcmp.ge.f32.partialorder %v16510_v56, 0.0 }
0x149b   : > { %v10038_v32 = vadd.f32 1.0, %v10034_v53  ;;  %v10036_v13 = vmul.f32 0.3275911, %v10032_v27  ;;  %v10090_v43 = vmul.f32 %v10086_v47, %v10030_v57  ;;  %v10088_v59 = vsub.f32 0.0, %v10032_v27 }
0x149c   : > { %v10039_v3 = vadd.f32 1.0, %v10035_v49  ;;  %v10037_v19 = vmul.f32 0.3275911, %v10033_v61  ;;  %v10091_v30 = vmul.f32 %v10087_v50, %v10031_v46  ;;  %v10089_v22 = vsub.f32 0.0, %v10033_v61 }
0x149d   : > { %13352 = vrcp.f32 %v10038_v32  ;;  %v10040_v58 = vadd.f32 1.0, %v10036_v13  ;;  %v10094_v35 = vmul.f32 1.442695, %v10090_v43  ;;  %v10092_v55 = vmul.f32 %v10088_v59, %v10032_v27 }
0x149e   : > { %13354 = vrcp.f32 %v10039_v3  ;;  %v10041_v16 = vadd.f32 1.0, %v10037_v19  ;;  %v10096_v63 = vmul.f32 1.442695, %v10091_v30  ;;  %v10093_v44 = vmul.f32 %v10089_v22, %v10033_v61 }
0x149f   : > { %13356 = vrcp.f32 %v10040_v58  ;;  %v10098_v39 = vmul.f32 1.442695, %v10092_v55  ;;  %v16740_v59 = vmov -1.0   ;;  %v10017_v56 = vmul.f32 0.5, %v16505_v25 }
0x14a0   : > { %13358 = vrcp.f32 %v10041_v16  ;;  %v10100_v24 = vmul.f32 1.442695, %v10093_v44  ;;  %v10027_v1 = vsel %vm10023_vm3, 1.0, %v16740_v59  ;;  %v10028_v60 = vsel %vm10024_vm4, 1.0, %v16740_v59 }
0x14a1   : > { %13360 = vpow2.f32 %v10094_v35 }
0x14a2   : > { %13362 = vpow2.f32 %v10096_v63  ;;  %v10014_v63 = vmul.f32 0.5, %v16489_v12 }
0x14a3   : > { %13364 = vpow2.f32 %v10098_v39 }
0x14a4   : > { %13366 = vpow2.f32 %v10100_v24 }
0x14a7   : > { %v13353_v41 = vpop.eup %13352 }
0x14a8   : > { %v13355_v6 = vpop.eup %13354  ;;  %v10050_v20 = vmul.f32 1.0614054, %v13353_v41 }
0x14a9   : > { %v10051_v10 = vmul.f32 1.0614054, %v13355_v6  ;;  %v13357_v9 = vpop.eup %13356 }
0x14aa   : > { %v10054_v34 = vadd.f32 -1.4531521, %v10050_v20  ;;  %v10052_v62 = vmul.f32 1.0614054, %v13357_v9  ;;  %v13359_v48 = vpop.eup %13358  ;;  %v10026_v20 = vsel %vm10022_vm2, 1.0, %v16740_v59 }
0x14ab   : > { %v10055_v23 = vadd.f32 -1.4531521, %v10051_v10  ;;  %v10053_v52 = vmul.f32 1.0614054, %v13359_v48  ;;  %v13361_v27 = vpop.eup %13360 }
0x14ac   : > { %v10058_v37 = vmul.f32 %v13353_v41, %v10054_v34  ;;  %v10056_v5 = vadd.f32 -1.4531521, %v10052_v62  ;;  %v13363_v3 = vpop.eup %13362  ;;  %v10029_v62 = vsel %vm10025_vm5, 1.0, %v16740_v59  ;;  %v13439_v59 = vmov 0.0|0.0  }
0x14ad   : > { %v10059_v31 = vmul.f32 %v13355_v6, %v10055_v23  ;;  %v10057_v7 = vadd.f32 -1.4531521, %v10053_v52  ;;  %v13365_v43 = vpop.eup %13364  ;;  %12759 = vmatprep.subr.bf16.mxu0 %v13439_v59 }
0x14ae   : > { %v10062_v21 = vadd.f32 1.4214138, %v10058_v37  ;;  %v10060_v17 = vmul.f32 %v13357_v9, %v10056_v5  ;;  %v13367_v22 = vpop.eup %13366 }
0x14af   : > { %v10063_v40 = vadd.f32 1.4214138, %v10059_v31  ;;  %v10061_v14 = vmul.f32 %v13359_v48, %v10057_v7 }
0x14b0   : > { %v10066_v18 = vmul.f32 %v13353_v41, %v10062_v21  ;;  %v10064_v8 = vadd.f32 1.4214138, %v10060_v17  ;;  %v10015_v21 = vmul.f32 0.5, %v16491_v29  ;;  %v11193_v29 = vld [vmem:[%s16638_s20 + $0x1] ss:$0 sm:$0xff] }
0x14b1   : > { %v10067_v45 = vmul.f32 %v13355_v6, %v10063_v40  ;;  %v10065_v42 = vadd.f32 1.4214138, %v10061_v14 }
0x14b2   : > { %v10070_v36 = vadd.f32 -0.28449672, %v10066_v18  ;;  %v10068_v2 = vmul.f32 %v13357_v9, %v10064_v8 }
0x14b3   : > { %v10071_v15 = vadd.f32 -0.28449672, %v10067_v45  ;;  %v10069_v26 = vmul.f32 %v13359_v48, %v10065_v42 }
0x14b4   : > { %v10074_v38 = vmul.f32 %v13353_v41, %v10070_v36  ;;  %v10072_v0 = vadd.f32 -0.28449672, %v10068_v2 }
0x14b5   : > { %v10075_v11 = vmul.f32 %v13355_v6, %v10071_v15  ;;  %v10073_v49 = vadd.f32 -0.28449672, %v10069_v26 }
0x14b6   : > { %v10078_v51 = vadd.f32 0.2548296, %v10074_v38  ;;  %v10076_v53 = vmul.f32 %v13357_v9, %v10072_v0 }
0x14b7   : > { %v10079_v57 = vadd.f32 0.2548296, %v10075_v11  ;;  %v10077_v58 = vmul.f32 %v13359_v48, %v10073_v49 }
0x14b8   : > { %v10082_v46 = vmul.f32 %v13353_v41, %v10078_v51  ;;  %v10080_v61 = vadd.f32 0.2548296, %v10076_v53 }
0x14b9   : > { %v10083_v32 = vmul.f32 %v13355_v6, %v10079_v57  ;;  %v10081_v50 = vadd.f32 0.2548296, %v10077_v58 }
0x14ba   : > { %v10102_v13 = vmul.f32 %v13361_v27, %v10082_v46  ;;  %v10084_v47 = vmul.f32 %v13357_v9, %v10080_v61 }
0x14bb   : > { %v10103_v19 = vmul.f32 %v13363_v3, %v10083_v32  ;;  %v10085_v10 = vmul.f32 %v13359_v48, %v10081_v50  ;;  %v10016_v48 = vmul.f32 0.5, %v16496_v28  ;;  %v11175_v28 = vld [vmem:[%s16637_s19 + $0x1] ss:$0 sm:$0xff]  ;;  %v10343_v50 = vld [vmem:[%s16641_s23 + $0x8] sm:$0xff] }
0x14bc   : > { %v10106_v16 = vsub.f32 1.0, %v10102_v13  ;;  %v10104_v6 = vmul.f32 %v13365_v43, %v10084_v47  ;;  %v10342_v47 = vld [vmem:[%s16641_s23] sm:$0xff] }
0x14bd   : > { %v10107_v41 = vsub.f32 1.0, %v10103_v19  ;;  %v10105_v23 = vmul.f32 %v13367_v22, %v10085_v10  ;;  %v12760_v43 = vpack.c.bf16 %v10343_v50, %v10342_v47  ;;  %v10347_v10 = vld [vmem:[%s16641_s23 + $0x28] sm:$0xff] }
0x14be   : > { %v10110_v30 = vmul.f32 %v10106_v16, %v10026_v20  ;;  %v10108_v35 = vsub.f32 1.0, %v10104_v6  ;;  %v10344_v20 = vld [vmem:[%s16641_s23 + $0x10] sm:$0xff]  ;;  %v10346_v6 = vld [vmem:[%s16641_s23 + $0x20] sm:$0xff] }
0x14bf   : > { %v10111_v34 = vmul.f32 %v10107_v41, %v10027_v1  ;;  %v10109_v37 = vsub.f32 1.0, %v10105_v23  ;;  %12761 = vmatpush3.bf16.msra.mxu0 %v12760_v43  ;;  %v10345_v41 = vld [vmem:[%s16641_s23 + $0x18] sm:$0xff]  ;;  %v12766_v22 = vpack.c.bf16 %v10347_v10, %v10346_v6  ;;  %v10348_v1 = vld [vmem:[%s16641_s23 + $0x30] sm:$0xff] }
0x14c0   : > { %v10114_v9 = vadd.f32 1.0, %v10110_v30  ;;  %v10112_v55 = vmul.f32 %v10108_v35, %v10028_v60  ;;  %12762 = vmatprep.subr.bf16.mxu0 %v13439_v59  ;;  %v12763_v30 = vpack.c.bf16 %v10345_v41, %v10344_v20 }
0x14c1   : > { %v10115_v4 = vadd.f32 1.0, %v10111_v34  ;;  %v10113_v44 = vmul.f32 %v10109_v37, %v10029_v62  ;;  %v10349_v34 = vld [vmem:[%s16641_s23 + $0x38] sm:$0xff]  ;;  %v10325_v37 = vld [vmem:[%s16742_s4] sm:$0x1]  ;;  %s16746_s4 = sld [smem:[#allocation30_spill]] }
0x14c2   : > { %v10116_v31 = vadd.f32 1.0, %v10112_v55  ;;  %v10118_v5 = vmul.f32 %v10114_v9, %v10014_v63  ;;  %v12769_v35 = vpack.c.bf16 %v10349_v34, %v10348_v1  ;;  %v10326_v62 = vld [vmem:[%s16743_s29] sm:$0x1] }
0x14c3   : > { %v10117_v40 = vadd.f32 1.0, %v10113_v44  ;;  %v10119_v39 = vmul.f32 %v10115_v4, %v10015_v21  ;;  %12764 = vmatpush3.bf16.msra.mxu0 %v12763_v30 }
0x14c4   : > { %v10120_v52 = vmul.f32 %v10116_v31, %v10016_v48  ;;  %12765 = vmatprep.subr.bf16.mxu0 %v13439_v59  ;;  %v10350_v31 = vld [vmem:[%s16745_s3] sm:$0x1]  ;;  %s13440_s3 = smov [#allocation2]  }
0x14c5   : > { %v10121_v17 = vmul.f32 %v10117_v40, %v10017_v56  ;;  %s13374_s21 = sshll.u32 %s13440_s3, 4  ;;  %s13375_s21 = int_to_ptr.vmem [resolvable:$false] %s13374_s21 }
0x14c6   : > { %v10122_v18 = vpack.c.bf16 %v10120_v52, %v10118_v5  ;;  %s13376_s29 = scalar_lea.vmem %s13375_s21, 32  ;;  %p13377_p0 = scmp.lt.s32.totalorder %s16578_s9, %s13375_s21 }
0x14c7   : > { %v10123_v7 = vpack.c.bf16 %v10121_v17, %v10119_v39  ;;  %12767 = vmatpush3.bf16.msra.mxu0 %v12766_v22  ;;  %s16576_s24 = scalar_lea.hbm %s16746_s4, %s11195_s5  ;;  %p13378_p1 = scmp.lt.s32.totalorder %s13376_s29, %s13370_s1 }
0x14c8   : > { %12768 = vmatprep.subr.bf16.mxu0 %v13439_v59 }
0x14c9   : > { %10293 = vmatprep.mubr.bf16.mxu1 %v10123_v7  ;;  %p13379_p2 = por %p13378_p1, %p13377_p0 }
0x14ca   : > { %10294 = vmatmul.mubr.bf16.vlgmr.msra.gmra.mrb[164].mxu1 %v10122_v18 }
0x14cb   : > { %12770 = vmatpush3.bf16.msra.mxu0 %v12769_v35  ;;  %p13380_p3 = pnand %p13379_p2, %p13373_p13 }
0x159d   : > { %v11637_v12 = vpop.f32.mrb[164].mxu1 }
0x159e   : > { %v11638_v45 = vpop.f32.mrb[165].mxu1 }
0x159f   : > { %v11639_v24 = vadd.f32 %v11638_v45, %v11637_v12  ;;  %v11640_v36 = vpop.f32.mrb[166].mxu1 }
0x15a0   : > { %v11641_v25 = vpop.f32.mrb[167].mxu1 }
0x15a1   : > { %v10296_v8 = vadd.f32 %v11639_v24, %v11175_v28  ;;  %v11642_v14 = vadd.f32 %v11641_v25, %v11640_v36 }
0x15a3   : > { %v10310_v15 = vmul.f32 %v11193_v29, %v10296_v8  ;;  %v10299_v38 = vadd.f32 %v11642_v14, %v11175_v28 }
0x15a5   : > { %v10311_v2 = vmul.f32 %v11193_v29, %v10299_v38  ;;  %v10312_v42 = vadd.f32 %v10310_v15, %v16388_v54 }
0x15a7   : > { %v10313_v11 = vadd.f32 %v10311_v2, %v16393_v33  ;;  %v10314_v0 = vsel %vm771_vm0, %v10312_v42, 0.0 }
0x15a9   : > { %v10315_v51 = vsel %vm775_vm1, %v10313_v11, 0.0 }
0x15aa   : > { %v10316_v26 = vadd.f32 %v10315_v51, %v10314_v0 }
0x15ac   : > { %v10317_v57 = vrot.slane %v10316_v26, 4 }
0x15ae   : > { %v10318_v46 = vadd.f32 %v10317_v57, %v10316_v26 }
0x15b0   : > { %v10319_v53 = vrot.slane %v10318_v46, 2 }
0x15b2   : > { %v10320_v49 = vadd.f32 %v10319_v53, %v10318_v46 }
0x15b4   : > { %v10321_v27 = vrot.slane %v10320_v49, 1 }
0x15b6   : > { %v10322_v32 = vadd.f32 %v10321_v27, %v10320_v49 }
0x15b8   : > { %v10323_v3 = vsub.f32 %v10322_v32, %v10312_v42 }
0x15ba   : > { %v10324_v13 = vmul.f32 0.125, %v10323_v3 }
0x15bc   : > { %v10327_v61 = vsel %vm775_vm1, %v10324_v13, 0.0 }
0x15bd   : > { %10328 = vadd.xlane.f32.xlu0 %v10327_v61 }
0x164a   : > { %v10329_v58 = vpop.xlane.xlu0 %10328 }
0x164b   : > { %v10330_v54 = vmul.f32 0.015625, %v10329_v58 }
0x164d   : > { %v10331_v19 = vsub.f32 %v10324_v13, %v10330_v54 }
0x164f   : > { %v10332_v33 = vmul.f32 %v10331_v19, %v10331_v19 }
0x1651   : > { %v10333_v16 = vsel %vm775_vm1, %v10332_v33, 0.0 }
0x1652   : > { %10334 = vadd.xlane.f32.xlu1 %v10333_v16 }
0x16df   : > { %v10335_v23 = vpop.xlane.xlu1 %10334 }
0x16e0   : > { %v10336_v60 = vmul.f32 0.015625, %v10335_v23 }
0x16e2   : > { %v10337_v9 = vadd.f32 1e-06, %v10336_v60 }
0x16e4   : > { %13368 = vrsqrt.f32 %v10337_v9 }
0x16ee   : > { %v13369_v55 = vpop.eup %13368 }
0x16ef   : > { %v10339_v63 = vmul.f32 %v13369_v55, %v10331_v19 }
0x16f1   : > { %v10340_v4 = vmul.f32 %v10339_v63, %v10325_v37 }
0x16f3   : > { %v10341_v48 = vadd.f32 %v10340_v4, %v10326_v62 }
0x16f5   : > { %12565 = vmatmul.mubr.msk.f32.vlgmr.msra.gmra.mrb[150].mxu0 %vm771_vm0, %v10341_v48 }
0x17c8   : > { %v10420_v44 = vpop.f32.mrb[150].mxu0 }
0x17c9   : > { %v10421_v21 = vadd.f32 %v10420_v44, %v10350_v31  ;;  %v12566_v5 = vpop.f32.mrb[151].mxu0 }
0x17cb   : > { %10424 = vst [vmem:[%s756_s8] sm:$0x1] %v10421_v21 }
0x17cc   : > { %13383 = shalt.err (!%p13380_p3)
}
0x17cd   : > { %s13384_s8 = scalar_lea.hbm %s16576_s24, 16  ;;  %s13388_s28 = scalar_lea.hbm %s16746_s4, 32 }
0x17ce   : > { %p13385_p4 = scmp.ne.s32.totalorder %s16576_s24, %s13384_s8  ;;  %p13389_p9 = scmp.lt.u32.totalorder %s16576_s24, %s16746_s4 }
0x17cf   : > { %p13390_p10 = scmp.lt.u32.totalorder %s13388_s28, %s13384_s8  ;;  %p13392_p12 = scmp.lt.u32.totalorder %s13384_s8, %s16576_s24 }
0x17d0   : > { %p13386_p7 = pnand %p13385_p4, %p13609_p5 }
0x17d1   : > { %p13391_p11 = por %p13390_p10, %p13389_p9 }
0x17d2   : > { %p13387_p8 = pneg %p13386_p7 }
0x17d3   : > { %p13393_p13 = por %p13392_p12, %p13391_p11 }
0x17d5   : > { %p13394_p0 = pnand %p13393_p13, %p13387_p8 }
0x17d7   : > { %13397 = shalt.err (!%p13394_p0)
}
0x17d8   : > { %12771 = dma.vmem_to_hbm [thread:$0]  (%p13609_p5), %s16578_s9, 16, %s16576_s24, %s10426_s0  }
0x17d9 PF: > { %s16747_s1 = sld [smem:[#allocation7_spill]]  ;;  %s16748_s3 = sld [smem:[#allocation5_spill]] }
0x17df   : > { %p12777_p1 = scmp.ge.s32.totalorder %s16747_s1, 2  ;;  %s10450_s29 = sand.u32 1, %s16748_s3  }
0x17e0   : > { %s10451_s5 = scalar_lea.sflag [#allocation3], %s10450_s29 }
0x17e1   : > { %p12774_p2 = pnand %p12777_p1, %p13613_p6 }
0x17e3   : > { %13415 = dma.done.wait (!%p12774_p2), %s10451_s5, 16  }
0x17e4   : > { %13417 = vsyncadd (!%p12774_p2), %s10451_s5, 4294967280  ;;  %s16750_s30 = sld [smem:[#allocation9_spill]]  ;;  %s16751_s8 = sld [smem:[#allocation6_spill]] }
0x17e5   : > { %s16752_s6 = sld [smem:[#allocation10_spill]]  ;;  %s16753_s29 = smov %s13424_s2 }
0x17ea   : > { %p35_p3 = scmp.ge.s32.totalorder %s16750_s30, 4   ;;  %s16754_s2 = smov %s16751_s8 }
0x17ec   :  { %37 = sbr.rel (!%p35_p3) target bundleno = 18 (0x12), region = 174 }
0x17f3   :  { %10455 = vsyncpa [#allocation3], 1 }
0x17f4   :  { %10457 = vsyncpa [#allocation3 + $0x1], 1 }

</bundles_post_ra>
